<compile_context>
chip_gen: v7x
topology: tpu7x:2x2x1
jax: 0.10.0
libtpu: 0.0.40
codegen_flags: <defaults>
</compile_context>

<pallas_src>
import numpy as np
import jax
import jax.numpy as jnp
from jax.experimental import pallas as pl
from jax.experimental.pallas import tpu as pltpu


# --------------------------------------------------------------------------- kernel
def make_gbp_kernel(n_iters, n, npp):
    pair = (1, 0, 3, 2)                       # partner slot: top<->bottom, left<->right
    amt = ((n - 1) % npp,                     # slot 0 reads the plaquette above  (p - (n-1))
           (npp - (n - 1)) % npp,             # slot 1 reads the plaquette below  (p + (n-1))
           1 % npp,                           # slot 2 reads the plaquette left   (p - 1)
           (npp - 1) % npp)                   # slot 3 reads the plaquette right  (p + 1)

    def gbp_kernel(log_phi_ref, xs_ref, pc_ref, place_ref, sums_ref, expand_ref,
                   mask_ref, valid_ref, b_plaq_ref, b_edge_ref, energy_ref):
        log_phi = log_phi_ref[...]                   # [16, NPP] plaquette log potentials
        mask16 = mask_ref[...]                       # [16, NPP] 1 where (slot, plaquette) is interior
        valid = valid_ref[...]                       # [1, NPP]  1 for real (non padded) plaquettes
        xs = [xs_ref[s] for s in range(4)]           # [16,16] lift slot-s edge messages to 16 states
        pc = [pc_ref[s] for s in range(4)]           # [4,16]  project 16 states to slot-s edge states
        place = [place_ref[s] for s in range(4)]     # [16,4]  place a slot-s block into rows 4s:4s+4
        sums = sums_ref[...]                         # [4,16]  per-slot row sums
        expand = expand_ref[...]                     # [16,4]  broadcast per-slot rows back to 16 rows

        def mm(a, b):
            return jnp.dot(a, b, preferred_element_type=jnp.float32)

        def lift(msg16):
            ex = [mm(xs[s], msg16) for s in range(4)]
            total = log_phi + ex[0] + ex[1] + ex[2] + ex[3]
            return ex, total

        def send(msg16):
            # parent->child messages: cavity + projected logsumexp + per-slot normalisation
            ex, total = lift(msg16)
            out = []
            for s in range(4):
                t = total - ex[s]                              # drop slot s's own incoming message
                mx = jnp.max(t, axis=0, keepdims=True)         # full-state max: safe stabiliser
                msum = mm(pc[s], jnp.exp(t - mx))              # [4,NPP] sums over consistent states
                o = jnp.log(msum) + mx                         # projected logsumexp, all 4 edge states
                m2 = jnp.max(o, axis=0, keepdims=True)         # per-slot log normalisation
                lse = m2 + jnp.log(jnp.sum(jnp.exp(o - m2), axis=0, keepdims=True))
                out.append(o - lse)
            return out

        def exchange(out):
            # deliver each sent message to the partner plaquette's paired slot:
            # lane roll along the plaquette axis + interior-edge mask (kills wrap-around).
            acc = pltpu.roll(mm(place[0], out[pair[0]]), amt[0], axis=1)
            for s in range(1, 4):
                acc = acc + pltpu.roll(mm(place[s], out[pair[s]]), amt[s], axis=1)
            return acc * mask16

        in16 = jnp.zeros((16, npp), jnp.float32)      # incoming messages per (slot, edge-state)
        out = [jnp.zeros((4, npp), jnp.float32) for _ in range(4)]
        for _ in range(n_iters):                      # parallel (Jacobi) parent->child updates
            out = send(in16)
            in16 = exchange(out)

        # outer-region (plaquette) beliefs
        _, total = lift(in16)
        mx = jnp.max(total, axis=0, keepdims=True)
        z = jnp.exp(total - mx)
        zsum = jnp.sum(z, axis=0, keepdims=True)
        log_bp = (total - mx) - jnp.log(zsum)
        b_plaq = z * pl.reciprocal(zsum, approx=True)
        b_plaq_ref[...] = b_plaq

        # inner-region (interior-edge) beliefs, per (plaquette, slot) representation
        out16 = mm(place[0], out[0])
        for s in range(1, 4):
            out16 = out16 + mm(place[s], out[s])
        out16 = out16 * mask16                        # = permute(in_msg): what each plaquette sent
        be = in16 + out16
        m2 = jnp.max(be, axis=0, keepdims=True)
        e2 = jnp.exp(be - m2)
        zslot = mm(sums, e2)                          # [4, NPP] per-slot partition sums
        ln = (be - m2) - mm(expand, jnp.log(zslot))   # per-slot log-normalised edge beliefs
        b_edge = e2 * mm(expand, pl.reciprocal(zslot))
        b_edge_ref[...] = b_edge

        # Kikuchi free energy: counting number +1 (plaquettes), -1 (interior edges);
        # each interior edge appears in two (plaquette, slot) reps -> factor 0.5.
        e_cols = jnp.sum(valid * b_plaq * (log_bp - log_phi), axis=0, keepdims=True)
        e_cols = e_cols - 0.5 * jnp.sum(mask16 * b_edge * ln, axis=0, keepdims=True)
        energy_ref[...] = jnp.sum(e_cols, axis=1, keepdims=True)

    return gbp_kernel


# --------------------------------------------------------------------------- model setup (glue)
def build_model(n, seed=0):
    key = jax.random.PRNGKey(seed)
    k1, k2 = jax.random.split(key)

    NP = (n - 1) ** 2
    NPP = ((NP + 127) // 128) * 128
    plaqs = [(r, c) for r in range(n - 1) for c in range(n - 1)]
    pid = {rc: k for k, rc in enumerate(plaqs)}

    # binary_idx: all grid edges (i, j), i < j (horizontal then vertical)
    binary_idx = []
    for r in range(n):
        for c in range(n - 1):
            binary_idx.append((r * n + c, r * n + c + 1))
    for r in range(n - 1):
        for c in range(n):
            binary_idx.append((r * n + c, (r + 1) * n + c))
    E = len(binary_idx)

    unary_theta = np.asarray(0.25 * jax.random.normal(k1, (n * n,)), np.float32)
    binary_J = np.asarray(0.25 * jax.random.normal(k2, (E,)), np.float32)

    # spin (+-1) of the 4 plaquette positions for each joint state (position 0 = MSB)
    spin = np.zeros((16, 4), np.float32)
    for x in range(16):
        bits = [(x >> 3) & 1, (x >> 2) & 1, (x >> 1) & 1, x & 1]
        spin[x] = [2.0 * b - 1.0 for b in bits]

    # projT[4*s+e, x] = 1 iff plaquette state x restricted to edge-slot s equals edge state e
    slot_pos = [(0, 1), (2, 3), (0, 2), (1, 3)]     # (top-h, bottom-h, left-v, right-v)
    projT = np.zeros((16, 16), np.float32)
    for x in range(16):
        bits = [(x >> 3) & 1, (x >> 2) & 1, (x >> 1) & 1, x & 1]
        for s, (a, b) in enumerate(slot_pos):
            projT[4 * s + bits[a] * 2 + bits[b], x] = 1.0

    # O(1)-sized structural one-hot matrices used inside the kernel
    pxc = projT.T                                   # [state x, column c]
    xs = np.zeros((4, 16, 16), np.float32)
    pc = np.zeros((4, 4, 16), np.float32)
    place = np.zeros((4, 16, 4), np.float32)
    sums = np.zeros((4, 16), np.float32)
    for s in range(4):
        xs[s, :, 4 * s:4 * s + 4] = pxc[:, 4 * s:4 * s + 4]
        pc[s] = projT[4 * s:4 * s + 4, :]
        sums[s, 4 * s:4 * s + 4] = 1.0
        for e in range(4):
            place[s, 4 * s + e, e] = 1.0
    expand = np.ascontiguousarray(sums.T)           # [16, 4]

    # interior (child-region) mask per (slot, plaquette), lane padded
    mask16_T = np.zeros((16, NPP), np.float32)
    for k, (r, c) in enumerate(plaqs):
        if r >= 1:
            mask16_T[0:4, k] = 1.0       # top edge shared with plaquette (r-1, c)
        if r <= n - 3:
            mask16_T[4:8, k] = 1.0       # bottom edge shared with (r+1, c)
        if c >= 1:
            mask16_T[8:12, k] = 1.0      # left edge shared with (r, c-1)
        if c <= n - 3:
            mask16_T[12:16, k] = 1.0     # right edge shared with (r, c+1)

    valid = np.zeros((1, NPP), np.float32)
    valid[0, :NP] = 1.0

    # region log-potentials: each Ising factor assigned to exactly one plaquette
    log_phi = np.zeros((NP, 16), np.float32)
    for v in range(n * n):
        vr, vc = v // n, v % n
        pr, pc_ = max(vr - 1, 0), max(vc - 1, 0)
        pos = 2 * (vr - pr) + (vc - pc_)
        log_phi[pid[(pr, pc_)], :] += unary_theta[v] * spin[:, pos]

    edge_parent = np.zeros(E, np.int32)
    edge_slot = np.zeros(E, np.int32)
    edge_interior = np.zeros(E, np.float32)
    for k, (i, j) in enumerate(binary_idx):
        r, c = i // n, i % n
        if j == i + 1:                      # horizontal edge
            p, s = ((r - 1, c), 1) if r >= 1 else ((r, c), 0)
            edge_interior[k] = 1.0 if 1 <= r <= n - 2 else 0.0
        else:                               # vertical edge
            p, s = ((r, c - 1), 3) if c >= 1 else ((r, c), 2)
            edge_interior[k] = 1.0 if 1 <= c <= n - 2 else 0.0
        edge_parent[k] = pid[p]
        edge_slot[k] = s
        a, b = slot_pos[s]
        log_phi[pid[p], :] += binary_J[k] * spin[:, a] * spin[:, b]

    log_phi_T = np.zeros((16, NPP), np.float32)
    log_phi_T[:, :NP] = log_phi.T

    consts = dict(n=n, log_phi_T=log_phi_T, xs=xs, pc=pc, place=place, sums=sums,
                  expand=expand, mask16_T=mask16_T, valid=valid, projT=projT)
    meta = dict(n=n, NP=NP, binary_idx=binary_idx, edge_parent=edge_parent,
                edge_slot=edge_slot, edge_interior=edge_interior)
    return consts, meta


# --------------------------------------------------------------------------- pallas_call wrapper
def run_gbp(consts, n_iters):
    npp = consts['log_phi_T'].shape[1]
    names = ['log_phi_T', 'xs', 'pc', 'place', 'sums', 'expand', 'mask16_T', 'valid']
    arrs = [jnp.asarray(consts[k], jnp.float32) for k in names]
    out_shape = (
        jax.ShapeDtypeStruct((16, npp), jnp.float32),   # plaquette beliefs  [state, plaquette]
        jax.ShapeDtypeStruct((16, npp), jnp.float32),   # edge beliefs       [4*slot+state, plaquette]
        jax.ShapeDtypeStruct((1, 1), jnp.float32),      # Kikuchi free energy
    )

    def full(shape):
        return pl.BlockSpec(shape, lambda i: (0,) * len(shape))

    fn = pl.pallas_call(
        make_gbp_kernel(n_iters, consts['n'], npp),
        grid=(1,),
        in_specs=[full(tuple(a.shape)) for a in arrs],
        out_specs=tuple(full(s.shape) for s in out_shape),
        out_shape=out_shape,
        compiler_params=pltpu.CompilerParams(dimension_semantics=("arbitrary",)),
    )
    return fn(*arrs)


def p2cbp_infer_forward(consts, meta, n_iters=10):
    b_plaq_T, b_edge_T, energy = run_gbp(consts, n_iters)
    NP = meta['NP']
    b_plaq = b_plaq_T[:, :NP].T                        # [NP, 16]
    b_edge = b_edge_T[:, :NP].T                        # [NP, 16], columns 4*slot+edge_state

    p_idx = jnp.asarray(meta['edge_parent'])
    s_idx = jnp.asarray(meta['edge_slot'])
    interior = jnp.asarray(meta['edge_interior'])
    projT = jnp.asarray(consts['projT'])
    n = meta['n']

    cols = (s_idx * 4)[:, None] + jnp.arange(4)[None, :]                 # [E, 4]
    be_slot = jnp.take_along_axis(b_edge[p_idx], cols, axis=1)           # interior-edge beliefs
    # boundary edges: marginalise the unique parent plaquette belief, renormalise
    marg = jnp.einsum('eax,ex->ea', projT[cols], b_plaq[p_idx])
    marg = marg / jnp.sum(marg, axis=1, keepdims=True)
    bm = jnp.where(interior[:, None] > 0.5, be_slot, marg)
    binary_marginals = bm.reshape(-1, 2, 2)                              # [E, 2, 2], [x_i, x_j]

    # binary2unary_marginals: average p(x_v = 1) over all edges incident to v
    i_idx = jnp.asarray([p[0] for p in meta['binary_idx']])
    j_idx = jnp.asarray([p[1] for p in meta['binary_idx']])
    p_i1 = jnp.sum(binary_marginals[:, 1, :], axis=-1)
    p_j1 = jnp.sum(binary_marginals[:, :, 1], axis=-1)
    num = jnp.zeros(n * n, jnp.float32).at[i_idx].add(p_i1).at[j_idx].add(p_j1)
    cnt = jnp.zeros(n * n, jnp.float32).at[i_idx].add(1.0).at[j_idx].add(1.0)
    unary_marginals = num / cnt

    neg_kikuchi_energy = -energy[0, 0]
    return neg_kikuchi_energy, unary_marginals, binary_marginals


if __name__ == "__main__":
    n = 4            # 4x4 Ising grid -> 9 plaquette regions, 24 pairwise terms
    msg_iters = 10   # args.msg_iters
    consts, meta = build_model(n, seed=0)
    neg_e, unary, binary = p2cbp_infer_forward(consts, meta, n_iters=msg_iters)
    jax.block_until_ready((neg_e, unary, binary))

    ok = (bool(jnp.isfinite(neg_e))
          and bool(jnp.all(jnp.isfinite(unary)))
          and bool(jnp.all(unary >= -1e-4)) and bool(jnp.all(unary <= 1.0 + 1e-4))
          and bool(jnp.all(jnp.abs(jnp.sum(binary, axis=(1, 2)) - 1.0) < 1e-3)))
    assert ok, "sanity checks failed"
    print("KERNEL_OK")
</pallas_src>

<mosaic_0001>
module attributes {stable_mosaic.version = 11 : i64} {
  func.func @gbp_kernel(%arg0: i32, %arg1: memref<16x128xf32, #tpu.memory_space<vmem>>, %arg2: memref<4x16x16xf32, #tpu.memory_space<vmem>>, %arg3: memref<4x4x16xf32, #tpu.memory_space<vmem>>, %arg4: memref<4x16x4xf32, #tpu.memory_space<vmem>>, %arg5: memref<4x16xf32, #tpu.memory_space<vmem>>, %arg6: memref<16x4xf32, #tpu.memory_space<vmem>>, %arg7: memref<16x128xf32, #tpu.memory_space<vmem>>, %arg8: memref<1x128xf32, #tpu.memory_space<vmem>>, %arg9: memref<16x128xf32, #tpu.memory_space<vmem>>, %arg10: memref<16x128xf32, #tpu.memory_space<vmem>>, %arg11: memref<1x1xf32, #tpu.memory_space<vmem>>) attributes {dimension_semantics = [#tpu.dimension_semantics<arbitrary>], iteration_bounds = array<i64: 1>, scalar_prefetch = 0 : i64, scratch_operands = 0 : i64, tpu.core_type = #tpu.core_type<tc>, window_params = [{pipeline_mode = #tpu.pipeline_mode<synchronous>, transform_indices = @transform_0, window_bounds = array<i64: 16, 128>}, {pipeline_mode = #tpu.pipeline_mode<synchronous>, transform_indices = @transform_1, window_bounds = array<i64: 4, 16, 16>}, {pipeline_mode = #tpu.pipeline_mode<synchronous>, transform_indices = @transform_2, window_bounds = array<i64: 4, 4, 16>}, {pipeline_mode = #tpu.pipeline_mode<synchronous>, transform_indices = @transform_3, window_bounds = array<i64: 4, 16, 4>}, {pipeline_mode = #tpu.pipeline_mode<synchronous>, transform_indices = @transform_4, window_bounds = array<i64: 4, 16>}, {pipeline_mode = #tpu.pipeline_mode<synchronous>, transform_indices = @transform_5, window_bounds = array<i64: 16, 4>}, {pipeline_mode = #tpu.pipeline_mode<synchronous>, transform_indices = @transform_6, window_bounds = array<i64: 16, 128>}, {pipeline_mode = #tpu.pipeline_mode<synchronous>, transform_indices = @transform_7, window_bounds = array<i64: 1, 128>}, {pipeline_mode = #tpu.pipeline_mode<synchronous>, transform_indices = @transform_8, window_bounds = array<i64: 16, 128>}, {pipeline_mode = #tpu.pipeline_mode<synchronous>, transform_indices = @transform_9, window_bounds = array<i64: 16, 128>}, {pipeline_mode = #tpu.pipeline_mode<synchronous>, transform_indices = @transform_10, window_bounds = array<i64: 1, 1>}]} {
    %c0 = arith.constant 0 : index
    %c0_0 = arith.constant 0 : index
    %0 = vector.load %arg1[%c0, %c0_0] : memref<16x128xf32, #tpu.memory_space<vmem>>, vector<16x128xf32>
    %c0_1 = arith.constant 0 : index
    %c0_2 = arith.constant 0 : index
    %1 = vector.load %arg7[%c0_1, %c0_2] : memref<16x128xf32, #tpu.memory_space<vmem>>, vector<16x128xf32>
    %c0_3 = arith.constant 0 : index
    %c0_4 = arith.constant 0 : index
    %2 = vector.load %arg8[%c0_3, %c0_4] : memref<1x128xf32, #tpu.memory_space<vmem>>, vector<1x128xf32>
    %c0_5 = arith.constant 0 : index
    %c0_6 = arith.constant 0 : index
    %c0_7 = arith.constant 0 : index
    %3 = vector.load %arg2[%c0_5, %c0_6, %c0_7] : memref<4x16x16xf32, #tpu.memory_space<vmem>>, vector<1x16x16xf32>
    %4 = vector.shape_cast %3 : vector<1x16x16xf32> to vector<16x16xf32>
    %c1 = arith.constant 1 : index
    %c0_8 = arith.constant 0 : index
    %c0_9 = arith.constant 0 : index
    %5 = vector.load %arg2[%c1, %c0_8, %c0_9] : memref<4x16x16xf32, #tpu.memory_space<vmem>>, vector<1x16x16xf32>
    %6 = vector.shape_cast %5 : vector<1x16x16xf32> to vector<16x16xf32>
    %c2 = arith.constant 2 : index
    %c0_10 = arith.constant 0 : index
    %c0_11 = arith.constant 0 : index
    %7 = vector.load %arg2[%c2, %c0_10, %c0_11] : memref<4x16x16xf32, #tpu.memory_space<vmem>>, vector<1x16x16xf32>
    %8 = vector.shape_cast %7 : vector<1x16x16xf32> to vector<16x16xf32>
    %c3 = arith.constant 3 : index
    %c0_12 = arith.constant 0 : index
    %c0_13 = arith.constant 0 : index
    %9 = vector.load %arg2[%c3, %c0_12, %c0_13] : memref<4x16x16xf32, #tpu.memory_space<vmem>>, vector<1x16x16xf32>
    %10 = vector.shape_cast %9 : vector<1x16x16xf32> to vector<16x16xf32>
    %c0_14 = arith.constant 0 : index
    %c0_15 = arith.constant 0 : index
    %c0_16 = arith.constant 0 : index
    %11 = vector.load %arg3[%c0_14, %c0_15, %c0_16] : memref<4x4x16xf32, #tpu.memory_space<vmem>>, vector<1x4x16xf32>
    %12 = vector.shape_cast %11 : vector<1x4x16xf32> to vector<4x16xf32>
    %c1_17 = arith.constant 1 : index
    %c0_18 = arith.constant 0 : index
    %c0_19 = arith.constant 0 : index
    %13 = vector.load %arg3[%c1_17, %c0_18, %c0_19] : memref<4x4x16xf32, #tpu.memory_space<vmem>>, vector<1x4x16xf32>
    %14 = vector.shape_cast %13 : vector<1x4x16xf32> to vector<4x16xf32>
    %c2_20 = arith.constant 2 : index
    %c0_21 = arith.constant 0 : index
    %c0_22 = arith.constant 0 : index
    %15 = vector.load %arg3[%c2_20, %c0_21, %c0_22] : memref<4x4x16xf32, #tpu.memory_space<vmem>>, vector<1x4x16xf32>
    %16 = vector.shape_cast %15 : vector<1x4x16xf32> to vector<4x16xf32>
    %c3_23 = arith.constant 3 : index
    %c0_24 = arith.constant 0 : index
    %c0_25 = arith.constant 0 : index
    %17 = vector.load %arg3[%c3_23, %c0_24, %c0_25] : memref<4x4x16xf32, #tpu.memory_space<vmem>>, vector<1x4x16xf32>
    %18 = vector.shape_cast %17 : vector<1x4x16xf32> to vector<4x16xf32>
    %c0_26 = arith.constant 0 : index
    %c0_27 = arith.constant 0 : index
    %c0_28 = arith.constant 0 : index
    %19 = vector.load %arg4[%c0_26, %c0_27, %c0_28] : memref<4x16x4xf32, #tpu.memory_space<vmem>>, vector<1x16x4xf32>
    %20 = vector.shape_cast %19 : vector<1x16x4xf32> to vector<16x4xf32>
    %c1_29 = arith.constant 1 : index
    %c0_30 = arith.constant 0 : index
    %c0_31 = arith.constant 0 : index
    %21 = vector.load %arg4[%c1_29, %c0_30, %c0_31] : memref<4x16x4xf32, #tpu.memory_space<vmem>>, vector<1x16x4xf32>
    %22 = vector.shape_cast %21 : vector<1x16x4xf32> to vector<16x4xf32>
    %c2_32 = arith.constant 2 : index
    %c0_33 = arith.constant 0 : index
    %c0_34 = arith.constant 0 : index
    %23 = vector.load %arg4[%c2_32, %c0_33, %c0_34] : memref<4x16x4xf32, #tpu.memory_space<vmem>>, vector<1x16x4xf32>
    %24 = vector.shape_cast %23 : vector<1x16x4xf32> to vector<16x4xf32>
    %c3_35 = arith.constant 3 : index
    %c0_36 = arith.constant 0 : index
    %c0_37 = arith.constant 0 : index
    %25 = vector.load %arg4[%c3_35, %c0_36, %c0_37] : memref<4x16x4xf32, #tpu.memory_space<vmem>>, vector<1x16x4xf32>
    %26 = vector.shape_cast %25 : vector<1x16x4xf32> to vector<16x4xf32>
    %c0_38 = arith.constant 0 : index
    %c0_39 = arith.constant 0 : index
    %27 = vector.load %arg5[%c0_38, %c0_39] : memref<4x16xf32, #tpu.memory_space<vmem>>, vector<4x16xf32>
    %c0_40 = arith.constant 0 : index
    %c0_41 = arith.constant 0 : index
    %28 = vector.load %arg6[%c0_40, %c0_41] : memref<16x4xf32, #tpu.memory_space<vmem>>, vector<16x4xf32>
    %cst = arith.constant 0.000000e+00 : f32
    %29 = vector.broadcast %cst : f32 to vector<16x128xf32>
    %cst_42 = arith.constant dense<0.000000e+00> : vector<16x128xf32>
    %30 = tpu.matmul %4, %29, %cst_42 {dimension_numbers = #tpu.dot_dimension_numbers<[1], [0], [0], [1], [0, 0, 1, 1], [], []>} : vector<16x16xf32>, vector<16x128xf32>, vector<16x128xf32> -> vector<16x128xf32>
    %cst_43 = arith.constant dense<0.000000e+00> : vector<16x128xf32>
    %31 = tpu.matmul %6, %29, %cst_43 {dimension_numbers = #tpu.dot_dimension_numbers<[1], [0], [0], [1], [0, 0, 1, 1], [], []>} : vector<16x16xf32>, vector<16x128xf32>, vector<16x128xf32> -> vector<16x128xf32>
    %cst_44 = arith.constant dense<0.000000e+00> : vector<16x128xf32>
    %32 = tpu.matmul %8, %29, %cst_44 {dimension_numbers = #tpu.dot_dimension_numbers<[1], [0], [0], [1], [0, 0, 1, 1], [], []>} : vector<16x16xf32>, vector<16x128xf32>, vector<16x128xf32> -> vector<16x128xf32>
    %cst_45 = arith.constant dense<0.000000e+00> : vector<16x128xf32>
    %33 = tpu.matmul %10, %29, %cst_45 {dimension_numbers = #tpu.dot_dimension_numbers<[1], [0], [0], [1], [0, 0, 1, 1], [], []>} : vector<16x16xf32>, vector<16x128xf32>, vector<16x128xf32> -> vector<16x128xf32>
    %34 = arith.addf %0, %30 : vector<16x128xf32>
    %35 = arith.addf %34, %31 : vector<16x128xf32>
    %36 = arith.addf %35, %32 : vector<16x128xf32>
    %37 = arith.addf %36, %33 : vector<16x128xf32>
    %38 = arith.subf %37, %30 : vector<16x128xf32>
    %cst_46 = arith.constant dense<0xFF800000> : vector<128xf32>
    %39 = vector.multi_reduction <maximumf>, %38, %cst_46 [0] : vector<16x128xf32> to vector<128xf32>
    %40 = vector.shape_cast %39 : vector<128xf32> to vector<1x128xf32>
    %41 = vector.broadcast %40 : vector<1x128xf32> to vector<16x128xf32>
    %42 = arith.subf %38, %41 : vector<16x128xf32>
    %43 = math.exp %42 : vector<16x128xf32>
    %cst_47 = arith.constant dense<0.000000e+00> : vector<4x128xf32>
    %44 = tpu.matmul %12, %43, %cst_47 {dimension_numbers = #tpu.dot_dimension_numbers<[1], [0], [0], [1], [0, 0, 1, 1], [], []>} : vector<4x16xf32>, vector<16x128xf32>, vector<4x128xf32> -> vector<4x128xf32>
    %45 = math.log %44 : vector<4x128xf32>
    %46 = vector.broadcast %40 : vector<1x128xf32> to vector<4x128xf32>
    %47 = arith.addf %45, %46 : vector<4x128xf32>
    %cst_48 = arith.constant dense<0xFF800000> : vector<128xf32>
    %48 = vector.multi_reduction <maximumf>, %47, %cst_48 [0] : vector<4x128xf32> to vector<128xf32>
    %49 = vector.shape_cast %48 : vector<128xf32> to vector<1x128xf32>
    %50 = vector.broadcast %49 : vector<1x128xf32> to vector<4x128xf32>
    %51 = arith.subf %47, %50 : vector<4x128xf32>
    %52 = math.exp %51 : vector<4x128xf32>
    %cst_49 = arith.constant dense<0.000000e+00> : vector<128xf32>
    %53 = vector.multi_reduction <add>, %52, %cst_49 [0] : vector<4x128xf32> to vector<128xf32>
    %54 = vector.shape_cast %53 : vector<128xf32> to vector<1x128xf32>
    %55 = math.log %54 : vector<1x128xf32>
    %56 = arith.addf %49, %55 : vector<1x128xf32>
    %57 = vector.broadcast %56 : vector<1x128xf32> to vector<4x128xf32>
    %58 = arith.subf %47, %57 : vector<4x128xf32>
    %59 = arith.subf %37, %31 : vector<16x128xf32>
    %cst_50 = arith.constant dense<0xFF800000> : vector<128xf32>
    %60 = vector.multi_reduction <maximumf>, %59, %cst_50 [0] : vector<16x128xf32> to vector<128xf32>
    %61 = vector.shape_cast %60 : vector<128xf32> to vector<1x128xf32>
    %62 = vector.broadcast %61 : vector<1x128xf32> to vector<16x128xf32>
    %63 = arith.subf %59, %62 : vector<16x128xf32>
    %64 = math.exp %63 : vector<16x128xf32>
    %cst_51 = arith.constant dense<0.000000e+00> : vector<4x128xf32>
    %65 = tpu.matmul %14, %64, %cst_51 {dimension_numbers = #tpu.dot_dimension_numbers<[1], [0], [0], [1], [0, 0, 1, 1], [], []>} : vector<4x16xf32>, vector<16x128xf32>, vector<4x128xf32> -> vector<4x128xf32>
    %66 = math.log %65 : vector<4x128xf32>
    %67 = vector.broadcast %61 : vector<1x128xf32> to vector<4x128xf32>
    %68 = arith.addf %66, %67 : vector<4x128xf32>
    %cst_52 = arith.constant dense<0xFF800000> : vector<128xf32>
    %69 = vector.multi_reduction <maximumf>, %68, %cst_52 [0] : vector<4x128xf32> to vector<128xf32>
    %70 = vector.shape_cast %69 : vector<128xf32> to vector<1x128xf32>
    %71 = vector.broadcast %70 : vector<1x128xf32> to vector<4x128xf32>
    %72 = arith.subf %68, %71 : vector<4x128xf32>
    %73 = math.exp %72 : vector<4x128xf32>
    %cst_53 = arith.constant dense<0.000000e+00> : vector<128xf32>
    %74 = vector.multi_reduction <add>, %73, %cst_53 [0] : vector<4x128xf32> to vector<128xf32>
    %75 = vector.shape_cast %74 : vector<128xf32> to vector<1x128xf32>
    %76 = math.log %75 : vector<1x128xf32>
    %77 = arith.addf %70, %76 : vector<1x128xf32>
    %78 = vector.broadcast %77 : vector<1x128xf32> to vector<4x128xf32>
    %79 = arith.subf %68, %78 : vector<4x128xf32>
    %80 = arith.subf %37, %32 : vector<16x128xf32>
    %cst_54 = arith.constant dense<0xFF800000> : vector<128xf32>
    %81 = vector.multi_reduction <maximumf>, %80, %cst_54 [0] : vector<16x128xf32> to vector<128xf32>
    %82 = vector.shape_cast %81 : vector<128xf32> to vector<1x128xf32>
    %83 = vector.broadcast %82 : vector<1x128xf32> to vector<16x128xf32>
    %84 = arith.subf %80, %83 : vector<16x128xf32>
    %85 = math.exp %84 : vector<16x128xf32>
    %cst_55 = arith.constant dense<0.000000e+00> : vector<4x128xf32>
    %86 = tpu.matmul %16, %85, %cst_55 {dimension_numbers = #tpu.dot_dimension_numbers<[1], [0], [0], [1], [0, 0, 1, 1], [], []>} : vector<4x16xf32>, vector<16x128xf32>, vector<4x128xf32> -> vector<4x128xf32>
    %87 = math.log %86 : vector<4x128xf32>
    %88 = vector.broadcast %82 : vector<1x128xf32> to vector<4x128xf32>
    %89 = arith.addf %87, %88 : vector<4x128xf32>
    %cst_56 = arith.constant dense<0xFF800000> : vector<128xf32>
    %90 = vector.multi_reduction <maximumf>, %89, %cst_56 [0] : vector<4x128xf32> to vector<128xf32>
    %91 = vector.shape_cast %90 : vector<128xf32> to vector<1x128xf32>
    %92 = vector.broadcast %91 : vector<1x128xf32> to vector<4x128xf32>
    %93 = arith.subf %89, %92 : vector<4x128xf32>
    %94 = math.exp %93 : vector<4x128xf32>
    %cst_57 = arith.constant dense<0.000000e+00> : vector<128xf32>
    %95 = vector.multi_reduction <add>, %94, %cst_57 [0] : vector<4x128xf32> to vector<128xf32>
    %96 = vector.shape_cast %95 : vector<128xf32> to vector<1x128xf32>
    %97 = math.log %96 : vector<1x128xf32>
    %98 = arith.addf %91, %97 : vector<1x128xf32>
    %99 = vector.broadcast %98 : vector<1x128xf32> to vector<4x128xf32>
    %100 = arith.subf %89, %99 : vector<4x128xf32>
    %101 = arith.subf %37, %33 : vector<16x128xf32>
    %cst_58 = arith.constant dense<0xFF800000> : vector<128xf32>
    %102 = vector.multi_reduction <maximumf>, %101, %cst_58 [0] : vector<16x128xf32> to vector<128xf32>
    %103 = vector.shape_cast %102 : vector<128xf32> to vector<1x128xf32>
    %104 = vector.broadcast %103 : vector<1x128xf32> to vector<16x128xf32>
    %105 = arith.subf %101, %104 : vector<16x128xf32>
    %106 = math.exp %105 : vector<16x128xf32>
    %cst_59 = arith.constant dense<0.000000e+00> : vector<4x128xf32>
    %107 = tpu.matmul %18, %106, %cst_59 {dimension_numbers = #tpu.dot_dimension_numbers<[1], [0], [0], [1], [0, 0, 1, 1], [], []>} : vector<4x16xf32>, vector<16x128xf32>, vector<4x128xf32> -> vector<4x128xf32>
    %108 = math.log %107 : vector<4x128xf32>
    %109 = vector.broadcast %103 : vector<1x128xf32> to vector<4x128xf32>
    %110 = arith.addf %108, %109 : vector<4x128xf32>
    %cst_60 = arith.constant dense<0xFF800000> : vector<128xf32>
    %111 = vector.multi_reduction <maximumf>, %110, %cst_60 [0] : vector<4x128xf32> to vector<128xf32>
    %112 = vector.shape_cast %111 : vector<128xf32> to vector<1x128xf32>
    %113 = vector.broadcast %112 : vector<1x128xf32> to vector<4x128xf32>
    %114 = arith.subf %110, %113 : vector<4x128xf32>
    %115 = math.exp %114 : vector<4x128xf32>
    %cst_61 = arith.constant dense<0.000000e+00> : vector<128xf32>
    %116 = vector.multi_reduction <add>, %115, %cst_61 [0] : vector<4x128xf32> to vector<128xf32>
    %117 = vector.shape_cast %116 : vector<128xf32> to vector<1x128xf32>
    %118 = math.log %117 : vector<1x128xf32>
    %119 = arith.addf %112, %118 : vector<1x128xf32>
    %120 = vector.broadcast %119 : vector<1x128xf32> to vector<4x128xf32>
    %121 = arith.subf %110, %120 : vector<4x128xf32>
    %cst_62 = arith.constant dense<0.000000e+00> : vector<16x128xf32>
    %122 = tpu.matmul %20, %79, %cst_62 {dimension_numbers = #tpu.dot_dimension_numbers<[1], [0], [0], [1], [0, 0, 1, 1], [], []>} : vector<16x4xf32>, vector<4x128xf32>, vector<16x128xf32> -> vector<16x128xf32>
    %c3_i32 = arith.constant 3 : i32
    %123 = tpu.dynamic_rotate %122 by %c3_i32 dim 1 : vector<16x128xf32>, i32 -> vector<16x128xf32>
    %cst_63 = arith.constant dense<0.000000e+00> : vector<16x128xf32>
    %124 = tpu.matmul %22, %58, %cst_63 {dimension_numbers = #tpu.dot_dimension_numbers<[1], [0], [0], [1], [0, 0, 1, 1], [], []>} : vector<16x4xf32>, vector<4x128xf32>, vector<16x128xf32> -> vector<16x128xf32>
    %c125_i32 = arith.constant 125 : i32
    %125 = tpu.dynamic_rotate %124 by %c125_i32 dim 1 : vector<16x128xf32>, i32 -> vector<16x128xf32>
    %126 = arith.addf %123, %125 : vector<16x128xf32>
    %cst_64 = arith.constant dense<0.000000e+00> : vector<16x128xf32>
    %127 = tpu.matmul %24, %121, %cst_64 {dimension_numbers = #tpu.dot_dimension_numbers<[1], [0], [0], [1], [0, 0, 1, 1], [], []>} : vector<16x4xf32>, vector<4x128xf32>, vector<16x128xf32> -> vector<16x128xf32>
    %c1_i32 = arith.constant 1 : i32
    %128 = tpu.dynamic_rotate %127 by %c1_i32 dim 1 : vector<16x128xf32>, i32 -> vector<16x128xf32>
    %129 = arith.addf %126, %128 : vector<16x128xf32>
    %cst_65 = arith.constant dense<0.000000e+00> : vector<16x128xf32>
    %130 = tpu.matmul %26, %100, %cst_65 {dimension_numbers = #tpu.dot_dimension_numbers<[1], [0], [0], [1], [0, 0, 1, 1], [], []>} : vector<16x4xf32>, vector<4x128xf32>, vector<16x128xf32> -> vector<16x128xf32>
    %c127_i32 = arith.constant 127 : i32
    %131 = tpu.dynamic_rotate %130 by %c127_i32 dim 1 : vector<16x128xf32>, i32 -> vector<16x128xf32>
    %132 = arith.addf %129, %131 : vector<16x128xf32>
    %133 = arith.mulf %132, %1 : vector<16x128xf32>
    %cst_66 = arith.constant dense<0.000000e+00> : vector<16x128xf32>
    %134 = tpu.matmul %4, %133, %cst_66 {dimension_numbers = #tpu.dot_dimension_numbers<[1], [0], [0], [1], [0, 0, 1, 1], [], []>} : vector<16x16xf32>, vector<16x128xf32>, vector<16x128xf32> -> vector<16x128xf32>
    %cst_67 = arith.constant dense<0.000000e+00> : vector<16x128xf32>
    %135 = tpu.matmul %6, %133, %cst_67 {dimension_numbers = #tpu.dot_dimension_numbers<[1], [0], [0], [1], [0, 0, 1, 1], [], []>} : vector<16x16xf32>, vector<16x128xf32>, vector<16x128xf32> -> vector<16x128xf32>
    %cst_68 = arith.constant dense<0.000000e+00> : vector<16x128xf32>
    %136 = tpu.matmul %8, %133, %cst_68 {dimension_numbers = #tpu.dot_dimension_numbers<[1], [0], [0], [1], [0, 0, 1, 1], [], []>} : vector<16x16xf32>, vector<16x128xf32>, vector<16x128xf32> -> vector<16x128xf32>
    %cst_69 = arith.constant dense<0.000000e+00> : vector<16x128xf32>
    %137 = tpu.matmul %10, %133, %cst_69 {dimension_numbers = #tpu.dot_dimension_numbers<[1], [0], [0], [1], [0, 0, 1, 1], [], []>} : vector<16x16xf32>, vector<16x128xf32>, vector<16x128xf32> -> vector<16x128xf32>
    %138 = arith.addf %0, %134 : vector<16x128xf32>
    %139 = arith.addf %138, %135 : vector<16x128xf32>
    %140 = arith.addf %139, %136 : vector<16x128xf32>
    %141 = arith.addf %140, %137 : vector<16x128xf32>
    %142 = arith.subf %141, %134 : vector<16x128xf32>
    %cst_70 = arith.constant dense<0xFF800000> : vector<128xf32>
    %143 = vector.multi_reduction <maximumf>, %142, %cst_70 [0] : vector<16x128xf32> to vector<128xf32>
    %144 = vector.shape_cast %143 : vector<128xf32> to vector<1x128xf32>
    %145 = vector.broadcast %144 : vector<1x128xf32> to vector<16x128xf32>
    %146 = arith.subf %142, %145 : vector<16x128xf32>
    %147 = math.exp %146 : vector<16x128xf32>
    %cst_71 = arith.constant dense<0.000000e+00> : vector<4x128xf32>
    %148 = tpu.matmul %12, %147, %cst_71 {dimension_numbers = #tpu.dot_dimension_numbers<[1], [0], [0], [1], [0, 0, 1, 1], [], []>} : vector<4x16xf32>, vector<16x128xf32>, vector<4x128xf32> -> vector<4x128xf32>
    %149 = math.log %148 : vector<4x128xf32>
    %150 = vector.broadcast %144 : vector<1x128xf32> to vector<4x128xf32>
    %151 = arith.addf %149, %150 : vector<4x128xf32>
    %cst_72 = arith.constant dense<0xFF800000> : vector<128xf32>
    %152 = vector.multi_reduction <maximumf>, %151, %cst_72 [0] : vector<4x128xf32> to vector<128xf32>
    %153 = vector.shape_cast %152 : vector<128xf32> to vector<1x128xf32>
    %154 = vector.broadcast %153 : vector<1x128xf32> to vector<4x128xf32>
    %155 = arith.subf %151, %154 : vector<4x128xf32>
    %156 = math.exp %155 : vector<4x128xf32>
    %cst_73 = arith.constant dense<0.000000e+00> : vector<128xf32>
    %157 = vector.multi_reduction <add>, %156, %cst_73 [0] : vector<4x128xf32> to vector<128xf32>
    %158 = vector.shape_cast %157 : vector<128xf32> to vector<1x128xf32>
    %159 = math.log %158 : vector<1x128xf32>
    %160 = arith.addf %153, %159 : vector<1x128xf32>
    %161 = vector.broadcast %160 : vector<1x128xf32> to vector<4x128xf32>
    %162 = arith.subf %151, %161 : vector<4x128xf32>
    %163 = arith.subf %141, %135 : vector<16x128xf32>
    %cst_74 = arith.constant dense<0xFF800000> : vector<128xf32>
    %164 = vector.multi_reduction <maximumf>, %163, %cst_74 [0] : vector<16x128xf32> to vector<128xf32>
    %165 = vector.shape_cast %164 : vector<128xf32> to vector<1x128xf32>
    %166 = vector.broadcast %165 : vector<1x128xf32> to vector<16x128xf32>
    %167 = arith.subf %163, %166 : vector<16x128xf32>
    %168 = math.exp %167 : vector<16x128xf32>
    %cst_75 = arith.constant dense<0.000000e+00> : vector<4x128xf32>
    %169 = tpu.matmul %14, %168, %cst_75 {dimension_numbers = #tpu.dot_dimension_numbers<[1], [0], [0], [1], [0, 0, 1, 1], [], []>} : vector<4x16xf32>, vector<16x128xf32>, vector<4x128xf32> -> vector<4x128xf32>
    %170 = math.log %169 : vector<4x128xf32>
    %171 = vector.broadcast %165 : vector<1x128xf32> to vector<4x128xf32>
    %172 = arith.addf %170, %171 : vector<4x128xf32>
    %cst_76 = arith.constant dense<0xFF800000> : vector<128xf32>
    %173 = vector.multi_reduction <maximumf>, %172, %cst_76 [0] : vector<4x128xf32> to vector<128xf32>
    %174 = vector.shape_cast %173 : vector<128xf32> to vector<1x128xf32>
    %175 = vector.broadcast %174 : vector<1x128xf32> to vector<4x128xf32>
    %176 = arith.subf %172, %175 : vector<4x128xf32>
    %177 = math.exp %176 : vector<4x128xf32>
    %cst_77 = arith.constant dense<0.000000e+00> : vector<128xf32>
    %178 = vector.multi_reduction <add>, %177, %cst_77 [0] : vector<4x128xf32> to vector<128xf32>
    %179 = vector.shape_cast %178 : vector<128xf32> to vector<1x128xf32>
    %180 = math.log %179 : vector<1x128xf32>
    %181 = arith.addf %174, %180 : vector<1x128xf32>
    %182 = vector.broadcast %181 : vector<1x128xf32> to vector<4x128xf32>
    %183 = arith.subf %172, %182 : vector<4x128xf32>
    %184 = arith.subf %141, %136 : vector<16x128xf32>
    %cst_78 = arith.constant dense<0xFF800000> : vector<128xf32>
    %185 = vector.multi_reduction <maximumf>, %184, %cst_78 [0] : vector<16x128xf32> to vector<128xf32>
    %186 = vector.shape_cast %185 : vector<128xf32> to vector<1x128xf32>
    %187 = vector.broadcast %186 : vector<1x128xf32> to vector<16x128xf32>
    %188 = arith.subf %184, %187 : vector<16x128xf32>
    %189 = math.exp %188 : vector<16x128xf32>
    %cst_79 = arith.constant dense<0.000000e+00> : vector<4x128xf32>
    %190 = tpu.matmul %16, %189, %cst_79 {dimension_numbers = #tpu.dot_dimension_numbers<[1], [0], [0], [1], [0, 0, 1, 1], [], []>} : vector<4x16xf32>, vector<16x128xf32>, vector<4x128xf32> -> vector<4x128xf32>
    %191 = math.log %190 : vector<4x128xf32>
    %192 = vector.broadcast %186 : vector<1x128xf32> to vector<4x128xf32>
    %193 = arith.addf %191, %192 : vector<4x128xf32>
    %cst_80 = arith.constant dense<0xFF800000> : vector<128xf32>
    %194 = vector.multi_reduction <maximumf>, %193, %cst_80 [0] : vector<4x128xf32> to vector<128xf32>
    %195 = vector.shape_cast %194 : vector<128xf32> to vector<1x128xf32>
    %196 = vector.broadcast %195 : vector<1x128xf32> to vector<4x128xf32>
    %197 = arith.subf %193, %196 : vector<4x128xf32>
    %198 = math.exp %197 : vector<4x128xf32>
    %cst_81 = arith.constant dense<0.000000e+00> : vector<128xf32>
    %199 = vector.multi_reduction <add>, %198, %cst_81 [0] : vector<4x128xf32> to vector<128xf32>
    %200 = vector.shape_cast %199 : vector<128xf32> to vector<1x128xf32>
    %201 = math.log %200 : vector<1x128xf32>
    %202 = arith.addf %195, %201 : vector<1x128xf32>
    %203 = vector.broadcast %202 : vector<1x128xf32> to vector<4x128xf32>
    %204 = arith.subf %193, %203 : vector<4x128xf32>
    %205 = arith.subf %141, %137 : vector<16x128xf32>
    %cst_82 = arith.constant dense<0xFF800000> : vector<128xf32>
    %206 = vector.multi_reduction <maximumf>, %205, %cst_82 [0] : vector<16x128xf32> to vector<128xf32>
    %207 = vector.shape_cast %206 : vector<128xf32> to vector<1x128xf32>
    %208 = vector.broadcast %207 : vector<1x128xf32> to vector<16x128xf32>
    %209 = arith.subf %205, %208 : vector<16x128xf32>
    %210 = math.exp %209 : vector<16x128xf32>
    %cst_83 = arith.constant dense<0.000000e+00> : vector<4x128xf32>
    %211 = tpu.matmul %18, %210, %cst_83 {dimension_numbers = #tpu.dot_dimension_numbers<[1], [0], [0], [1], [0, 0, 1, 1], [], []>} : vector<4x16xf32>, vector<16x128xf32>, vector<4x128xf32> -> vector<4x128xf32>
    %212 = math.log %211 : vector<4x128xf32>
    %213 = vector.broadcast %207 : vector<1x128xf32> to vector<4x128xf32>
    %214 = arith.addf %212, %213 : vector<4x128xf32>
    %cst_84 = arith.constant dense<0xFF800000> : vector<128xf32>
    %215 = vector.multi_reduction <maximumf>, %214, %cst_84 [0] : vector<4x128xf32> to vector<128xf32>
    %216 = vector.shape_cast %215 : vector<128xf32> to vector<1x128xf32>
    %217 = vector.broadcast %216 : vector<1x128xf32> to vector<4x128xf32>
    %218 = arith.subf %214, %217 : vector<4x128xf32>
    %219 = math.exp %218 : vector<4x128xf32>
    %cst_85 = arith.constant dense<0.000000e+00> : vector<128xf32>
    %220 = vector.multi_reduction <add>, %219, %cst_85 [0] : vector<4x128xf32> to vector<128xf32>
    %221 = vector.shape_cast %220 : vector<128xf32> to vector<1x128xf32>
    %222 = math.log %221 : vector<1x128xf32>
    %223 = arith.addf %216, %222 : vector<1x128xf32>
    %224 = vector.broadcast %223 : vector<1x128xf32> to vector<4x128xf32>
    %225 = arith.subf %214, %224 : vector<4x128xf32>
    %cst_86 = arith.constant dense<0.000000e+00> : vector<16x128xf32>
    %226 = tpu.matmul %20, %183, %cst_86 {dimension_numbers = #tpu.dot_dimension_numbers<[1], [0], [0], [1], [0, 0, 1, 1], [], []>} : vector<16x4xf32>, vector<4x128xf32>, vector<16x128xf32> -> vector<16x128xf32>
    %c3_i32_87 = arith.constant 3 : i32
    %227 = tpu.dynamic_rotate %226 by %c3_i32_87 dim 1 : vector<16x128xf32>, i32 -> vector<16x128xf32>
    %cst_88 = arith.constant dense<0.000000e+00> : vector<16x128xf32>
    %228 = tpu.matmul %22, %162, %cst_88 {dimension_numbers = #tpu.dot_dimension_numbers<[1], [0], [0], [1], [0, 0, 1, 1], [], []>} : vector<16x4xf32>, vector<4x128xf32>, vector<16x128xf32> -> vector<16x128xf32>
    %c125_i32_89 = arith.constant 125 : i32
    %229 = tpu.dynamic_rotate %228 by %c125_i32_89 dim 1 : vector<16x128xf32>, i32 -> vector<16x128xf32>
    %230 = arith.addf %227, %229 : vector<16x128xf32>
    %cst_90 = arith.constant dense<0.000000e+00> : vector<16x128xf32>
    %231 = tpu.matmul %24, %225, %cst_90 {dimension_numbers = #tpu.dot_dimension_numbers<[1], [0], [0], [1], [0, 0, 1, 1], [], []>} : vector<16x4xf32>, vector<4x128xf32>, vector<16x128xf32> -> vector<16x128xf32>
    %c1_i32_91 = arith.constant 1 : i32
    %232 = tpu.dynamic_rotate %231 by %c1_i32_91 dim 1 : vector<16x128xf32>, i32 -> vector<16x128xf32>
    %233 = arith.addf %230, %232 : vector<16x128xf32>
    %cst_92 = arith.constant dense<0.000000e+00> : vector<16x128xf32>
    %234 = tpu.matmul %26, %204, %cst_92 {dimension_numbers = #tpu.dot_dimension_numbers<[1], [0], [0], [1], [0, 0, 1, 1], [], []>} : vector<16x4xf32>, vector<4x128xf32>, vector<16x128xf32> -> vector<16x128xf32>
    %c127_i32_93 = arith.constant 127 : i32
    %235 = tpu.dynamic_rotate %234 by %c127_i32_93 dim 1 : vector<16x128xf32>, i32 -> vector<16x128xf32>
    %236 = arith.addf %233, %235 : vector<16x128xf32>
    %237 = arith.mulf %236, %1 : vector<16x128xf32>
    %cst_94 = arith.constant dense<0.000000e+00> : vector<16x128xf32>
    %238 = tpu.matmul %4, %237, %cst_94 {dimension_numbers = #tpu.dot_dimension_numbers<[1], [0], [0], [1], [0, 0, 1, 1], [], []>} : vector<16x16xf32>, vector<16x128xf32>, vector<16x128xf32> -> vector<16x128xf32>
    %cst_95 = arith.constant dense<0.000000e+00> : vector<16x128xf32>
    %239 = tpu.matmul %6, %237, %cst_95 {dimension_numbers = #tpu.dot_dimension_numbers<[1], [0], [0], [1], [0, 0, 1, 1], [], []>} : vector<16x16xf32>, vector<16x128xf32>, vector<16x128xf32> -> vector<16x128xf32>
    %cst_96 = arith.constant dense<0.000000e+00> : vector<16x128xf32>
    %240 = tpu.matmul %8, %237, %cst_96 {dimension_numbers = #tpu.dot_dimension_numbers<[1], [0], [0], [1], [0, 0, 1, 1], [], []>} : vector<16x16xf32>, vector<16x128xf32>, vector<16x128xf32> -> vector<16x128xf32>
    %cst_97 = arith.constant dense<0.000000e+00> : vector<16x128xf32>
    %241 = tpu.matmul %10, %237, %cst_97 {dimension_numbers = #tpu.dot_dimension_numbers<[1], [0], [0], [1], [0, 0, 1, 1], [], []>} : vector<16x16xf32>, vector<16x128xf32>, vector<16x128xf32> -> vector<16x128xf32>
    %242 = arith.addf %0, %238 : vector<16x128xf32>
    %243 = arith.addf %242, %239 : vector<16x128xf32>
    %244 = arith.addf %243, %240 : vector<16x128xf32>
    %245 = arith.addf %244, %241 : vector<16x128xf32>
    %246 = arith.subf %245, %238 : vector<16x128xf32>
    %cst_98 = arith.constant dense<0xFF800000> : vector<128xf32>
    %247 = vector.multi_reduction <maximumf>, %246, %cst_98 [0] : vector<16x128xf32> to vector<128xf32>
    %248 = vector.shape_cast %247 : vector<128xf32> to vector<1x128xf32>
    %249 = vector.broadcast %248 : vector<1x128xf32> to vector<16x128xf32>
    %250 = arith.subf %246, %249 : vector<16x128xf32>
    %251 = math.exp %250 : vector<16x128xf32>
    %cst_99 = arith.constant dense<0.000000e+00> : vector<4x128xf32>
    %252 = tpu.matmul %12, %251, %cst_99 {dimension_numbers = #tpu.dot_dimension_numbers<[1], [0], [0], [1], [0, 0, 1, 1], [], []>} : vector<4x16xf32>, vector<16x128xf32>, vector<4x128xf32> -> vector<4x128xf32>
    %253 = math.log %252 : vector<4x128xf32>
    %254 = vector.broadcast %248 : vector<1x128xf32> to vector<4x128xf32>
    %255 = arith.addf %253, %254 : vector<4x128xf32>
    %cst_100 = arith.constant dense<0xFF800000> : vector<128xf32>
    %256 = vector.multi_reduction <maximumf>, %255, %cst_100 [0] : vector<4x128xf32> to vector<128xf32>
    %257 = vector.shape_cast %256 : vector<128xf32> to vector<1x128xf32>
    %258 = vector.broadcast %257 : vector<1x128xf32> to vector<4x128xf32>
    %259 = arith.subf %255, %258 : vector<4x128xf32>
    %260 = math.exp %259 : vector<4x128xf32>
    %cst_101 = arith.constant dense<0.000000e+00> : vector<128xf32>
    %261 = vector.multi_reduction <add>, %260, %cst_101 [0] : vector<4x128xf32> to vector<128xf32>
    %262 = vector.shape_cast %261 : vector<128xf32> to vector<1x128xf32>
    %263 = math.log %262 : vector<1x128xf32>
    %264 = arith.addf %257, %263 : vector<1x128xf32>
    %265 = vector.broadcast %264 : vector<1x128xf32> to vector<4x128xf32>
    %266 = arith.subf %255, %265 : vector<4x128xf32>
    %267 = arith.subf %245, %239 : vector<16x128xf32>
    %cst_102 = arith.constant dense<0xFF800000> : vector<128xf32>
    %268 = vector.multi_reduction <maximumf>, %267, %cst_102 [0] : vector<16x128xf32> to vector<128xf32>
    %269 = vector.shape_cast %268 : vector<128xf32> to vector<1x128xf32>
    %270 = vector.broadcast %269 : vector<1x128xf32> to vector<16x128xf32>
    %271 = arith.subf %267, %270 : vector<16x128xf32>
    %272 = math.exp %271 : vector<16x128xf32>
    %cst_103 = arith.constant dense<0.000000e+00> : vector<4x128xf32>
    %273 = tpu.matmul %14, %272, %cst_103 {dimension_numbers = #tpu.dot_dimension_numbers<[1], [0], [0], [1], [0, 0, 1, 1], [], []>} : vector<4x16xf32>, vector<16x128xf32>, vector<4x128xf32> -> vector<4x128xf32>
    %274 = math.log %273 : vector<4x128xf32>
    %275 = vector.broadcast %269 : vector<1x128xf32> to vector<4x128xf32>
    %276 = arith.addf %274, %275 : vector<4x128xf32>
    %cst_104 = arith.constant dense<0xFF800000> : vector<128xf32>
    %277 = vector.multi_reduction <maximumf>, %276, %cst_104 [0] : vector<4x128xf32> to vector<128xf32>
    %278 = vector.shape_cast %277 : vector<128xf32> to vector<1x128xf32>
    %279 = vector.broadcast %278 : vector<1x128xf32> to vector<4x128xf32>
    %280 = arith.subf %276, %279 : vector<4x128xf32>
    %281 = math.exp %280 : vector<4x128xf32>
    %cst_105 = arith.constant dense<0.000000e+00> : vector<128xf32>
    %282 = vector.multi_reduction <add>, %281, %cst_105 [0] : vector<4x128xf32> to vector<128xf32>
    %283 = vector.shape_cast %282 : vector<128xf32> to vector<1x128xf32>
    %284 = math.log %283 : vector<1x128xf32>
    %285 = arith.addf %278, %284 : vector<1x128xf32>
    %286 = vector.broadcast %285 : vector<1x128xf32> to vector<4x128xf32>
    %287 = arith.subf %276, %286 : vector<4x128xf32>
    %288 = arith.subf %245, %240 : vector<16x128xf32>
    %cst_106 = arith.constant dense<0xFF800000> : vector<128xf32>
    %289 = vector.multi_reduction <maximumf>, %288, %cst_106 [0] : vector<16x128xf32> to vector<128xf32>
    %290 = vector.shape_cast %289 : vector<128xf32> to vector<1x128xf32>
    %291 = vector.broadcast %290 : vector<1x128xf32> to vector<16x128xf32>
    %292 = arith.subf %288, %291 : vector<16x128xf32>
    %293 = math.exp %292 : vector<16x128xf32>
    %cst_107 = arith.constant dense<0.000000e+00> : vector<4x128xf32>
    %294 = tpu.matmul %16, %293, %cst_107 {dimension_numbers = #tpu.dot_dimension_numbers<[1], [0], [0], [1], [0, 0, 1, 1], [], []>} : vector<4x16xf32>, vector<16x128xf32>, vector<4x128xf32> -> vector<4x128xf32>
    %295 = math.log %294 : vector<4x128xf32>
    %296 = vector.broadcast %290 : vector<1x128xf32> to vector<4x128xf32>
    %297 = arith.addf %295, %296 : vector<4x128xf32>
    %cst_108 = arith.constant dense<0xFF800000> : vector<128xf32>
    %298 = vector.multi_reduction <maximumf>, %297, %cst_108 [0] : vector<4x128xf32> to vector<128xf32>
    %299 = vector.shape_cast %298 : vector<128xf32> to vector<1x128xf32>
    %300 = vector.broadcast %299 : vector<1x128xf32> to vector<4x128xf32>
    %301 = arith.subf %297, %300 : vector<4x128xf32>
    %302 = math.exp %301 : vector<4x128xf32>
    %cst_109 = arith.constant dense<0.000000e+00> : vector<128xf32>
    %303 = vector.multi_reduction <add>, %302, %cst_109 [0] : vector<4x128xf32> to vector<128xf32>
    %304 = vector.shape_cast %303 : vector<128xf32> to vector<1x128xf32>
    %305 = math.log %304 : vector<1x128xf32>
    %306 = arith.addf %299, %305 : vector<1x128xf32>
    %307 = vector.broadcast %306 : vector<1x128xf32> to vector<4x128xf32>
    %308 = arith.subf %297, %307 : vector<4x128xf32>
    %309 = arith.subf %245, %241 : vector<16x128xf32>
    %cst_110 = arith.constant dense<0xFF800000> : vector<128xf32>
    %310 = vector.multi_reduction <maximumf>, %309, %cst_110 [0] : vector<16x128xf32> to vector<128xf32>
    %311 = vector.shape_cast %310 : vector<128xf32> to vector<1x128xf32>
    %312 = vector.broadcast %311 : vector<1x128xf32> to vector<16x128xf32>
    %313 = arith.subf %309, %312 : vector<16x128xf32>
    %314 = math.exp %313 : vector<16x128xf32>
    %cst_111 = arith.constant dense<0.000000e+00> : vector<4x128xf32>
    %315 = tpu.matmul %18, %314, %cst_111 {dimension_numbers = #tpu.dot_dimension_numbers<[1], [0], [0], [1], [0, 0, 1, 1], [], []>} : vector<4x16xf32>, vector<16x128xf32>, vector<4x128xf32> -> vector<4x128xf32>
    %316 = math.log %315 : vector<4x128xf32>
    %317 = vector.broadcast %311 : vector<1x128xf32> to vector<4x128xf32>
    %318 = arith.addf %316, %317 : vector<4x128xf32>
    %cst_112 = arith.constant dense<0xFF800000> : vector<128xf32>
    %319 = vector.multi_reduction <maximumf>, %318, %cst_112 [0] : vector<4x128xf32> to vector<128xf32>
    %320 = vector.shape_cast %319 : vector<128xf32> to vector<1x128xf32>
    %321 = vector.broadcast %320 : vector<1x128xf32> to vector<4x128xf32>
    %322 = arith.subf %318, %321 : vector<4x128xf32>
    %323 = math.exp %322 : vector<4x128xf32>
    %cst_113 = arith.constant dense<0.000000e+00> : vector<128xf32>
    %324 = vector.multi_reduction <add>, %323, %cst_113 [0] : vector<4x128xf32> to vector<128xf32>
    %325 = vector.shape_cast %324 : vector<128xf32> to vector<1x128xf32>
    %326 = math.log %325 : vector<1x128xf32>
    %327 = arith.addf %320, %326 : vector<1x128xf32>
    %328 = vector.broadcast %327 : vector<1x128xf32> to vector<4x128xf32>
    %329 = arith.subf %318, %328 : vector<4x128xf32>
    %cst_114 = arith.constant dense<0.000000e+00> : vector<16x128xf32>
    %330 = tpu.matmul %20, %287, %cst_114 {dimension_numbers = #tpu.dot_dimension_numbers<[1], [0], [0], [1], [0, 0, 1, 1], [], []>} : vector<16x4xf32>, vector<4x128xf32>, vector<16x128xf32> -> vector<16x128xf32>
    %c3_i32_115 = arith.constant 3 : i32
    %331 = tpu.dynamic_rotate %330 by %c3_i32_115 dim 1 : vector<16x128xf32>, i32 -> vector<16x128xf32>
    %cst_116 = arith.constant dense<0.000000e+00> : vector<16x128xf32>
    %332 = tpu.matmul %22, %266, %cst_116 {dimension_numbers = #tpu.dot_dimension_numbers<[1], [0], [0], [1], [0, 0, 1, 1], [], []>} : vector<16x4xf32>, vector<4x128xf32>, vector<16x128xf32> -> vector<16x128xf32>
    %c125_i32_117 = arith.constant 125 : i32
    %333 = tpu.dynamic_rotate %332 by %c125_i32_117 dim 1 : vector<16x128xf32>, i32 -> vector<16x128xf32>
    %334 = arith.addf %331, %333 : vector<16x128xf32>
    %cst_118 = arith.constant dense<0.000000e+00> : vector<16x128xf32>
    %335 = tpu.matmul %24, %329, %cst_118 {dimension_numbers = #tpu.dot_dimension_numbers<[1], [0], [0], [1], [0, 0, 1, 1], [], []>} : vector<16x4xf32>, vector<4x128xf32>, vector<16x128xf32> -> vector<16x128xf32>
    %c1_i32_119 = arith.constant 1 : i32
    %336 = tpu.dynamic_rotate %335 by %c1_i32_119 dim 1 : vector<16x128xf32>, i32 -> vector<16x128xf32>
    %337 = arith.addf %334, %336 : vector<16x128xf32>
    %cst_120 = arith.constant dense<0.000000e+00> : vector<16x128xf32>
    %338 = tpu.matmul %26, %308, %cst_120 {dimension_numbers = #tpu.dot_dimension_numbers<[1], [0], [0], [1], [0, 0, 1, 1], [], []>} : vector<16x4xf32>, vector<4x128xf32>, vector<16x128xf32> -> vector<16x128xf32>
    %c127_i32_121 = arith.constant 127 : i32
    %339 = tpu.dynamic_rotate %338 by %c127_i32_121 dim 1 : vector<16x128xf32>, i32 -> vector<16x128xf32>
    %340 = arith.addf %337, %339 : vector<16x128xf32>
    %341 = arith.mulf %340, %1 : vector<16x128xf32>
    %cst_122 = arith.constant dense<0.000000e+00> : vector<16x128xf32>
    %342 = tpu.matmul %4, %341, %cst_122 {dimension_numbers = #tpu.dot_dimension_numbers<[1], [0], [0], [1], [0, 0, 1, 1], [], []>} : vector<16x16xf32>, vector<16x128xf32>, vector<16x128xf32> -> vector<16x128xf32>
    %cst_123 = arith.constant dense<0.000000e+00> : vector<16x128xf32>
    %343 = tpu.matmul %6, %341, %cst_123 {dimension_numbers = #tpu.dot_dimension_numbers<[1], [0], [0], [1], [0, 0, 1, 1], [], []>} : vector<16x16xf32>, vector<16x128xf32>, vector<16x128xf32> -> vector<16x128xf32>
    %cst_124 = arith.constant dense<0.000000e+00> : vector<16x128xf32>
    %344 = tpu.matmul %8, %341, %cst_124 {dimension_numbers = #tpu.dot_dimension_numbers<[1], [0], [0], [1], [0, 0, 1, 1], [], []>} : vector<16x16xf32>, vector<16x128xf32>, vector<16x128xf32> -> vector<16x128xf32>
    %cst_125 = arith.constant dense<0.000000e+00> : vector<16x128xf32>
    %345 = tpu.matmul %10, %341, %cst_125 {dimension_numbers = #tpu.dot_dimension_numbers<[1], [0], [0], [1], [0, 0, 1, 1], [], []>} : vector<16x16xf32>, vector<16x128xf32>, vector<16x128xf32> -> vector<16x128xf32>
    %346 = arith.addf %0, %342 : vector<16x128xf32>
    %347 = arith.addf %346, %343 : vector<16x128xf32>
    %348 = arith.addf %347, %344 : vector<16x128xf32>
    %349 = arith.addf %348, %345 : vector<16x128xf32>
    %350 = arith.subf %349, %342 : vector<16x128xf32>
    %cst_126 = arith.constant dense<0xFF800000> : vector<128xf32>
    %351 = vector.multi_reduction <maximumf>, %350, %cst_126 [0] : vector<16x128xf32> to vector<128xf32>
    %352 = vector.shape_cast %351 : vector<128xf32> to vector<1x128xf32>
    %353 = vector.broadcast %352 : vector<1x128xf32> to vector<16x128xf32>
    %354 = arith.subf %350, %353 : vector<16x128xf32>
    %355 = math.exp %354 : vector<16x128xf32>
    %cst_127 = arith.constant dense<0.000000e+00> : vector<4x128xf32>
    %356 = tpu.matmul %12, %355, %cst_127 {dimension_numbers = #tpu.dot_dimension_numbers<[1], [0], [0], [1], [0, 0, 1, 1], [], []>} : vector<4x16xf32>, vector<16x128xf32>, vector<4x128xf32> -> vector<4x128xf32>
    %357 = math.log %356 : vector<4x128xf32>
    %358 = vector.broadcast %352 : vector<1x128xf32> to vector<4x128xf32>
    %359 = arith.addf %357, %358 : vector<4x128xf32>
    %cst_128 = arith.constant dense<0xFF800000> : vector<128xf32>
    %360 = vector.multi_reduction <maximumf>, %359, %cst_128 [0] : vector<4x128xf32> to vector<128xf32>
    %361 = vector.shape_cast %360 : vector<128xf32> to vector<1x128xf32>
    %362 = vector.broadcast %361 : vector<1x128xf32> to vector<4x128xf32>
    %363 = arith.subf %359, %362 : vector<4x128xf32>
    %364 = math.exp %363 : vector<4x128xf32>
    %cst_129 = arith.constant dense<0.000000e+00> : vector<128xf32>
    %365 = vector.multi_reduction <add>, %364, %cst_129 [0] : vector<4x128xf32> to vector<128xf32>
    %366 = vector.shape_cast %365 : vector<128xf32> to vector<1x128xf32>
    %367 = math.log %366 : vector<1x128xf32>
    %368 = arith.addf %361, %367 : vector<1x128xf32>
    %369 = vector.broadcast %368 : vector<1x128xf32> to vector<4x128xf32>
    %370 = arith.subf %359, %369 : vector<4x128xf32>
    %371 = arith.subf %349, %343 : vector<16x128xf32>
    %cst_130 = arith.constant dense<0xFF800000> : vector<128xf32>
    %372 = vector.multi_reduction <maximumf>, %371, %cst_130 [0] : vector<16x128xf32> to vector<128xf32>
    %373 = vector.shape_cast %372 : vector<128xf32> to vector<1x128xf32>
    %374 = vector.broadcast %373 : vector<1x128xf32> to vector<16x128xf32>
    %375 = arith.subf %371, %374 : vector<16x128xf32>
    %376 = math.exp %375 : vector<16x128xf32>
    %cst_131 = arith.constant dense<0.000000e+00> : vector<4x128xf32>
    %377 = tpu.matmul %14, %376, %cst_131 {dimension_numbers = #tpu.dot_dimension_numbers<[1], [0], [0], [1], [0, 0, 1, 1], [], []>} : vector<4x16xf32>, vector<16x128xf32>, vector<4x128xf32> -> vector<4x128xf32>
    %378 = math.log %377 : vector<4x128xf32>
    %379 = vector.broadcast %373 : vector<1x128xf32> to vector<4x128xf32>
    %380 = arith.addf %378, %379 : vector<4x128xf32>
    %cst_132 = arith.constant dense<0xFF800000> : vector<128xf32>
    %381 = vector.multi_reduction <maximumf>, %380, %cst_132 [0] : vector<4x128xf32> to vector<128xf32>
    %382 = vector.shape_cast %381 : vector<128xf32> to vector<1x128xf32>
    %383 = vector.broadcast %382 : vector<1x128xf32> to vector<4x128xf32>
    %384 = arith.subf %380, %383 : vector<4x128xf32>
    %385 = math.exp %384 : vector<4x128xf32>
    %cst_133 = arith.constant dense<0.000000e+00> : vector<128xf32>
    %386 = vector.multi_reduction <add>, %385, %cst_133 [0] : vector<4x128xf32> to vector<128xf32>
    %387 = vector.shape_cast %386 : vector<128xf32> to vector<1x128xf32>
    %388 = math.log %387 : vector<1x128xf32>
    %389 = arith.addf %382, %388 : vector<1x128xf32>
    %390 = vector.broadcast %389 : vector<1x128xf32> to vector<4x128xf32>
    %391 = arith.subf %380, %390 : vector<4x128xf32>
    %392 = arith.subf %349, %344 : vector<16x128xf32>
    %cst_134 = arith.constant dense<0xFF800000> : vector<128xf32>
    %393 = vector.multi_reduction <maximumf>, %392, %cst_134 [0] : vector<16x128xf32> to vector<128xf32>
    %394 = vector.shape_cast %393 : vector<128xf32> to vector<1x128xf32>
    %395 = vector.broadcast %394 : vector<1x128xf32> to vector<16x128xf32>
    %396 = arith.subf %392, %395 : vector<16x128xf32>
    %397 = math.exp %396 : vector<16x128xf32>
    %cst_135 = arith.constant dense<0.000000e+00> : vector<4x128xf32>
    %398 = tpu.matmul %16, %397, %cst_135 {dimension_numbers = #tpu.dot_dimension_numbers<[1], [0], [0], [1], [0, 0, 1, 1], [], []>} : vector<4x16xf32>, vector<16x128xf32>, vector<4x128xf32> -> vector<4x128xf32>
    %399 = math.log %398 : vector<4x128xf32>
    %400 = vector.broadcast %394 : vector<1x128xf32> to vector<4x128xf32>
    %401 = arith.addf %399, %400 : vector<4x128xf32>
    %cst_136 = arith.constant dense<0xFF800000> : vector<128xf32>
    %402 = vector.multi_reduction <maximumf>, %401, %cst_136 [0] : vector<4x128xf32> to vector<128xf32>
    %403 = vector.shape_cast %402 : vector<128xf32> to vector<1x128xf32>
    %404 = vector.broadcast %403 : vector<1x128xf32> to vector<4x128xf32>
    %405 = arith.subf %401, %404 : vector<4x128xf32>
    %406 = math.exp %405 : vector<4x128xf32>
    %cst_137 = arith.constant dense<0.000000e+00> : vector<128xf32>
    %407 = vector.multi_reduction <add>, %406, %cst_137 [0] : vector<4x128xf32> to vector<128xf32>
    %408 = vector.shape_cast %407 : vector<128xf32> to vector<1x128xf32>
    %409 = math.log %408 : vector<1x128xf32>
    %410 = arith.addf %403, %409 : vector<1x128xf32>
    %411 = vector.broadcast %410 : vector<1x128xf32> to vector<4x128xf32>
    %412 = arith.subf %401, %411 : vector<4x128xf32>
    %413 = arith.subf %349, %345 : vector<16x128xf32>
    %cst_138 = arith.constant dense<0xFF800000> : vector<128xf32>
    %414 = vector.multi_reduction <maximumf>, %413, %cst_138 [0] : vector<16x128xf32> to vector<128xf32>
    %415 = vector.shape_cast %414 : vector<128xf32> to vector<1x128xf32>
    %416 = vector.broadcast %415 : vector<1x128xf32> to vector<16x128xf32>
    %417 = arith.subf %413, %416 : vector<16x128xf32>
    %418 = math.exp %417 : vector<16x128xf32>
    %cst_139 = arith.constant dense<0.000000e+00> : vector<4x128xf32>
    %419 = tpu.matmul %18, %418, %cst_139 {dimension_numbers = #tpu.dot_dimension_numbers<[1], [0], [0], [1], [0, 0, 1, 1], [], []>} : vector<4x16xf32>, vector<16x128xf32>, vector<4x128xf32> -> vector<4x128xf32>
    %420 = math.log %419 : vector<4x128xf32>
    %421 = vector.broadcast %415 : vector<1x128xf32> to vector<4x128xf32>
    %422 = arith.addf %420, %421 : vector<4x128xf32>
    %cst_140 = arith.constant dense<0xFF800000> : vector<128xf32>
    %423 = vector.multi_reduction <maximumf>, %422, %cst_140 [0] : vector<4x128xf32> to vector<128xf32>
    %424 = vector.shape_cast %423 : vector<128xf32> to vector<1x128xf32>
    %425 = vector.broadcast %424 : vector<1x128xf32> to vector<4x128xf32>
    %426 = arith.subf %422, %425 : vector<4x128xf32>
    %427 = math.exp %426 : vector<4x128xf32>
    %cst_141 = arith.constant dense<0.000000e+00> : vector<128xf32>
    %428 = vector.multi_reduction <add>, %427, %cst_141 [0] : vector<4x128xf32> to vector<128xf32>
    %429 = vector.shape_cast %428 : vector<128xf32> to vector<1x128xf32>
    %430 = math.log %429 : vector<1x128xf32>
    %431 = arith.addf %424, %430 : vector<1x128xf32>
    %432 = vector.broadcast %431 : vector<1x128xf32> to vector<4x128xf32>
    %433 = arith.subf %422, %432 : vector<4x128xf32>
    %cst_142 = arith.constant dense<0.000000e+00> : vector<16x128xf32>
    %434 = tpu.matmul %20, %391, %cst_142 {dimension_numbers = #tpu.dot_dimension_numbers<[1], [0], [0], [1], [0, 0, 1, 1], [], []>} : vector<16x4xf32>, vector<4x128xf32>, vector<16x128xf32> -> vector<16x128xf32>
    %c3_i32_143 = arith.constant 3 : i32
    %435 = tpu.dynamic_rotate %434 by %c3_i32_143 dim 1 : vector<16x128xf32>, i32 -> vector<16x128xf32>
    %cst_144 = arith.constant dense<0.000000e+00> : vector<16x128xf32>
    %436 = tpu.matmul %22, %370, %cst_144 {dimension_numbers = #tpu.dot_dimension_numbers<[1], [0], [0], [1], [0, 0, 1, 1], [], []>} : vector<16x4xf32>, vector<4x128xf32>, vector<16x128xf32> -> vector<16x128xf32>
    %c125_i32_145 = arith.constant 125 : i32
    %437 = tpu.dynamic_rotate %436 by %c125_i32_145 dim 1 : vector<16x128xf32>, i32 -> vector<16x128xf32>
    %438 = arith.addf %435, %437 : vector<16x128xf32>
    %cst_146 = arith.constant dense<0.000000e+00> : vector<16x128xf32>
    %439 = tpu.matmul %24, %433, %cst_146 {dimension_numbers = #tpu.dot_dimension_numbers<[1], [0], [0], [1], [0, 0, 1, 1], [], []>} : vector<16x4xf32>, vector<4x128xf32>, vector<16x128xf32> -> vector<16x128xf32>
    %c1_i32_147 = arith.constant 1 : i32
    %440 = tpu.dynamic_rotate %439 by %c1_i32_147 dim 1 : vector<16x128xf32>, i32 -> vector<16x128xf32>
    %441 = arith.addf %438, %440 : vector<16x128xf32>
    %cst_148 = arith.constant dense<0.000000e+00> : vector<16x128xf32>
    %442 = tpu.matmul %26, %412, %cst_148 {dimension_numbers = #tpu.dot_dimension_numbers<[1], [0], [0], [1], [0, 0, 1, 1], [], []>} : vector<16x4xf32>, vector<4x128xf32>, vector<16x128xf32> -> vector<16x128xf32>
    %c127_i32_149 = arith.constant 127 : i32
    %443 = tpu.dynamic_rotate %442 by %c127_i32_149 dim 1 : vector<16x128xf32>, i32 -> vector<16x128xf32>
    %444 = arith.addf %441, %443 : vector<16x128xf32>
    %445 = arith.mulf %444, %1 : vector<16x128xf32>
    %cst_150 = arith.constant dense<0.000000e+00> : vector<16x128xf32>
    %446 = tpu.matmul %4, %445, %cst_150 {dimension_numbers = #tpu.dot_dimension_numbers<[1], [0], [0], [1], [0, 0, 1, 1], [], []>} : vector<16x16xf32>, vector<16x128xf32>, vector<16x128xf32> -> vector<16x128xf32>
    %cst_151 = arith.constant dense<0.000000e+00> : vector<16x128xf32>
    %447 = tpu.matmul %6, %445, %cst_151 {dimension_numbers = #tpu.dot_dimension_numbers<[1], [0], [0], [1], [0, 0, 1, 1], [], []>} : vector<16x16xf32>, vector<16x128xf32>, vector<16x128xf32> -> vector<16x128xf32>
    %cst_152 = arith.constant dense<0.000000e+00> : vector<16x128xf32>
    %448 = tpu.matmul %8, %445, %cst_152 {dimension_numbers = #tpu.dot_dimension_numbers<[1], [0], [0], [1], [0, 0, 1, 1], [], []>} : vector<16x16xf32>, vector<16x128xf32>, vector<16x128xf32> -> vector<16x128xf32>
    %cst_153 = arith.constant dense<0.000000e+00> : vector<16x128xf32>
    %449 = tpu.matmul %10, %445, %cst_153 {dimension_numbers = #tpu.dot_dimension_numbers<[1], [0], [0], [1], [0, 0, 1, 1], [], []>} : vector<16x16xf32>, vector<16x128xf32>, vector<16x128xf32> -> vector<16x128xf32>
    %450 = arith.addf %0, %446 : vector<16x128xf32>
    %451 = arith.addf %450, %447 : vector<16x128xf32>
    %452 = arith.addf %451, %448 : vector<16x128xf32>
    %453 = arith.addf %452, %449 : vector<16x128xf32>
    %454 = arith.subf %453, %446 : vector<16x128xf32>
    %cst_154 = arith.constant dense<0xFF800000> : vector<128xf32>
    %455 = vector.multi_reduction <maximumf>, %454, %cst_154 [0] : vector<16x128xf32> to vector<128xf32>
    %456 = vector.shape_cast %455 : vector<128xf32> to vector<1x128xf32>
    %457 = vector.broadcast %456 : vector<1x128xf32> to vector<16x128xf32>
    %458 = arith.subf %454, %457 : vector<16x128xf32>
    %459 = math.exp %458 : vector<16x128xf32>
    %cst_155 = arith.constant dense<0.000000e+00> : vector<4x128xf32>
    %460 = tpu.matmul %12, %459, %cst_155 {dimension_numbers = #tpu.dot_dimension_numbers<[1], [0], [0], [1], [0, 0, 1, 1], [], []>} : vector<4x16xf32>, vector<16x128xf32>, vector<4x128xf32> -> vector<4x128xf32>
    %461 = math.log %460 : vector<4x128xf32>
    %462 = vector.broadcast %456 : vector<1x128xf32> to vector<4x128xf32>
    %463 = arith.addf %461, %462 : vector<4x128xf32>
    %cst_156 = arith.constant dense<0xFF800000> : vector<128xf32>
    %464 = vector.multi_reduction <maximumf>, %463, %cst_156 [0] : vector<4x128xf32> to vector<128xf32>
    %465 = vector.shape_cast %464 : vector<128xf32> to vector<1x128xf32>
    %466 = vector.broadcast %465 : vector<1x128xf32> to vector<4x128xf32>
    %467 = arith.subf %463, %466 : vector<4x128xf32>
    %468 = math.exp %467 : vector<4x128xf32>
    %cst_157 = arith.constant dense<0.000000e+00> : vector<128xf32>
    %469 = vector.multi_reduction <add>, %468, %cst_157 [0] : vector<4x128xf32> to vector<128xf32>
    %470 = vector.shape_cast %469 : vector<128xf32> to vector<1x128xf32>
    %471 = math.log %470 : vector<1x128xf32>
    %472 = arith.addf %465, %471 : vector<1x128xf32>
    %473 = vector.broadcast %472 : vector<1x128xf32> to vector<4x128xf32>
    %474 = arith.subf %463, %473 : vector<4x128xf32>
    %475 = arith.subf %453, %447 : vector<16x128xf32>
    %cst_158 = arith.constant dense<0xFF800000> : vector<128xf32>
    %476 = vector.multi_reduction <maximumf>, %475, %cst_158 [0] : vector<16x128xf32> to vector<128xf32>
    %477 = vector.shape_cast %476 : vector<128xf32> to vector<1x128xf32>
    %478 = vector.broadcast %477 : vector<1x128xf32> to vector<16x128xf32>
    %479 = arith.subf %475, %478 : vector<16x128xf32>
    %480 = math.exp %479 : vector<16x128xf32>
    %cst_159 = arith.constant dense<0.000000e+00> : vector<4x128xf32>
    %481 = tpu.matmul %14, %480, %cst_159 {dimension_numbers = #tpu.dot_dimension_numbers<[1], [0], [0], [1], [0, 0, 1, 1], [], []>} : vector<4x16xf32>, vector<16x128xf32>, vector<4x128xf32> -> vector<4x128xf32>
    %482 = math.log %481 : vector<4x128xf32>
    %483 = vector.broadcast %477 : vector<1x128xf32> to vector<4x128xf32>
    %484 = arith.addf %482, %483 : vector<4x128xf32>
    %cst_160 = arith.constant dense<0xFF800000> : vector<128xf32>
    %485 = vector.multi_reduction <maximumf>, %484, %cst_160 [0] : vector<4x128xf32> to vector<128xf32>
    %486 = vector.shape_cast %485 : vector<128xf32> to vector<1x128xf32>
    %487 = vector.broadcast %486 : vector<1x128xf32> to vector<4x128xf32>
    %488 = arith.subf %484, %487 : vector<4x128xf32>
    %489 = math.exp %488 : vector<4x128xf32>
    %cst_161 = arith.constant dense<0.000000e+00> : vector<128xf32>
    %490 = vector.multi_reduction <add>, %489, %cst_161 [0] : vector<4x128xf32> to vector<128xf32>
    %491 = vector.shape_cast %490 : vector<128xf32> to vector<1x128xf32>
    %492 = math.log %491 : vector<1x128xf32>
    %493 = arith.addf %486, %492 : vector<1x128xf32>
    %494 = vector.broadcast %493 : vector<1x128xf32> to vector<4x128xf32>
    %495 = arith.subf %484, %494 : vector<4x128xf32>
    %496 = arith.subf %453, %448 : vector<16x128xf32>
    %cst_162 = arith.constant dense<0xFF800000> : vector<128xf32>
    %497 = vector.multi_reduction <maximumf>, %496, %cst_162 [0] : vector<16x128xf32> to vector<128xf32>
    %498 = vector.shape_cast %497 : vector<128xf32> to vector<1x128xf32>
    %499 = vector.broadcast %498 : vector<1x128xf32> to vector<16x128xf32>
    %500 = arith.subf %496, %499 : vector<16x128xf32>
    %501 = math.exp %500 : vector<16x128xf32>
    %cst_163 = arith.constant dense<0.000000e+00> : vector<4x128xf32>
    %502 = tpu.matmul %16, %501, %cst_163 {dimension_numbers = #tpu.dot_dimension_numbers<[1], [0], [0], [1], [0, 0, 1, 1], [], []>} : vector<4x16xf32>, vector<16x128xf32>, vector<4x128xf32> -> vector<4x128xf32>
    %503 = math.log %502 : vector<4x128xf32>
    %504 = vector.broadcast %498 : vector<1x128xf32> to vector<4x128xf32>
    %505 = arith.addf %503, %504 : vector<4x128xf32>
    %cst_164 = arith.constant dense<0xFF800000> : vector<128xf32>
    %506 = vector.multi_reduction <maximumf>, %505, %cst_164 [0] : vector<4x128xf32> to vector<128xf32>
    %507 = vector.shape_cast %506 : vector<128xf32> to vector<1x128xf32>
    %508 = vector.broadcast %507 : vector<1x128xf32> to vector<4x128xf32>
    %509 = arith.subf %505, %508 : vector<4x128xf32>
    %510 = math.exp %509 : vector<4x128xf32>
    %cst_165 = arith.constant dense<0.000000e+00> : vector<128xf32>
    %511 = vector.multi_reduction <add>, %510, %cst_165 [0] : vector<4x128xf32> to vector<128xf32>
    %512 = vector.shape_cast %511 : vector<128xf32> to vector<1x128xf32>
    %513 = math.log %512 : vector<1x128xf32>
    %514 = arith.addf %507, %513 : vector<1x128xf32>
    %515 = vector.broadcast %514 : vector<1x128xf32> to vector<4x128xf32>
    %516 = arith.subf %505, %515 : vector<4x128xf32>
    %517 = arith.subf %453, %449 : vector<16x128xf32>
    %cst_166 = arith.constant dense<0xFF800000> : vector<128xf32>
    %518 = vector.multi_reduction <maximumf>, %517, %cst_166 [0] : vector<16x128xf32> to vector<128xf32>
    %519 = vector.shape_cast %518 : vector<128xf32> to vector<1x128xf32>
    %520 = vector.broadcast %519 : vector<1x128xf32> to vector<16x128xf32>
    %521 = arith.subf %517, %520 : vector<16x128xf32>
    %522 = math.exp %521 : vector<16x128xf32>
    %cst_167 = arith.constant dense<0.000000e+00> : vector<4x128xf32>
    %523 = tpu.matmul %18, %522, %cst_167 {dimension_numbers = #tpu.dot_dimension_numbers<[1], [0], [0], [1], [0, 0, 1, 1], [], []>} : vector<4x16xf32>, vector<16x128xf32>, vector<4x128xf32> -> vector<4x128xf32>
    %524 = math.log %523 : vector<4x128xf32>
    %525 = vector.broadcast %519 : vector<1x128xf32> to vector<4x128xf32>
    %526 = arith.addf %524, %525 : vector<4x128xf32>
    %cst_168 = arith.constant dense<0xFF800000> : vector<128xf32>
    %527 = vector.multi_reduction <maximumf>, %526, %cst_168 [0] : vector<4x128xf32> to vector<128xf32>
    %528 = vector.shape_cast %527 : vector<128xf32> to vector<1x128xf32>
    %529 = vector.broadcast %528 : vector<1x128xf32> to vector<4x128xf32>
    %530 = arith.subf %526, %529 : vector<4x128xf32>
    %531 = math.exp %530 : vector<4x128xf32>
    %cst_169 = arith.constant dense<0.000000e+00> : vector<128xf32>
    %532 = vector.multi_reduction <add>, %531, %cst_169 [0] : vector<4x128xf32> to vector<128xf32>
    %533 = vector.shape_cast %532 : vector<128xf32> to vector<1x128xf32>
    %534 = math.log %533 : vector<1x128xf32>
    %535 = arith.addf %528, %534 : vector<1x128xf32>
    %536 = vector.broadcast %535 : vector<1x128xf32> to vector<4x128xf32>
    %537 = arith.subf %526, %536 : vector<4x128xf32>
    %cst_170 = arith.constant dense<0.000000e+00> : vector<16x128xf32>
    %538 = tpu.matmul %20, %495, %cst_170 {dimension_numbers = #tpu.dot_dimension_numbers<[1], [0], [0], [1], [0, 0, 1, 1], [], []>} : vector<16x4xf32>, vector<4x128xf32>, vector<16x128xf32> -> vector<16x128xf32>
    %c3_i32_171 = arith.constant 3 : i32
    %539 = tpu.dynamic_rotate %538 by %c3_i32_171 dim 1 : vector<16x128xf32>, i32 -> vector<16x128xf32>
    %cst_172 = arith.constant dense<0.000000e+00> : vector<16x128xf32>
    %540 = tpu.matmul %22, %474, %cst_172 {dimension_numbers = #tpu.dot_dimension_numbers<[1], [0], [0], [1], [0, 0, 1, 1], [], []>} : vector<16x4xf32>, vector<4x128xf32>, vector<16x128xf32> -> vector<16x128xf32>
    %c125_i32_173 = arith.constant 125 : i32
    %541 = tpu.dynamic_rotate %540 by %c125_i32_173 dim 1 : vector<16x128xf32>, i32 -> vector<16x128xf32>
    %542 = arith.addf %539, %541 : vector<16x128xf32>
    %cst_174 = arith.constant dense<0.000000e+00> : vector<16x128xf32>
    %543 = tpu.matmul %24, %537, %cst_174 {dimension_numbers = #tpu.dot_dimension_numbers<[1], [0], [0], [1], [0, 0, 1, 1], [], []>} : vector<16x4xf32>, vector<4x128xf32>, vector<16x128xf32> -> vector<16x128xf32>
    %c1_i32_175 = arith.constant 1 : i32
    %544 = tpu.dynamic_rotate %543 by %c1_i32_175 dim 1 : vector<16x128xf32>, i32 -> vector<16x128xf32>
    %545 = arith.addf %542, %544 : vector<16x128xf32>
    %cst_176 = arith.constant dense<0.000000e+00> : vector<16x128xf32>
    %546 = tpu.matmul %26, %516, %cst_176 {dimension_numbers = #tpu.dot_dimension_numbers<[1], [0], [0], [1], [0, 0, 1, 1], [], []>} : vector<16x4xf32>, vector<4x128xf32>, vector<16x128xf32> -> vector<16x128xf32>
    %c127_i32_177 = arith.constant 127 : i32
    %547 = tpu.dynamic_rotate %546 by %c127_i32_177 dim 1 : vector<16x128xf32>, i32 -> vector<16x128xf32>
    %548 = arith.addf %545, %547 : vector<16x128xf32>
    %549 = arith.mulf %548, %1 : vector<16x128xf32>
    %cst_178 = arith.constant dense<0.000000e+00> : vector<16x128xf32>
    %550 = tpu.matmul %4, %549, %cst_178 {dimension_numbers = #tpu.dot_dimension_numbers<[1], [0], [0], [1], [0, 0, 1, 1], [], []>} : vector<16x16xf32>, vector<16x128xf32>, vector<16x128xf32> -> vector<16x128xf32>
    %cst_179 = arith.constant dense<0.000000e+00> : vector<16x128xf32>
    %551 = tpu.matmul %6, %549, %cst_179 {dimension_numbers = #tpu.dot_dimension_numbers<[1], [0], [0], [1], [0, 0, 1, 1], [], []>} : vector<16x16xf32>, vector<16x128xf32>, vector<16x128xf32> -> vector<16x128xf32>
    %cst_180 = arith.constant dense<0.000000e+00> : vector<16x128xf32>
    %552 = tpu.matmul %8, %549, %cst_180 {dimension_numbers = #tpu.dot_dimension_numbers<[1], [0], [0], [1], [0, 0, 1, 1], [], []>} : vector<16x16xf32>, vector<16x128xf32>, vector<16x128xf32> -> vector<16x128xf32>
    %cst_181 = arith.constant dense<0.000000e+00> : vector<16x128xf32>
    %553 = tpu.matmul %10, %549, %cst_181 {dimension_numbers = #tpu.dot_dimension_numbers<[1], [0], [0], [1], [0, 0, 1, 1], [], []>} : vector<16x16xf32>, vector<16x128xf32>, vector<16x128xf32> -> vector<16x128xf32>
    %554 = arith.addf %0, %550 : vector<16x128xf32>
    %555 = arith.addf %554, %551 : vector<16x128xf32>
    %556 = arith.addf %555, %552 : vector<16x128xf32>
    %557 = arith.addf %556, %553 : vector<16x128xf32>
    %558 = arith.subf %557, %550 : vector<16x128xf32>
    %cst_182 = arith.constant dense<0xFF800000> : vector<128xf32>
    %559 = vector.multi_reduction <maximumf>, %558, %cst_182 [0] : vector<16x128xf32> to vector<128xf32>
    %560 = vector.shape_cast %559 : vector<128xf32> to vector<1x128xf32>
    %561 = vector.broadcast %560 : vector<1x128xf32> to vector<16x128xf32>
    %562 = arith.subf %558, %561 : vector<16x128xf32>
    %563 = math.exp %562 : vector<16x128xf32>
    %cst_183 = arith.constant dense<0.000000e+00> : vector<4x128xf32>
    %564 = tpu.matmul %12, %563, %cst_183 {dimension_numbers = #tpu.dot_dimension_numbers<[1], [0], [0], [1], [0, 0, 1, 1], [], []>} : vector<4x16xf32>, vector<16x128xf32>, vector<4x128xf32> -> vector<4x128xf32>
    %565 = math.log %564 : vector<4x128xf32>
    %566 = vector.broadcast %560 : vector<1x128xf32> to vector<4x128xf32>
    %567 = arith.addf %565, %566 : vector<4x128xf32>
    %cst_184 = arith.constant dense<0xFF800000> : vector<128xf32>
    %568 = vector.multi_reduction <maximumf>, %567, %cst_184 [0] : vector<4x128xf32> to vector<128xf32>
    %569 = vector.shape_cast %568 : vector<128xf32> to vector<1x128xf32>
    %570 = vector.broadcast %569 : vector<1x128xf32> to vector<4x128xf32>
    %571 = arith.subf %567, %570 : vector<4x128xf32>
    %572 = math.exp %571 : vector<4x128xf32>
    %cst_185 = arith.constant dense<0.000000e+00> : vector<128xf32>
    %573 = vector.multi_reduction <add>, %572, %cst_185 [0] : vector<4x128xf32> to vector<128xf32>
    %574 = vector.shape_cast %573 : vector<128xf32> to vector<1x128xf32>
    %575 = math.log %574 : vector<1x128xf32>
    %576 = arith.addf %569, %575 : vector<1x128xf32>
    %577 = vector.broadcast %576 : vector<1x128xf32> to vector<4x128xf32>
    %578 = arith.subf %567, %577 : vector<4x128xf32>
    %579 = arith.subf %557, %551 : vector<16x128xf32>
    %cst_186 = arith.constant dense<0xFF800000> : vector<128xf32>
    %580 = vector.multi_reduction <maximumf>, %579, %cst_186 [0] : vector<16x128xf32> to vector<128xf32>
    %581 = vector.shape_cast %580 : vector<128xf32> to vector<1x128xf32>
    %582 = vector.broadcast %581 : vector<1x128xf32> to vector<16x128xf32>
    %583 = arith.subf %579, %582 : vector<16x128xf32>
    %584 = math.exp %583 : vector<16x128xf32>
    %cst_187 = arith.constant dense<0.000000e+00> : vector<4x128xf32>
    %585 = tpu.matmul %14, %584, %cst_187 {dimension_numbers = #tpu.dot_dimension_numbers<[1], [0], [0], [1], [0, 0, 1, 1], [], []>} : vector<4x16xf32>, vector<16x128xf32>, vector<4x128xf32> -> vector<4x128xf32>
    %586 = math.log %585 : vector<4x128xf32>
    %587 = vector.broadcast %581 : vector<1x128xf32> to vector<4x128xf32>
    %588 = arith.addf %586, %587 : vector<4x128xf32>
    %cst_188 = arith.constant dense<0xFF800000> : vector<128xf32>
    %589 = vector.multi_reduction <maximumf>, %588, %cst_188 [0] : vector<4x128xf32> to vector<128xf32>
    %590 = vector.shape_cast %589 : vector<128xf32> to vector<1x128xf32>
    %591 = vector.broadcast %590 : vector<1x128xf32> to vector<4x128xf32>
    %592 = arith.subf %588, %591 : vector<4x128xf32>
    %593 = math.exp %592 : vector<4x128xf32>
    %cst_189 = arith.constant dense<0.000000e+00> : vector<128xf32>
    %594 = vector.multi_reduction <add>, %593, %cst_189 [0] : vector<4x128xf32> to vector<128xf32>
    %595 = vector.shape_cast %594 : vector<128xf32> to vector<1x128xf32>
    %596 = math.log %595 : vector<1x128xf32>
    %597 = arith.addf %590, %596 : vector<1x128xf32>
    %598 = vector.broadcast %597 : vector<1x128xf32> to vector<4x128xf32>
    %599 = arith.subf %588, %598 : vector<4x128xf32>
    %600 = arith.subf %557, %552 : vector<16x128xf32>
    %cst_190 = arith.constant dense<0xFF800000> : vector<128xf32>
    %601 = vector.multi_reduction <maximumf>, %600, %cst_190 [0] : vector<16x128xf32> to vector<128xf32>
    %602 = vector.shape_cast %601 : vector<128xf32> to vector<1x128xf32>
    %603 = vector.broadcast %602 : vector<1x128xf32> to vector<16x128xf32>
    %604 = arith.subf %600, %603 : vector<16x128xf32>
    %605 = math.exp %604 : vector<16x128xf32>
    %cst_191 = arith.constant dense<0.000000e+00> : vector<4x128xf32>
    %606 = tpu.matmul %16, %605, %cst_191 {dimension_numbers = #tpu.dot_dimension_numbers<[1], [0], [0], [1], [0, 0, 1, 1], [], []>} : vector<4x16xf32>, vector<16x128xf32>, vector<4x128xf32> -> vector<4x128xf32>
    %607 = math.log %606 : vector<4x128xf32>
    %608 = vector.broadcast %602 : vector<1x128xf32> to vector<4x128xf32>
    %609 = arith.addf %607, %608 : vector<4x128xf32>
    %cst_192 = arith.constant dense<0xFF800000> : vector<128xf32>
    %610 = vector.multi_reduction <maximumf>, %609, %cst_192 [0] : vector<4x128xf32> to vector<128xf32>
    %611 = vector.shape_cast %610 : vector<128xf32> to vector<1x128xf32>
    %612 = vector.broadcast %611 : vector<1x128xf32> to vector<4x128xf32>
    %613 = arith.subf %609, %612 : vector<4x128xf32>
    %614 = math.exp %613 : vector<4x128xf32>
    %cst_193 = arith.constant dense<0.000000e+00> : vector<128xf32>
    %615 = vector.multi_reduction <add>, %614, %cst_193 [0] : vector<4x128xf32> to vector<128xf32>
    %616 = vector.shape_cast %615 : vector<128xf32> to vector<1x128xf32>
    %617 = math.log %616 : vector<1x128xf32>
    %618 = arith.addf %611, %617 : vector<1x128xf32>
    %619 = vector.broadcast %618 : vector<1x128xf32> to vector<4x128xf32>
    %620 = arith.subf %609, %619 : vector<4x128xf32>
    %621 = arith.subf %557, %553 : vector<16x128xf32>
    %cst_194 = arith.constant dense<0xFF800000> : vector<128xf32>
    %622 = vector.multi_reduction <maximumf>, %621, %cst_194 [0] : vector<16x128xf32> to vector<128xf32>
    %623 = vector.shape_cast %622 : vector<128xf32> to vector<1x128xf32>
    %624 = vector.broadcast %623 : vector<1x128xf32> to vector<16x128xf32>
    %625 = arith.subf %621, %624 : vector<16x128xf32>
    %626 = math.exp %625 : vector<16x128xf32>
    %cst_195 = arith.constant dense<0.000000e+00> : vector<4x128xf32>
    %627 = tpu.matmul %18, %626, %cst_195 {dimension_numbers = #tpu.dot_dimension_numbers<[1], [0], [0], [1], [0, 0, 1, 1], [], []>} : vector<4x16xf32>, vector<16x128xf32>, vector<4x128xf32> -> vector<4x128xf32>
    %628 = math.log %627 : vector<4x128xf32>
    %629 = vector.broadcast %623 : vector<1x128xf32> to vector<4x128xf32>
    %630 = arith.addf %628, %629 : vector<4x128xf32>
    %cst_196 = arith.constant dense<0xFF800000> : vector<128xf32>
    %631 = vector.multi_reduction <maximumf>, %630, %cst_196 [0] : vector<4x128xf32> to vector<128xf32>
    %632 = vector.shape_cast %631 : vector<128xf32> to vector<1x128xf32>
    %633 = vector.broadcast %632 : vector<1x128xf32> to vector<4x128xf32>
    %634 = arith.subf %630, %633 : vector<4x128xf32>
    %635 = math.exp %634 : vector<4x128xf32>
    %cst_197 = arith.constant dense<0.000000e+00> : vector<128xf32>
    %636 = vector.multi_reduction <add>, %635, %cst_197 [0] : vector<4x128xf32> to vector<128xf32>
    %637 = vector.shape_cast %636 : vector<128xf32> to vector<1x128xf32>
    %638 = math.log %637 : vector<1x128xf32>
    %639 = arith.addf %632, %638 : vector<1x128xf32>
    %640 = vector.broadcast %639 : vector<1x128xf32> to vector<4x128xf32>
    %641 = arith.subf %630, %640 : vector<4x128xf32>
    %cst_198 = arith.constant dense<0.000000e+00> : vector<16x128xf32>
    %642 = tpu.matmul %20, %599, %cst_198 {dimension_numbers = #tpu.dot_dimension_numbers<[1], [0], [0], [1], [0, 0, 1, 1], [], []>} : vector<16x4xf32>, vector<4x128xf32>, vector<16x128xf32> -> vector<16x128xf32>
    %c3_i32_199 = arith.constant 3 : i32
    %643 = tpu.dynamic_rotate %642 by %c3_i32_199 dim 1 : vector<16x128xf32>, i32 -> vector<16x128xf32>
    %cst_200 = arith.constant dense<0.000000e+00> : vector<16x128xf32>
    %644 = tpu.matmul %22, %578, %cst_200 {dimension_numbers = #tpu.dot_dimension_numbers<[1], [0], [0], [1], [0, 0, 1, 1], [], []>} : vector<16x4xf32>, vector<4x128xf32>, vector<16x128xf32> -> vector<16x128xf32>
    %c125_i32_201 = arith.constant 125 : i32
    %645 = tpu.dynamic_rotate %644 by %c125_i32_201 dim 1 : vector<16x128xf32>, i32 -> vector<16x128xf32>
    %646 = arith.addf %643, %645 : vector<16x128xf32>
    %cst_202 = arith.constant dense<0.000000e+00> : vector<16x128xf32>
    %647 = tpu.matmul %24, %641, %cst_202 {dimension_numbers = #tpu.dot_dimension_numbers<[1], [0], [0], [1], [0, 0, 1, 1], [], []>} : vector<16x4xf32>, vector<4x128xf32>, vector<16x128xf32> -> vector<16x128xf32>
    %c1_i32_203 = arith.constant 1 : i32
    %648 = tpu.dynamic_rotate %647 by %c1_i32_203 dim 1 : vector<16x128xf32>, i32 -> vector<16x128xf32>
    %649 = arith.addf %646, %648 : vector<16x128xf32>
    %cst_204 = arith.constant dense<0.000000e+00> : vector<16x128xf32>
    %650 = tpu.matmul %26, %620, %cst_204 {dimension_numbers = #tpu.dot_dimension_numbers<[1], [0], [0], [1], [0, 0, 1, 1], [], []>} : vector<16x4xf32>, vector<4x128xf32>, vector<16x128xf32> -> vector<16x128xf32>
    %c127_i32_205 = arith.constant 127 : i32
    %651 = tpu.dynamic_rotate %650 by %c127_i32_205 dim 1 : vector<16x128xf32>, i32 -> vector<16x128xf32>
    %652 = arith.addf %649, %651 : vector<16x128xf32>
    %653 = arith.mulf %652, %1 : vector<16x128xf32>
    %cst_206 = arith.constant dense<0.000000e+00> : vector<16x128xf32>
    %654 = tpu.matmul %4, %653, %cst_206 {dimension_numbers = #tpu.dot_dimension_numbers<[1], [0], [0], [1], [0, 0, 1, 1], [], []>} : vector<16x16xf32>, vector<16x128xf32>, vector<16x128xf32> -> vector<16x128xf32>
    %cst_207 = arith.constant dense<0.000000e+00> : vector<16x128xf32>
    %655 = tpu.matmul %6, %653, %cst_207 {dimension_numbers = #tpu.dot_dimension_numbers<[1], [0], [0], [1], [0, 0, 1, 1], [], []>} : vector<16x16xf32>, vector<16x128xf32>, vector<16x128xf32> -> vector<16x128xf32>
    %cst_208 = arith.constant dense<0.000000e+00> : vector<16x128xf32>
    %656 = tpu.matmul %8, %653, %cst_208 {dimension_numbers = #tpu.dot_dimension_numbers<[1], [0], [0], [1], [0, 0, 1, 1], [], []>} : vector<16x16xf32>, vector<16x128xf32>, vector<16x128xf32> -> vector<16x128xf32>
    %cst_209 = arith.constant dense<0.000000e+00> : vector<16x128xf32>
    %657 = tpu.matmul %10, %653, %cst_209 {dimension_numbers = #tpu.dot_dimension_numbers<[1], [0], [0], [1], [0, 0, 1, 1], [], []>} : vector<16x16xf32>, vector<16x128xf32>, vector<16x128xf32> -> vector<16x128xf32>
    %658 = arith.addf %0, %654 : vector<16x128xf32>
    %659 = arith.addf %658, %655 : vector<16x128xf32>
    %660 = arith.addf %659, %656 : vector<16x128xf32>
    %661 = arith.addf %660, %657 : vector<16x128xf32>
    %662 = arith.subf %661, %654 : vector<16x128xf32>
    %cst_210 = arith.constant dense<0xFF800000> : vector<128xf32>
    %663 = vector.multi_reduction <maximumf>, %662, %cst_210 [0] : vector<16x128xf32> to vector<128xf32>
    %664 = vector.shape_cast %663 : vector<128xf32> to vector<1x128xf32>
    %665 = vector.broadcast %664 : vector<1x128xf32> to vector<16x128xf32>
    %666 = arith.subf %662, %665 : vector<16x128xf32>
    %667 = math.exp %666 : vector<16x128xf32>
    %cst_211 = arith.constant dense<0.000000e+00> : vector<4x128xf32>
    %668 = tpu.matmul %12, %667, %cst_211 {dimension_numbers = #tpu.dot_dimension_numbers<[1], [0], [0], [1], [0, 0, 1, 1], [], []>} : vector<4x16xf32>, vector<16x128xf32>, vector<4x128xf32> -> vector<4x128xf32>
    %669 = math.log %668 : vector<4x128xf32>
    %670 = vector.broadcast %664 : vector<1x128xf32> to vector<4x128xf32>
    %671 = arith.addf %669, %670 : vector<4x128xf32>
    %cst_212 = arith.constant dense<0xFF800000> : vector<128xf32>
    %672 = vector.multi_reduction <maximumf>, %671, %cst_212 [0] : vector<4x128xf32> to vector<128xf32>
    %673 = vector.shape_cast %672 : vector<128xf32> to vector<1x128xf32>
    %674 = vector.broadcast %673 : vector<1x128xf32> to vector<4x128xf32>
    %675 = arith.subf %671, %674 : vector<4x128xf32>
    %676 = math.exp %675 : vector<4x128xf32>
    %cst_213 = arith.constant dense<0.000000e+00> : vector<128xf32>
    %677 = vector.multi_reduction <add>, %676, %cst_213 [0] : vector<4x128xf32> to vector<128xf32>
    %678 = vector.shape_cast %677 : vector<128xf32> to vector<1x128xf32>
    %679 = math.log %678 : vector<1x128xf32>
    %680 = arith.addf %673, %679 : vector<1x128xf32>
    %681 = vector.broadcast %680 : vector<1x128xf32> to vector<4x128xf32>
    %682 = arith.subf %671, %681 : vector<4x128xf32>
    %683 = arith.subf %661, %655 : vector<16x128xf32>
    %cst_214 = arith.constant dense<0xFF800000> : vector<128xf32>
    %684 = vector.multi_reduction <maximumf>, %683, %cst_214 [0] : vector<16x128xf32> to vector<128xf32>
    %685 = vector.shape_cast %684 : vector<128xf32> to vector<1x128xf32>
    %686 = vector.broadcast %685 : vector<1x128xf32> to vector<16x128xf32>
    %687 = arith.subf %683, %686 : vector<16x128xf32>
    %688 = math.exp %687 : vector<16x128xf32>
    %cst_215 = arith.constant dense<0.000000e+00> : vector<4x128xf32>
    %689 = tpu.matmul %14, %688, %cst_215 {dimension_numbers = #tpu.dot_dimension_numbers<[1], [0], [0], [1], [0, 0, 1, 1], [], []>} : vector<4x16xf32>, vector<16x128xf32>, vector<4x128xf32> -> vector<4x128xf32>
    %690 = math.log %689 : vector<4x128xf32>
    %691 = vector.broadcast %685 : vector<1x128xf32> to vector<4x128xf32>
    %692 = arith.addf %690, %691 : vector<4x128xf32>
    %cst_216 = arith.constant dense<0xFF800000> : vector<128xf32>
    %693 = vector.multi_reduction <maximumf>, %692, %cst_216 [0] : vector<4x128xf32> to vector<128xf32>
    %694 = vector.shape_cast %693 : vector<128xf32> to vector<1x128xf32>
    %695 = vector.broadcast %694 : vector<1x128xf32> to vector<4x128xf32>
    %696 = arith.subf %692, %695 : vector<4x128xf32>
    %697 = math.exp %696 : vector<4x128xf32>
    %cst_217 = arith.constant dense<0.000000e+00> : vector<128xf32>
    %698 = vector.multi_reduction <add>, %697, %cst_217 [0] : vector<4x128xf32> to vector<128xf32>
    %699 = vector.shape_cast %698 : vector<128xf32> to vector<1x128xf32>
    %700 = math.log %699 : vector<1x128xf32>
    %701 = arith.addf %694, %700 : vector<1x128xf32>
    %702 = vector.broadcast %701 : vector<1x128xf32> to vector<4x128xf32>
    %703 = arith.subf %692, %702 : vector<4x128xf32>
    %704 = arith.subf %661, %656 : vector<16x128xf32>
    %cst_218 = arith.constant dense<0xFF800000> : vector<128xf32>
    %705 = vector.multi_reduction <maximumf>, %704, %cst_218 [0] : vector<16x128xf32> to vector<128xf32>
    %706 = vector.shape_cast %705 : vector<128xf32> to vector<1x128xf32>
    %707 = vector.broadcast %706 : vector<1x128xf32> to vector<16x128xf32>
    %708 = arith.subf %704, %707 : vector<16x128xf32>
    %709 = math.exp %708 : vector<16x128xf32>
    %cst_219 = arith.constant dense<0.000000e+00> : vector<4x128xf32>
    %710 = tpu.matmul %16, %709, %cst_219 {dimension_numbers = #tpu.dot_dimension_numbers<[1], [0], [0], [1], [0, 0, 1, 1], [], []>} : vector<4x16xf32>, vector<16x128xf32>, vector<4x128xf32> -> vector<4x128xf32>
    %711 = math.log %710 : vector<4x128xf32>
    %712 = vector.broadcast %706 : vector<1x128xf32> to vector<4x128xf32>
    %713 = arith.addf %711, %712 : vector<4x128xf32>
    %cst_220 = arith.constant dense<0xFF800000> : vector<128xf32>
    %714 = vector.multi_reduction <maximumf>, %713, %cst_220 [0] : vector<4x128xf32> to vector<128xf32>
    %715 = vector.shape_cast %714 : vector<128xf32> to vector<1x128xf32>
    %716 = vector.broadcast %715 : vector<1x128xf32> to vector<4x128xf32>
    %717 = arith.subf %713, %716 : vector<4x128xf32>
    %718 = math.exp %717 : vector<4x128xf32>
    %cst_221 = arith.constant dense<0.000000e+00> : vector<128xf32>
    %719 = vector.multi_reduction <add>, %718, %cst_221 [0] : vector<4x128xf32> to vector<128xf32>
    %720 = vector.shape_cast %719 : vector<128xf32> to vector<1x128xf32>
    %721 = math.log %720 : vector<1x128xf32>
    %722 = arith.addf %715, %721 : vector<1x128xf32>
    %723 = vector.broadcast %722 : vector<1x128xf32> to vector<4x128xf32>
    %724 = arith.subf %713, %723 : vector<4x128xf32>
    %725 = arith.subf %661, %657 : vector<16x128xf32>
    %cst_222 = arith.constant dense<0xFF800000> : vector<128xf32>
    %726 = vector.multi_reduction <maximumf>, %725, %cst_222 [0] : vector<16x128xf32> to vector<128xf32>
    %727 = vector.shape_cast %726 : vector<128xf32> to vector<1x128xf32>
    %728 = vector.broadcast %727 : vector<1x128xf32> to vector<16x128xf32>
    %729 = arith.subf %725, %728 : vector<16x128xf32>
    %730 = math.exp %729 : vector<16x128xf32>
    %cst_223 = arith.constant dense<0.000000e+00> : vector<4x128xf32>
    %731 = tpu.matmul %18, %730, %cst_223 {dimension_numbers = #tpu.dot_dimension_numbers<[1], [0], [0], [1], [0, 0, 1, 1], [], []>} : vector<4x16xf32>, vector<16x128xf32>, vector<4x128xf32> -> vector<4x128xf32>
    %732 = math.log %731 : vector<4x128xf32>
    %733 = vector.broadcast %727 : vector<1x128xf32> to vector<4x128xf32>
    %734 = arith.addf %732, %733 : vector<4x128xf32>
    %cst_224 = arith.constant dense<0xFF800000> : vector<128xf32>
    %735 = vector.multi_reduction <maximumf>, %734, %cst_224 [0] : vector<4x128xf32> to vector<128xf32>
    %736 = vector.shape_cast %735 : vector<128xf32> to vector<1x128xf32>
    %737 = vector.broadcast %736 : vector<1x128xf32> to vector<4x128xf32>
    %738 = arith.subf %734, %737 : vector<4x128xf32>
    %739 = math.exp %738 : vector<4x128xf32>
    %cst_225 = arith.constant dense<0.000000e+00> : vector<128xf32>
    %740 = vector.multi_reduction <add>, %739, %cst_225 [0] : vector<4x128xf32> to vector<128xf32>
    %741 = vector.shape_cast %740 : vector<128xf32> to vector<1x128xf32>
    %742 = math.log %741 : vector<1x128xf32>
    %743 = arith.addf %736, %742 : vector<1x128xf32>
    %744 = vector.broadcast %743 : vector<1x128xf32> to vector<4x128xf32>
    %745 = arith.subf %734, %744 : vector<4x128xf32>
    %cst_226 = arith.constant dense<0.000000e+00> : vector<16x128xf32>
    %746 = tpu.matmul %20, %703, %cst_226 {dimension_numbers = #tpu.dot_dimension_numbers<[1], [0], [0], [1], [0, 0, 1, 1], [], []>} : vector<16x4xf32>, vector<4x128xf32>, vector<16x128xf32> -> vector<16x128xf32>
    %c3_i32_227 = arith.constant 3 : i32
    %747 = tpu.dynamic_rotate %746 by %c3_i32_227 dim 1 : vector<16x128xf32>, i32 -> vector<16x128xf32>
    %cst_228 = arith.constant dense<0.000000e+00> : vector<16x128xf32>
    %748 = tpu.matmul %22, %682, %cst_228 {dimension_numbers = #tpu.dot_dimension_numbers<[1], [0], [0], [1], [0, 0, 1, 1], [], []>} : vector<16x4xf32>, vector<4x128xf32>, vector<16x128xf32> -> vector<16x128xf32>
    %c125_i32_229 = arith.constant 125 : i32
    %749 = tpu.dynamic_rotate %748 by %c125_i32_229 dim 1 : vector<16x128xf32>, i32 -> vector<16x128xf32>
    %750 = arith.addf %747, %749 : vector<16x128xf32>
    %cst_230 = arith.constant dense<0.000000e+00> : vector<16x128xf32>
    %751 = tpu.matmul %24, %745, %cst_230 {dimension_numbers = #tpu.dot_dimension_numbers<[1], [0], [0], [1], [0, 0, 1, 1], [], []>} : vector<16x4xf32>, vector<4x128xf32>, vector<16x128xf32> -> vector<16x128xf32>
    %c1_i32_231 = arith.constant 1 : i32
    %752 = tpu.dynamic_rotate %751 by %c1_i32_231 dim 1 : vector<16x128xf32>, i32 -> vector<16x128xf32>
    %753 = arith.addf %750, %752 : vector<16x128xf32>
    %cst_232 = arith.constant dense<0.000000e+00> : vector<16x128xf32>
    %754 = tpu.matmul %26, %724, %cst_232 {dimension_numbers = #tpu.dot_dimension_numbers<[1], [0], [0], [1], [0, 0, 1, 1], [], []>} : vector<16x4xf32>, vector<4x128xf32>, vector<16x128xf32> -> vector<16x128xf32>
    %c127_i32_233 = arith.constant 127 : i32
    %755 = tpu.dynamic_rotate %754 by %c127_i32_233 dim 1 : vector<16x128xf32>, i32 -> vector<16x128xf32>
    %756 = arith.addf %753, %755 : vector<16x128xf32>
    %757 = arith.mulf %756, %1 : vector<16x128xf32>
    %cst_234 = arith.constant dense<0.000000e+00> : vector<16x128xf32>
    %758 = tpu.matmul %4, %757, %cst_234 {dimension_numbers = #tpu.dot_dimension_numbers<[1], [0], [0], [1], [0, 0, 1, 1], [], []>} : vector<16x16xf32>, vector<16x128xf32>, vector<16x128xf32> -> vector<16x128xf32>
    %cst_235 = arith.constant dense<0.000000e+00> : vector<16x128xf32>
    %759 = tpu.matmul %6, %757, %cst_235 {dimension_numbers = #tpu.dot_dimension_numbers<[1], [0], [0], [1], [0, 0, 1, 1], [], []>} : vector<16x16xf32>, vector<16x128xf32>, vector<16x128xf32> -> vector<16x128xf32>
    %cst_236 = arith.constant dense<0.000000e+00> : vector<16x128xf32>
    %760 = tpu.matmul %8, %757, %cst_236 {dimension_numbers = #tpu.dot_dimension_numbers<[1], [0], [0], [1], [0, 0, 1, 1], [], []>} : vector<16x16xf32>, vector<16x128xf32>, vector<16x128xf32> -> vector<16x128xf32>
    %cst_237 = arith.constant dense<0.000000e+00> : vector<16x128xf32>
    %761 = tpu.matmul %10, %757, %cst_237 {dimension_numbers = #tpu.dot_dimension_numbers<[1], [0], [0], [1], [0, 0, 1, 1], [], []>} : vector<16x16xf32>, vector<16x128xf32>, vector<16x128xf32> -> vector<16x128xf32>
    %762 = arith.addf %0, %758 : vector<16x128xf32>
    %763 = arith.addf %762, %759 : vector<16x128xf32>
    %764 = arith.addf %763, %760 : vector<16x128xf32>
    %765 = arith.addf %764, %761 : vector<16x128xf32>
    %766 = arith.subf %765, %758 : vector<16x128xf32>
    %cst_238 = arith.constant dense<0xFF800000> : vector<128xf32>
    %767 = vector.multi_reduction <maximumf>, %766, %cst_238 [0] : vector<16x128xf32> to vector<128xf32>
    %768 = vector.shape_cast %767 : vector<128xf32> to vector<1x128xf32>
    %769 = vector.broadcast %768 : vector<1x128xf32> to vector<16x128xf32>
    %770 = arith.subf %766, %769 : vector<16x128xf32>
    %771 = math.exp %770 : vector<16x128xf32>
    %cst_239 = arith.constant dense<0.000000e+00> : vector<4x128xf32>
    %772 = tpu.matmul %12, %771, %cst_239 {dimension_numbers = #tpu.dot_dimension_numbers<[1], [0], [0], [1], [0, 0, 1, 1], [], []>} : vector<4x16xf32>, vector<16x128xf32>, vector<4x128xf32> -> vector<4x128xf32>
    %773 = math.log %772 : vector<4x128xf32>
    %774 = vector.broadcast %768 : vector<1x128xf32> to vector<4x128xf32>
    %775 = arith.addf %773, %774 : vector<4x128xf32>
    %cst_240 = arith.constant dense<0xFF800000> : vector<128xf32>
    %776 = vector.multi_reduction <maximumf>, %775, %cst_240 [0] : vector<4x128xf32> to vector<128xf32>
    %777 = vector.shape_cast %776 : vector<128xf32> to vector<1x128xf32>
    %778 = vector.broadcast %777 : vector<1x128xf32> to vector<4x128xf32>
    %779 = arith.subf %775, %778 : vector<4x128xf32>
    %780 = math.exp %779 : vector<4x128xf32>
    %cst_241 = arith.constant dense<0.000000e+00> : vector<128xf32>
    %781 = vector.multi_reduction <add>, %780, %cst_241 [0] : vector<4x128xf32> to vector<128xf32>
    %782 = vector.shape_cast %781 : vector<128xf32> to vector<1x128xf32>
    %783 = math.log %782 : vector<1x128xf32>
    %784 = arith.addf %777, %783 : vector<1x128xf32>
    %785 = vector.broadcast %784 : vector<1x128xf32> to vector<4x128xf32>
    %786 = arith.subf %775, %785 : vector<4x128xf32>
    %787 = arith.subf %765, %759 : vector<16x128xf32>
    %cst_242 = arith.constant dense<0xFF800000> : vector<128xf32>
    %788 = vector.multi_reduction <maximumf>, %787, %cst_242 [0] : vector<16x128xf32> to vector<128xf32>
    %789 = vector.shape_cast %788 : vector<128xf32> to vector<1x128xf32>
    %790 = vector.broadcast %789 : vector<1x128xf32> to vector<16x128xf32>
    %791 = arith.subf %787, %790 : vector<16x128xf32>
    %792 = math.exp %791 : vector<16x128xf32>
    %cst_243 = arith.constant dense<0.000000e+00> : vector<4x128xf32>
    %793 = tpu.matmul %14, %792, %cst_243 {dimension_numbers = #tpu.dot_dimension_numbers<[1], [0], [0], [1], [0, 0, 1, 1], [], []>} : vector<4x16xf32>, vector<16x128xf32>, vector<4x128xf32> -> vector<4x128xf32>
    %794 = math.log %793 : vector<4x128xf32>
    %795 = vector.broadcast %789 : vector<1x128xf32> to vector<4x128xf32>
    %796 = arith.addf %794, %795 : vector<4x128xf32>
    %cst_244 = arith.constant dense<0xFF800000> : vector<128xf32>
    %797 = vector.multi_reduction <maximumf>, %796, %cst_244 [0] : vector<4x128xf32> to vector<128xf32>
    %798 = vector.shape_cast %797 : vector<128xf32> to vector<1x128xf32>
    %799 = vector.broadcast %798 : vector<1x128xf32> to vector<4x128xf32>
    %800 = arith.subf %796, %799 : vector<4x128xf32>
    %801 = math.exp %800 : vector<4x128xf32>
    %cst_245 = arith.constant dense<0.000000e+00> : vector<128xf32>
    %802 = vector.multi_reduction <add>, %801, %cst_245 [0] : vector<4x128xf32> to vector<128xf32>
    %803 = vector.shape_cast %802 : vector<128xf32> to vector<1x128xf32>
    %804 = math.log %803 : vector<1x128xf32>
    %805 = arith.addf %798, %804 : vector<1x128xf32>
    %806 = vector.broadcast %805 : vector<1x128xf32> to vector<4x128xf32>
    %807 = arith.subf %796, %806 : vector<4x128xf32>
    %808 = arith.subf %765, %760 : vector<16x128xf32>
    %cst_246 = arith.constant dense<0xFF800000> : vector<128xf32>
    %809 = vector.multi_reduction <maximumf>, %808, %cst_246 [0] : vector<16x128xf32> to vector<128xf32>
    %810 = vector.shape_cast %809 : vector<128xf32> to vector<1x128xf32>
    %811 = vector.broadcast %810 : vector<1x128xf32> to vector<16x128xf32>
    %812 = arith.subf %808, %811 : vector<16x128xf32>
    %813 = math.exp %812 : vector<16x128xf32>
    %cst_247 = arith.constant dense<0.000000e+00> : vector<4x128xf32>
    %814 = tpu.matmul %16, %813, %cst_247 {dimension_numbers = #tpu.dot_dimension_numbers<[1], [0], [0], [1], [0, 0, 1, 1], [], []>} : vector<4x16xf32>, vector<16x128xf32>, vector<4x128xf32> -> vector<4x128xf32>
    %815 = math.log %814 : vector<4x128xf32>
    %816 = vector.broadcast %810 : vector<1x128xf32> to vector<4x128xf32>
    %817 = arith.addf %815, %816 : vector<4x128xf32>
    %cst_248 = arith.constant dense<0xFF800000> : vector<128xf32>
    %818 = vector.multi_reduction <maximumf>, %817, %cst_248 [0] : vector<4x128xf32> to vector<128xf32>
    %819 = vector.shape_cast %818 : vector<128xf32> to vector<1x128xf32>
    %820 = vector.broadcast %819 : vector<1x128xf32> to vector<4x128xf32>
    %821 = arith.subf %817, %820 : vector<4x128xf32>
    %822 = math.exp %821 : vector<4x128xf32>
    %cst_249 = arith.constant dense<0.000000e+00> : vector<128xf32>
    %823 = vector.multi_reduction <add>, %822, %cst_249 [0] : vector<4x128xf32> to vector<128xf32>
    %824 = vector.shape_cast %823 : vector<128xf32> to vector<1x128xf32>
    %825 = math.log %824 : vector<1x128xf32>
    %826 = arith.addf %819, %825 : vector<1x128xf32>
    %827 = vector.broadcast %826 : vector<1x128xf32> to vector<4x128xf32>
    %828 = arith.subf %817, %827 : vector<4x128xf32>
    %829 = arith.subf %765, %761 : vector<16x128xf32>
    %cst_250 = arith.constant dense<0xFF800000> : vector<128xf32>
    %830 = vector.multi_reduction <maximumf>, %829, %cst_250 [0] : vector<16x128xf32> to vector<128xf32>
    %831 = vector.shape_cast %830 : vector<128xf32> to vector<1x128xf32>
    %832 = vector.broadcast %831 : vector<1x128xf32> to vector<16x128xf32>
    %833 = arith.subf %829, %832 : vector<16x128xf32>
    %834 = math.exp %833 : vector<16x128xf32>
    %cst_251 = arith.constant dense<0.000000e+00> : vector<4x128xf32>
    %835 = tpu.matmul %18, %834, %cst_251 {dimension_numbers = #tpu.dot_dimension_numbers<[1], [0], [0], [1], [0, 0, 1, 1], [], []>} : vector<4x16xf32>, vector<16x128xf32>, vector<4x128xf32> -> vector<4x128xf32>
    %836 = math.log %835 : vector<4x128xf32>
    %837 = vector.broadcast %831 : vector<1x128xf32> to vector<4x128xf32>
    %838 = arith.addf %836, %837 : vector<4x128xf32>
    %cst_252 = arith.constant dense<0xFF800000> : vector<128xf32>
    %839 = vector.multi_reduction <maximumf>, %838, %cst_252 [0] : vector<4x128xf32> to vector<128xf32>
    %840 = vector.shape_cast %839 : vector<128xf32> to vector<1x128xf32>
    %841 = vector.broadcast %840 : vector<1x128xf32> to vector<4x128xf32>
    %842 = arith.subf %838, %841 : vector<4x128xf32>
    %843 = math.exp %842 : vector<4x128xf32>
    %cst_253 = arith.constant dense<0.000000e+00> : vector<128xf32>
    %844 = vector.multi_reduction <add>, %843, %cst_253 [0] : vector<4x128xf32> to vector<128xf32>
    %845 = vector.shape_cast %844 : vector<128xf32> to vector<1x128xf32>
    %846 = math.log %845 : vector<1x128xf32>
    %847 = arith.addf %840, %846 : vector<1x128xf32>
    %848 = vector.broadcast %847 : vector<1x128xf32> to vector<4x128xf32>
    %849 = arith.subf %838, %848 : vector<4x128xf32>
    %cst_254 = arith.constant dense<0.000000e+00> : vector<16x128xf32>
    %850 = tpu.matmul %20, %807, %cst_254 {dimension_numbers = #tpu.dot_dimension_numbers<[1], [0], [0], [1], [0, 0, 1, 1], [], []>} : vector<16x4xf32>, vector<4x128xf32>, vector<16x128xf32> -> vector<16x128xf32>
    %c3_i32_255 = arith.constant 3 : i32
    %851 = tpu.dynamic_rotate %850 by %c3_i32_255 dim 1 : vector<16x128xf32>, i32 -> vector<16x128xf32>
    %cst_256 = arith.constant dense<0.000000e+00> : vector<16x128xf32>
    %852 = tpu.matmul %22, %786, %cst_256 {dimension_numbers = #tpu.dot_dimension_numbers<[1], [0], [0], [1], [0, 0, 1, 1], [], []>} : vector<16x4xf32>, vector<4x128xf32>, vector<16x128xf32> -> vector<16x128xf32>
    %c125_i32_257 = arith.constant 125 : i32
    %853 = tpu.dynamic_rotate %852 by %c125_i32_257 dim 1 : vector<16x128xf32>, i32 -> vector<16x128xf32>
    %854 = arith.addf %851, %853 : vector<16x128xf32>
    %cst_258 = arith.constant dense<0.000000e+00> : vector<16x128xf32>
    %855 = tpu.matmul %24, %849, %cst_258 {dimension_numbers = #tpu.dot_dimension_numbers<[1], [0], [0], [1], [0, 0, 1, 1], [], []>} : vector<16x4xf32>, vector<4x128xf32>, vector<16x128xf32> -> vector<16x128xf32>
    %c1_i32_259 = arith.constant 1 : i32
    %856 = tpu.dynamic_rotate %855 by %c1_i32_259 dim 1 : vector<16x128xf32>, i32 -> vector<16x128xf32>
    %857 = arith.addf %854, %856 : vector<16x128xf32>
    %cst_260 = arith.constant dense<0.000000e+00> : vector<16x128xf32>
    %858 = tpu.matmul %26, %828, %cst_260 {dimension_numbers = #tpu.dot_dimension_numbers<[1], [0], [0], [1], [0, 0, 1, 1], [], []>} : vector<16x4xf32>, vector<4x128xf32>, vector<16x128xf32> -> vector<16x128xf32>
    %c127_i32_261 = arith.constant 127 : i32
    %859 = tpu.dynamic_rotate %858 by %c127_i32_261 dim 1 : vector<16x128xf32>, i32 -> vector<16x128xf32>
    %860 = arith.addf %857, %859 : vector<16x128xf32>
    %861 = arith.mulf %860, %1 : vector<16x128xf32>
    %cst_262 = arith.constant dense<0.000000e+00> : vector<16x128xf32>
    %862 = tpu.matmul %4, %861, %cst_262 {dimension_numbers = #tpu.dot_dimension_numbers<[1], [0], [0], [1], [0, 0, 1, 1], [], []>} : vector<16x16xf32>, vector<16x128xf32>, vector<16x128xf32> -> vector<16x128xf32>
    %cst_263 = arith.constant dense<0.000000e+00> : vector<16x128xf32>
    %863 = tpu.matmul %6, %861, %cst_263 {dimension_numbers = #tpu.dot_dimension_numbers<[1], [0], [0], [1], [0, 0, 1, 1], [], []>} : vector<16x16xf32>, vector<16x128xf32>, vector<16x128xf32> -> vector<16x128xf32>
    %cst_264 = arith.constant dense<0.000000e+00> : vector<16x128xf32>
    %864 = tpu.matmul %8, %861, %cst_264 {dimension_numbers = #tpu.dot_dimension_numbers<[1], [0], [0], [1], [0, 0, 1, 1], [], []>} : vector<16x16xf32>, vector<16x128xf32>, vector<16x128xf32> -> vector<16x128xf32>
    %cst_265 = arith.constant dense<0.000000e+00> : vector<16x128xf32>
    %865 = tpu.matmul %10, %861, %cst_265 {dimension_numbers = #tpu.dot_dimension_numbers<[1], [0], [0], [1], [0, 0, 1, 1], [], []>} : vector<16x16xf32>, vector<16x128xf32>, vector<16x128xf32> -> vector<16x128xf32>
    %866 = arith.addf %0, %862 : vector<16x128xf32>
    %867 = arith.addf %866, %863 : vector<16x128xf32>
    %868 = arith.addf %867, %864 : vector<16x128xf32>
    %869 = arith.addf %868, %865 : vector<16x128xf32>
    %870 = arith.subf %869, %862 : vector<16x128xf32>
    %cst_266 = arith.constant dense<0xFF800000> : vector<128xf32>
    %871 = vector.multi_reduction <maximumf>, %870, %cst_266 [0] : vector<16x128xf32> to vector<128xf32>
    %872 = vector.shape_cast %871 : vector<128xf32> to vector<1x128xf32>
    %873 = vector.broadcast %872 : vector<1x128xf32> to vector<16x128xf32>
    %874 = arith.subf %870, %873 : vector<16x128xf32>
    %875 = math.exp %874 : vector<16x128xf32>
    %cst_267 = arith.constant dense<0.000000e+00> : vector<4x128xf32>
    %876 = tpu.matmul %12, %875, %cst_267 {dimension_numbers = #tpu.dot_dimension_numbers<[1], [0], [0], [1], [0, 0, 1, 1], [], []>} : vector<4x16xf32>, vector<16x128xf32>, vector<4x128xf32> -> vector<4x128xf32>
    %877 = math.log %876 : vector<4x128xf32>
    %878 = vector.broadcast %872 : vector<1x128xf32> to vector<4x128xf32>
    %879 = arith.addf %877, %878 : vector<4x128xf32>
    %cst_268 = arith.constant dense<0xFF800000> : vector<128xf32>
    %880 = vector.multi_reduction <maximumf>, %879, %cst_268 [0] : vector<4x128xf32> to vector<128xf32>
    %881 = vector.shape_cast %880 : vector<128xf32> to vector<1x128xf32>
    %882 = vector.broadcast %881 : vector<1x128xf32> to vector<4x128xf32>
    %883 = arith.subf %879, %882 : vector<4x128xf32>
    %884 = math.exp %883 : vector<4x128xf32>
    %cst_269 = arith.constant dense<0.000000e+00> : vector<128xf32>
    %885 = vector.multi_reduction <add>, %884, %cst_269 [0] : vector<4x128xf32> to vector<128xf32>
    %886 = vector.shape_cast %885 : vector<128xf32> to vector<1x128xf32>
    %887 = math.log %886 : vector<1x128xf32>
    %888 = arith.addf %881, %887 : vector<1x128xf32>
    %889 = vector.broadcast %888 : vector<1x128xf32> to vector<4x128xf32>
    %890 = arith.subf %879, %889 : vector<4x128xf32>
    %891 = arith.subf %869, %863 : vector<16x128xf32>
    %cst_270 = arith.constant dense<0xFF800000> : vector<128xf32>
    %892 = vector.multi_reduction <maximumf>, %891, %cst_270 [0] : vector<16x128xf32> to vector<128xf32>
    %893 = vector.shape_cast %892 : vector<128xf32> to vector<1x128xf32>
    %894 = vector.broadcast %893 : vector<1x128xf32> to vector<16x128xf32>
    %895 = arith.subf %891, %894 : vector<16x128xf32>
    %896 = math.exp %895 : vector<16x128xf32>
    %cst_271 = arith.constant dense<0.000000e+00> : vector<4x128xf32>
    %897 = tpu.matmul %14, %896, %cst_271 {dimension_numbers = #tpu.dot_dimension_numbers<[1], [0], [0], [1], [0, 0, 1, 1], [], []>} : vector<4x16xf32>, vector<16x128xf32>, vector<4x128xf32> -> vector<4x128xf32>
    %898 = math.log %897 : vector<4x128xf32>
    %899 = vector.broadcast %893 : vector<1x128xf32> to vector<4x128xf32>
    %900 = arith.addf %898, %899 : vector<4x128xf32>
    %cst_272 = arith.constant dense<0xFF800000> : vector<128xf32>
    %901 = vector.multi_reduction <maximumf>, %900, %cst_272 [0] : vector<4x128xf32> to vector<128xf32>
    %902 = vector.shape_cast %901 : vector<128xf32> to vector<1x128xf32>
    %903 = vector.broadcast %902 : vector<1x128xf32> to vector<4x128xf32>
    %904 = arith.subf %900, %903 : vector<4x128xf32>
    %905 = math.exp %904 : vector<4x128xf32>
    %cst_273 = arith.constant dense<0.000000e+00> : vector<128xf32>
    %906 = vector.multi_reduction <add>, %905, %cst_273 [0] : vector<4x128xf32> to vector<128xf32>
    %907 = vector.shape_cast %906 : vector<128xf32> to vector<1x128xf32>
    %908 = math.log %907 : vector<1x128xf32>
    %909 = arith.addf %902, %908 : vector<1x128xf32>
    %910 = vector.broadcast %909 : vector<1x128xf32> to vector<4x128xf32>
    %911 = arith.subf %900, %910 : vector<4x128xf32>
    %912 = arith.subf %869, %864 : vector<16x128xf32>
    %cst_274 = arith.constant dense<0xFF800000> : vector<128xf32>
    %913 = vector.multi_reduction <maximumf>, %912, %cst_274 [0] : vector<16x128xf32> to vector<128xf32>
    %914 = vector.shape_cast %913 : vector<128xf32> to vector<1x128xf32>
    %915 = vector.broadcast %914 : vector<1x128xf32> to vector<16x128xf32>
    %916 = arith.subf %912, %915 : vector<16x128xf32>
    %917 = math.exp %916 : vector<16x128xf32>
    %cst_275 = arith.constant dense<0.000000e+00> : vector<4x128xf32>
    %918 = tpu.matmul %16, %917, %cst_275 {dimension_numbers = #tpu.dot_dimension_numbers<[1], [0], [0], [1], [0, 0, 1, 1], [], []>} : vector<4x16xf32>, vector<16x128xf32>, vector<4x128xf32> -> vector<4x128xf32>
    %919 = math.log %918 : vector<4x128xf32>
    %920 = vector.broadcast %914 : vector<1x128xf32> to vector<4x128xf32>
    %921 = arith.addf %919, %920 : vector<4x128xf32>
    %cst_276 = arith.constant dense<0xFF800000> : vector<128xf32>
    %922 = vector.multi_reduction <maximumf>, %921, %cst_276 [0] : vector<4x128xf32> to vector<128xf32>
    %923 = vector.shape_cast %922 : vector<128xf32> to vector<1x128xf32>
    %924 = vector.broadcast %923 : vector<1x128xf32> to vector<4x128xf32>
    %925 = arith.subf %921, %924 : vector<4x128xf32>
    %926 = math.exp %925 : vector<4x128xf32>
    %cst_277 = arith.constant dense<0.000000e+00> : vector<128xf32>
    %927 = vector.multi_reduction <add>, %926, %cst_277 [0] : vector<4x128xf32> to vector<128xf32>
    %928 = vector.shape_cast %927 : vector<128xf32> to vector<1x128xf32>
    %929 = math.log %928 : vector<1x128xf32>
    %930 = arith.addf %923, %929 : vector<1x128xf32>
    %931 = vector.broadcast %930 : vector<1x128xf32> to vector<4x128xf32>
    %932 = arith.subf %921, %931 : vector<4x128xf32>
    %933 = arith.subf %869, %865 : vector<16x128xf32>
    %cst_278 = arith.constant dense<0xFF800000> : vector<128xf32>
    %934 = vector.multi_reduction <maximumf>, %933, %cst_278 [0] : vector<16x128xf32> to vector<128xf32>
    %935 = vector.shape_cast %934 : vector<128xf32> to vector<1x128xf32>
    %936 = vector.broadcast %935 : vector<1x128xf32> to vector<16x128xf32>
    %937 = arith.subf %933, %936 : vector<16x128xf32>
    %938 = math.exp %937 : vector<16x128xf32>
    %cst_279 = arith.constant dense<0.000000e+00> : vector<4x128xf32>
    %939 = tpu.matmul %18, %938, %cst_279 {dimension_numbers = #tpu.dot_dimension_numbers<[1], [0], [0], [1], [0, 0, 1, 1], [], []>} : vector<4x16xf32>, vector<16x128xf32>, vector<4x128xf32> -> vector<4x128xf32>
    %940 = math.log %939 : vector<4x128xf32>
    %941 = vector.broadcast %935 : vector<1x128xf32> to vector<4x128xf32>
    %942 = arith.addf %940, %941 : vector<4x128xf32>
    %cst_280 = arith.constant dense<0xFF800000> : vector<128xf32>
    %943 = vector.multi_reduction <maximumf>, %942, %cst_280 [0] : vector<4x128xf32> to vector<128xf32>
    %944 = vector.shape_cast %943 : vector<128xf32> to vector<1x128xf32>
    %945 = vector.broadcast %944 : vector<1x128xf32> to vector<4x128xf32>
    %946 = arith.subf %942, %945 : vector<4x128xf32>
    %947 = math.exp %946 : vector<4x128xf32>
    %cst_281 = arith.constant dense<0.000000e+00> : vector<128xf32>
    %948 = vector.multi_reduction <add>, %947, %cst_281 [0] : vector<4x128xf32> to vector<128xf32>
    %949 = vector.shape_cast %948 : vector<128xf32> to vector<1x128xf32>
    %950 = math.log %949 : vector<1x128xf32>
    %951 = arith.addf %944, %950 : vector<1x128xf32>
    %952 = vector.broadcast %951 : vector<1x128xf32> to vector<4x128xf32>
    %953 = arith.subf %942, %952 : vector<4x128xf32>
    %cst_282 = arith.constant dense<0.000000e+00> : vector<16x128xf32>
    %954 = tpu.matmul %20, %911, %cst_282 {dimension_numbers = #tpu.dot_dimension_numbers<[1], [0], [0], [1], [0, 0, 1, 1], [], []>} : vector<16x4xf32>, vector<4x128xf32>, vector<16x128xf32> -> vector<16x128xf32>
    %c3_i32_283 = arith.constant 3 : i32
    %955 = tpu.dynamic_rotate %954 by %c3_i32_283 dim 1 : vector<16x128xf32>, i32 -> vector<16x128xf32>
    %cst_284 = arith.constant dense<0.000000e+00> : vector<16x128xf32>
    %956 = tpu.matmul %22, %890, %cst_284 {dimension_numbers = #tpu.dot_dimension_numbers<[1], [0], [0], [1], [0, 0, 1, 1], [], []>} : vector<16x4xf32>, vector<4x128xf32>, vector<16x128xf32> -> vector<16x128xf32>
    %c125_i32_285 = arith.constant 125 : i32
    %957 = tpu.dynamic_rotate %956 by %c125_i32_285 dim 1 : vector<16x128xf32>, i32 -> vector<16x128xf32>
    %958 = arith.addf %955, %957 : vector<16x128xf32>
    %cst_286 = arith.constant dense<0.000000e+00> : vector<16x128xf32>
    %959 = tpu.matmul %24, %953, %cst_286 {dimension_numbers = #tpu.dot_dimension_numbers<[1], [0], [0], [1], [0, 0, 1, 1], [], []>} : vector<16x4xf32>, vector<4x128xf32>, vector<16x128xf32> -> vector<16x128xf32>
    %c1_i32_287 = arith.constant 1 : i32
    %960 = tpu.dynamic_rotate %959 by %c1_i32_287 dim 1 : vector<16x128xf32>, i32 -> vector<16x128xf32>
    %961 = arith.addf %958, %960 : vector<16x128xf32>
    %cst_288 = arith.constant dense<0.000000e+00> : vector<16x128xf32>
    %962 = tpu.matmul %26, %932, %cst_288 {dimension_numbers = #tpu.dot_dimension_numbers<[1], [0], [0], [1], [0, 0, 1, 1], [], []>} : vector<16x4xf32>, vector<4x128xf32>, vector<16x128xf32> -> vector<16x128xf32>
    %c127_i32_289 = arith.constant 127 : i32
    %963 = tpu.dynamic_rotate %962 by %c127_i32_289 dim 1 : vector<16x128xf32>, i32 -> vector<16x128xf32>
    %964 = arith.addf %961, %963 : vector<16x128xf32>
    %965 = arith.mulf %964, %1 : vector<16x128xf32>
    %cst_290 = arith.constant dense<0.000000e+00> : vector<16x128xf32>
    %966 = tpu.matmul %4, %965, %cst_290 {dimension_numbers = #tpu.dot_dimension_numbers<[1], [0], [0], [1], [0, 0, 1, 1], [], []>} : vector<16x16xf32>, vector<16x128xf32>, vector<16x128xf32> -> vector<16x128xf32>
    %cst_291 = arith.constant dense<0.000000e+00> : vector<16x128xf32>
    %967 = tpu.matmul %6, %965, %cst_291 {dimension_numbers = #tpu.dot_dimension_numbers<[1], [0], [0], [1], [0, 0, 1, 1], [], []>} : vector<16x16xf32>, vector<16x128xf32>, vector<16x128xf32> -> vector<16x128xf32>
    %cst_292 = arith.constant dense<0.000000e+00> : vector<16x128xf32>
    %968 = tpu.matmul %8, %965, %cst_292 {dimension_numbers = #tpu.dot_dimension_numbers<[1], [0], [0], [1], [0, 0, 1, 1], [], []>} : vector<16x16xf32>, vector<16x128xf32>, vector<16x128xf32> -> vector<16x128xf32>
    %cst_293 = arith.constant dense<0.000000e+00> : vector<16x128xf32>
    %969 = tpu.matmul %10, %965, %cst_293 {dimension_numbers = #tpu.dot_dimension_numbers<[1], [0], [0], [1], [0, 0, 1, 1], [], []>} : vector<16x16xf32>, vector<16x128xf32>, vector<16x128xf32> -> vector<16x128xf32>
    %970 = arith.addf %0, %966 : vector<16x128xf32>
    %971 = arith.addf %970, %967 : vector<16x128xf32>
    %972 = arith.addf %971, %968 : vector<16x128xf32>
    %973 = arith.addf %972, %969 : vector<16x128xf32>
    %974 = arith.subf %973, %966 : vector<16x128xf32>
    %cst_294 = arith.constant dense<0xFF800000> : vector<128xf32>
    %975 = vector.multi_reduction <maximumf>, %974, %cst_294 [0] : vector<16x128xf32> to vector<128xf32>
    %976 = vector.shape_cast %975 : vector<128xf32> to vector<1x128xf32>
    %977 = vector.broadcast %976 : vector<1x128xf32> to vector<16x128xf32>
    %978 = arith.subf %974, %977 : vector<16x128xf32>
    %979 = math.exp %978 : vector<16x128xf32>
    %cst_295 = arith.constant dense<0.000000e+00> : vector<4x128xf32>
    %980 = tpu.matmul %12, %979, %cst_295 {dimension_numbers = #tpu.dot_dimension_numbers<[1], [0], [0], [1], [0, 0, 1, 1], [], []>} : vector<4x16xf32>, vector<16x128xf32>, vector<4x128xf32> -> vector<4x128xf32>
    %981 = math.log %980 : vector<4x128xf32>
    %982 = vector.broadcast %976 : vector<1x128xf32> to vector<4x128xf32>
    %983 = arith.addf %981, %982 : vector<4x128xf32>
    %cst_296 = arith.constant dense<0xFF800000> : vector<128xf32>
    %984 = vector.multi_reduction <maximumf>, %983, %cst_296 [0] : vector<4x128xf32> to vector<128xf32>
    %985 = vector.shape_cast %984 : vector<128xf32> to vector<1x128xf32>
    %986 = vector.broadcast %985 : vector<1x128xf32> to vector<4x128xf32>
    %987 = arith.subf %983, %986 : vector<4x128xf32>
    %988 = math.exp %987 : vector<4x128xf32>
    %cst_297 = arith.constant dense<0.000000e+00> : vector<128xf32>
    %989 = vector.multi_reduction <add>, %988, %cst_297 [0] : vector<4x128xf32> to vector<128xf32>
    %990 = vector.shape_cast %989 : vector<128xf32> to vector<1x128xf32>
    %991 = math.log %990 : vector<1x128xf32>
    %992 = arith.addf %985, %991 : vector<1x128xf32>
    %993 = vector.broadcast %992 : vector<1x128xf32> to vector<4x128xf32>
    %994 = arith.subf %983, %993 : vector<4x128xf32>
    %995 = arith.subf %973, %967 : vector<16x128xf32>
    %cst_298 = arith.constant dense<0xFF800000> : vector<128xf32>
    %996 = vector.multi_reduction <maximumf>, %995, %cst_298 [0] : vector<16x128xf32> to vector<128xf32>
    %997 = vector.shape_cast %996 : vector<128xf32> to vector<1x128xf32>
    %998 = vector.broadcast %997 : vector<1x128xf32> to vector<16x128xf32>
    %999 = arith.subf %995, %998 : vector<16x128xf32>
    %1000 = math.exp %999 : vector<16x128xf32>
    %cst_299 = arith.constant dense<0.000000e+00> : vector<4x128xf32>
    %1001 = tpu.matmul %14, %1000, %cst_299 {dimension_numbers = #tpu.dot_dimension_numbers<[1], [0], [0], [1], [0, 0, 1, 1], [], []>} : vector<4x16xf32>, vector<16x128xf32>, vector<4x128xf32> -> vector<4x128xf32>
    %1002 = math.log %1001 : vector<4x128xf32>
    %1003 = vector.broadcast %997 : vector<1x128xf32> to vector<4x128xf32>
    %1004 = arith.addf %1002, %1003 : vector<4x128xf32>
    %cst_300 = arith.constant dense<0xFF800000> : vector<128xf32>
    %1005 = vector.multi_reduction <maximumf>, %1004, %cst_300 [0] : vector<4x128xf32> to vector<128xf32>
    %1006 = vector.shape_cast %1005 : vector<128xf32> to vector<1x128xf32>
    %1007 = vector.broadcast %1006 : vector<1x128xf32> to vector<4x128xf32>
    %1008 = arith.subf %1004, %1007 : vector<4x128xf32>
    %1009 = math.exp %1008 : vector<4x128xf32>
    %cst_301 = arith.constant dense<0.000000e+00> : vector<128xf32>
    %1010 = vector.multi_reduction <add>, %1009, %cst_301 [0] : vector<4x128xf32> to vector<128xf32>
    %1011 = vector.shape_cast %1010 : vector<128xf32> to vector<1x128xf32>
    %1012 = math.log %1011 : vector<1x128xf32>
    %1013 = arith.addf %1006, %1012 : vector<1x128xf32>
    %1014 = vector.broadcast %1013 : vector<1x128xf32> to vector<4x128xf32>
    %1015 = arith.subf %1004, %1014 : vector<4x128xf32>
    %1016 = arith.subf %973, %968 : vector<16x128xf32>
    %cst_302 = arith.constant dense<0xFF800000> : vector<128xf32>
    %1017 = vector.multi_reduction <maximumf>, %1016, %cst_302 [0] : vector<16x128xf32> to vector<128xf32>
    %1018 = vector.shape_cast %1017 : vector<128xf32> to vector<1x128xf32>
    %1019 = vector.broadcast %1018 : vector<1x128xf32> to vector<16x128xf32>
    %1020 = arith.subf %1016, %1019 : vector<16x128xf32>
    %1021 = math.exp %1020 : vector<16x128xf32>
    %cst_303 = arith.constant dense<0.000000e+00> : vector<4x128xf32>
    %1022 = tpu.matmul %16, %1021, %cst_303 {dimension_numbers = #tpu.dot_dimension_numbers<[1], [0], [0], [1], [0, 0, 1, 1], [], []>} : vector<4x16xf32>, vector<16x128xf32>, vector<4x128xf32> -> vector<4x128xf32>
    %1023 = math.log %1022 : vector<4x128xf32>
    %1024 = vector.broadcast %1018 : vector<1x128xf32> to vector<4x128xf32>
    %1025 = arith.addf %1023, %1024 : vector<4x128xf32>
    %cst_304 = arith.constant dense<0xFF800000> : vector<128xf32>
    %1026 = vector.multi_reduction <maximumf>, %1025, %cst_304 [0] : vector<4x128xf32> to vector<128xf32>
    %1027 = vector.shape_cast %1026 : vector<128xf32> to vector<1x128xf32>
    %1028 = vector.broadcast %1027 : vector<1x128xf32> to vector<4x128xf32>
    %1029 = arith.subf %1025, %1028 : vector<4x128xf32>
    %1030 = math.exp %1029 : vector<4x128xf32>
    %cst_305 = arith.constant dense<0.000000e+00> : vector<128xf32>
    %1031 = vector.multi_reduction <add>, %1030, %cst_305 [0] : vector<4x128xf32> to vector<128xf32>
    %1032 = vector.shape_cast %1031 : vector<128xf32> to vector<1x128xf32>
    %1033 = math.log %1032 : vector<1x128xf32>
    %1034 = arith.addf %1027, %1033 : vector<1x128xf32>
    %1035 = vector.broadcast %1034 : vector<1x128xf32> to vector<4x128xf32>
    %1036 = arith.subf %1025, %1035 : vector<4x128xf32>
    %1037 = arith.subf %973, %969 : vector<16x128xf32>
    %cst_306 = arith.constant dense<0xFF800000> : vector<128xf32>
    %1038 = vector.multi_reduction <maximumf>, %1037, %cst_306 [0] : vector<16x128xf32> to vector<128xf32>
    %1039 = vector.shape_cast %1038 : vector<128xf32> to vector<1x128xf32>
    %1040 = vector.broadcast %1039 : vector<1x128xf32> to vector<16x128xf32>
    %1041 = arith.subf %1037, %1040 : vector<16x128xf32>
    %1042 = math.exp %1041 : vector<16x128xf32>
    %cst_307 = arith.constant dense<0.000000e+00> : vector<4x128xf32>
    %1043 = tpu.matmul %18, %1042, %cst_307 {dimension_numbers = #tpu.dot_dimension_numbers<[1], [0], [0], [1], [0, 0, 1, 1], [], []>} : vector<4x16xf32>, vector<16x128xf32>, vector<4x128xf32> -> vector<4x128xf32>
    %1044 = math.log %1043 : vector<4x128xf32>
    %1045 = vector.broadcast %1039 : vector<1x128xf32> to vector<4x128xf32>
    %1046 = arith.addf %1044, %1045 : vector<4x128xf32>
    %cst_308 = arith.constant dense<0xFF800000> : vector<128xf32>
    %1047 = vector.multi_reduction <maximumf>, %1046, %cst_308 [0] : vector<4x128xf32> to vector<128xf32>
    %1048 = vector.shape_cast %1047 : vector<128xf32> to vector<1x128xf32>
    %1049 = vector.broadcast %1048 : vector<1x128xf32> to vector<4x128xf32>
    %1050 = arith.subf %1046, %1049 : vector<4x128xf32>
    %1051 = math.exp %1050 : vector<4x128xf32>
    %cst_309 = arith.constant dense<0.000000e+00> : vector<128xf32>
    %1052 = vector.multi_reduction <add>, %1051, %cst_309 [0] : vector<4x128xf32> to vector<128xf32>
    %1053 = vector.shape_cast %1052 : vector<128xf32> to vector<1x128xf32>
    %1054 = math.log %1053 : vector<1x128xf32>
    %1055 = arith.addf %1048, %1054 : vector<1x128xf32>
    %1056 = vector.broadcast %1055 : vector<1x128xf32> to vector<4x128xf32>
    %1057 = arith.subf %1046, %1056 : vector<4x128xf32>
    %cst_310 = arith.constant dense<0.000000e+00> : vector<16x128xf32>
    %1058 = tpu.matmul %20, %1015, %cst_310 {dimension_numbers = #tpu.dot_dimension_numbers<[1], [0], [0], [1], [0, 0, 1, 1], [], []>} : vector<16x4xf32>, vector<4x128xf32>, vector<16x128xf32> -> vector<16x128xf32>
    %c3_i32_311 = arith.constant 3 : i32
    %1059 = tpu.dynamic_rotate %1058 by %c3_i32_311 dim 1 : vector<16x128xf32>, i32 -> vector<16x128xf32>
    %cst_312 = arith.constant dense<0.000000e+00> : vector<16x128xf32>
    %1060 = tpu.matmul %22, %994, %cst_312 {dimension_numbers = #tpu.dot_dimension_numbers<[1], [0], [0], [1], [0, 0, 1, 1], [], []>} : vector<16x4xf32>, vector<4x128xf32>, vector<16x128xf32> -> vector<16x128xf32>
    %c125_i32_313 = arith.constant 125 : i32
    %1061 = tpu.dynamic_rotate %1060 by %c125_i32_313 dim 1 : vector<16x128xf32>, i32 -> vector<16x128xf32>
    %1062 = arith.addf %1059, %1061 : vector<16x128xf32>
    %cst_314 = arith.constant dense<0.000000e+00> : vector<16x128xf32>
    %1063 = tpu.matmul %24, %1057, %cst_314 {dimension_numbers = #tpu.dot_dimension_numbers<[1], [0], [0], [1], [0, 0, 1, 1], [], []>} : vector<16x4xf32>, vector<4x128xf32>, vector<16x128xf32> -> vector<16x128xf32>
    %c1_i32_315 = arith.constant 1 : i32
    %1064 = tpu.dynamic_rotate %1063 by %c1_i32_315 dim 1 : vector<16x128xf32>, i32 -> vector<16x128xf32>
    %1065 = arith.addf %1062, %1064 : vector<16x128xf32>
    %cst_316 = arith.constant dense<0.000000e+00> : vector<16x128xf32>
    %1066 = tpu.matmul %26, %1036, %cst_316 {dimension_numbers = #tpu.dot_dimension_numbers<[1], [0], [0], [1], [0, 0, 1, 1], [], []>} : vector<16x4xf32>, vector<4x128xf32>, vector<16x128xf32> -> vector<16x128xf32>
    %c127_i32_317 = arith.constant 127 : i32
    %1067 = tpu.dynamic_rotate %1066 by %c127_i32_317 dim 1 : vector<16x128xf32>, i32 -> vector<16x128xf32>
    %1068 = arith.addf %1065, %1067 : vector<16x128xf32>
    %1069 = arith.mulf %1068, %1 : vector<16x128xf32>
    %cst_318 = arith.constant dense<0.000000e+00> : vector<16x128xf32>
    %1070 = tpu.matmul %4, %1069, %cst_318 {dimension_numbers = #tpu.dot_dimension_numbers<[1], [0], [0], [1], [0, 0, 1, 1], [], []>} : vector<16x16xf32>, vector<16x128xf32>, vector<16x128xf32> -> vector<16x128xf32>
    %cst_319 = arith.constant dense<0.000000e+00> : vector<16x128xf32>
    %1071 = tpu.matmul %6, %1069, %cst_319 {dimension_numbers = #tpu.dot_dimension_numbers<[1], [0], [0], [1], [0, 0, 1, 1], [], []>} : vector<16x16xf32>, vector<16x128xf32>, vector<16x128xf32> -> vector<16x128xf32>
    %cst_320 = arith.constant dense<0.000000e+00> : vector<16x128xf32>
    %1072 = tpu.matmul %8, %1069, %cst_320 {dimension_numbers = #tpu.dot_dimension_numbers<[1], [0], [0], [1], [0, 0, 1, 1], [], []>} : vector<16x16xf32>, vector<16x128xf32>, vector<16x128xf32> -> vector<16x128xf32>
    %cst_321 = arith.constant dense<0.000000e+00> : vector<16x128xf32>
    %1073 = tpu.matmul %10, %1069, %cst_321 {dimension_numbers = #tpu.dot_dimension_numbers<[1], [0], [0], [1], [0, 0, 1, 1], [], []>} : vector<16x16xf32>, vector<16x128xf32>, vector<16x128xf32> -> vector<16x128xf32>
    %1074 = arith.addf %0, %1070 : vector<16x128xf32>
    %1075 = arith.addf %1074, %1071 : vector<16x128xf32>
    %1076 = arith.addf %1075, %1072 : vector<16x128xf32>
    %1077 = arith.addf %1076, %1073 : vector<16x128xf32>
    %cst_322 = arith.constant dense<0xFF800000> : vector<128xf32>
    %1078 = vector.multi_reduction <maximumf>, %1077, %cst_322 [0] : vector<16x128xf32> to vector<128xf32>
    %1079 = vector.shape_cast %1078 : vector<128xf32> to vector<1x128xf32>
    %1080 = vector.broadcast %1079 : vector<1x128xf32> to vector<16x128xf32>
    %1081 = arith.subf %1077, %1080 : vector<16x128xf32>
    %1082 = math.exp %1081 : vector<16x128xf32>
    %cst_323 = arith.constant dense<0.000000e+00> : vector<128xf32>
    %1083 = vector.multi_reduction <add>, %1082, %cst_323 [0] : vector<16x128xf32> to vector<128xf32>
    %1084 = vector.shape_cast %1083 : vector<128xf32> to vector<1x128xf32>
    %1085 = vector.broadcast %1079 : vector<1x128xf32> to vector<16x128xf32>
    %1086 = arith.subf %1077, %1085 : vector<16x128xf32>
    %1087 = math.log %1084 : vector<1x128xf32>
    %1088 = vector.broadcast %1087 : vector<1x128xf32> to vector<16x128xf32>
    %1089 = arith.subf %1086, %1088 : vector<16x128xf32>
    %1090 = tpu.reciprocal %1084 {approx = true} : vector<1x128xf32> -> vector<1x128xf32>
    %1091 = vector.broadcast %1090 : vector<1x128xf32> to vector<16x128xf32>
    %1092 = arith.mulf %1082, %1091 : vector<16x128xf32>
    %c0_324 = arith.constant 0 : index
    %c0_325 = arith.constant 0 : index
    %1093 = vector.load %arg9[%c0_324, %c0_325] : memref<16x128xf32, #tpu.memory_space<vmem>>, vector<16x128xf32>
    tpu.vector_store %arg9[%c0_324, %c0_325], %1092 {strides = array<i32>} : memref<16x128xf32, #tpu.memory_space<vmem>>, vector<16x128xf32>,
    %cst_326 = arith.constant dense<0.000000e+00> : vector<16x128xf32>
    %1094 = tpu.matmul %20, %994, %cst_326 {dimension_numbers = #tpu.dot_dimension_numbers<[1], [0], [0], [1], [0, 0, 1, 1], [], []>} : vector<16x4xf32>, vector<4x128xf32>, vector<16x128xf32> -> vector<16x128xf32>
    %cst_327 = arith.constant dense<0.000000e+00> : vector<16x128xf32>
    %1095 = tpu.matmul %22, %1015, %cst_327 {dimension_numbers = #tpu.dot_dimension_numbers<[1], [0], [0], [1], [0, 0, 1, 1], [], []>} : vector<16x4xf32>, vector<4x128xf32>, vector<16x128xf32> -> vector<16x128xf32>
    %1096 = arith.addf %1094, %1095 : vector<16x128xf32>
    %cst_328 = arith.constant dense<0.000000e+00> : vector<16x128xf32>
    %1097 = tpu.matmul %24, %1036, %cst_328 {dimension_numbers = #tpu.dot_dimension_numbers<[1], [0], [0], [1], [0, 0, 1, 1], [], []>} : vector<16x4xf32>, vector<4x128xf32>, vector<16x128xf32> -> vector<16x128xf32>
    %1098 = arith.addf %1096, %1097 : vector<16x128xf32>
    %cst_329 = arith.constant dense<0.000000e+00> : vector<16x128xf32>
    %1099 = tpu.matmul %26, %1057, %cst_329 {dimension_numbers = #tpu.dot_dimension_numbers<[1], [0], [0], [1], [0, 0, 1, 1], [], []>} : vector<16x4xf32>, vector<4x128xf32>, vector<16x128xf32> -> vector<16x128xf32>
    %1100 = arith.addf %1098, %1099 : vector<16x128xf32>
    %1101 = arith.mulf %1100, %1 : vector<16x128xf32>
    %1102 = arith.addf %1069, %1101 : vector<16x128xf32>
    %cst_330 = arith.constant dense<0xFF800000> : vector<128xf32>
    %1103 = vector.multi_reduction <maximumf>, %1102, %cst_330 [0] : vector<16x128xf32> to vector<128xf32>
    %1104 = vector.shape_cast %1103 : vector<128xf32> to vector<1x128xf32>
    %1105 = vector.broadcast %1104 : vector<1x128xf32> to vector<16x128xf32>
    %1106 = arith.subf %1102, %1105 : vector<16x128xf32>
    %1107 = math.exp %1106 : vector<16x128xf32>
    %cst_331 = arith.constant dense<0.000000e+00> : vector<4x128xf32>
    %1108 = tpu.matmul %27, %1107, %cst_331 {dimension_numbers = #tpu.dot_dimension_numbers<[1], [0], [0], [1], [0, 0, 1, 1], [], []>} : vector<4x16xf32>, vector<16x128xf32>, vector<4x128xf32> -> vector<4x128xf32>
    %1109 = vector.broadcast %1104 : vector<1x128xf32> to vector<16x128xf32>
    %1110 = arith.subf %1102, %1109 : vector<16x128xf32>
    %1111 = math.log %1108 : vector<4x128xf32>
    %cst_332 = arith.constant dense<0.000000e+00> : vector<16x128xf32>
    %1112 = tpu.matmul %28, %1111, %cst_332 {dimension_numbers = #tpu.dot_dimension_numbers<[1], [0], [0], [1], [0, 0, 1, 1], [], []>} : vector<16x4xf32>, vector<4x128xf32>, vector<16x128xf32> -> vector<16x128xf32>
    %1113 = arith.subf %1110, %1112 : vector<16x128xf32>
    %1114 = tpu.reciprocal %1108 : vector<4x128xf32> -> vector<4x128xf32>
    %cst_333 = arith.constant dense<0.000000e+00> : vector<16x128xf32>
    %1115 = tpu.matmul %28, %1114, %cst_333 {dimension_numbers = #tpu.dot_dimension_numbers<[1], [0], [0], [1], [0, 0, 1, 1], [], []>} : vector<16x4xf32>, vector<4x128xf32>, vector<16x128xf32> -> vector<16x128xf32>
    %1116 = arith.mulf %1107, %1115 : vector<16x128xf32>
    %c0_334 = arith.constant 0 : index
    %c0_335 = arith.constant 0 : index
    %1117 = vector.load %arg10[%c0_334, %c0_335] : memref<16x128xf32, #tpu.memory_space<vmem>>, vector<16x128xf32>
    tpu.vector_store %arg10[%c0_334, %c0_335], %1116 {strides = array<i32>} : memref<16x128xf32, #tpu.memory_space<vmem>>, vector<16x128xf32>,
    %1118 = vector.broadcast %2 : vector<1x128xf32> to vector<16x128xf32>
    %1119 = arith.mulf %1118, %1092 : vector<16x128xf32>
    %1120 = arith.subf %1089, %0 : vector<16x128xf32>
    %1121 = arith.mulf %1119, %1120 : vector<16x128xf32>
    %cst_336 = arith.constant dense<0.000000e+00> : vector<128xf32>
    %1122 = vector.multi_reduction <add>, %1121, %cst_336 [0] : vector<16x128xf32> to vector<128xf32>
    %1123 = vector.shape_cast %1122 : vector<128xf32> to vector<1x128xf32>
    %1124 = arith.mulf %1, %1116 : vector<16x128xf32>
    %1125 = arith.mulf %1124, %1113 : vector<16x128xf32>
    %cst_337 = arith.constant dense<0.000000e+00> : vector<128xf32>
    %1126 = vector.multi_reduction <add>, %1125, %cst_337 [0] : vector<16x128xf32> to vector<128xf32>
    %1127 = vector.shape_cast %1126 : vector<128xf32> to vector<1x128xf32>
    %cst_338 = arith.constant 5.000000e-01 : f32
    %1128 = vector.broadcast %cst_338 : f32 to vector<1x128xf32>
    %1129 = arith.mulf %1128, %1127 : vector<1x128xf32>
    %1130 = arith.subf %1123, %1129 : vector<1x128xf32>
    %cst_339 = arith.constant dense<0.000000e+00> : vector<1xf32>
    %1131 = vector.multi_reduction <add>, %1130, %cst_339 [1] : vector<1x128xf32> to vector<1xf32>
    %1132 = vector.shape_cast %1131 : vector<1xf32> to vector<1x1xf32>
    %c0_340 = arith.constant 0 : index
    %c0_341 = arith.constant 0 : index
    %1133 = vector.load %arg11[%c0_340, %c0_341] : memref<1x1xf32, #tpu.memory_space<vmem>>, vector<1x1xf32>
    tpu.vector_store %arg11[%c0_340, %c0_341], %1132 {strides = array<i32>} : memref<1x1xf32, #tpu.memory_space<vmem>>, vector<1x1xf32>,
    return
  }
  func.func @transform_0(%arg0: i32) -> (i32, i32) {
    %c0_i32 = arith.constant 0 : i32
    %c0_i32_0 = arith.constant 0 : i32
    %c0_i32_1 = arith.constant 0 : i32
    return %c0_i32, %c0_i32_0 : i32, i32
  }
  func.func @transform_1(%arg0: i32) -> (i32, i32, i32) {
    %c0_i32 = arith.constant 0 : i32
    %c0_i32_0 = arith.constant 0 : i32
    %c0_i32_1 = arith.constant 0 : i32
    %c0_i32_2 = arith.constant 0 : i32
    return %c0_i32, %c0_i32_0, %c0_i32_1 : i32, i32, i32
  }
  func.func @transform_2(%arg0: i32) -> (i32, i32, i32) {
    %c0_i32 = arith.constant 0 : i32
    %c0_i32_0 = arith.constant 0 : i32
    %c0_i32_1 = arith.constant 0 : i32
    %c0_i32_2 = arith.constant 0 : i32
    return %c0_i32, %c0_i32_0, %c0_i32_1 : i32, i32, i32
  }
  func.func @transform_3(%arg0: i32) -> (i32, i32, i32) {
    %c0_i32 = arith.constant 0 : i32
    %c0_i32_0 = arith.constant 0 : i32
    %c0_i32_1 = arith.constant 0 : i32
    %c0_i32_2 = arith.constant 0 : i32
    return %c0_i32, %c0_i32_0, %c0_i32_1 : i32, i32, i32
  }
  func.func @transform_4(%arg0: i32) -> (i32, i32) {
    %c0_i32 = arith.constant 0 : i32
    %c0_i32_0 = arith.constant 0 : i32
    %c0_i32_1 = arith.constant 0 : i32
    return %c0_i32, %c0_i32_0 : i32, i32
  }
  func.func @transform_5(%arg0: i32) -> (i32, i32) {
    %c0_i32 = arith.constant 0 : i32
    %c0_i32_0 = arith.constant 0 : i32
    %c0_i32_1 = arith.constant 0 : i32
    return %c0_i32, %c0_i32_0 : i32, i32
  }
  func.func @transform_6(%arg0: i32) -> (i32, i32) {
    %c0_i32 = arith.constant 0 : i32
    %c0_i32_0 = arith.constant 0 : i32
    %c0_i32_1 = arith.constant 0 : i32
    return %c0_i32, %c0_i32_0 : i32, i32
  }
  func.func @transform_7(%arg0: i32) -> (i32, i32) {
    %c0_i32 = arith.constant 0 : i32
    %c0_i32_0 = arith.constant 0 : i32
    %c0_i32_1 = arith.constant 0 : i32
    return %c0_i32, %c0_i32_0 : i32, i32
  }
  func.func @transform_8(%arg0: i32) -> (i32, i32) {
    %c0_i32 = arith.constant 0 : i32
    %c0_i32_0 = arith.constant 0 : i32
    %c0_i32_1 = arith.constant 0 : i32
    return %c0_i32, %c0_i32_0 : i32, i32
  }
  func.func @transform_9(%arg0: i32) -> (i32, i32) {
    %c0_i32 = arith.constant 0 : i32
    %c0_i32_0 = arith.constant 0 : i32
    %c0_i32_1 = arith.constant 0 : i32
    return %c0_i32, %c0_i32_0 : i32, i32
  }
  func.func @transform_10(%arg0: i32) -> (i32, i32) {
    %c0_i32 = arith.constant 0 : i32
    %c0_i32_0 = arith.constant 0 : i32
    %c0_i32_1 = arith.constant 0 : i32
    return %c0_i32, %c0_i32_0 : i32, i32
  }
}

</mosaic_0001>

<bundles_post_ra>
// kernel: tpu_custom_call.1
= control target key start
LH: loop header
LB: loop body
LE: loop exit
PB: predicated region body
PF: predicated region fallthrough
CT: control target
= control target key end

     0   :  { %16 = vsyncpa [#allocation3], 0  ;;  %s16414_s0 = inlined_call_operand.vmem [shape: f32[16,128], index: 0, kind: input, shape index: {}]   ;;  %s16415_s1 = inlined_call_operand.vmem [shape: f32[4,16,16], index: 1, kind: input, shape index: {}]   ;;  %s16416_s2 = inlined_call_operand.hbm [shape: f32[4,4,16], index: 2, kind: input, shape index: {}]   ;;  %s16417_s3 = inlined_call_operand.vmem [shape: f32[4,16,4], index: 3, kind: input, shape index: {}]   ;;  %s16418_s4 = inlined_call_operand.hbm [shape: f32[4,16], index: 4, kind: input, shape index: {}]   ;;  %s16419_s5 = inlined_call_operand.vmem [shape: f32[16,4], index: 5, kind: input, shape index: {}]   ;;  %s16420_s6 = inlined_call_operand.vmem [shape: f32[16,128], index: 6, kind: input, shape index: {}]   ;;  %s16421_s7 = inlined_call_operand.vmem [shape: f32[1,128], index: 7, kind: input, shape index: {}]   ;;  %s16422_s8 = inlined_call_operand.hbm [shape: f32[16,128], index: 8, kind: output, shape index: {0}]   ;;  %s16423_s9 = inlined_call_operand.hbm [shape: f32[16,128], index: 9, kind: output, shape index: {1}]   ;;  %s16424_s10 = inlined_call_operand.hbm [shape: f32[1,1], index: 10, kind: output, shape index: {2}]  }
   0x1   :  { %17 = vsyncpa [#allocation6], 0 }
   0x2   :  { %18 = vsyncpa [#allocation4], 0 }
   0x3   :  { %19 = vsyncpa [#allocation9], 0  ;;  %s14428_s13 = smov [#allocation2]   ;;  %s14310_s17 = scalar_lea.hbm %s16416_s2, 256 }
   0x4   :  { %s29_s14 = sshll.u32 %s14428_s13, 4  ;;  %p14311_p0 = scmp.ne.s32.totalorder %s16416_s2, %s14310_s17  ;;  %s30_s14 = int_to_ptr.vmem [resolvable:$true] %s29_s14 }
   0x5   :  { %p14314_p1 = scmp.lt.u32.totalorder %s14310_s17, %s16416_s2 }
   0x7   :  { %p14316_p2 = pnand %p14314_p1, %p14311_p0 }
   0x9   :  { %14319 = shalt.err (!%p14316_p2)
}
   0xa   :  { %s14320_s22 = scalar_lea.vmem %s30_s14, 256  ;;  %p14325_p4 = scmp.lt.s32.totalorder %s30_s14, %s30_s14 }
   0xb   :  { %p14321_p3 = scmp.ne.s32.totalorder %s30_s14, %s14320_s22  ;;  %p14326_p5 = scmp.lt.s32.totalorder %s14320_s22, %s14320_s22 }
   0xd   :  { %p14327_p6 = por %p14326_p5, %p14325_p4 }
   0xf   :  { %p14328_p7 = pnand %p14327_p6, %p14321_p3 }
  0x11   :  { %14331 = shalt.err (!%p14328_p7)
}
  0x12   :  { %s14429_s23 = smov 64   ;;  %s14430_s24 = smov 4  }
  0x13   :  { %35 = dma.hbm_to_vmem [thread:$0]  %s16416_s2, 256, %s30_s14, [#allocation3], %s14429_s23, %s14429_s23, %s14430_s24  }
  0x14   :  { %s14431_s27 = smov [#allocation5]   ;;  %s14332_s11 = scalar_lea.hbm %s16418_s4, 64 }
  0x15   :  { %s44_s28 = sshll.u32 %s14431_s27, 4  ;;  %p14333_p8 = scmp.ne.s32.totalorder %s16418_s4, %s14332_s11  ;;  %s45_s28 = int_to_ptr.vmem [resolvable:$true] %s44_s28 }
  0x16   :  { %p14336_p9 = scmp.lt.u32.totalorder %s14332_s11, %s16418_s4 }
  0x18   :  { %p14338_p10 = pnand %p14336_p9, %p14333_p8 }
  0x1a   :  { %14341 = shalt.err (!%p14338_p10)
}
  0x1b   :  { %s14342_s17 = scalar_lea.vmem %s45_s28, 64  ;;  %p14347_p12 = scmp.lt.s32.totalorder %s45_s28, %s45_s28 }
  0x1c   :  { %p14343_p11 = scmp.ne.s32.totalorder %s45_s28, %s14342_s17  ;;  %p14348_p13 = scmp.lt.s32.totalorder %s14342_s17, %s14342_s17 }
  0x1e   :  { %p14349_p0 = por %p14348_p13, %p14347_p12 }
  0x20   :  { %p14350_p1 = pnand %p14349_p0, %p14343_p11 }
  0x22   :  { %14353 = shalt.err (!%p14350_p1)
}
  0x23   :  { %47 = dma.hbm_to_vmem [thread:$0]  %s16418_s4, 64, %s45_s28, [#allocation6]  }
  0x24   :  { %14420 = dma.done.wait [#allocation3], 256  }
  0x25   :  { %14421 = vsyncadd [#allocation3], 4294967040 }
  0x26   :  { %14422 = dma.done.wait [#allocation6], 64  }
  0x27   :  { %14423 = vsyncadd [#allocation6], 4294967232  ;;  %v14432_v0 = vmov 0.0   ;;  %vm97_vm0 = vcmask 130048   ;;  %v14532_v1 = vld [vmem:[%s16415_s1] sm:$0xff]  ;;  %v14537_v2 = vld [vmem:[%s16415_s1 + $0x8] sm:$0xff] }
  0x28   :  { %12658 = vmatprep.subr.mxu0 %v14432_v0  ;;  %12663 = vmatprep.subr.mxu1 %v14432_v0  ;;  %v14542_v3 = vld [vmem:[%s16415_s1 + $0x10] sm:$0xff]  ;;  %v14551_v4 = vld [vmem:[%s16415_s1 + $0x18] sm:$0xff]  ;;  %v14556_v5 = vld [vmem:[%s16415_s1 + $0x20] sm:$0xff]  ;;  %v14433_v9 = vmov 0.0|0.0   ;;  %vm14434_vm1 = vmmov 0   ;;  %vm879_vm2 = vcmask 31744  }
  0x29   :  { %12659 = vmatpush3.msra.mxu0 %v14432_v0  ;;  %12664 = vmatpush3.msra.mxu1 %v14432_v0  ;;  %v14565_v6 = vld [vmem:[%s16415_s1 + $0x30] sm:$0xff]  ;;  %v14573_v7 = vld [vmem:[%s16415_s1 + $0x28] sm:$0xff]  ;;  %v14578_v8 = vld [vmem:[%s16415_s1 + $0x38] sm:$0xff]  ;;  %vm521_vm3 = vcmask 1043456   ;;  %s14435_s11 = smov 125   ;;  %s14436_s12 = smov 3  }
  0x2a   :  { %12668 = vmatprep.subr.mxu0 %v14432_v0  ;;  %12673 = vmatprep.subr.mxu1 %v14432_v0  ;;  %v14596_v10 = vld [vmem:[%s16414_s0 + $0x8] sm:$0xff]  ;;  %v14601_v11 = vld [vmem:[%s16414_s0] sm:$0xff]  ;;  %s14437_s13 = smov 1   ;;  %s14438_s15 = smov 127  }
  0x2b   :  { %12660 = vmatprep.mubr.msk.f32.mxu0 %vm97_vm0, %v14532_v1  ;;  %12665 = vmatprep.mubr.msk.f32.mxu1 %vm97_vm0, %v14542_v3 }
  0x2c   :  { %12661 = vmatmul.mubr.msk.f32.vlgmr.msra.gmra.mrb[0].mxu0 %vm97_vm0, %v14537_v2  ;;  %12666 = vmatmul.mubr.msk.f32.vlgmr.msra.gmra.mrb[0].mxu1 %vm97_vm0, %v14551_v4 }
  0x2d   :  { %12669 = vmatpush3.msra.mxu0 %v14432_v0  ;;  %12670 = vmatprep.mubr.msk.f32.mxu0 %vm97_vm0, %v14556_v5 }
  0x2e   :  { %12674 = vmatpush3.msra.mxu1 %v14432_v0  ;;  %12675 = vmatprep.mubr.msk.f32.mxu1 %vm97_vm0, %v14565_v6 }
  0x2f   :  { %13475 = vmatprep.subr.bf16.mxu0 %v14433_v9  ;;  %13478 = vmatprep.subr.bf16.mxu1 %v14433_v9 }
  0x30   :  { %12671 = vmatmul.mubr.msk.f32.vlgmr.msra.gmra.mrb[2].mxu0 %vm97_vm0, %v14573_v7  ;;  %12676 = vmatmul.mubr.msk.f32.vlgmr.msra.gmra.mrb[2].mxu1 %vm97_vm0, %v14578_v8 }
  0x31   :  { %12682 = vmatprep.mubr.msk.f32.mxu0 %vm14434_vm1, %v14432_v0  ;;  %12689 = vmatprep.mubr.msk.f32.mxu1 %vm14434_vm1, %v14432_v0 }
  0xff   :  { %v12662_v12 = vpop.f32.mrb[0].mxu0  ;;  %v12667_v13 = vpop.f32.mrb[0].mxu1 }
 0x100   :  { %v423_v14 = vadd.f32 %v12662_v12, %v14596_v10  ;;  %v170_v15 = vpop.f32.mrb[1].mxu0  ;;  %v251_v16 = vpop.f32.mrb[1].mxu1 }
 0x101   :  { %v422_v17 = vadd.f32 %v170_v15, %v14601_v11 }
 0x102   :  { %v425_v18 = vadd.f32 %v12667_v13, %v423_v14 }
 0x103   :  { %v424_v19 = vadd.f32 %v422_v17, %v251_v16  ;;  %v12672_v20 = vpop.f32.mrb[2].mxu0  ;;  %v12677_v21 = vpop.f32.mrb[2].mxu1 }
 0x104   :  { %v427_v22 = vadd.f32 %v12672_v20, %v425_v18  ;;  %v332_v23 = vpop.f32.mrb[3].mxu0  ;;  %v413_v24 = vpop.f32.mrb[3].mxu1 }
 0x105   :  { %v426_v25 = vadd.f32 %v424_v19, %v332_v23 }
 0x106   :  { %v429_v26 = vadd.f32 %v12677_v21, %v427_v22 }
 0x107   :  { %v428_v27 = vadd.f32 %v426_v25, %v413_v24 }
 0x108   :  { %v431_v28 = vsub.f32 %v429_v26, %v12662_v12  ;;  %v544_v29 = vsub.f32 %v429_v26, %v12667_v13  ;;  %v656_v30 = vsub.f32 %v429_v26, %v12672_v20  ;;  %v768_v31 = vsub.f32 %v429_v26, %v12677_v21 }
 0x109   :  { %v430_v32 = vsub.f32 %v428_v27, %v170_v15  ;;  %v543_v33 = vsub.f32 %v428_v27, %v251_v16  ;;  %v655_v34 = vsub.f32 %v428_v27, %v332_v23  ;;  %v767_v35 = vsub.f32 %v428_v27, %v413_v24 }
 0x10b   :  { %v432_v36 = vmax.f32 %v430_v32, %v431_v28  ;;  %v545_v37 = vmax.f32 %v543_v33, %v544_v29  ;;  %v657_v38 = vmax.f32 %v655_v34, %v656_v30  ;;  %v769_v39 = vmax.f32 %v767_v35, %v768_v31 }
 0x10d   :  { %v433_v40 = vrot.slane %v432_v36, 4  ;;  %v546_v41 = vrot.slane %v545_v37, 4  ;;  %v658_v42 = vrot.slane %v657_v38, 4  ;;  %v770_v43 = vrot.slane %v769_v39, 4 }
 0x10f   :  { %v434_v44 = vmax.f32 %v432_v36, %v433_v40  ;;  %v547_v45 = vmax.f32 %v545_v37, %v546_v41  ;;  %v659_v46 = vmax.f32 %v657_v38, %v658_v42  ;;  %v771_v47 = vmax.f32 %v769_v39, %v770_v43  ;;  %v14621_v39 = vld [vmem:[#allocation2] sm:$0xf]  ;;  %v14623_v41 = vld [vmem:[#allocation2 + $0x4] sm:$0xf]  ;;  %v14631_v42 = vld [vmem:[#allocation2 + $0x8] sm:$0xf] }
 0x110   :  { %v14635_v43 = vld [vmem:[#allocation2 + $0xc] sm:$0xf] }
 0x111   :  { %v435_v48 = vrot.slane %v434_v44, 2  ;;  %v548_v49 = vrot.slane %v547_v45, 2  ;;  %v660_v50 = vrot.slane %v659_v46, 2  ;;  %v772_v51 = vrot.slane %v771_v47, 2 }
 0x113   :  { %v436_v52 = vmax.f32 %v434_v44, %v435_v48  ;;  %v549_v53 = vmax.f32 %v547_v45, %v548_v49  ;;  %v661_v54 = vmax.f32 %v659_v46, %v660_v50  ;;  %v773_v55 = vmax.f32 %v771_v47, %v772_v51  ;;  %v14646_v44 = vld [vmem:[%s16417_s3] sm:$0xff]  ;;  %v14651_v45 = vld [vmem:[%s16417_s3 + $0x10] sm:$0xff] }
 0x115   :  { %v437_v56 = vrot.slane %v436_v52, 1  ;;  %v550_v57 = vrot.slane %v549_v53, 1  ;;  %v662_v58 = vrot.slane %v661_v54, 1  ;;  %v774_v59 = vrot.slane %v773_v55, 1 }
 0x117   :  { %v14605_v60 = vmax.f32 %v436_v52, %v437_v56  ;;  %v14607_v61 = vmax.f32 %v549_v53, %v550_v57  ;;  %v14609_v62 = vmax.f32 %v661_v54, %v662_v58  ;;  %v14611_v63 = vmax.f32 %v773_v55, %v774_v59 }
 0x119   :  { %v439_v12 = vsub.f32 %v430_v32, %v14605_v60  ;;  %v552_v13 = vsub.f32 %v543_v33, %v14607_v61  ;;  %v664_v14 = vsub.f32 %v655_v34, %v14609_v62  ;;  %v776_v15 = vsub.f32 %v767_v35, %v14611_v63 }
 0x11a   :  { %v777_v16 = vsub.f32 %v768_v31, %v14611_v63  ;;  %v440_v17 = vsub.f32 %v431_v28, %v14605_v60  ;;  %v553_v21 = vsub.f32 %v544_v29, %v14607_v61  ;;  %v665_v23 = vsub.f32 %v656_v30, %v14609_v62 }
 0x11b   :  { %v441_v18 = vmul.f32 1.442695, %v439_v12  ;;  %v554_v19 = vmul.f32 1.442695, %v552_v13  ;;  %v666_v20 = vmul.f32 1.442695, %v664_v14 }
 0x11c   :  { %v778_v22 = vmul.f32 1.442695, %v776_v15  ;;  %v780_v24 = vmul.f32 1.442695, %v777_v16  ;;  %v443_v25 = vmul.f32 1.442695, %v440_v17 }
 0x11d   :  { %13788 = vpow2.f32 %v441_v18  ;;  %v556_v26 = vmul.f32 1.442695, %v553_v21  ;;  %v668_v27 = vmul.f32 1.442695, %v665_v23 }
 0x11e   :  { %13790 = vpow2.f32 %v554_v19 }
 0x11f   :  { %13792 = vpow2.f32 %v666_v20 }
 0x120   :  { %13794 = vpow2.f32 %v778_v22 }
 0x121   :  { %13796 = vpow2.f32 %v780_v24 }
 0x122   :  { %13798 = vpow2.f32 %v443_v25 }
 0x123   :  { %13800 = vpow2.f32 %v556_v26 }
 0x124   :  { %13802 = vpow2.f32 %v668_v27 }
 0x127   :  { %v13789_v28 = vpop.eup %13788 }
 0x128   :  { %v13791_v31 = vpop.eup %13790 }
 0x129   :  { %v13793_v32 = vpop.eup %13792 }
 0x12a   :  { %v13795_v33 = vpop.eup %13794 }
 0x12b   :  { %v13797_v29 = vpop.eup %13796 }
 0x12c   :  { %v13799_v34 = vpop.eup %13798  ;;  %v13485_v35 = vpack.c.bf16 %v13797_v29, %v13795_v33 }
 0x12d   :  { %v13801_v30 = vpop.eup %13800  ;;  %v13476_v36 = vpack.c.bf16 %v13799_v34, %v13789_v28 }
 0x12e   :  { %v13803_v37 = vpop.eup %13802  ;;  %v13479_v38 = vpack.c.bf16 %v13801_v30, %v13791_v31 }
 0x12f   :  { %13477 = vmatpush3.bf16.msra.mxu0 %v13476_v36  ;;  %v13482_v40 = vpack.c.bf16 %v13803_v37, %v13793_v32 }
 0x130   :  { %13480 = vmatpush3.bf16.msra.mxu1 %v13479_v38  ;;  %13481 = vmatprep.subr.bf16.mxu0 %v14433_v9 }
 0x131   :  { %13484 = vmatprep.subr.bf16.mxu1 %v14433_v9 }
 0x132   :  { %12683 = vmatmul.mubr.msk.f32.vlgmr.msra.gmra.mrb[4].mxu0 %vm97_vm0, %v14621_v39 }
 0x133   :  { %12690 = vmatmul.mubr.msk.f32.vlgmr.msra.gmra.mrb[4].mxu1 %vm97_vm0, %v14623_v41  ;;  %13483 = vmatpush3.bf16.msra.mxu0 %v13482_v40 }
 0x134   :  { %13486 = vmatpush3.bf16.msra.mxu1 %v13485_v35  ;;  %12696 = vmatprep.mubr.msk.f32.mxu0 %vm14434_vm1, %v14432_v0 }
 0x135   :  { %12703 = vmatprep.mubr.msk.f32.mxu1 %vm14434_vm1, %v14432_v0 }
 0x136   :  { %12697 = vmatmul.mubr.msk.f32.vlgmr.msra.gmra.mrb[6].mxu0 %vm97_vm0, %v14631_v42 }
 0x137   :  { %12704 = vmatmul.mubr.msk.f32.vlgmr.msra.gmra.mrb[6].mxu1 %vm97_vm0, %v14635_v43  ;;  %12708 = vmatprep.mubr.msk.f32.mxu0 %vm879_vm2, %v14646_v44 }
 0x138   :  { %12713 = vmatprep.mubr.msk.f32.mxu1 %vm879_vm2, %v14651_v45 }
 0x205   :  { %v514_v46 = vpop.f32.mrb[4].mxu0 }
 0x206   :  { %13804 = vlog2.f32 %v514_v46  ;;  %v627_v47 = vpop.f32.mrb[4].mxu1  ;;  %v12684_v48 = vpop.f32.mrb[5].mxu0 }
 0x207   :  { %13806 = vlog2.f32 %v627_v47  ;;  %v12691_v49 = vpop.f32.mrb[5].mxu1 }
 0x209   :  { %v739_v50 = vpop.f32.mrb[6].mxu0 }
 0x20a   :  { %13808 = vlog2.f32 %v739_v50  ;;  %v851_v51 = vpop.f32.mrb[6].mxu1  ;;  %v12698_v52 = vpop.f32.mrb[7].mxu0 }
 0x20b   :  { %13810 = vlog2.f32 %v851_v51  ;;  %v12705_v53 = vpop.f32.mrb[7].mxu1 }
 0x210   :  { %v13805_v54 = vpop.eup %13804 }
 0x211   :  { %v13807_v55 = vpop.eup %13806  ;;  %v519_v56 = vmul.f32 0.6931472, %v13805_v54 }
 0x212   :  { %v632_v57 = vmul.f32 0.6931472, %v13807_v55 }
 0x213   :  { %v14658_v58 = vadd.f32 %v519_v56, %v14605_v60 }
 0x214   :  { %v13809_v59 = vpop.eup %13808  ;;  %v14661_v12 = vadd.f32 %v632_v57, %v14607_v61 }
 0x215   :  { %v13811_v13 = vpop.eup %13810  ;;  %v522_v14 = vsel %vm521_vm3, %v14658_v58, -inf  ;;  %v744_v15 = vmul.f32 0.6931472, %v13809_v59 }
 0x216   :  { %v523_v16 = vrot.slane %v522_v14, 4  ;;  %v634_v17 = vsel %vm521_vm3, %v14661_v12, -inf  ;;  %v856_v18 = vmul.f32 0.6931472, %v13811_v13 }
 0x217   :  { %v635_v19 = vrot.slane %v634_v17, 4  ;;  %v14668_v20 = vadd.f32 %v744_v15, %v14609_v62 }
 0x218   :  { %v524_v60 = vmax.f32 %v522_v14, %v523_v16  ;;  %v14671_v21 = vadd.f32 %v856_v18, %v14611_v63 }
 0x219   :  { %v636_v61 = vmax.f32 %v634_v17, %v635_v19  ;;  %v746_v22 = vsel %vm521_vm3, %v14668_v20, -inf }
 0x21a   :  { %v525_v23 = vrot.slane %v524_v60, 2  ;;  %v747_v24 = vrot.slane %v746_v22, 4  ;;  %v858_v25 = vsel %vm521_vm3, %v14671_v21, -inf }
 0x21b   :  { %v637_v26 = vrot.slane %v636_v61, 2  ;;  %v859_v27 = vrot.slane %v858_v25, 4 }
 0x21c   :  { %v526_v28 = vmax.f32 %v524_v60, %v525_v23  ;;  %v748_v31 = vmax.f32 %v746_v22, %v747_v24 }
 0x21d   :  { %v638_v32 = vmax.f32 %v636_v61, %v637_v26  ;;  %v860_v62 = vmax.f32 %v858_v25, %v859_v27 }
 0x21e   :  { %v527_v33 = vrot.slane %v526_v28, 1  ;;  %v749_v29 = vrot.slane %v748_v31, 2 }
 0x21f   :  { %v639_v34 = vrot.slane %v638_v32, 1  ;;  %v861_v63 = vrot.slane %v860_v62, 2 }
 0x220   :  { %v528_v35 = vmax.f32 %v526_v28, %v527_v33  ;;  %v750_v30 = vmax.f32 %v748_v31, %v749_v29 }
 0x221   :  { %v640_v36 = vmax.f32 %v638_v32, %v639_v34  ;;  %v862_v37 = vmax.f32 %v860_v62, %v861_v63 }
 0x222   :  { %v529_v38 = vsub.f32 %v14658_v58, %v528_v35  ;;  %v751_v40 = vrot.slane %v750_v30, 1 }
 0x223   :  { %v641_v46 = vsub.f32 %v14661_v12, %v640_v36  ;;  %v863_v47 = vrot.slane %v862_v37, 1 }
 0x224   :  { %v530_v48 = vmul.f32 1.442695, %v529_v38  ;;  %v752_v49 = vmax.f32 %v750_v30, %v751_v40 }
 0x225   :  { %v642_v50 = vmul.f32 1.442695, %v641_v46  ;;  %v14679_v51 = vmax.f32 %v862_v37, %v863_v47 }
 0x226   :  { %13812 = vpow2.f32 %v530_v48  ;;  %v753_v52 = vsub.f32 %v14668_v20, %v752_v49 }
 0x227   :  { %13814 = vpow2.f32 %v642_v50  ;;  %v865_v53 = vsub.f32 %v14671_v21, %v14679_v51 }
 0x228   :  { %v754_v54 = vmul.f32 1.442695, %v753_v52 }
 0x229   :  { %v866_v55 = vmul.f32 1.442695, %v865_v53 }
 0x22a   :  { %13816 = vpow2.f32 %v754_v54 }
 0x22b   :  { %13818 = vpow2.f32 %v866_v55 }
 0x230   :  { %v13813_v56 = vpop.eup %13812 }
 0x231   :  { %v13815_v57 = vpop.eup %13814  ;;  %v532_v59 = vsel %vm521_vm3, %v13813_v56, 0.0 }
 0x232   :  { %v644_v13 = vsel %vm521_vm3, %v13815_v57, 0.0  ;;  %v533_v14 = vrot.slane %v532_v59, 4 }
 0x233   :  { %v645_v15 = vrot.slane %v644_v13, 4 }
 0x234   :  { %v13817_v16 = vpop.eup %13816  ;;  %v534_v17 = vadd.f32 %v533_v14, %v532_v59 }
 0x235   :  { %v13819_v18 = vpop.eup %13818  ;;  %v646_v19 = vadd.f32 %v645_v15, %v644_v13  ;;  %v756_v60 = vsel %vm521_vm3, %v13817_v16, 0.0  ;;  %v14693_v15 = vld [vmem:[%s16417_s3 + $0x18] sm:$0xff] }
 0x236   :  { %v535_v61 = vrot.slane %v534_v17, 2  ;;  %v868_v22 = vsel %vm521_vm3, %v13819_v18, 0.0  ;;  %v757_v23 = vrot.slane %v756_v60, 4 }
 0x237   :  { %v647_v24 = vrot.slane %v646_v19, 2  ;;  %v869_v25 = vrot.slane %v868_v22, 4 }
 0x238   :  { %v536_v26 = vadd.f32 %v535_v61, %v534_v17  ;;  %v758_v27 = vadd.f32 %v757_v23, %v756_v60  ;;  %v14712_v17 = vld [vmem:[%s16417_s3 + $0x20] sm:$0xff] }
 0x239   :  { %v648_v28 = vadd.f32 %v647_v24, %v646_v19  ;;  %v870_v31 = vadd.f32 %v869_v25, %v868_v22 }
 0x23a   :  { %v537_v32 = vrot.slane %v536_v26, 1  ;;  %v759_v62 = vrot.slane %v758_v27, 2 }
 0x23b   :  { %v649_v33 = vrot.slane %v648_v28, 1  ;;  %v871_v29 = vrot.slane %v870_v31, 2 }
 0x23c   :  { %v538_v34 = vadd.f32 %v537_v32, %v536_v26  ;;  %v760_v63 = vadd.f32 %v759_v62, %v758_v27 }
 0x23d   :  { %v650_v30 = vadd.f32 %v649_v33, %v648_v28  ;;  %v872_v37 = vadd.f32 %v871_v29, %v870_v31 }
 0x23e   :  { %13820 = vlog2.f32 %v538_v34  ;;  %v761_v38 = vrot.slane %v760_v63, 1  ;;  %v14758_v34 = vld [vmem:[%s16420_s6 + $0x8] sm:$0xff] }
 0x23f   :  { %13822 = vlog2.f32 %v650_v30  ;;  %v873_v40 = vrot.slane %v872_v37, 1 }
 0x240   :  { %v762_v46 = vadd.f32 %v761_v38, %v760_v63 }
 0x241   :  { %v874_v47 = vadd.f32 %v873_v40, %v872_v37  ;;  %v14763_v37 = vld [vmem:[%s16420_s6] sm:$0xff] }
 0x242   :  { %13824 = vlog2.f32 %v762_v46 }
 0x243   :  { %13826 = vlog2.f32 %v874_v47 }
 0x248   :  { %v13821_v48 = vpop.eup %13820 }
 0x249   :  { %v13823_v50 = vpop.eup %13822  ;;  %v540_v52 = vmul.f32 0.6931472, %v13821_v48 }
 0x24a   :  { %v652_v53 = vmul.f32 0.6931472, %v13823_v50 }
 0x24b   :  { %v541_v54 = vadd.f32 %v540_v52, %v528_v35  ;;  %v14699_v35 = vld [vmem:[%s16417_s3 + $0x8] sm:$0xff] }
 0x24c   :  { %v13825_v55 = vpop.eup %13824  ;;  %v653_v56 = vadd.f32 %v652_v53, %v640_v36 }
 0x24d   :  { %v13827_v57 = vpop.eup %13826  ;;  %v542_v59 = vsub.f32 %v14658_v58, %v541_v54  ;;  %v764_v13 = vmul.f32 0.6931472, %v13825_v55  ;;  %v14704_v58 = vld [vmem:[%s16417_s3 + $0x30] sm:$0xff] }
 0x24e   :  { %v654_v14 = vsub.f32 %v14661_v12, %v653_v56  ;;  %v876_v16 = vmul.f32 0.6931472, %v13827_v57 }
 0x24f   :  { %12711 = vmatprep.subr.msk.mxu1 %vm521_vm3, %v542_v59  ;;  %v765_v36 = vadd.f32 %v764_v13, %v752_v49 }
 0x250   :  { %12706 = vmatprep.subr.msk.mxu0 %vm521_vm3, %v654_v14  ;;  %12712 = vmatpush3.msk.msra.mxu1 %vm521_vm3, %v542_v59  ;;  %v877_v12 = vadd.f32 %v876_v16, %v14679_v51  ;;  %v14726_v51 = vld [vmem:[%s16417_s3 + $0x38] sm:$0xff] }
 0x251   :  { %12707 = vmatpush3.msk.msra.mxu0 %vm521_vm3, %v654_v14  ;;  %12714 = vmatmul.mubr.msk.f32.vlgmr.msra.gmra.mrb[8].mxu1 %vm879_vm2, %v14693_v15  ;;  %v766_v49 = vsub.f32 %v14668_v20, %v765_v36  ;;  %v14734_v20 = vld [vmem:[%s16417_s3 + $0x28] sm:$0xff] }
 0x252   :  { %12709 = vmatmul.mubr.msk.f32.vlgmr.msra.gmra.mrb[8].mxu0 %vm879_vm2, %v14699_v35  ;;  %v878_v18 = vsub.f32 %v14671_v21, %v877_v12  ;;  %12723 = vmatprep.mubr.msk.f32.mxu1 %vm879_vm2, %v14704_v58 }
 0x253   :  { %12721 = vmatprep.subr.msk.mxu1 %vm521_vm3, %v766_v49  ;;  %12718 = vmatprep.mubr.msk.f32.mxu0 %vm879_vm2, %v14712_v17 }
 0x254   :  { %12716 = vmatprep.subr.msk.mxu0 %vm521_vm3, %v878_v18  ;;  %12722 = vmatpush3.msk.msra.mxu1 %vm521_vm3, %v766_v49 }
 0x255   :  { %12717 = vmatpush3.msk.msra.mxu0 %vm521_vm3, %v878_v18  ;;  %12724 = vmatmul.mubr.msk.f32.vlgmr.msra.gmra.mrb[10].mxu1 %vm879_vm2, %v14726_v51 }
 0x256   :  { %12719 = vmatmul.mubr.msk.f32.vlgmr.msra.gmra.mrb[10].mxu0 %vm879_vm2, %v14734_v20  ;;  %12737 = vmatprep.mubr.msk.f32.mxu1 %vm97_vm0, %v14542_v3 }
 0x257   :  { %12730 = vmatprep.mubr.msk.f32.mxu0 %vm97_vm0, %v14532_v1 }
 0x324   :  { %v12715_v21 = vpop.f32.mrb[8].mxu1 }
 0x325   :  { %v12710_v19 = vpop.f32.mrb[8].mxu0  ;;  %1054 = vrot.lane.b32.xlu1 %v12715_v21, %s14435_s11  ;;  %v1043_v60 = vpop.f32.mrb[9].mxu1 }
 0x326   :  { %966 = vrot.lane.b32.xlu0 %v12710_v19, %s14436_s12  ;;  %v955_v61 = vpop.f32.mrb[9].mxu0 }
 0x328   :  { %v12725_v22 = vpop.f32.mrb[10].mxu1 }
 0x329   :  { %1052 = vrot.lane.b32.xlu1 %v1043_v60, %s14435_s11  ;;  %v12720_v23 = vpop.f32.mrb[10].mxu0  ;;  %v1223_v24 = vpop.f32.mrb[11].mxu1 }
 0x32a   :  { %964 = vrot.lane.b32.xlu0 %v955_v61, %s14436_s12  ;;  %v1133_v3 = vpop.f32.mrb[11].mxu0 }
 0x32d   :  { %1144 = vrot.lane.b32.xlu1 %v12720_v23, %s14437_s13 }
 0x32e   :  { %1142 = vrot.lane.b32.xlu0 %v1133_v3, %s14437_s13 }
 0x331   :  { %1234 = vrot.lane.b32.xlu1 %v12725_v22, %s14438_s15 }
 0x332   :  { %1232 = vrot.lane.b32.xlu0 %v1223_v24, %s14438_s15 }
 0x397   :  { %v1055_v1 = vpop.permute.xlu1 %1054 }
 0x398   :  { %v967_v25 = vpop.permute.xlu0 %966 }
 0x399   :  { %v1057_v31 = vadd.f32 %v1055_v1, %v967_v25 }
 0x39b   :  { %v1053_v26 = vpop.permute.xlu1 %1052 }
 0x39c   :  { %v965_v27 = vpop.permute.xlu0 %964 }
 0x39d   :  { %v1056_v62 = vadd.f32 %v1053_v26, %v965_v27 }
 0x39f   :  { %v1145_v28 = vpop.permute.xlu1 %1144 }
 0x3a0   :  { %v1143_v32 = vpop.permute.xlu0 %1142  ;;  %v1147_v33 = vadd.f32 %v1145_v28, %v1057_v31 }
 0x3a1   :  { %v1146_v29 = vadd.f32 %v1143_v32, %v1056_v62 }
 0x3a3   :  { %v1235_v63 = vpop.permute.xlu1 %1234 }
 0x3a4   :  { %v1237_v30 = vadd.f32 %v1235_v63, %v1147_v33  ;;  %v1233_v38 = vpop.permute.xlu0 %1232 }
 0x3a5   :  { %v1236_v40 = vadd.f32 %v1233_v38, %v1146_v29 }
 0x3a6   :  { %v1239_v46 = vmul.f32 %v1237_v30, %v14758_v34 }
 0x3a7   :  { %v1238_v47 = vmul.f32 %v1236_v40, %v14763_v37 }
 0x3a9   :  { %v13487_v48 = vpack.c.bf16 %v1239_v46, %v1238_v47 }
 0x3ab   :  { %13488 = vmatprep.subr.bf16.mxu0 %v13487_v48  ;;  %13492 = vmatprep.subr.bf16.mxu1 %v13487_v48 }
 0x3ac   :  { %13490 = vmatpush3.bf16.msra.mxu0 %v13487_v48  ;;  %13494 = vmatpush3.bf16.msra.mxu1 %v13487_v48 }
 0x3ad   :  { %13496 = vmatprep.subr.bf16.mxu0 %v13487_v48  ;;  %13500 = vmatprep.subr.bf16.mxu1 %v13487_v48 }
 0x3af   :  { %12731 = vmatmul.mubr.msk.f32.vlgmr.msra.gmra.mrb[12].mxu0 %vm97_vm0, %v14537_v2  ;;  %12738 = vmatmul.mubr.msk.f32.vlgmr.msra.gmra.mrb[12].mxu1 %vm97_vm0, %v14551_v4 }
 0x3b0   :  { %13498 = vmatpush3.bf16.msra.mxu0 %v13487_v48  ;;  %13502 = vmatpush3.bf16.msra.mxu1 %v13487_v48 }
 0x3b1   :  { %12744 = vmatprep.mubr.msk.f32.mxu0 %vm97_vm0, %v14556_v5  ;;  %12751 = vmatprep.mubr.msk.f32.mxu1 %vm97_vm0, %v14565_v6 }
 0x3b2   :  { %13503 = vmatprep.subr.bf16.mxu0 %v14433_v9  ;;  %13506 = vmatprep.subr.bf16.mxu1 %v14433_v9 }
 0x3b3   :  { %12745 = vmatmul.mubr.msk.f32.vlgmr.msra.gmra.mrb[14].mxu0 %vm97_vm0, %v14573_v7  ;;  %12752 = vmatmul.mubr.msk.f32.vlgmr.msra.gmra.mrb[14].mxu1 %vm97_vm0, %v14578_v8 }
 0x3b4   :  { %12758 = vmatprep.mubr.msk.f32.mxu0 %vm14434_vm1, %v14432_v0  ;;  %12765 = vmatprep.mubr.msk.f32.mxu1 %vm14434_vm1, %v14432_v0 }
 0x482   :  { %v12732_v2 = vpop.f32.mrb[12].mxu0  ;;  %v12739_v4 = vpop.f32.mrb[12].mxu1 }
 0x483   :  { %v1541_v5 = vadd.f32 %v12732_v2, %v14596_v10  ;;  %v1306_v6 = vpop.f32.mrb[13].mxu0  ;;  %v1381_v50 = vpop.f32.mrb[13].mxu1 }
 0x484   :  { %v1540_v52 = vadd.f32 %v1306_v6, %v14601_v11 }
 0x485   :  { %v1543_v53 = vadd.f32 %v12739_v4, %v1541_v5 }
 0x486   :  { %v1542_v54 = vadd.f32 %v1540_v52, %v1381_v50  ;;  %v12746_v7 = vpop.f32.mrb[14].mxu0  ;;  %v12753_v55 = vpop.f32.mrb[14].mxu1 }
 0x487   :  { %v1545_v56 = vadd.f32 %v12746_v7, %v1543_v53  ;;  %v1456_v8 = vpop.f32.mrb[15].mxu0  ;;  %v1531_v57 = vpop.f32.mrb[15].mxu1 }
 0x488   :  { %v1544_v59 = vadd.f32 %v1542_v54, %v1456_v8 }
 0x489   :  { %v1547_v13 = vadd.f32 %v12753_v55, %v1545_v56 }
 0x48a   :  { %v1546_v14 = vadd.f32 %v1544_v59, %v1531_v57 }
 0x48b   :  { %v1549_v16 = vsub.f32 %v1547_v13, %v12732_v2  ;;  %v1658_v36 = vsub.f32 %v1547_v13, %v12739_v4  ;;  %v1767_v12 = vsub.f32 %v1547_v13, %v12746_v7  ;;  %v1876_v49 = vsub.f32 %v1547_v13, %v12753_v55 }
 0x48c   :  { %v1548_v18 = vsub.f32 %v1546_v14, %v1306_v6  ;;  %v1657_v10 = vsub.f32 %v1546_v14, %v1381_v50  ;;  %v1766_v21 = vsub.f32 %v1546_v14, %v1456_v8  ;;  %v1875_v19 = vsub.f32 %v1546_v14, %v1531_v57 }
 0x48e   :  { %v1550_v60 = vmax.f32 %v1548_v18, %v1549_v16  ;;  %v1659_v11 = vmax.f32 %v1657_v10, %v1658_v36  ;;  %v1768_v61 = vmax.f32 %v1766_v21, %v1767_v12  ;;  %v1877_v22 = vmax.f32 %v1875_v19, %v1876_v49 }
 0x490   :  { %v1551_v23 = vrot.slane %v1550_v60, 4  ;;  %v1660_v24 = vrot.slane %v1659_v11, 4  ;;  %v1769_v3 = vrot.slane %v1768_v61, 4  ;;  %v1878_v1 = vrot.slane %v1877_v22, 4 }
 0x492   :  { %v1552_v25 = vmax.f32 %v1550_v60, %v1551_v23  ;;  %v1661_v26 = vmax.f32 %v1659_v11, %v1660_v24  ;;  %v1770_v27 = vmax.f32 %v1768_v61, %v1769_v3  ;;  %v1879_v28 = vmax.f32 %v1877_v22, %v1878_v1 }
 0x494   :  { %v1553_v31 = vrot.slane %v1552_v25, 2  ;;  %v1662_v32 = vrot.slane %v1661_v26, 2  ;;  %v1771_v62 = vrot.slane %v1770_v27, 2  ;;  %v1880_v33 = vrot.slane %v1879_v28, 2 }
 0x496   :  { %v1554_v29 = vmax.f32 %v1552_v25, %v1553_v31  ;;  %v1663_v63 = vmax.f32 %v1661_v26, %v1662_v32  ;;  %v1772_v30 = vmax.f32 %v1770_v27, %v1771_v62  ;;  %v1881_v38 = vmax.f32 %v1879_v28, %v1880_v33 }
 0x498   :  { %v1555_v40 = vrot.slane %v1554_v29, 1  ;;  %v1664_v46 = vrot.slane %v1663_v63, 1  ;;  %v1773_v47 = vrot.slane %v1772_v30, 1  ;;  %v1882_v48 = vrot.slane %v1881_v38, 1 }
 0x49a   :  { %v14787_v2 = vmax.f32 %v1554_v29, %v1555_v40  ;;  %v14789_v4 = vmax.f32 %v1663_v63, %v1664_v46  ;;  %v14791_v5 = vmax.f32 %v1772_v30, %v1773_v47  ;;  %v14793_v6 = vmax.f32 %v1881_v38, %v1882_v48 }
 0x49c   :  { %v1557_v50 = vsub.f32 %v1548_v18, %v14787_v2  ;;  %v1666_v52 = vsub.f32 %v1657_v10, %v14789_v4  ;;  %v1775_v53 = vsub.f32 %v1766_v21, %v14791_v5  ;;  %v1884_v54 = vsub.f32 %v1875_v19, %v14793_v6 }
 0x49d   :  { %v1885_v7 = vsub.f32 %v1876_v49, %v14793_v6  ;;  %v1558_v55 = vsub.f32 %v1549_v16, %v14787_v2  ;;  %v1667_v59 = vsub.f32 %v1658_v36, %v14789_v4  ;;  %v1776_v14 = vsub.f32 %v1767_v12, %v14791_v5 }
 0x49e   :  { %v1559_v56 = vmul.f32 1.442695, %v1557_v50  ;;  %v1668_v8 = vmul.f32 1.442695, %v1666_v52  ;;  %v1777_v57 = vmul.f32 1.442695, %v1775_v53 }
 0x49f   :  { %v1886_v13 = vmul.f32 1.442695, %v1884_v54  ;;  %v1888_v18 = vmul.f32 1.442695, %v1885_v7  ;;  %v1561_v10 = vmul.f32 1.442695, %v1558_v55 }
 0x4a0   :  { %13828 = vpow2.f32 %v1559_v56  ;;  %v1670_v21 = vmul.f32 1.442695, %v1667_v59  ;;  %v1779_v19 = vmul.f32 1.442695, %v1776_v14 }
 0x4a1   :  { %13830 = vpow2.f32 %v1668_v8 }
 0x4a2   :  { %13832 = vpow2.f32 %v1777_v57 }
 0x4a3   :  { %13834 = vpow2.f32 %v1886_v13 }
 0x4a4   :  { %13836 = vpow2.f32 %v1888_v18 }
 0x4a5   :  { %13838 = vpow2.f32 %v1561_v10 }
 0x4a6   :  { %13840 = vpow2.f32 %v1670_v21 }
 0x4a7   :  { %13842 = vpow2.f32 %v1779_v19 }
 0x4aa   :  { %v13829_v16 = vpop.eup %13828 }
 0x4ab   :  { %v13831_v49 = vpop.eup %13830 }
 0x4ac   :  { %v13833_v60 = vpop.eup %13832 }
 0x4ad   :  { %v13835_v11 = vpop.eup %13834 }
 0x4ae   :  { %v13837_v36 = vpop.eup %13836 }
 0x4af   :  { %v13839_v61 = vpop.eup %13838  ;;  %v13513_v22 = vpack.c.bf16 %v13837_v36, %v13835_v11 }
 0x4b0   :  { %v13841_v12 = vpop.eup %13840  ;;  %v13504_v23 = vpack.c.bf16 %v13839_v61, %v13829_v16 }
 0x4b1   :  { %v13843_v24 = vpop.eup %13842  ;;  %v13507_v3 = vpack.c.bf16 %v13841_v12, %v13831_v49 }
 0x4b2   :  { %13505 = vmatpush3.bf16.msra.mxu0 %v13504_v23  ;;  %v13510_v1 = vpack.c.bf16 %v13843_v24, %v13833_v60 }
 0x4b3   :  { %13508 = vmatpush3.bf16.msra.mxu1 %v13507_v3  ;;  %13509 = vmatprep.subr.bf16.mxu0 %v14433_v9 }
 0x4b4   :  { %13512 = vmatprep.subr.bf16.mxu1 %v14433_v9 }
 0x4b5   :  { %12759 = vmatmul.mubr.msk.f32.vlgmr.msra.gmra.mrb[16].mxu0 %vm97_vm0, %v14621_v39 }
 0x4b6   :  { %12766 = vmatmul.mubr.msk.f32.vlgmr.msra.gmra.mrb[16].mxu1 %vm97_vm0, %v14623_v41  ;;  %13511 = vmatpush3.bf16.msra.mxu0 %v13510_v1 }
 0x4b7   :  { %13514 = vmatpush3.bf16.msra.mxu1 %v13513_v22  ;;  %12772 = vmatprep.mubr.msk.f32.mxu0 %vm14434_vm1, %v14432_v0 }
 0x4b8   :  { %12779 = vmatprep.mubr.msk.f32.mxu1 %vm14434_vm1, %v14432_v0 }
 0x4b9   :  { %12773 = vmatmul.mubr.msk.f32.vlgmr.msra.gmra.mrb[18].mxu0 %vm97_vm0, %v14631_v42 }
 0x4ba   :  { %12780 = vmatmul.mubr.msk.f32.vlgmr.msra.gmra.mrb[18].mxu1 %vm97_vm0, %v14635_v43  ;;  %12784 = vmatprep.mubr.msk.f32.mxu0 %vm879_vm2, %v14646_v44 }
 0x4bb   :  { %12789 = vmatprep.mubr.msk.f32.mxu1 %vm879_vm2, %v14651_v45 }
 0x588   :  { %v1629_v39 = vpop.f32.mrb[16].mxu0 }
 0x589   :  { %13844 = vlog2.f32 %v1629_v39  ;;  %v1738_v41 = vpop.f32.mrb[16].mxu1  ;;  %v12760_v25 = vpop.f32.mrb[17].mxu0 }
 0x58a   :  { %13846 = vlog2.f32 %v1738_v41  ;;  %v12767_v26 = vpop.f32.mrb[17].mxu1 }
 0x58c   :  { %v1847_v27 = vpop.f32.mrb[18].mxu0 }
 0x58d   :  { %13848 = vlog2.f32 %v1847_v27  ;;  %v1956_v28 = vpop.f32.mrb[18].mxu1  ;;  %v12774_v31 = vpop.f32.mrb[19].mxu0 }
 0x58e   :  { %13850 = vlog2.f32 %v1956_v28  ;;  %v12781_v42 = vpop.f32.mrb[19].mxu1 }
 0x593   :  { %v13845_v32 = vpop.eup %13844 }
 0x594   :  { %v13847_v43 = vpop.eup %13846  ;;  %v1634_v62 = vmul.f32 0.6931472, %v13845_v32 }
 0x595   :  { %v1743_v33 = vmul.f32 0.6931472, %v13847_v43 }
 0x596   :  { %v14822_v44 = vadd.f32 %v1634_v62, %v14787_v2 }
 0x597   :  { %v13849_v45 = vpop.eup %13848  ;;  %v14825_v29 = vadd.f32 %v1743_v33, %v14789_v4 }
 0x598   :  { %v13851_v63 = vpop.eup %13850  ;;  %v1636_v30 = vsel %vm521_vm3, %v14822_v44, -inf  ;;  %v1852_v38 = vmul.f32 0.6931472, %v13849_v45 }
 0x599   :  { %v1637_v40 = vrot.slane %v1636_v30, 4  ;;  %v1745_v46 = vsel %vm521_vm3, %v14825_v29, -inf  ;;  %v1961_v47 = vmul.f32 0.6931472, %v13851_v63 }
 0x59a   :  { %v1746_v48 = vrot.slane %v1745_v46, 4  ;;  %v14832_v50 = vadd.f32 %v1852_v38, %v14791_v5 }
 0x59b   :  { %v1638_v2 = vmax.f32 %v1636_v30, %v1637_v40  ;;  %v14835_v52 = vadd.f32 %v1961_v47, %v14793_v6 }
 0x59c   :  { %v1747_v4 = vmax.f32 %v1745_v46, %v1746_v48  ;;  %v1854_v53 = vsel %vm521_vm3, %v14832_v50, -inf }
 0x59d   :  { %v1639_v54 = vrot.slane %v1638_v2, 2  ;;  %v1855_v7 = vrot.slane %v1854_v53, 4  ;;  %v1963_v55 = vsel %vm521_vm3, %v14835_v52, -inf }
 0x59e   :  { %v1748_v56 = vrot.slane %v1747_v4, 2  ;;  %v1964_v8 = vrot.slane %v1963_v55, 4 }
 0x59f   :  { %v1640_v57 = vmax.f32 %v1638_v2, %v1639_v54  ;;  %v1856_v59 = vmax.f32 %v1854_v53, %v1855_v7 }
 0x5a0   :  { %v1749_v13 = vmax.f32 %v1747_v4, %v1748_v56  ;;  %v1965_v5 = vmax.f32 %v1963_v55, %v1964_v8 }
 0x5a1   :  { %v1641_v14 = vrot.slane %v1640_v57, 1  ;;  %v1857_v18 = vrot.slane %v1856_v59, 2 }
 0x5a2   :  { %v1750_v10 = vrot.slane %v1749_v13, 1  ;;  %v1966_v6 = vrot.slane %v1965_v5, 2 }
 0x5a3   :  { %v1642_v21 = vmax.f32 %v1640_v57, %v1641_v14  ;;  %v1858_v19 = vmax.f32 %v1856_v59, %v1857_v18 }
 0x5a4   :  { %v1751_v16 = vmax.f32 %v1749_v13, %v1750_v10  ;;  %v1967_v49 = vmax.f32 %v1965_v5, %v1966_v6 }
 0x5a5   :  { %v1643_v60 = vsub.f32 %v14822_v44, %v1642_v21  ;;  %v1859_v11 = vrot.slane %v1858_v19, 1 }
 0x5a6   :  { %v1752_v36 = vsub.f32 %v14825_v29, %v1751_v16  ;;  %v1968_v61 = vrot.slane %v1967_v49, 1 }
 0x5a7   :  { %v1644_v22 = vmul.f32 1.442695, %v1643_v60  ;;  %v1860_v12 = vmax.f32 %v1858_v19, %v1859_v11 }
 0x5a8   :  { %v1753_v23 = vmul.f32 1.442695, %v1752_v36  ;;  %v1969_v24 = vmax.f32 %v1967_v49, %v1968_v61 }
 0x5a9   :  { %13852 = vpow2.f32 %v1644_v22  ;;  %v1861_v3 = vsub.f32 %v14832_v50, %v1860_v12 }
 0x5aa   :  { %13854 = vpow2.f32 %v1753_v23  ;;  %v1970_v1 = vsub.f32 %v14835_v52, %v1969_v24 }
 0x5ab   :  { %v1862_v39 = vmul.f32 1.442695, %v1861_v3 }
 0x5ac   :  { %v1971_v41 = vmul.f32 1.442695, %v1970_v1 }
 0x5ad   :  { %13856 = vpow2.f32 %v1862_v39 }
 0x5ae   :  { %13858 = vpow2.f32 %v1971_v41 }
 0x5b3   :  { %v13853_v25 = vpop.eup %13852 }
 0x5b4   :  { %v13855_v26 = vpop.eup %13854  ;;  %v1646_v27 = vsel %vm521_vm3, %v13853_v25, 0.0 }
 0x5b5   :  { %v1755_v28 = vsel %vm521_vm3, %v13855_v26, 0.0  ;;  %v1647_v31 = vrot.slane %v1646_v27, 4 }
 0x5b6   :  { %v1756_v42 = vrot.slane %v1755_v28, 4 }
 0x5b7   :  { %v13857_v32 = vpop.eup %13856  ;;  %v1648_v43 = vadd.f32 %v1647_v31, %v1646_v27 }
 0x5b8   :  { %v13859_v62 = vpop.eup %13858  ;;  %v1757_v33 = vadd.f32 %v1756_v42, %v1755_v28  ;;  %v1864_v45 = vsel %vm521_vm3, %v13857_v32, 0.0 }
 0x5b9   :  { %v1649_v63 = vrot.slane %v1648_v43, 2  ;;  %v1973_v30 = vsel %vm521_vm3, %v13859_v62, 0.0  ;;  %v1865_v38 = vrot.slane %v1864_v45, 4 }
 0x5ba   :  { %v1758_v40 = vrot.slane %v1757_v33, 2  ;;  %v1974_v46 = vrot.slane %v1973_v30, 4 }
 0x5bb   :  { %v1650_v47 = vadd.f32 %v1649_v63, %v1648_v43  ;;  %v1866_v48 = vadd.f32 %v1865_v38, %v1864_v45 }
 0x5bc   :  { %v1759_v2 = vadd.f32 %v1758_v40, %v1757_v33  ;;  %v1975_v4 = vadd.f32 %v1974_v46, %v1973_v30  ;;  %v14900_v46 = vld [vmem:[%s16415_s1 + $0x8] sm:$0xff] }
 0x5bd   :  { %v1651_v53 = vrot.slane %v1650_v47, 1  ;;  %v1867_v54 = vrot.slane %v1866_v48, 2 }
 0x5be   :  { %v1760_v7 = vrot.slane %v1759_v2, 1  ;;  %v1976_v55 = vrot.slane %v1975_v4, 2 }
 0x5bf   :  { %v1652_v56 = vadd.f32 %v1651_v53, %v1650_v47  ;;  %v1868_v8 = vadd.f32 %v1867_v54, %v1866_v48  ;;  %v14921_v47 = vld [vmem:[%s16415_s1 + $0x30] sm:$0xff]  ;;  %v14930_v48 = vld [vmem:[%s16415_s1 + $0x28] sm:$0xff] }
 0x5c0   :  { %v1761_v57 = vadd.f32 %v1760_v7, %v1759_v2  ;;  %v1977_v59 = vadd.f32 %v1976_v55, %v1975_v4  ;;  %v14937_v2 = vld [vmem:[%s16415_s1 + $0x38] sm:$0xff]  ;;  %v14948_v54 = vld [vmem:[%s16414_s0 + $0x8] sm:$0xff] }
 0x5c1   :  { %13860 = vlog2.f32 %v1652_v56  ;;  %v1869_v13 = vrot.slane %v1868_v8, 1 }
 0x5c2   :  { %13862 = vlog2.f32 %v1761_v57  ;;  %v1978_v5 = vrot.slane %v1977_v59, 1 }
 0x5c3   :  { %v1870_v14 = vadd.f32 %v1869_v13, %v1868_v8  ;;  %v14954_v8 = vld [vmem:[%s16414_s0] sm:$0xff] }
 0x5c4   :  { %v1979_v18 = vadd.f32 %v1978_v5, %v1977_v59 }
 0x5c5   :  { %13864 = vlog2.f32 %v1870_v14 }
 0x5c6   :  { %13866 = vlog2.f32 %v1979_v18 }
 0x5cb   :  { %v13861_v10 = vpop.eup %13860 }
 0x5cc   :  { %v13863_v6 = vpop.eup %13862  ;;  %v1654_v19 = vmul.f32 0.6931472, %v13861_v10 }
 0x5cd   :  { %v1763_v49 = vmul.f32 0.6931472, %v13863_v6 }
 0x5ce   :  { %v1655_v60 = vadd.f32 %v1654_v19, %v1642_v21 }
 0x5cf   :  { %v13865_v11 = vpop.eup %13864  ;;  %v1764_v36 = vadd.f32 %v1763_v49, %v1751_v16 }
 0x5d0   :  { %v13867_v61 = vpop.eup %13866  ;;  %v1656_v22 = vsub.f32 %v14822_v44, %v1655_v60  ;;  %v1872_v23 = vmul.f32 0.6931472, %v13865_v11 }
 0x5d1   :  { %v1765_v3 = vsub.f32 %v14825_v29, %v1764_v36  ;;  %v1981_v1 = vmul.f32 0.6931472, %v13867_v61 }
 0x5d2   :  { %12787 = vmatprep.subr.msk.mxu1 %vm521_vm3, %v1656_v22  ;;  %v1873_v39 = vadd.f32 %v1872_v23, %v1860_v12 }
 0x5d3   :  { %12782 = vmatprep.subr.msk.mxu0 %vm521_vm3, %v1765_v3  ;;  %12788 = vmatpush3.msk.msra.mxu1 %vm521_vm3, %v1656_v22  ;;  %v1982_v41 = vadd.f32 %v1981_v1, %v1969_v24 }
 0x5d4   :  { %12783 = vmatpush3.msk.msra.mxu0 %vm521_vm3, %v1765_v3  ;;  %v1874_v21 = vsub.f32 %v14832_v50, %v1873_v39  ;;  %12790 = vmatmul.mubr.msk.f32.vlgmr.msra.gmra.mrb[20].mxu1 %vm879_vm2, %v14693_v15  ;;  %v14876_v15 = vld [vmem:[%s16415_s1 + $0x10] sm:$0xff] }
 0x5d5   :  { %12785 = vmatmul.mubr.msk.f32.vlgmr.msra.gmra.mrb[20].mxu0 %vm879_vm2, %v14699_v35  ;;  %v1983_v44 = vsub.f32 %v14835_v52, %v1982_v41  ;;  %12799 = vmatprep.mubr.msk.f32.mxu1 %vm879_vm2, %v14704_v58  ;;  %v14883_v35 = vld [vmem:[%s16415_s1] sm:$0xff] }
 0x5d6   :  { %12797 = vmatprep.subr.msk.mxu1 %vm521_vm3, %v1874_v21  ;;  %12794 = vmatprep.mubr.msk.f32.mxu0 %vm879_vm2, %v14712_v17 }
 0x5d7   :  { %12792 = vmatprep.subr.msk.mxu0 %vm521_vm3, %v1983_v44  ;;  %12798 = vmatpush3.msk.msra.mxu1 %vm521_vm3, %v1874_v21 }
 0x5d8   :  { %12793 = vmatpush3.msk.msra.mxu0 %vm521_vm3, %v1983_v44  ;;  %12800 = vmatmul.mubr.msk.f32.vlgmr.msra.gmra.mrb[22].mxu1 %vm879_vm2, %v14726_v51 }
 0x5d9   :  { %12795 = vmatmul.mubr.msk.f32.vlgmr.msra.gmra.mrb[22].mxu0 %vm879_vm2, %v14734_v20  ;;  %12813 = vmatprep.mubr.msk.f32.mxu1 %vm97_vm0, %v14876_v15 }
 0x5da   :  { %12806 = vmatprep.mubr.msk.f32.mxu0 %vm97_vm0, %v14883_v35 }
 0x6a7   :  { %v12791_v58 = vpop.f32.mrb[20].mxu1 }
 0x6a8   :  { %v12786_v17 = vpop.f32.mrb[20].mxu0  ;;  %v2135_v51 = vpop.f32.mrb[21].mxu1 }
 0x6a9   :  { %2064 = vrot.lane.b32.xlu1 %v12786_v17, %s14436_s12  ;;  %v2053_v20 = vpop.f32.mrb[21].mxu0 }
 0x6aa   :  { %2062 = vrot.lane.b32.xlu0 %v2053_v20, %s14436_s12 }
 0x6ab   :  { %v12801_v29 = vpop.f32.mrb[22].mxu1 }
 0x6ac   :  { %v12796_v50 = vpop.f32.mrb[22].mxu0  ;;  %v2303_v52 = vpop.f32.mrb[23].mxu1 }
 0x6ad   :  { %2146 = vrot.lane.b32.xlu1 %v12791_v58, %s14435_s11  ;;  %v2219_v16 = vpop.f32.mrb[23].mxu0 }
 0x6ae   :  { %2144 = vrot.lane.b32.xlu0 %v2135_v51, %s14435_s11 }
 0x6b1   :  { %2230 = vrot.lane.b32.xlu1 %v12796_v50, %s14437_s13 }
 0x6b2   :  { %2228 = vrot.lane.b32.xlu0 %v2219_v16, %s14437_s13 }
 0x6b5   :  { %2314 = vrot.lane.b32.xlu1 %v12801_v29, %s14438_s15 }
 0x6b6   :  { %2312 = vrot.lane.b32.xlu0 %v2303_v52, %s14438_s15 }
 0x71b   :  { %v2065_v12 = vpop.permute.xlu1 %2064 }
 0x71c   :  { %v2063_v24 = vpop.permute.xlu0 %2062 }
 0x71f   :  { %v2147_v25 = vpop.permute.xlu1 %2146 }
 0x720   :  { %v2145_v26 = vpop.permute.xlu0 %2144  ;;  %v2149_v28 = vadd.f32 %v2147_v25, %v2065_v12 }
 0x721   :  { %v2148_v42 = vadd.f32 %v2145_v26, %v2063_v24 }
 0x723   :  { %v2231_v27 = vpop.permute.xlu1 %2230 }
 0x724   :  { %v2229_v31 = vpop.permute.xlu0 %2228  ;;  %v2233_v32 = vadd.f32 %v2231_v27, %v2149_v28 }
 0x725   :  { %v2232_v43 = vadd.f32 %v2229_v31, %v2148_v42 }
 0x727   :  { %v2315_v62 = vpop.permute.xlu1 %2314 }
 0x728   :  { %v2317_v33 = vadd.f32 %v2315_v62, %v2233_v32  ;;  %v2313_v45 = vpop.permute.xlu0 %2312 }
 0x729   :  { %v2316_v63 = vadd.f32 %v2313_v45, %v2232_v43 }
 0x72a   :  { %v2319_v30 = vmul.f32 %v2317_v33, %v14758_v34  ;;  %v14907_v34 = vld [vmem:[%s16415_s1 + $0x18] sm:$0xff] }
 0x72b   :  { %v2318_v38 = vmul.f32 %v2316_v63, %v14763_v37  ;;  %v14914_v37 = vld [vmem:[%s16415_s1 + $0x20] sm:$0xff] }
 0x72d   :  { %v13515_v40 = vpack.c.bf16 %v2319_v30, %v2318_v38 }
 0x72f   :  { %13516 = vmatprep.subr.bf16.mxu0 %v13515_v40  ;;  %13520 = vmatprep.subr.bf16.mxu1 %v13515_v40 }
 0x730   :  { %13518 = vmatpush3.bf16.msra.mxu0 %v13515_v40  ;;  %13522 = vmatpush3.bf16.msra.mxu1 %v13515_v40 }
 0x731   :  { %13524 = vmatprep.subr.bf16.mxu0 %v13515_v40  ;;  %13528 = vmatprep.subr.bf16.mxu1 %v13515_v40 }
 0x733   :  { %12807 = vmatmul.mubr.msk.f32.vlgmr.msra.gmra.mrb[24].mxu0 %vm97_vm0, %v14900_v46  ;;  %12814 = vmatmul.mubr.msk.f32.vlgmr.msra.gmra.mrb[24].mxu1 %vm97_vm0, %v14907_v34 }
 0x734   :  { %13526 = vmatpush3.bf16.msra.mxu0 %v13515_v40  ;;  %13530 = vmatpush3.bf16.msra.mxu1 %v13515_v40 }
 0x735   :  { %12820 = vmatprep.mubr.msk.f32.mxu0 %vm97_vm0, %v14914_v37  ;;  %12827 = vmatprep.mubr.msk.f32.mxu1 %vm97_vm0, %v14921_v47 }
 0x736   :  { %13531 = vmatprep.subr.bf16.mxu0 %v14433_v9  ;;  %13534 = vmatprep.subr.bf16.mxu1 %v14433_v9 }
 0x737   :  { %12821 = vmatmul.mubr.msk.f32.vlgmr.msra.gmra.mrb[26].mxu0 %vm97_vm0, %v14930_v48  ;;  %12828 = vmatmul.mubr.msk.f32.vlgmr.msra.gmra.mrb[26].mxu1 %vm97_vm0, %v14937_v2 }
 0x738   :  { %12834 = vmatprep.mubr.msk.f32.mxu0 %vm14434_vm1, %v14432_v0  ;;  %12841 = vmatprep.mubr.msk.f32.mxu1 %vm14434_vm1, %v14432_v0 }
 0x806   :  { %v12808_v4 = vpop.f32.mrb[24].mxu0  ;;  %v12815_v53 = vpop.f32.mrb[24].mxu1 }
 0x807   :  { %v2621_v7 = vadd.f32 %v14948_v54, %v12808_v4  ;;  %v2386_v55 = vpop.f32.mrb[25].mxu0  ;;  %v2461_v56 = vpop.f32.mrb[25].mxu1 }
 0x808   :  { %v2620_v57 = vadd.f32 %v14954_v8, %v2386_v55 }
 0x809   :  { %v2623_v59 = vadd.f32 %v12815_v53, %v2621_v7 }
 0x80a   :  { %v2622_v13 = vadd.f32 %v2620_v57, %v2461_v56  ;;  %v12822_v5 = vpop.f32.mrb[26].mxu0  ;;  %v12829_v14 = vpop.f32.mrb[26].mxu1 }
 0x80b   :  { %v2625_v18 = vadd.f32 %v12822_v5, %v2623_v59  ;;  %v2536_v10 = vpop.f32.mrb[27].mxu0  ;;  %v2611_v6 = vpop.f32.mrb[27].mxu1 }
 0x80c   :  { %v2624_v19 = vadd.f32 %v2622_v13, %v2536_v10 }
 0x80d   :  { %v2627_v49 = vadd.f32 %v12829_v14, %v2625_v18 }
 0x80e   :  { %v2626_v60 = vadd.f32 %v2624_v19, %v2611_v6 }
 0x80f   :  { %v2629_v11 = vsub.f32 %v2627_v49, %v12808_v4  ;;  %v2738_v36 = vsub.f32 %v2627_v49, %v12815_v53  ;;  %v2847_v61 = vsub.f32 %v2627_v49, %v12822_v5  ;;  %v2956_v22 = vsub.f32 %v2627_v49, %v12829_v14 }
 0x810   :  { %v2628_v23 = vsub.f32 %v2626_v60, %v2386_v55  ;;  %v2737_v3 = vsub.f32 %v2626_v60, %v2461_v56  ;;  %v2846_v1 = vsub.f32 %v2626_v60, %v2536_v10  ;;  %v2955_v39 = vsub.f32 %v2626_v60, %v2611_v6 }
 0x812   :  { %v2630_v41 = vmax.f32 %v2628_v23, %v2629_v11  ;;  %v2739_v21 = vmax.f32 %v2737_v3, %v2738_v36  ;;  %v2848_v44 = vmax.f32 %v2846_v1, %v2847_v61  ;;  %v2957_v58 = vmax.f32 %v2955_v39, %v2956_v22 }
 0x814   :  { %v2631_v17 = vrot.slane %v2630_v41, 4  ;;  %v2740_v51 = vrot.slane %v2739_v21, 4  ;;  %v2849_v20 = vrot.slane %v2848_v44, 4  ;;  %v2958_v29 = vrot.slane %v2957_v58, 4 }
 0x816   :  { %v2632_v50 = vmax.f32 %v2630_v41, %v2631_v17  ;;  %v2741_v52 = vmax.f32 %v2739_v21, %v2740_v51  ;;  %v2850_v16 = vmax.f32 %v2848_v44, %v2849_v20  ;;  %v2959_v12 = vmax.f32 %v2957_v58, %v2958_v29  ;;  %v14975_v17 = vld [vmem:[#allocation2] sm:$0xf]  ;;  %v14979_v51 = vld [vmem:[#allocation2 + $0x4] sm:$0xf]  ;;  %v14987_v20 = vld [vmem:[#allocation2 + $0x8] sm:$0xf] }
 0x817   :  { %v14991_v29 = vld [vmem:[#allocation2 + $0xc] sm:$0xf] }
 0x818   :  { %v2633_v24 = vrot.slane %v2632_v50, 2  ;;  %v2742_v25 = vrot.slane %v2741_v52, 2  ;;  %v2851_v26 = vrot.slane %v2850_v16, 2  ;;  %v2960_v27 = vrot.slane %v2959_v12, 2 }
 0x81a   :  { %v2634_v28 = vmax.f32 %v2632_v50, %v2633_v24  ;;  %v2743_v31 = vmax.f32 %v2741_v52, %v2742_v25  ;;  %v2852_v42 = vmax.f32 %v2850_v16, %v2851_v26  ;;  %v2961_v32 = vmax.f32 %v2959_v12, %v2960_v27  ;;  %v14998_v50 = vld [vmem:[%s16417_s3] sm:$0xff]  ;;  %v15005_v52 = vld [vmem:[%s16417_s3 + $0x10] sm:$0xff] }
 0x81c   :  { %v2635_v43 = vrot.slane %v2634_v28, 1  ;;  %v2744_v62 = vrot.slane %v2743_v31, 1  ;;  %v2853_v33 = vrot.slane %v2852_v42, 1  ;;  %v2962_v45 = vrot.slane %v2961_v32, 1 }
 0x81e   :  { %v14957_v63 = vmax.f32 %v2634_v28, %v2635_v43  ;;  %v14959_v30 = vmax.f32 %v2743_v31, %v2744_v62  ;;  %v14961_v38 = vmax.f32 %v2852_v42, %v2853_v33  ;;  %v14963_v40 = vmax.f32 %v2961_v32, %v2962_v45 }
 0x820   :  { %v2637_v4 = vsub.f32 %v2628_v23, %v14957_v63  ;;  %v2746_v53 = vsub.f32 %v2737_v3, %v14959_v30  ;;  %v2855_v7 = vsub.f32 %v2846_v1, %v14961_v38  ;;  %v2964_v55 = vsub.f32 %v2955_v39, %v14963_v40 }
 0x821   :  { %v2965_v56 = vsub.f32 %v2956_v22, %v14963_v40  ;;  %v2638_v57 = vsub.f32 %v2629_v11, %v14957_v63  ;;  %v2747_v14 = vsub.f32 %v2738_v36, %v14959_v30  ;;  %v2856_v10 = vsub.f32 %v2847_v61, %v14961_v38 }
 0x822   :  { %v2639_v59 = vmul.f32 1.442695, %v2637_v4  ;;  %v2748_v13 = vmul.f32 1.442695, %v2746_v53  ;;  %v2857_v5 = vmul.f32 1.442695, %v2855_v7 }
 0x823   :  { %v2966_v18 = vmul.f32 1.442695, %v2964_v55  ;;  %v2968_v6 = vmul.f32 1.442695, %v2965_v56  ;;  %v2641_v19 = vmul.f32 1.442695, %v2638_v57 }
 0x824   :  { %13868 = vpow2.f32 %v2639_v59  ;;  %v2750_v49 = vmul.f32 1.442695, %v2747_v14  ;;  %v2859_v60 = vmul.f32 1.442695, %v2856_v10 }
 0x825   :  { %13870 = vpow2.f32 %v2748_v13 }
 0x826   :  { %13872 = vpow2.f32 %v2857_v5 }
 0x827   :  { %13874 = vpow2.f32 %v2966_v18 }
 0x828   :  { %13876 = vpow2.f32 %v2968_v6 }
 0x829   :  { %13878 = vpow2.f32 %v2641_v19 }
 0x82a   :  { %13880 = vpow2.f32 %v2750_v49 }
 0x82b   :  { %13882 = vpow2.f32 %v2859_v60 }
 0x82e   :  { %v13869_v11 = vpop.eup %13868 }
 0x82f   :  { %v13871_v22 = vpop.eup %13870 }
 0x830   :  { %v13873_v23 = vpop.eup %13872 }
 0x831   :  { %v13875_v3 = vpop.eup %13874 }
 0x832   :  { %v13877_v36 = vpop.eup %13876 }
 0x833   :  { %v13879_v1 = vpop.eup %13878  ;;  %v13541_v39 = vpack.c.bf16 %v13877_v36, %v13875_v3 }
 0x834   :  { %v13881_v61 = vpop.eup %13880  ;;  %v13532_v41 = vpack.c.bf16 %v13879_v1, %v13869_v11 }
 0x835   :  { %v13883_v21 = vpop.eup %13882  ;;  %v13535_v44 = vpack.c.bf16 %v13881_v61, %v13871_v22 }
 0x836   :  { %13533 = vmatpush3.bf16.msra.mxu0 %v13532_v41  ;;  %v13538_v58 = vpack.c.bf16 %v13883_v21, %v13873_v23 }
 0x837   :  { %13536 = vmatpush3.bf16.msra.mxu1 %v13535_v44  ;;  %13537 = vmatprep.subr.bf16.mxu0 %v14433_v9 }
 0x838   :  { %13540 = vmatprep.subr.bf16.mxu1 %v14433_v9 }
 0x839   :  { %12835 = vmatmul.mubr.msk.f32.vlgmr.msra.gmra.mrb[28].mxu0 %vm97_vm0, %v14975_v17 }
 0x83a   :  { %12842 = vmatmul.mubr.msk.f32.vlgmr.msra.gmra.mrb[28].mxu1 %vm97_vm0, %v14979_v51  ;;  %13539 = vmatpush3.bf16.msra.mxu0 %v13538_v58 }
 0x83b   :  { %13542 = vmatpush3.bf16.msra.mxu1 %v13541_v39  ;;  %12848 = vmatprep.mubr.msk.f32.mxu0 %vm14434_vm1, %v14432_v0 }
 0x83c   :  { %12855 = vmatprep.mubr.msk.f32.mxu1 %vm14434_vm1, %v14432_v0 }
 0x83d   :  { %12849 = vmatmul.mubr.msk.f32.vlgmr.msra.gmra.mrb[30].mxu0 %vm97_vm0, %v14987_v20 }
 0x83e   :  { %12856 = vmatmul.mubr.msk.f32.vlgmr.msra.gmra.mrb[30].mxu1 %vm97_vm0, %v14991_v29  ;;  %12860 = vmatprep.mubr.msk.f32.mxu0 %vm879_vm2, %v14998_v50 }
 0x83f   :  { %12865 = vmatprep.mubr.msk.f32.mxu1 %vm879_vm2, %v15005_v52 }
 0x90c   :  { %v2709_v16 = vpop.f32.mrb[28].mxu0 }
 0x90d   :  { %13884 = vlog2.f32 %v2709_v16  ;;  %v2818_v12 = vpop.f32.mrb[28].mxu1  ;;  %v12836_v24 = vpop.f32.mrb[29].mxu0 }
 0x90e   :  { %13886 = vlog2.f32 %v2818_v12  ;;  %v12843_v25 = vpop.f32.mrb[29].mxu1 }
 0x910   :  { %v2927_v26 = vpop.f32.mrb[30].mxu0 }
 0x911   :  { %13888 = vlog2.f32 %v2927_v26  ;;  %v3036_v27 = vpop.f32.mrb[30].mxu1  ;;  %v12850_v28 = vpop.f32.mrb[31].mxu0 }
 0x912   :  { %13890 = vlog2.f32 %v3036_v27  ;;  %v12857_v31 = vpop.f32.mrb[31].mxu1 }
 0x917   :  { %v13885_v42 = vpop.eup %13884 }
 0x918   :  { %v13887_v32 = vpop.eup %13886  ;;  %v2714_v43 = vmul.f32 0.6931472, %v13885_v42 }
 0x919   :  { %v2823_v62 = vmul.f32 0.6931472, %v13887_v32 }
 0x91a   :  { %v15010_v33 = vadd.f32 %v2714_v43, %v14957_v63 }
 0x91b   :  { %v13889_v45 = vpop.eup %13888  ;;  %v15013_v4 = vadd.f32 %v2823_v62, %v14959_v30 }
 0x91c   :  { %v13891_v53 = vpop.eup %13890  ;;  %v2716_v7 = vsel %vm521_vm3, %v15010_v33, -inf  ;;  %v2932_v55 = vmul.f32 0.6931472, %v13889_v45 }
 0x91d   :  { %v2717_v56 = vrot.slane %v2716_v7, 4  ;;  %v2825_v57 = vsel %vm521_vm3, %v15013_v4, -inf  ;;  %v3041_v59 = vmul.f32 0.6931472, %v13891_v53 }
 0x91e   :  { %v2826_v13 = vrot.slane %v2825_v57, 4  ;;  %v15020_v5 = vadd.f32 %v2932_v55, %v14961_v38 }
 0x91f   :  { %v2718_v63 = vmax.f32 %v2716_v7, %v2717_v56  ;;  %v15023_v14 = vadd.f32 %v3041_v59, %v14963_v40 }
 0x920   :  { %v2827_v30 = vmax.f32 %v2825_v57, %v2826_v13  ;;  %v2934_v18 = vsel %vm521_vm3, %v15020_v5, -inf }
 0x921   :  { %v2719_v10 = vrot.slane %v2718_v63, 2  ;;  %v2935_v6 = vrot.slane %v2934_v18, 4  ;;  %v3043_v19 = vsel %vm521_vm3, %v15023_v14, -inf }
 0x922   :  { %v2828_v49 = vrot.slane %v2827_v30, 2  ;;  %v3044_v60 = vrot.slane %v3043_v19, 4 }
 0x923   :  { %v2720_v11 = vmax.f32 %v2718_v63, %v2719_v10  ;;  %v2936_v22 = vmax.f32 %v2934_v18, %v2935_v6 }
 0x924   :  { %v2829_v23 = vmax.f32 %v2827_v30, %v2828_v49  ;;  %v3045_v38 = vmax.f32 %v3043_v19, %v3044_v60 }
 0x925   :  { %v2721_v3 = vrot.slane %v2720_v11, 1  ;;  %v2937_v36 = vrot.slane %v2936_v22, 2 }
 0x926   :  { %v2830_v1 = vrot.slane %v2829_v23, 1  ;;  %v3046_v40 = vrot.slane %v3045_v38, 2 }
 0x927   :  { %v2722_v39 = vmax.f32 %v2720_v11, %v2721_v3  ;;  %v2938_v61 = vmax.f32 %v2936_v22, %v2937_v36 }
 0x928   :  { %v2831_v41 = vmax.f32 %v2829_v23, %v2830_v1  ;;  %v3047_v21 = vmax.f32 %v3045_v38, %v3046_v40 }
 0x929   :  { %v2723_v44 = vsub.f32 %v15010_v33, %v2722_v39  ;;  %v2939_v58 = vrot.slane %v2938_v61, 1 }
 0x92a   :  { %v2832_v16 = vsub.f32 %v15013_v4, %v2831_v41  ;;  %v3048_v12 = vrot.slane %v3047_v21, 1 }
 0x92b   :  { %v2724_v24 = vmul.f32 1.442695, %v2723_v44  ;;  %v2940_v25 = vmax.f32 %v2938_v61, %v2939_v58 }
 0x92c   :  { %v2833_v26 = vmul.f32 1.442695, %v2832_v16  ;;  %v3049_v27 = vmax.f32 %v3047_v21, %v3048_v12 }
 0x92d   :  { %13892 = vpow2.f32 %v2724_v24  ;;  %v2941_v28 = vsub.f32 %v15020_v5, %v2940_v25 }
 0x92e   :  { %13894 = vpow2.f32 %v2833_v26  ;;  %v3050_v31 = vsub.f32 %v15023_v14, %v3049_v27 }
 0x92f   :  { %v2942_v42 = vmul.f32 1.442695, %v2941_v28 }
 0x930   :  { %v3051_v32 = vmul.f32 1.442695, %v3050_v31 }
 0x931   :  { %13896 = vpow2.f32 %v2942_v42 }
 0x932   :  { %13898 = vpow2.f32 %v3051_v32 }
 0x937   :  { %v13893_v43 = vpop.eup %13892 }
 0x938   :  { %v13895_v62 = vpop.eup %13894  ;;  %v2726_v45 = vsel %vm521_vm3, %v13893_v43, 0.0 }
 0x939   :  { %v2835_v53 = vsel %vm521_vm3, %v13895_v62, 0.0  ;;  %v2727_v7 = vrot.slane %v2726_v45, 4 }
 0x93a   :  { %v2836_v55 = vrot.slane %v2835_v53, 4 }
 0x93b   :  { %v13897_v56 = vpop.eup %13896  ;;  %v2728_v57 = vadd.f32 %v2727_v7, %v2726_v45 }
 0x93c   :  { %v13899_v59 = vpop.eup %13898  ;;  %v2837_v13 = vadd.f32 %v2836_v55, %v2835_v53  ;;  %v2944_v63 = vsel %vm521_vm3, %v13897_v56, 0.0 }
 0x93d   :  { %v2729_v30 = vrot.slane %v2728_v57, 2  ;;  %v3053_v18 = vsel %vm521_vm3, %v13899_v59, 0.0  ;;  %v2945_v10 = vrot.slane %v2944_v63, 4 }
 0x93e   :  { %v2838_v6 = vrot.slane %v2837_v13, 2  ;;  %v3054_v19 = vrot.slane %v3053_v18, 4 }
 0x93f   :  { %v2730_v49 = vadd.f32 %v2729_v30, %v2728_v57  ;;  %v2946_v60 = vadd.f32 %v2945_v10, %v2944_v63 }
 0x940   :  { %v2839_v11 = vadd.f32 %v2838_v6, %v2837_v13  ;;  %v3055_v22 = vadd.f32 %v3054_v19, %v3053_v18 }
 0x941   :  { %v2731_v23 = vrot.slane %v2730_v49, 1  ;;  %v2947_v38 = vrot.slane %v2946_v60, 2 }
 0x942   :  { %v2840_v3 = vrot.slane %v2839_v11, 1  ;;  %v3056_v36 = vrot.slane %v3055_v22, 2 }
 0x943   :  { %v2732_v1 = vadd.f32 %v2731_v23, %v2730_v49  ;;  %v2948_v40 = vadd.f32 %v2947_v38, %v2946_v60 }
 0x944   :  { %v2841_v61 = vadd.f32 %v2840_v3, %v2839_v11  ;;  %v3057_v21 = vadd.f32 %v3056_v36, %v3055_v22 }
 0x945   :  { %13900 = vlog2.f32 %v2732_v1  ;;  %v2949_v44 = vrot.slane %v2948_v40, 1 }
 0x946   :  { %13902 = vlog2.f32 %v2841_v61  ;;  %v3058_v58 = vrot.slane %v3057_v21, 1 }
 0x947   :  { %v2950_v16 = vadd.f32 %v2949_v44, %v2948_v40  ;;  %v15106_v44 = vld [vmem:[%s16420_s6 + $0x8] sm:$0xff] }
 0x948   :  { %v3059_v12 = vadd.f32 %v3058_v58, %v3057_v21 }
 0x949   :  { %13904 = vlog2.f32 %v2950_v16  ;;  %v15112_v16 = vld [vmem:[%s16420_s6] sm:$0xff] }
 0x94a   :  { %13906 = vlog2.f32 %v3059_v12 }
 0x94f   :  { %v13901_v24 = vpop.eup %13900 }
 0x950   :  { %v13903_v26 = vpop.eup %13902  ;;  %v2734_v28 = vmul.f32 0.6931472, %v13901_v24 }
 0x951   :  { %v2843_v31 = vmul.f32 0.6931472, %v13903_v26 }
 0x952   :  { %v2735_v42 = vadd.f32 %v2734_v28, %v2722_v39 }
 0x953   :  { %v13905_v32 = vpop.eup %13904  ;;  %v2844_v43 = vadd.f32 %v2843_v31, %v2831_v41 }
 0x954   :  { %v13907_v62 = vpop.eup %13906  ;;  %v2736_v45 = vsub.f32 %v15010_v33, %v2735_v42  ;;  %v2952_v53 = vmul.f32 0.6931472, %v13905_v32  ;;  %v15047_v33 = vld [vmem:[%s16417_s3 + $0x18] sm:$0xff] }
 0x955   :  { %v2845_v7 = vsub.f32 %v15013_v4, %v2844_v43  ;;  %v3061_v55 = vmul.f32 0.6931472, %v13907_v62  ;;  %v15054_v4 = vld [vmem:[%s16417_s3 + $0x8] sm:$0xff] }
 0x956   :  { %12863 = vmatprep.subr.msk.mxu1 %vm521_vm3, %v2736_v45  ;;  %v2953_v56 = vadd.f32 %v2952_v53, %v2940_v25  ;;  %v15070_v25 = vld [vmem:[%s16417_s3 + $0x20] sm:$0xff] }
 0x957   :  { %12858 = vmatprep.subr.msk.mxu0 %vm521_vm3, %v2845_v7  ;;  %12864 = vmatpush3.msk.msra.mxu1 %vm521_vm3, %v2736_v45  ;;  %v3062_v57 = vadd.f32 %v3061_v55, %v3049_v27  ;;  %v15087_v27 = vld [vmem:[%s16417_s3 + $0x28] sm:$0xff] }
 0x958   :  { %12859 = vmatpush3.msk.msra.mxu0 %vm521_vm3, %v2845_v7  ;;  %v2954_v39 = vsub.f32 %v15020_v5, %v2953_v56  ;;  %12866 = vmatmul.mubr.msk.f32.vlgmr.msra.gmra.mrb[32].mxu1 %vm879_vm2, %v15047_v33  ;;  %v15062_v5 = vld [vmem:[%s16417_s3 + $0x30] sm:$0xff] }
 0x959   :  { %12861 = vmatmul.mubr.msk.f32.vlgmr.msra.gmra.mrb[32].mxu0 %vm879_vm2, %v15054_v4  ;;  %v3063_v41 = vsub.f32 %v15023_v14, %v3062_v57  ;;  %12875 = vmatprep.mubr.msk.f32.mxu1 %vm879_vm2, %v15062_v5  ;;  %v15080_v14 = vld [vmem:[%s16417_s3 + $0x38] sm:$0xff] }
 0x95a   :  { %12873 = vmatprep.subr.msk.mxu1 %vm521_vm3, %v2954_v39  ;;  %12870 = vmatprep.mubr.msk.f32.mxu0 %vm879_vm2, %v15070_v25 }
 0x95b   :  { %12868 = vmatprep.subr.msk.mxu0 %vm521_vm3, %v3063_v41  ;;  %12874 = vmatpush3.msk.msra.mxu1 %vm521_vm3, %v2954_v39 }
 0x95c   :  { %12869 = vmatpush3.msk.msra.mxu0 %vm521_vm3, %v3063_v41  ;;  %12876 = vmatmul.mubr.msk.f32.vlgmr.msra.gmra.mrb[34].mxu1 %vm879_vm2, %v15080_v14 }
 0x95d   :  { %12871 = vmatmul.mubr.msk.f32.vlgmr.msra.gmra.mrb[34].mxu0 %vm879_vm2, %v15087_v27  ;;  %12889 = vmatprep.mubr.msk.f32.mxu1 %vm97_vm0, %v14876_v15 }
 0x95e   :  { %12882 = vmatprep.mubr.msk.f32.mxu0 %vm97_vm0, %v14883_v35 }
 0xa2b   :  { %v12867_v59 = vpop.f32.mrb[32].mxu1 }
 0xa2c   :  { %v12862_v13 = vpop.f32.mrb[32].mxu0  ;;  %v3215_v63 = vpop.f32.mrb[33].mxu1 }
 0xa2d   :  { %3144 = vrot.lane.b32.xlu1 %v12862_v13, %s14436_s12  ;;  %v3133_v30 = vpop.f32.mrb[33].mxu0 }
 0xa2e   :  { %3142 = vrot.lane.b32.xlu0 %v3133_v30, %s14436_s12 }
 0xa2f   :  { %v12877_v18 = vpop.f32.mrb[34].mxu1 }
 0xa30   :  { %v12872_v10 = vpop.f32.mrb[34].mxu0  ;;  %v3383_v6 = vpop.f32.mrb[35].mxu1 }
 0xa31   :  { %3226 = vrot.lane.b32.xlu1 %v12867_v59, %s14435_s11  ;;  %v3299_v19 = vpop.f32.mrb[35].mxu0 }
 0xa32   :  { %3224 = vrot.lane.b32.xlu0 %v3215_v63, %s14435_s11 }
 0xa35   :  { %3310 = vrot.lane.b32.xlu1 %v12872_v10, %s14437_s13 }
 0xa36   :  { %3308 = vrot.lane.b32.xlu0 %v3299_v19, %s14437_s13 }
 0xa39   :  { %3394 = vrot.lane.b32.xlu1 %v12877_v18, %s14438_s15 }
 0xa3a   :  { %3392 = vrot.lane.b32.xlu0 %v3383_v6, %s14438_s15 }
 0xa9f   :  { %v3145_v15 = vpop.permute.xlu1 %3144 }
 0xaa0   :  { %v3143_v35 = vpop.permute.xlu0 %3142 }
 0xaa3   :  { %v3227_v49 = vpop.permute.xlu1 %3226 }
 0xaa4   :  { %v3225_v60 = vpop.permute.xlu0 %3224  ;;  %v3229_v22 = vadd.f32 %v3227_v49, %v3145_v15 }
 0xaa5   :  { %v3228_v38 = vadd.f32 %v3225_v60, %v3143_v35 }
 0xaa7   :  { %v3311_v11 = vpop.permute.xlu1 %3310 }
 0xaa8   :  { %v3309_v23 = vpop.permute.xlu0 %3308  ;;  %v3313_v3 = vadd.f32 %v3311_v11, %v3229_v22 }
 0xaa9   :  { %v3312_v36 = vadd.f32 %v3309_v23, %v3228_v38 }
 0xaab   :  { %v3395_v1 = vpop.permute.xlu1 %3394 }
 0xaac   :  { %v3397_v40 = vadd.f32 %v3395_v1, %v3313_v3  ;;  %v3393_v61 = vpop.permute.xlu0 %3392 }
 0xaad   :  { %v3396_v21 = vadd.f32 %v3393_v61, %v3312_v36 }
 0xaae   :  { %v3399_v58 = vmul.f32 %v15106_v44, %v3397_v40 }
 0xaaf   :  { %v3398_v12 = vmul.f32 %v15112_v16, %v3396_v21 }
 0xab1   :  { %v13543_v24 = vpack.c.bf16 %v3399_v58, %v3398_v12 }
 0xab3   :  { %13544 = vmatprep.subr.bf16.mxu0 %v13543_v24  ;;  %13548 = vmatprep.subr.bf16.mxu1 %v13543_v24 }
 0xab4   :  { %13546 = vmatpush3.bf16.msra.mxu0 %v13543_v24  ;;  %13550 = vmatpush3.bf16.msra.mxu1 %v13543_v24 }
 0xab5   :  { %13552 = vmatprep.subr.bf16.mxu0 %v13543_v24  ;;  %13556 = vmatprep.subr.bf16.mxu1 %v13543_v24 }
 0xab7   :  { %12883 = vmatmul.mubr.msk.f32.vlgmr.msra.gmra.mrb[36].mxu0 %vm97_vm0, %v14900_v46  ;;  %12890 = vmatmul.mubr.msk.f32.vlgmr.msra.gmra.mrb[36].mxu1 %vm97_vm0, %v14907_v34 }
 0xab8   :  { %13554 = vmatpush3.bf16.msra.mxu0 %v13543_v24  ;;  %13558 = vmatpush3.bf16.msra.mxu1 %v13543_v24 }
 0xab9   :  { %12896 = vmatprep.mubr.msk.f32.mxu0 %vm97_vm0, %v14914_v37  ;;  %12903 = vmatprep.mubr.msk.f32.mxu1 %vm97_vm0, %v14921_v47 }
 0xaba   :  { %13559 = vmatprep.subr.bf16.mxu0 %v14433_v9  ;;  %13562 = vmatprep.subr.bf16.mxu1 %v14433_v9 }
 0xabb   :  { %12897 = vmatmul.mubr.msk.f32.vlgmr.msra.gmra.mrb[38].mxu0 %vm97_vm0, %v14930_v48  ;;  %12904 = vmatmul.mubr.msk.f32.vlgmr.msra.gmra.mrb[38].mxu1 %vm97_vm0, %v14937_v2 }
 0xabc   :  { %12910 = vmatprep.mubr.msk.f32.mxu0 %vm14434_vm1, %v14432_v0  ;;  %12917 = vmatprep.mubr.msk.f32.mxu1 %vm14434_vm1, %v14432_v0 }
 0xb8a   :  { %v12884_v46 = vpop.f32.mrb[36].mxu0  ;;  %v12891_v34 = vpop.f32.mrb[36].mxu1 }
 0xb8b   :  { %v3701_v37 = vadd.f32 %v14948_v54, %v12884_v46  ;;  %v3466_v47 = vpop.f32.mrb[37].mxu0  ;;  %v3541_v26 = vpop.f32.mrb[37].mxu1 }
 0xb8c   :  { %v3700_v28 = vadd.f32 %v14954_v8, %v3466_v47 }
 0xb8d   :  { %v3703_v31 = vadd.f32 %v12891_v34, %v3701_v37 }
 0xb8e   :  { %v3702_v42 = vadd.f32 %v3700_v28, %v3541_v26  ;;  %v12898_v48 = vpop.f32.mrb[38].mxu0  ;;  %v12905_v32 = vpop.f32.mrb[38].mxu1 }
 0xb8f   :  { %v3705_v43 = vadd.f32 %v12898_v48, %v3703_v31  ;;  %v3616_v2 = vpop.f32.mrb[39].mxu0  ;;  %v3691_v62 = vpop.f32.mrb[39].mxu1 }
 0xb90   :  { %v3704_v45 = vadd.f32 %v3702_v42, %v3616_v2 }
 0xb91   :  { %v3707_v53 = vadd.f32 %v12905_v32, %v3705_v43 }
 0xb92   :  { %v3706_v7 = vadd.f32 %v3704_v45, %v3691_v62 }
 0xb93   :  { %v3709_v55 = vsub.f32 %v3707_v53, %v12884_v46  ;;  %v3818_v56 = vsub.f32 %v3707_v53, %v12891_v34  ;;  %v3927_v57 = vsub.f32 %v3707_v53, %v12898_v48  ;;  %v4036_v39 = vsub.f32 %v3707_v53, %v12905_v32 }
 0xb94   :  { %v3708_v41 = vsub.f32 %v3706_v7, %v3466_v47  ;;  %v3817_v54 = vsub.f32 %v3706_v7, %v3541_v26  ;;  %v3926_v59 = vsub.f32 %v3706_v7, %v3616_v2  ;;  %v4035_v13 = vsub.f32 %v3706_v7, %v3691_v62 }
 0xb96   :  { %v3710_v63 = vmax.f32 %v3708_v41, %v3709_v55  ;;  %v3819_v8 = vmax.f32 %v3817_v54, %v3818_v56  ;;  %v3928_v30 = vmax.f32 %v3926_v59, %v3927_v57  ;;  %v4037_v18 = vmax.f32 %v4035_v13, %v4036_v39 }
 0xb98   :  { %v3711_v10 = vrot.slane %v3710_v63, 4  ;;  %v3820_v6 = vrot.slane %v3819_v8, 4  ;;  %v3929_v19 = vrot.slane %v3928_v30, 4  ;;  %v4038_v15 = vrot.slane %v4037_v18, 4 }
 0xb9a   :  { %v3712_v35 = vmax.f32 %v3710_v63, %v3711_v10  ;;  %v3821_v49 = vmax.f32 %v3819_v8, %v3820_v6  ;;  %v3930_v60 = vmax.f32 %v3928_v30, %v3929_v19  ;;  %v4039_v11 = vmax.f32 %v4037_v18, %v4038_v15 }
 0xb9c   :  { %v3713_v22 = vrot.slane %v3712_v35, 2  ;;  %v3822_v23 = vrot.slane %v3821_v49, 2  ;;  %v3931_v38 = vrot.slane %v3930_v60, 2  ;;  %v4040_v3 = vrot.slane %v4039_v11, 2 }
 0xb9e   :  { %v3714_v36 = vmax.f32 %v3712_v35, %v3713_v22  ;;  %v3823_v1 = vmax.f32 %v3821_v49, %v3822_v23  ;;  %v3932_v40 = vmax.f32 %v3930_v60, %v3931_v38  ;;  %v4041_v61 = vmax.f32 %v4039_v11, %v4040_v3 }
 0xba0   :  { %v3715_v21 = vrot.slane %v3714_v36, 1  ;;  %v3824_v58 = vrot.slane %v3823_v1, 1  ;;  %v3933_v12 = vrot.slane %v3932_v40, 1  ;;  %v4042_v24 = vrot.slane %v4041_v61, 1 }
 0xba2   :  { %v15135_v46 = vmax.f32 %v3714_v36, %v3715_v21  ;;  %v15137_v34 = vmax.f32 %v3823_v1, %v3824_v58  ;;  %v15139_v37 = vmax.f32 %v3932_v40, %v3933_v12  ;;  %v15141_v47 = vmax.f32 %v4041_v61, %v4042_v24 }
 0xba4   :  { %v3717_v26 = vsub.f32 %v3708_v41, %v15135_v46  ;;  %v3826_v28 = vsub.f32 %v3817_v54, %v15137_v34  ;;  %v3935_v31 = vsub.f32 %v3926_v59, %v15139_v37  ;;  %v4044_v42 = vsub.f32 %v4035_v13, %v15141_v47 }
 0xba5   :  { %v4045_v48 = vsub.f32 %v4036_v39, %v15141_v47  ;;  %v3718_v32 = vsub.f32 %v3709_v55, %v15135_v46  ;;  %v3827_v45 = vsub.f32 %v3818_v56, %v15137_v34  ;;  %v3936_v7 = vsub.f32 %v3927_v57, %v15139_v37 }
 0xba6   :  { %v3719_v43 = vmul.f32 1.442695, %v3717_v26  ;;  %v3828_v2 = vmul.f32 1.442695, %v3826_v28  ;;  %v3937_v62 = vmul.f32 1.442695, %v3935_v31 }
 0xba7   :  { %v4046_v53 = vmul.f32 1.442695, %v4044_v42  ;;  %v4048_v41 = vmul.f32 1.442695, %v4045_v48  ;;  %v3721_v54 = vmul.f32 1.442695, %v3718_v32 }
 0xba8   :  { %13908 = vpow2.f32 %v3719_v43  ;;  %v3830_v59 = vmul.f32 1.442695, %v3827_v45  ;;  %v3939_v13 = vmul.f32 1.442695, %v3936_v7 }
 0xba9   :  { %13910 = vpow2.f32 %v3828_v2 }
 0xbaa   :  { %13912 = vpow2.f32 %v3937_v62 }
 0xbab   :  { %13914 = vpow2.f32 %v4046_v53 }
 0xbac   :  { %13916 = vpow2.f32 %v4048_v41 }
 0xbad   :  { %13918 = vpow2.f32 %v3721_v54 }
 0xbae   :  { %13920 = vpow2.f32 %v3830_v59 }
 0xbaf   :  { %13922 = vpow2.f32 %v3939_v13 }
 0xbb2   :  { %v13909_v55 = vpop.eup %13908 }
 0xbb3   :  { %v13911_v39 = vpop.eup %13910 }
 0xbb4   :  { %v13913_v63 = vpop.eup %13912 }
 0xbb5   :  { %v13915_v8 = vpop.eup %13914 }
 0xbb6   :  { %v13917_v56 = vpop.eup %13916 }
 0xbb7   :  { %v13919_v30 = vpop.eup %13918  ;;  %v13569_v18 = vpack.c.bf16 %v13917_v56, %v13915_v8 }
 0xbb8   :  { %v13921_v57 = vpop.eup %13920  ;;  %v13560_v10 = vpack.c.bf16 %v13919_v30, %v13909_v55 }
 0xbb9   :  { %v13923_v6 = vpop.eup %13922  ;;  %v13563_v19 = vpack.c.bf16 %v13921_v57, %v13911_v39 }
 0xbba   :  { %13561 = vmatpush3.bf16.msra.mxu0 %v13560_v10  ;;  %v13566_v15 = vpack.c.bf16 %v13923_v6, %v13913_v63 }
 0xbbb   :  { %13564 = vmatpush3.bf16.msra.mxu1 %v13563_v19  ;;  %13565 = vmatprep.subr.bf16.mxu0 %v14433_v9 }
 0xbbc   :  { %13568 = vmatprep.subr.bf16.mxu1 %v14433_v9 }
 0xbbd   :  { %12911 = vmatmul.mubr.msk.f32.vlgmr.msra.gmra.mrb[40].mxu0 %vm97_vm0, %v14975_v17 }
 0xbbe   :  { %12918 = vmatmul.mubr.msk.f32.vlgmr.msra.gmra.mrb[40].mxu1 %vm97_vm0, %v14979_v51  ;;  %13567 = vmatpush3.bf16.msra.mxu0 %v13566_v15 }
 0xbbf   :  { %13570 = vmatpush3.bf16.msra.mxu1 %v13569_v18  ;;  %12924 = vmatprep.mubr.msk.f32.mxu0 %vm14434_vm1, %v14432_v0 }
 0xbc0   :  { %12931 = vmatprep.mubr.msk.f32.mxu1 %vm14434_vm1, %v14432_v0 }
 0xbc1   :  { %12925 = vmatmul.mubr.msk.f32.vlgmr.msra.gmra.mrb[42].mxu0 %vm97_vm0, %v14987_v20 }
 0xbc2   :  { %12932 = vmatmul.mubr.msk.f32.vlgmr.msra.gmra.mrb[42].mxu1 %vm97_vm0, %v14991_v29  ;;  %12936 = vmatprep.mubr.msk.f32.mxu0 %vm879_vm2, %v14998_v50 }
 0xbc3   :  { %12941 = vmatprep.mubr.msk.f32.mxu1 %vm879_vm2, %v15005_v52 }
 0xc90   :  { %v3789_v17 = vpop.f32.mrb[40].mxu0 }
 0xc91   :  { %13924 = vlog2.f32 %v3789_v17  ;;  %v3898_v51 = vpop.f32.mrb[40].mxu1  ;;  %v12912_v35 = vpop.f32.mrb[41].mxu0 }
 0xc92   :  { %13926 = vlog2.f32 %v3898_v51  ;;  %v12919_v49 = vpop.f32.mrb[41].mxu1 }
 0xc94   :  { %v4007_v60 = vpop.f32.mrb[42].mxu0 }
 0xc95   :  { %13928 = vlog2.f32 %v4007_v60  ;;  %v4116_v11 = vpop.f32.mrb[42].mxu1  ;;  %v12926_v22 = vpop.f32.mrb[43].mxu0 }
 0xc96   :  { %13930 = vlog2.f32 %v4116_v11  ;;  %v12933_v20 = vpop.f32.mrb[43].mxu1 }
 0xc9b   :  { %v13925_v23 = vpop.eup %13924 }
 0xc9c   :  { %v13927_v29 = vpop.eup %13926  ;;  %v3794_v38 = vmul.f32 0.6931472, %v13925_v23 }
 0xc9d   :  { %v3903_v3 = vmul.f32 0.6931472, %v13927_v29 }
 0xc9e   :  { %v15170_v50 = vadd.f32 %v3794_v38, %v15135_v46 }
 0xc9f   :  { %v13929_v52 = vpop.eup %13928  ;;  %v15173_v36 = vadd.f32 %v3903_v3, %v15137_v34 }
 0xca0   :  { %v13931_v1 = vpop.eup %13930  ;;  %v3796_v40 = vsel %vm521_vm3, %v15170_v50, -inf  ;;  %v4012_v61 = vmul.f32 0.6931472, %v13929_v52 }
 0xca1   :  { %v3797_v21 = vrot.slane %v3796_v40, 4  ;;  %v3905_v58 = vsel %vm521_vm3, %v15173_v36, -inf  ;;  %v4121_v12 = vmul.f32 0.6931472, %v13931_v1 }
 0xca2   :  { %v3906_v24 = vrot.slane %v3905_v58, 4  ;;  %v15180_v26 = vadd.f32 %v4012_v61, %v15139_v37 }
 0xca3   :  { %v3798_v46 = vmax.f32 %v3796_v40, %v3797_v21  ;;  %v15183_v28 = vadd.f32 %v4121_v12, %v15141_v47 }
 0xca4   :  { %v3907_v34 = vmax.f32 %v3905_v58, %v3906_v24  ;;  %v4014_v31 = vsel %vm521_vm3, %v15180_v26, -inf }
 0xca5   :  { %v3799_v42 = vrot.slane %v3798_v46, 2  ;;  %v4015_v48 = vrot.slane %v4014_v31, 4  ;;  %v4123_v32 = vsel %vm521_vm3, %v15183_v28, -inf }
 0xca6   :  { %v3908_v43 = vrot.slane %v3907_v34, 2  ;;  %v4124_v2 = vrot.slane %v4123_v32, 4 }
 0xca7   :  { %v3800_v62 = vmax.f32 %v3798_v46, %v3799_v42  ;;  %v4016_v45 = vmax.f32 %v4014_v31, %v4015_v48 }
 0xca8   :  { %v3909_v53 = vmax.f32 %v3907_v34, %v3908_v43  ;;  %v4125_v37 = vmax.f32 %v4123_v32, %v4124_v2 }
 0xca9   :  { %v3801_v7 = vrot.slane %v3800_v62, 1  ;;  %v4017_v41 = vrot.slane %v4016_v45, 2 }
 0xcaa   :  { %v3910_v54 = vrot.slane %v3909_v53, 1  ;;  %v4126_v47 = vrot.slane %v4125_v37, 2 }
 0xcab   :  { %v3802_v59 = vmax.f32 %v3800_v62, %v3801_v7  ;;  %v4018_v13 = vmax.f32 %v4016_v45, %v4017_v41 }
 0xcac   :  { %v3911_v55 = vmax.f32 %v3909_v53, %v3910_v54  ;;  %v4127_v39 = vmax.f32 %v4125_v37, %v4126_v47 }
 0xcad   :  { %v3803_v63 = vsub.f32 %v15170_v50, %v3802_v59  ;;  %v4019_v8 = vrot.slane %v4018_v13, 1 }
 0xcae   :  { %v3912_v56 = vsub.f32 %v15173_v36, %v3911_v55  ;;  %v4128_v30 = vrot.slane %v4127_v39, 1 }
 0xcaf   :  { %v3804_v18 = vmul.f32 1.442695, %v3803_v63  ;;  %v4020_v57 = vmax.f32 %v4018_v13, %v4019_v8 }
 0xcb0   :  { %v3913_v10 = vmul.f32 1.442695, %v3912_v56  ;;  %v4129_v6 = vmax.f32 %v4127_v39, %v4128_v30 }
 0xcb1   :  { %13932 = vpow2.f32 %v3804_v18  ;;  %v4021_v19 = vsub.f32 %v15180_v26, %v4020_v57 }
 0xcb2   :  { %13934 = vpow2.f32 %v3913_v10  ;;  %v4130_v15 = vsub.f32 %v15183_v28, %v4129_v6 }
 0xcb3   :  { %v4022_v17 = vmul.f32 1.442695, %v4021_v19 }
 0xcb4   :  { %v4131_v51 = vmul.f32 1.442695, %v4130_v15 }
 0xcb5   :  { %13936 = vpow2.f32 %v4022_v17 }
 0xcb6   :  { %13938 = vpow2.f32 %v4131_v51 }
 0xcbb   :  { %v13933_v35 = vpop.eup %13932 }
 0xcbc   :  { %v13935_v49 = vpop.eup %13934  ;;  %v3806_v60 = vsel %vm521_vm3, %v13933_v35, 0.0 }
 0xcbd   :  { %v3915_v11 = vsel %vm521_vm3, %v13935_v49, 0.0  ;;  %v3807_v22 = vrot.slane %v3806_v60, 4 }
 0xcbe   :  { %v3916_v20 = vrot.slane %v3915_v11, 4 }
 0xcbf   :  { %v13937_v23 = vpop.eup %13936  ;;  %v3808_v29 = vadd.f32 %v3807_v22, %v3806_v60 }
 0xcc0   :  { %v13939_v38 = vpop.eup %13938  ;;  %v3917_v3 = vadd.f32 %v3916_v20, %v3915_v11  ;;  %v4024_v52 = vsel %vm521_vm3, %v13937_v23, 0.0 }
 0xcc1   :  { %v3809_v1 = vrot.slane %v3808_v29, 2  ;;  %v4133_v40 = vsel %vm521_vm3, %v13939_v38, 0.0  ;;  %v4025_v61 = vrot.slane %v4024_v52, 4 }
 0xcc2   :  { %v3918_v21 = vrot.slane %v3917_v3, 2  ;;  %v4134_v58 = vrot.slane %v4133_v40, 4 }
 0xcc3   :  { %v3810_v12 = vadd.f32 %v3809_v1, %v3808_v29  ;;  %v4026_v24 = vadd.f32 %v4025_v61, %v4024_v52 }
 0xcc4   :  { %v3919_v46 = vadd.f32 %v3918_v21, %v3917_v3  ;;  %v4135_v34 = vadd.f32 %v4134_v58, %v4133_v40  ;;  %v15248_v58 = vld [vmem:[%s16415_s1 + $0x8] sm:$0xff] }
 0xcc5   :  { %v3811_v31 = vrot.slane %v3810_v12, 1  ;;  %v4027_v42 = vrot.slane %v4026_v24, 2 }
 0xcc6   :  { %v3920_v48 = vrot.slane %v3919_v46, 1  ;;  %v4136_v32 = vrot.slane %v4135_v34, 2 }
 0xcc7   :  { %v3812_v43 = vadd.f32 %v3811_v31, %v3810_v12  ;;  %v4028_v2 = vadd.f32 %v4027_v42, %v4026_v24  ;;  %v15269_v12 = vld [vmem:[%s16415_s1 + $0x30] sm:$0xff]  ;;  %v15278_v24 = vld [vmem:[%s16415_s1 + $0x28] sm:$0xff] }
 0xcc8   :  { %v3921_v62 = vadd.f32 %v3920_v48, %v3919_v46  ;;  %v4137_v45 = vadd.f32 %v4136_v32, %v4135_v34  ;;  %v15285_v46 = vld [vmem:[%s16415_s1 + $0x38] sm:$0xff]  ;;  %v15296_v42 = vld [vmem:[%s16414_s0 + $0x8] sm:$0xff] }
 0xcc9   :  { %13940 = vlog2.f32 %v3812_v43  ;;  %v4029_v53 = vrot.slane %v4028_v2, 1 }
 0xcca   :  { %13942 = vlog2.f32 %v3921_v62  ;;  %v4138_v37 = vrot.slane %v4137_v45, 1 }
 0xccb   :  { %v4030_v7 = vadd.f32 %v4029_v53, %v4028_v2  ;;  %v15302_v2 = vld [vmem:[%s16414_s0] sm:$0xff] }
 0xccc   :  { %v4139_v41 = vadd.f32 %v4138_v37, %v4137_v45 }
 0xccd   :  { %13944 = vlog2.f32 %v4030_v7 }
 0xcce   :  { %13946 = vlog2.f32 %v4139_v41 }
 0xcd3   :  { %v13941_v54 = vpop.eup %13940 }
 0xcd4   :  { %v13943_v47 = vpop.eup %13942  ;;  %v3814_v13 = vmul.f32 0.6931472, %v13941_v54 }
 0xcd5   :  { %v3923_v39 = vmul.f32 0.6931472, %v13943_v47 }
 0xcd6   :  { %v3815_v63 = vadd.f32 %v3814_v13, %v3802_v59 }
 0xcd7   :  { %v13945_v8 = vpop.eup %13944  ;;  %v3924_v56 = vadd.f32 %v3923_v39, %v3911_v55 }
 0xcd8   :  { %v13947_v30 = vpop.eup %13946  ;;  %v3816_v18 = vsub.f32 %v15170_v50, %v3815_v63  ;;  %v4032_v10 = vmul.f32 0.6931472, %v13945_v8 }
 0xcd9   :  { %v3925_v19 = vsub.f32 %v15173_v36, %v3924_v56  ;;  %v4141_v15 = vmul.f32 0.6931472, %v13947_v30 }
 0xcda   :  { %12939 = vmatprep.subr.msk.mxu1 %vm521_vm3, %v3816_v18  ;;  %v4033_v17 = vadd.f32 %v4032_v10, %v4020_v57 }
 0xcdb   :  { %12934 = vmatprep.subr.msk.mxu0 %vm521_vm3, %v3925_v19  ;;  %12940 = vmatpush3.msk.msra.mxu1 %vm521_vm3, %v3816_v18  ;;  %v4142_v51 = vadd.f32 %v4141_v15, %v4129_v6 }
 0xcdc   :  { %12935 = vmatpush3.msk.msra.mxu0 %vm521_vm3, %v3925_v19  ;;  %v4034_v59 = vsub.f32 %v15180_v26, %v4033_v17  ;;  %12942 = vmatmul.mubr.msk.f32.vlgmr.msra.gmra.mrb[44].mxu1 %vm879_vm2, %v15047_v33  ;;  %v15224_v33 = vld [vmem:[%s16415_s1 + $0x10] sm:$0xff] }
 0xcdd   :  { %12937 = vmatmul.mubr.msk.f32.vlgmr.msra.gmra.mrb[44].mxu0 %vm879_vm2, %v15054_v4  ;;  %v4143_v50 = vsub.f32 %v15183_v28, %v4142_v51  ;;  %12951 = vmatprep.mubr.msk.f32.mxu1 %vm879_vm2, %v15062_v5  ;;  %v15231_v4 = vld [vmem:[%s16415_s1] sm:$0xff] }
 0xcde   :  { %12949 = vmatprep.subr.msk.mxu1 %vm521_vm3, %v4034_v59  ;;  %12946 = vmatprep.mubr.msk.f32.mxu0 %vm879_vm2, %v15070_v25 }
 0xcdf   :  { %12944 = vmatprep.subr.msk.mxu0 %vm521_vm3, %v4143_v50  ;;  %12950 = vmatpush3.msk.msra.mxu1 %vm521_vm3, %v4034_v59 }
 0xce0   :  { %12945 = vmatpush3.msk.msra.mxu0 %vm521_vm3, %v4143_v50  ;;  %12952 = vmatmul.mubr.msk.f32.vlgmr.msra.gmra.mrb[46].mxu1 %vm879_vm2, %v15080_v14 }
 0xce1   :  { %12947 = vmatmul.mubr.msk.f32.vlgmr.msra.gmra.mrb[46].mxu0 %vm879_vm2, %v15087_v27  ;;  %12965 = vmatprep.mubr.msk.f32.mxu1 %vm97_vm0, %v15224_v33 }
 0xce2   :  { %12958 = vmatprep.mubr.msk.f32.mxu0 %vm97_vm0, %v15231_v4 }
 0xdaf   :  { %v12943_v5 = vpop.f32.mrb[44].mxu1 }
 0xdb0   :  { %v12938_v25 = vpop.f32.mrb[44].mxu0  ;;  %v4295_v14 = vpop.f32.mrb[45].mxu1 }
 0xdb1   :  { %4224 = vrot.lane.b32.xlu1 %v12938_v25, %s14436_s12  ;;  %v4213_v27 = vpop.f32.mrb[45].mxu0 }
 0xdb2   :  { %4222 = vrot.lane.b32.xlu0 %v4213_v27, %s14436_s12 }
 0xdb3   :  { %v12953_v36 = vpop.f32.mrb[46].mxu1 }
 0xdb4   :  { %v12948_v26 = vpop.f32.mrb[46].mxu0  ;;  %v4463_v28 = vpop.f32.mrb[47].mxu1 }
 0xdb5   :  { %4306 = vrot.lane.b32.xlu1 %v12943_v5, %s14435_s11  ;;  %v4379_v55 = vpop.f32.mrb[47].mxu0 }
 0xdb6   :  { %4304 = vrot.lane.b32.xlu0 %v4295_v14, %s14435_s11 }
 0xdb9   :  { %4390 = vrot.lane.b32.xlu1 %v12948_v26, %s14437_s13 }
 0xdba   :  { %4388 = vrot.lane.b32.xlu0 %v4379_v55, %s14437_s13 }
 0xdbd   :  { %4474 = vrot.lane.b32.xlu1 %v12953_v36, %s14438_s15 }
 0xdbe   :  { %4472 = vrot.lane.b32.xlu0 %v4463_v28, %s14438_s15 }
 0xe23   :  { %v4225_v57 = vpop.permute.xlu1 %4224 }
 0xe24   :  { %v4223_v6 = vpop.permute.xlu0 %4222 }
 0xe27   :  { %v4307_v35 = vpop.permute.xlu1 %4306 }
 0xe28   :  { %v4305_v49 = vpop.permute.xlu0 %4304  ;;  %v4309_v11 = vadd.f32 %v4307_v35, %v4225_v57 }
 0xe29   :  { %v4308_v20 = vadd.f32 %v4305_v49, %v4223_v6 }
 0xe2b   :  { %v4391_v60 = vpop.permute.xlu1 %4390 }
 0xe2c   :  { %v4389_v22 = vpop.permute.xlu0 %4388  ;;  %v4393_v23 = vadd.f32 %v4391_v60, %v4309_v11 }
 0xe2d   :  { %v4392_v29 = vadd.f32 %v4389_v22, %v4308_v20 }
 0xe2f   :  { %v4475_v38 = vpop.permute.xlu1 %4474 }
 0xe30   :  { %v4477_v3 = vadd.f32 %v4475_v38, %v4393_v23  ;;  %v4473_v52 = vpop.permute.xlu0 %4472 }
 0xe31   :  { %v4476_v1 = vadd.f32 %v4473_v52, %v4392_v29 }
 0xe32   :  { %v4479_v40 = vmul.f32 %v15106_v44, %v4477_v3  ;;  %v15255_v44 = vld [vmem:[%s16415_s1 + $0x18] sm:$0xff] }
 0xe33   :  { %v4478_v61 = vmul.f32 %v15112_v16, %v4476_v1  ;;  %v15262_v16 = vld [vmem:[%s16415_s1 + $0x20] sm:$0xff] }
 0xe35   :  { %v13571_v21 = vpack.c.bf16 %v4479_v40, %v4478_v61 }
 0xe37   :  { %13572 = vmatprep.subr.bf16.mxu0 %v13571_v21  ;;  %13576 = vmatprep.subr.bf16.mxu1 %v13571_v21 }
 0xe38   :  { %13574 = vmatpush3.bf16.msra.mxu0 %v13571_v21  ;;  %13578 = vmatpush3.bf16.msra.mxu1 %v13571_v21 }
 0xe39   :  { %13580 = vmatprep.subr.bf16.mxu0 %v13571_v21  ;;  %13584 = vmatprep.subr.bf16.mxu1 %v13571_v21 }
 0xe3b   :  { %12959 = vmatmul.mubr.msk.f32.vlgmr.msra.gmra.mrb[48].mxu0 %vm97_vm0, %v15248_v58  ;;  %12966 = vmatmul.mubr.msk.f32.vlgmr.msra.gmra.mrb[48].mxu1 %vm97_vm0, %v15255_v44 }
 0xe3c   :  { %13582 = vmatpush3.bf16.msra.mxu0 %v13571_v21  ;;  %13586 = vmatpush3.bf16.msra.mxu1 %v13571_v21 }
 0xe3d   :  { %12972 = vmatprep.mubr.msk.f32.mxu0 %vm97_vm0, %v15262_v16  ;;  %12979 = vmatprep.mubr.msk.f32.mxu1 %vm97_vm0, %v15269_v12 }
 0xe3e   :  { %13587 = vmatprep.subr.bf16.mxu0 %v14433_v9  ;;  %13590 = vmatprep.subr.bf16.mxu1 %v14433_v9 }
 0xe3f   :  { %12973 = vmatmul.mubr.msk.f32.vlgmr.msra.gmra.mrb[50].mxu0 %vm97_vm0, %v15278_v24  ;;  %12980 = vmatmul.mubr.msk.f32.vlgmr.msra.gmra.mrb[50].mxu1 %vm97_vm0, %v15285_v46 }
 0xe40   :  { %12986 = vmatprep.mubr.msk.f32.mxu0 %vm14434_vm1, %v14432_v0  ;;  %12993 = vmatprep.mubr.msk.f32.mxu1 %vm14434_vm1, %v14432_v0 }
 0xf0e   :  { %v12960_v34 = vpop.f32.mrb[48].mxu0  ;;  %v12967_v31 = vpop.f32.mrb[48].mxu1 }
 0xf0f   :  { %v4781_v48 = vadd.f32 %v15296_v42, %v12960_v34  ;;  %v4546_v32 = vpop.f32.mrb[49].mxu0  ;;  %v4621_v43 = vpop.f32.mrb[49].mxu1 }
 0xf10   :  { %v4780_v62 = vadd.f32 %v15302_v2, %v4546_v32 }
 0xf11   :  { %v4783_v45 = vadd.f32 %v12967_v31, %v4781_v48 }
 0xf12   :  { %v4782_v53 = vadd.f32 %v4780_v62, %v4621_v43  ;;  %v12974_v37 = vpop.f32.mrb[50].mxu0  ;;  %v12981_v7 = vpop.f32.mrb[50].mxu1 }
 0xf13   :  { %v4785_v41 = vadd.f32 %v12974_v37, %v4783_v45  ;;  %v4696_v54 = vpop.f32.mrb[51].mxu0  ;;  %v4771_v47 = vpop.f32.mrb[51].mxu1 }
 0xf14   :  { %v4784_v13 = vadd.f32 %v4782_v53, %v4696_v54 }
 0xf15   :  { %v4787_v39 = vadd.f32 %v12981_v7, %v4785_v41 }
 0xf16   :  { %v4786_v63 = vadd.f32 %v4784_v13, %v4771_v47 }
 0xf17   :  { %v4789_v8 = vsub.f32 %v4787_v39, %v12960_v34  ;;  %v4898_v56 = vsub.f32 %v4787_v39, %v12967_v31  ;;  %v5007_v30 = vsub.f32 %v4787_v39, %v12974_v37  ;;  %v5116_v18 = vsub.f32 %v4787_v39, %v12981_v7 }
 0xf18   :  { %v4788_v10 = vsub.f32 %v4786_v63, %v4546_v32  ;;  %v4897_v19 = vsub.f32 %v4786_v63, %v4621_v43  ;;  %v5006_v15 = vsub.f32 %v4786_v63, %v4696_v54  ;;  %v5115_v17 = vsub.f32 %v4786_v63, %v4771_v47 }
 0xf1a   :  { %v4790_v51 = vmax.f32 %v4788_v10, %v4789_v8  ;;  %v4899_v59 = vmax.f32 %v4897_v19, %v4898_v56  ;;  %v5008_v50 = vmax.f32 %v5006_v15, %v5007_v30  ;;  %v5117_v5 = vmax.f32 %v5115_v17, %v5116_v18 }
 0xf1c   :  { %v4791_v25 = vrot.slane %v4790_v51, 4  ;;  %v4900_v14 = vrot.slane %v4899_v59, 4  ;;  %v5009_v27 = vrot.slane %v5008_v50, 4  ;;  %v5118_v36 = vrot.slane %v5117_v5, 4 }
 0xf1e   :  { %v4792_v26 = vmax.f32 %v4790_v51, %v4791_v25  ;;  %v4901_v28 = vmax.f32 %v4899_v59, %v4900_v14  ;;  %v5010_v55 = vmax.f32 %v5008_v50, %v5009_v27  ;;  %v5119_v57 = vmax.f32 %v5117_v5, %v5118_v36  ;;  %v15323_v25 = vld [vmem:[#allocation2] sm:$0xf]  ;;  %v15327_v14 = vld [vmem:[#allocation2 + $0x4] sm:$0xf]  ;;  %v15335_v27 = vld [vmem:[#allocation2 + $0x8] sm:$0xf] }
 0xf1f   :  { %v15339_v36 = vld [vmem:[#allocation2 + $0xc] sm:$0xf] }
 0xf20   :  { %v4793_v6 = vrot.slane %v4792_v26, 2  ;;  %v4902_v35 = vrot.slane %v4901_v28, 2  ;;  %v5011_v49 = vrot.slane %v5010_v55, 2  ;;  %v5120_v60 = vrot.slane %v5119_v57, 2 }
 0xf22   :  { %v4794_v11 = vmax.f32 %v4792_v26, %v4793_v6  ;;  %v4903_v22 = vmax.f32 %v4901_v28, %v4902_v35  ;;  %v5012_v20 = vmax.f32 %v5010_v55, %v5011_v49  ;;  %v5121_v23 = vmax.f32 %v5119_v57, %v5120_v60  ;;  %v15346_v26 = vld [vmem:[%s16417_s3] sm:$0xff]  ;;  %v15353_v28 = vld [vmem:[%s16417_s3 + $0x10] sm:$0xff] }
 0xf24   :  { %v4795_v29 = vrot.slane %v4794_v11, 1  ;;  %v4904_v38 = vrot.slane %v4903_v22, 1  ;;  %v5013_v3 = vrot.slane %v5012_v20, 1  ;;  %v5122_v52 = vrot.slane %v5121_v23, 1 }
 0xf26   :  { %v15305_v1 = vmax.f32 %v4794_v11, %v4795_v29  ;;  %v15307_v40 = vmax.f32 %v4903_v22, %v4904_v38  ;;  %v15309_v61 = vmax.f32 %v5012_v20, %v5013_v3  ;;  %v15311_v21 = vmax.f32 %v5121_v23, %v5122_v52 }
 0xf28   :  { %v4797_v34 = vsub.f32 %v4788_v10, %v15305_v1  ;;  %v4906_v31 = vsub.f32 %v4897_v19, %v15307_v40  ;;  %v5015_v48 = vsub.f32 %v5006_v15, %v15309_v61  ;;  %v5124_v32 = vsub.f32 %v5115_v17, %v15311_v21 }
 0xf29   :  { %v5125_v43 = vsub.f32 %v5116_v18, %v15311_v21  ;;  %v4798_v62 = vsub.f32 %v4789_v8, %v15305_v1  ;;  %v4907_v7 = vsub.f32 %v4898_v56, %v15307_v40  ;;  %v5016_v54 = vsub.f32 %v5007_v30, %v15309_v61 }
 0xf2a   :  { %v4799_v45 = vmul.f32 1.442695, %v4797_v34  ;;  %v4908_v53 = vmul.f32 1.442695, %v4906_v31  ;;  %v5017_v37 = vmul.f32 1.442695, %v5015_v48 }
 0xf2b   :  { %v5126_v41 = vmul.f32 1.442695, %v5124_v32  ;;  %v5128_v47 = vmul.f32 1.442695, %v5125_v43  ;;  %v4801_v13 = vmul.f32 1.442695, %v4798_v62 }
 0xf2c   :  { %13948 = vpow2.f32 %v4799_v45  ;;  %v4910_v39 = vmul.f32 1.442695, %v4907_v7  ;;  %v5019_v63 = vmul.f32 1.442695, %v5016_v54 }
 0xf2d   :  { %13950 = vpow2.f32 %v4908_v53 }
 0xf2e   :  { %13952 = vpow2.f32 %v5017_v37 }
 0xf2f   :  { %13954 = vpow2.f32 %v5126_v41 }
 0xf30   :  { %13956 = vpow2.f32 %v5128_v47 }
 0xf31   :  { %13958 = vpow2.f32 %v4801_v13 }
 0xf32   :  { %13960 = vpow2.f32 %v4910_v39 }
 0xf33   :  { %13962 = vpow2.f32 %v5019_v63 }
 0xf36   :  { %v13949_v8 = vpop.eup %13948 }
 0xf37   :  { %v13951_v18 = vpop.eup %13950 }
 0xf38   :  { %v13953_v10 = vpop.eup %13952 }
 0xf39   :  { %v13955_v19 = vpop.eup %13954 }
 0xf3a   :  { %v13957_v56 = vpop.eup %13956 }
 0xf3b   :  { %v13959_v15 = vpop.eup %13958  ;;  %v13597_v17 = vpack.c.bf16 %v13957_v56, %v13955_v19 }
 0xf3c   :  { %v13961_v30 = vpop.eup %13960  ;;  %v13588_v51 = vpack.c.bf16 %v13959_v15, %v13949_v8 }
 0xf3d   :  { %v13963_v59 = vpop.eup %13962  ;;  %v13591_v50 = vpack.c.bf16 %v13961_v30, %v13951_v18 }
 0xf3e   :  { %13589 = vmatpush3.bf16.msra.mxu0 %v13588_v51  ;;  %v13594_v5 = vpack.c.bf16 %v13963_v59, %v13953_v10 }
 0xf3f   :  { %13592 = vmatpush3.bf16.msra.mxu1 %v13591_v50  ;;  %13593 = vmatprep.subr.bf16.mxu0 %v14433_v9 }
 0xf40   :  { %13596 = vmatprep.subr.bf16.mxu1 %v14433_v9 }
 0xf41   :  { %12987 = vmatmul.mubr.msk.f32.vlgmr.msra.gmra.mrb[52].mxu0 %vm97_vm0, %v15323_v25 }
 0xf42   :  { %12994 = vmatmul.mubr.msk.f32.vlgmr.msra.gmra.mrb[52].mxu1 %vm97_vm0, %v15327_v14  ;;  %13595 = vmatpush3.bf16.msra.mxu0 %v13594_v5 }
 0xf43   :  { %13598 = vmatpush3.bf16.msra.mxu1 %v13597_v17  ;;  %13000 = vmatprep.mubr.msk.f32.mxu0 %vm14434_vm1, %v14432_v0 }
 0xf44   :  { %13007 = vmatprep.mubr.msk.f32.mxu1 %vm14434_vm1, %v14432_v0 }
 0xf45   :  { %13001 = vmatmul.mubr.msk.f32.vlgmr.msra.gmra.mrb[54].mxu0 %vm97_vm0, %v15335_v27 }
 0xf46   :  { %13008 = vmatmul.mubr.msk.f32.vlgmr.msra.gmra.mrb[54].mxu1 %vm97_vm0, %v15339_v36  ;;  %13012 = vmatprep.mubr.msk.f32.mxu0 %vm879_vm2, %v15346_v26 }
 0xf47   :  { %13017 = vmatprep.mubr.msk.f32.mxu1 %vm879_vm2, %v15353_v28 }
0x1014   :  { %v4869_v55 = vpop.f32.mrb[52].mxu0 }
0x1015   :  { %13964 = vlog2.f32 %v4869_v55  ;;  %v4978_v57 = vpop.f32.mrb[52].mxu1  ;;  %v12988_v6 = vpop.f32.mrb[53].mxu0 }
0x1016   :  { %13966 = vlog2.f32 %v4978_v57  ;;  %v12995_v35 = vpop.f32.mrb[53].mxu1 }
0x1018   :  { %v5087_v49 = vpop.f32.mrb[54].mxu0 }
0x1019   :  { %13968 = vlog2.f32 %v5087_v49  ;;  %v5196_v60 = vpop.f32.mrb[54].mxu1  ;;  %v13002_v11 = vpop.f32.mrb[55].mxu0 }
0x101a   :  { %13970 = vlog2.f32 %v5196_v60  ;;  %v13009_v22 = vpop.f32.mrb[55].mxu1 }
0x101f   :  { %v13965_v20 = vpop.eup %13964 }
0x1020   :  { %v13967_v23 = vpop.eup %13966  ;;  %v4874_v29 = vmul.f32 0.6931472, %v13965_v20 }
0x1021   :  { %v4983_v38 = vmul.f32 0.6931472, %v13967_v23 }
0x1022   :  { %v15358_v3 = vadd.f32 %v4874_v29, %v15305_v1 }
0x1023   :  { %v13969_v52 = vpop.eup %13968  ;;  %v15361_v34 = vadd.f32 %v4983_v38, %v15307_v40 }
0x1024   :  { %v13971_v31 = vpop.eup %13970  ;;  %v4876_v48 = vsel %vm521_vm3, %v15358_v3, -inf  ;;  %v5092_v32 = vmul.f32 0.6931472, %v13969_v52 }
0x1025   :  { %v4877_v43 = vrot.slane %v4876_v48, 4  ;;  %v4985_v62 = vsel %vm521_vm3, %v15361_v34, -inf  ;;  %v5201_v45 = vmul.f32 0.6931472, %v13971_v31 }
0x1026   :  { %v4986_v53 = vrot.slane %v4985_v62, 4  ;;  %v15368_v37 = vadd.f32 %v5092_v32, %v15309_v61 }
0x1027   :  { %v4878_v1 = vmax.f32 %v4876_v48, %v4877_v43  ;;  %v15371_v7 = vadd.f32 %v5201_v45, %v15311_v21 }
0x1028   :  { %v4987_v40 = vmax.f32 %v4985_v62, %v4986_v53  ;;  %v5094_v41 = vsel %vm521_vm3, %v15368_v37, -inf }
0x1029   :  { %v4879_v54 = vrot.slane %v4878_v1, 2  ;;  %v5095_v47 = vrot.slane %v5094_v41, 4  ;;  %v5203_v13 = vsel %vm521_vm3, %v15371_v7, -inf }
0x102a   :  { %v4988_v39 = vrot.slane %v4987_v40, 2  ;;  %v5204_v63 = vrot.slane %v5203_v13, 4 }
0x102b   :  { %v4880_v8 = vmax.f32 %v4878_v1, %v4879_v54  ;;  %v5096_v18 = vmax.f32 %v5094_v41, %v5095_v47 }
0x102c   :  { %v4989_v10 = vmax.f32 %v4987_v40, %v4988_v39  ;;  %v5205_v61 = vmax.f32 %v5203_v13, %v5204_v63 }
0x102d   :  { %v4881_v19 = vrot.slane %v4880_v8, 1  ;;  %v5097_v56 = vrot.slane %v5096_v18, 2 }
0x102e   :  { %v4990_v15 = vrot.slane %v4989_v10, 1  ;;  %v5206_v21 = vrot.slane %v5205_v61, 2 }
0x102f   :  { %v4882_v17 = vmax.f32 %v4880_v8, %v4881_v19  ;;  %v5098_v30 = vmax.f32 %v5096_v18, %v5097_v56 }
0x1030   :  { %v4991_v51 = vmax.f32 %v4989_v10, %v4990_v15  ;;  %v5207_v59 = vmax.f32 %v5205_v61, %v5206_v21 }
0x1031   :  { %v4883_v50 = vsub.f32 %v15358_v3, %v4882_v17  ;;  %v5099_v5 = vrot.slane %v5098_v30, 1 }
0x1032   :  { %v4992_v55 = vsub.f32 %v15361_v34, %v4991_v51  ;;  %v5208_v57 = vrot.slane %v5207_v59, 1 }
0x1033   :  { %v4884_v6 = vmul.f32 1.442695, %v4883_v50  ;;  %v5100_v35 = vmax.f32 %v5098_v30, %v5099_v5 }
0x1034   :  { %v4993_v49 = vmul.f32 1.442695, %v4992_v55  ;;  %v5209_v60 = vmax.f32 %v5207_v59, %v5208_v57 }
0x1035   :  { %13972 = vpow2.f32 %v4884_v6  ;;  %v5101_v11 = vsub.f32 %v15368_v37, %v5100_v35 }
0x1036   :  { %13974 = vpow2.f32 %v4993_v49  ;;  %v5210_v22 = vsub.f32 %v15371_v7, %v5209_v60 }
0x1037   :  { %v5102_v20 = vmul.f32 1.442695, %v5101_v11 }
0x1038   :  { %v5211_v23 = vmul.f32 1.442695, %v5210_v22 }
0x1039   :  { %13976 = vpow2.f32 %v5102_v20 }
0x103a   :  { %13978 = vpow2.f32 %v5211_v23 }
0x103f   :  { %v13973_v29 = vpop.eup %13972 }
0x1040   :  { %v13975_v38 = vpop.eup %13974  ;;  %v4886_v52 = vsel %vm521_vm3, %v13973_v29, 0.0 }
0x1041   :  { %v4995_v31 = vsel %vm521_vm3, %v13975_v38, 0.0  ;;  %v4887_v48 = vrot.slane %v4886_v52, 4 }
0x1042   :  { %v4996_v32 = vrot.slane %v4995_v31, 4 }
0x1043   :  { %v13977_v43 = vpop.eup %13976  ;;  %v4888_v62 = vadd.f32 %v4887_v48, %v4886_v52 }
0x1044   :  { %v13979_v45 = vpop.eup %13978  ;;  %v4997_v53 = vadd.f32 %v4996_v32, %v4995_v31  ;;  %v5104_v1 = vsel %vm521_vm3, %v13977_v43, 0.0 }
0x1045   :  { %v4889_v40 = vrot.slane %v4888_v62, 2  ;;  %v5213_v41 = vsel %vm521_vm3, %v13979_v45, 0.0  ;;  %v5105_v54 = vrot.slane %v5104_v1, 4 }
0x1046   :  { %v4998_v47 = vrot.slane %v4997_v53, 2  ;;  %v5214_v13 = vrot.slane %v5213_v41, 4 }
0x1047   :  { %v4890_v39 = vadd.f32 %v4889_v40, %v4888_v62  ;;  %v5106_v63 = vadd.f32 %v5105_v54, %v5104_v1 }
0x1048   :  { %v4999_v8 = vadd.f32 %v4998_v47, %v4997_v53  ;;  %v5215_v18 = vadd.f32 %v5214_v13, %v5213_v41 }
0x1049   :  { %v4891_v10 = vrot.slane %v4890_v39, 1  ;;  %v5107_v61 = vrot.slane %v5106_v63, 2 }
0x104a   :  { %v5000_v19 = vrot.slane %v4999_v8, 1  ;;  %v5216_v56 = vrot.slane %v5215_v18, 2 }
0x104b   :  { %v4892_v15 = vadd.f32 %v4891_v10, %v4890_v39  ;;  %v5108_v21 = vadd.f32 %v5107_v61, %v5106_v63 }
0x104c   :  { %v5001_v30 = vadd.f32 %v5000_v19, %v4999_v8  ;;  %v5217_v59 = vadd.f32 %v5216_v56, %v5215_v18 }
0x104d   :  { %13980 = vlog2.f32 %v4892_v15  ;;  %v5109_v50 = vrot.slane %v5108_v21, 1 }
0x104e   :  { %13982 = vlog2.f32 %v5001_v30  ;;  %v5218_v5 = vrot.slane %v5217_v59, 1 }
0x104f   :  { %v5110_v55 = vadd.f32 %v5109_v50, %v5108_v21  ;;  %v15454_v50 = vld [vmem:[%s16420_s6 + $0x8] sm:$0xff] }
0x1050   :  { %v5219_v57 = vadd.f32 %v5218_v5, %v5217_v59 }
0x1051   :  { %13984 = vlog2.f32 %v5110_v55  ;;  %v15460_v55 = vld [vmem:[%s16420_s6] sm:$0xff] }
0x1052   :  { %13986 = vlog2.f32 %v5219_v57 }
0x1057   :  { %v13981_v6 = vpop.eup %13980 }
0x1058   :  { %v13983_v49 = vpop.eup %13982  ;;  %v4894_v11 = vmul.f32 0.6931472, %v13981_v6 }
0x1059   :  { %v5003_v22 = vmul.f32 0.6931472, %v13983_v49 }
0x105a   :  { %v4895_v20 = vadd.f32 %v4894_v11, %v4882_v17 }
0x105b   :  { %v13985_v23 = vpop.eup %13984  ;;  %v5004_v29 = vadd.f32 %v5003_v22, %v4991_v51 }
0x105c   :  { %v13987_v38 = vpop.eup %13986  ;;  %v4896_v52 = vsub.f32 %v15358_v3, %v4895_v20  ;;  %v5112_v31 = vmul.f32 0.6931472, %v13985_v23  ;;  %v15395_v3 = vld [vmem:[%s16417_s3 + $0x18] sm:$0xff] }
0x105d   :  { %v5005_v48 = vsub.f32 %v15361_v34, %v5004_v29  ;;  %v5221_v32 = vmul.f32 0.6931472, %v13987_v38  ;;  %v15402_v34 = vld [vmem:[%s16417_s3 + $0x8] sm:$0xff] }
0x105e   :  { %13015 = vmatprep.subr.msk.mxu1 %vm521_vm3, %v4896_v52  ;;  %v5113_v43 = vadd.f32 %v5112_v31, %v5100_v35  ;;  %v15418_v35 = vld [vmem:[%s16417_s3 + $0x20] sm:$0xff] }
0x105f   :  { %13010 = vmatprep.subr.msk.mxu0 %vm521_vm3, %v5005_v48  ;;  %13016 = vmatpush3.msk.msra.mxu1 %vm521_vm3, %v4896_v52  ;;  %v5222_v62 = vadd.f32 %v5221_v32, %v5209_v60  ;;  %v15435_v60 = vld [vmem:[%s16417_s3 + $0x28] sm:$0xff] }
0x1060   :  { %13011 = vmatpush3.msk.msra.mxu0 %vm521_vm3, %v5005_v48  ;;  %v5114_v17 = vsub.f32 %v15368_v37, %v5113_v43  ;;  %13018 = vmatmul.mubr.msk.f32.vlgmr.msra.gmra.mrb[56].mxu1 %vm879_vm2, %v15395_v3  ;;  %v15410_v37 = vld [vmem:[%s16417_s3 + $0x30] sm:$0xff] }
0x1061   :  { %13013 = vmatmul.mubr.msk.f32.vlgmr.msra.gmra.mrb[56].mxu0 %vm879_vm2, %v15402_v34  ;;  %v5223_v51 = vsub.f32 %v15371_v7, %v5222_v62  ;;  %13027 = vmatprep.mubr.msk.f32.mxu1 %vm879_vm2, %v15410_v37  ;;  %v15428_v7 = vld [vmem:[%s16417_s3 + $0x38] sm:$0xff] }
0x1062   :  { %13025 = vmatprep.subr.msk.mxu1 %vm521_vm3, %v5114_v17  ;;  %13022 = vmatprep.mubr.msk.f32.mxu0 %vm879_vm2, %v15418_v35 }
0x1063   :  { %13020 = vmatprep.subr.msk.mxu0 %vm521_vm3, %v5223_v51  ;;  %13026 = vmatpush3.msk.msra.mxu1 %vm521_vm3, %v5114_v17 }
0x1064   :  { %13021 = vmatpush3.msk.msra.mxu0 %vm521_vm3, %v5223_v51  ;;  %13028 = vmatmul.mubr.msk.f32.vlgmr.msra.gmra.mrb[58].mxu1 %vm879_vm2, %v15428_v7 }
0x1065   :  { %13023 = vmatmul.mubr.msk.f32.vlgmr.msra.gmra.mrb[58].mxu0 %vm879_vm2, %v15435_v60  ;;  %13041 = vmatprep.mubr.msk.f32.mxu1 %vm97_vm0, %v15224_v33 }
0x1066   :  { %13034 = vmatprep.mubr.msk.f32.mxu0 %vm97_vm0, %v15231_v4 }
0x1133   :  { %v13019_v45 = vpop.f32.mrb[56].mxu1 }
0x1134   :  { %v13014_v53 = vpop.f32.mrb[56].mxu0  ;;  %v5375_v1 = vpop.f32.mrb[57].mxu1 }
0x1135   :  { %5304 = vrot.lane.b32.xlu1 %v13014_v53, %s14436_s12  ;;  %v5293_v40 = vpop.f32.mrb[57].mxu0 }
0x1136   :  { %5302 = vrot.lane.b32.xlu0 %v5293_v40, %s14436_s12 }
0x1137   :  { %v13029_v41 = vpop.f32.mrb[58].mxu1 }
0x1138   :  { %v13024_v54 = vpop.f32.mrb[58].mxu0  ;;  %v5543_v47 = vpop.f32.mrb[59].mxu1 }
0x1139   :  { %5386 = vrot.lane.b32.xlu1 %v13019_v45, %s14435_s11  ;;  %v5459_v13 = vpop.f32.mrb[59].mxu0 }
0x113a   :  { %5384 = vrot.lane.b32.xlu0 %v5375_v1, %s14435_s11 }
0x113d   :  { %5470 = vrot.lane.b32.xlu1 %v13024_v54, %s14437_s13 }
0x113e   :  { %5468 = vrot.lane.b32.xlu0 %v5459_v13, %s14437_s13 }
0x1141   :  { %5554 = vrot.lane.b32.xlu1 %v13029_v41, %s14438_s15 }
0x1142   :  { %5552 = vrot.lane.b32.xlu0 %v5543_v47, %s14438_s15 }
0x11a7   :  { %v5305_v33 = vpop.permute.xlu1 %5304 }
0x11a8   :  { %v5303_v4 = vpop.permute.xlu0 %5302 }
0x11ab   :  { %v5387_v39 = vpop.permute.xlu1 %5386 }
0x11ac   :  { %v5385_v63 = vpop.permute.xlu0 %5384  ;;  %v5389_v18 = vadd.f32 %v5387_v39, %v5305_v33 }
0x11ad   :  { %v5388_v61 = vadd.f32 %v5385_v63, %v5303_v4 }
0x11af   :  { %v5471_v8 = vpop.permute.xlu1 %5470 }
0x11b0   :  { %v5469_v10 = vpop.permute.xlu0 %5468  ;;  %v5473_v19 = vadd.f32 %v5471_v8, %v5389_v18 }
0x11b1   :  { %v5472_v56 = vadd.f32 %v5469_v10, %v5388_v61 }
0x11b3   :  { %v5555_v15 = vpop.permute.xlu1 %5554 }
0x11b4   :  { %v5557_v21 = vadd.f32 %v5555_v15, %v5473_v19  ;;  %v5553_v30 = vpop.permute.xlu0 %5552 }
0x11b5   :  { %v5556_v59 = vadd.f32 %v5553_v30, %v5472_v56 }
0x11b6   :  { %v5559_v5 = vmul.f32 %v15454_v50, %v5557_v21 }
0x11b7   :  { %v5558_v57 = vmul.f32 %v15460_v55, %v5556_v59 }
0x11b9   :  { %v13599_v6 = vpack.c.bf16 %v5559_v5, %v5558_v57 }
0x11bb   :  { %13600 = vmatprep.subr.bf16.mxu0 %v13599_v6  ;;  %13604 = vmatprep.subr.bf16.mxu1 %v13599_v6 }
0x11bc   :  { %13602 = vmatpush3.bf16.msra.mxu0 %v13599_v6  ;;  %13606 = vmatpush3.bf16.msra.mxu1 %v13599_v6 }
0x11bd   :  { %13608 = vmatprep.subr.bf16.mxu0 %v13599_v6  ;;  %13612 = vmatprep.subr.bf16.mxu1 %v13599_v6 }
0x11bf   :  { %13035 = vmatmul.mubr.msk.f32.vlgmr.msra.gmra.mrb[60].mxu0 %vm97_vm0, %v15248_v58  ;;  %13042 = vmatmul.mubr.msk.f32.vlgmr.msra.gmra.mrb[60].mxu1 %vm97_vm0, %v15255_v44 }
0x11c0   :  { %13610 = vmatpush3.bf16.msra.mxu0 %v13599_v6  ;;  %13614 = vmatpush3.bf16.msra.mxu1 %v13599_v6 }
0x11c1   :  { %13048 = vmatprep.mubr.msk.f32.mxu0 %vm97_vm0, %v15262_v16  ;;  %13055 = vmatprep.mubr.msk.f32.mxu1 %vm97_vm0, %v15269_v12 }
0x11c2   :  { %13615 = vmatprep.subr.bf16.mxu0 %v14433_v9  ;;  %13618 = vmatprep.subr.bf16.mxu1 %v14433_v9 }
0x11c3   :  { %13049 = vmatmul.mubr.msk.f32.vlgmr.msra.gmra.mrb[62].mxu0 %vm97_vm0, %v15278_v24  ;;  %13056 = vmatmul.mubr.msk.f32.vlgmr.msra.gmra.mrb[62].mxu1 %vm97_vm0, %v15285_v46 }
0x11c4   :  { %13062 = vmatprep.mubr.msk.f32.mxu0 %vm14434_vm1, %v14432_v0  ;;  %13069 = vmatprep.mubr.msk.f32.mxu1 %vm14434_vm1, %v14432_v0 }
0x1292   :  { %v13036_v58 = vpop.f32.mrb[60].mxu0  ;;  %v13043_v44 = vpop.f32.mrb[60].mxu1 }
0x1293   :  { %v5861_v16 = vadd.f32 %v15296_v42, %v13036_v58  ;;  %v5626_v12 = vpop.f32.mrb[61].mxu0  ;;  %v5701_v49 = vpop.f32.mrb[61].mxu1 }
0x1294   :  { %v5860_v11 = vadd.f32 %v15302_v2, %v5626_v12 }
0x1295   :  { %v5863_v22 = vadd.f32 %v13043_v44, %v5861_v16 }
0x1296   :  { %v5862_v20 = vadd.f32 %v5860_v11, %v5701_v49  ;;  %v13050_v24 = vpop.f32.mrb[62].mxu0  ;;  %v13057_v23 = vpop.f32.mrb[62].mxu1 }
0x1297   :  { %v5865_v29 = vadd.f32 %v13050_v24, %v5863_v22  ;;  %v5776_v46 = vpop.f32.mrb[63].mxu0  ;;  %v5851_v38 = vpop.f32.mrb[63].mxu1 }
0x1298   :  { %v5864_v52 = vadd.f32 %v5862_v20, %v5776_v46 }
0x1299   :  { %v5867_v31 = vadd.f32 %v13057_v23, %v5865_v29 }
0x129a   :  { %v5866_v48 = vadd.f32 %v5864_v52, %v5851_v38 }
0x129b   :  { %v5869_v32 = vsub.f32 %v5867_v31, %v13036_v58  ;;  %v5978_v43 = vsub.f32 %v5867_v31, %v13043_v44  ;;  %v6087_v62 = vsub.f32 %v5867_v31, %v13050_v24  ;;  %v6196_v17 = vsub.f32 %v5867_v31, %v13057_v23 }
0x129c   :  { %v5868_v51 = vsub.f32 %v5866_v48, %v5626_v12  ;;  %v5977_v42 = vsub.f32 %v5866_v48, %v5701_v49  ;;  %v6086_v45 = vsub.f32 %v5866_v48, %v5776_v46  ;;  %v6195_v53 = vsub.f32 %v5866_v48, %v5851_v38 }
0x129e   :  { %v5870_v1 = vmax.f32 %v5868_v51, %v5869_v32  ;;  %v5979_v2 = vmax.f32 %v5977_v42, %v5978_v43  ;;  %v6088_v40 = vmax.f32 %v6086_v45, %v6087_v62  ;;  %v6197_v41 = vmax.f32 %v6195_v53, %v6196_v17 }
0x12a0   :  { %v5871_v54 = vrot.slane %v5870_v1, 4  ;;  %v5980_v47 = vrot.slane %v5979_v2, 4  ;;  %v6089_v13 = vrot.slane %v6088_v40, 4  ;;  %v6198_v33 = vrot.slane %v6197_v41, 4 }
0x12a2   :  { %v5872_v4 = vmax.f32 %v5870_v1, %v5871_v54  ;;  %v5981_v39 = vmax.f32 %v5979_v2, %v5980_v47  ;;  %v6090_v63 = vmax.f32 %v6088_v40, %v6089_v13  ;;  %v6199_v8 = vmax.f32 %v6197_v41, %v6198_v33 }
0x12a4   :  { %v5873_v18 = vrot.slane %v5872_v4, 2  ;;  %v5982_v10 = vrot.slane %v5981_v39, 2  ;;  %v6091_v61 = vrot.slane %v6090_v63, 2  ;;  %v6200_v19 = vrot.slane %v6199_v8, 2 }
0x12a6   :  { %v5874_v56 = vmax.f32 %v5872_v4, %v5873_v18  ;;  %v5983_v15 = vmax.f32 %v5981_v39, %v5982_v10  ;;  %v6092_v21 = vmax.f32 %v6090_v63, %v6091_v61  ;;  %v6201_v30 = vmax.f32 %v6199_v8, %v6200_v19 }
0x12a8   :  { %v5875_v59 = vrot.slane %v5874_v56, 1  ;;  %v5984_v5 = vrot.slane %v5983_v15, 1  ;;  %v6093_v57 = vrot.slane %v6092_v21, 1  ;;  %v6202_v6 = vrot.slane %v6201_v30, 1 }
0x12aa   :  { %v15483_v58 = vmax.f32 %v5874_v56, %v5875_v59  ;;  %v15485_v44 = vmax.f32 %v5983_v15, %v5984_v5  ;;  %v15487_v16 = vmax.f32 %v6092_v21, %v6093_v57  ;;  %v15489_v12 = vmax.f32 %v6201_v30, %v6202_v6 }
0x12ac   :  { %v5877_v49 = vsub.f32 %v5868_v51, %v15483_v58  ;;  %v5986_v11 = vsub.f32 %v5977_v42, %v15485_v44  ;;  %v6095_v22 = vsub.f32 %v6086_v45, %v15487_v16  ;;  %v6204_v20 = vsub.f32 %v6195_v53, %v15489_v12 }
0x12ad   :  { %v6205_v24 = vsub.f32 %v6196_v17, %v15489_v12  ;;  %v5878_v23 = vsub.f32 %v5869_v32, %v15483_v58  ;;  %v5987_v52 = vsub.f32 %v5978_v43, %v15485_v44  ;;  %v6096_v48 = vsub.f32 %v6087_v62, %v15487_v16 }
0x12ae   :  { %v5879_v29 = vmul.f32 1.442695, %v5877_v49  ;;  %v5988_v46 = vmul.f32 1.442695, %v5986_v11  ;;  %v6097_v38 = vmul.f32 1.442695, %v6095_v22 }
0x12af   :  { %v6206_v31 = vmul.f32 1.442695, %v6204_v20  ;;  %v6208_v51 = vmul.f32 1.442695, %v6205_v24  ;;  %v5881_v42 = vmul.f32 1.442695, %v5878_v23 }
0x12b0   :  { %13988 = vpow2.f32 %v5879_v29  ;;  %v5990_v45 = vmul.f32 1.442695, %v5987_v52  ;;  %v6099_v53 = vmul.f32 1.442695, %v6096_v48 }
0x12b1   :  { %13990 = vpow2.f32 %v5988_v46 }
0x12b2   :  { %13992 = vpow2.f32 %v6097_v38 }
0x12b3   :  { %13994 = vpow2.f32 %v6206_v31 }
0x12b4   :  { %13996 = vpow2.f32 %v6208_v51 }
0x12b5   :  { %13998 = vpow2.f32 %v5881_v42 }
0x12b6   :  { %14000 = vpow2.f32 %v5990_v45 }
0x12b7   :  { %14002 = vpow2.f32 %v6099_v53 }
0x12ba   :  { %v13989_v32 = vpop.eup %13988 }
0x12bb   :  { %v13991_v17 = vpop.eup %13990 }
0x12bc   :  { %v13993_v1 = vpop.eup %13992 }
0x12bd   :  { %v13995_v2 = vpop.eup %13994 }
0x12be   :  { %v13997_v43 = vpop.eup %13996 }
0x12bf   :  { %v13999_v40 = vpop.eup %13998  ;;  %v13625_v41 = vpack.c.bf16 %v13997_v43, %v13995_v2 }
0x12c0   :  { %v14001_v62 = vpop.eup %14000  ;;  %v13616_v54 = vpack.c.bf16 %v13999_v40, %v13989_v32 }
0x12c1   :  { %v14003_v47 = vpop.eup %14002  ;;  %v13619_v13 = vpack.c.bf16 %v14001_v62, %v13991_v17 }
0x12c2   :  { %13617 = vmatpush3.bf16.msra.mxu0 %v13616_v54  ;;  %v13622_v33 = vpack.c.bf16 %v14003_v47, %v13993_v1 }
0x12c3   :  { %13620 = vmatpush3.bf16.msra.mxu1 %v13619_v13  ;;  %13621 = vmatprep.subr.bf16.mxu0 %v14433_v9 }
0x12c4   :  { %13624 = vmatprep.subr.bf16.mxu1 %v14433_v9 }
0x12c5   :  { %13063 = vmatmul.mubr.msk.f32.vlgmr.msra.gmra.mrb[64].mxu0 %vm97_vm0, %v15323_v25 }
0x12c6   :  { %13070 = vmatmul.mubr.msk.f32.vlgmr.msra.gmra.mrb[64].mxu1 %vm97_vm0, %v15327_v14  ;;  %13623 = vmatpush3.bf16.msra.mxu0 %v13622_v33 }
0x12c7   :  { %13626 = vmatpush3.bf16.msra.mxu1 %v13625_v41  ;;  %13076 = vmatprep.mubr.msk.f32.mxu0 %vm14434_vm1, %v14432_v0 }
0x12c8   :  { %13083 = vmatprep.mubr.msk.f32.mxu1 %vm14434_vm1, %v14432_v0 }
0x12c9   :  { %13077 = vmatmul.mubr.msk.f32.vlgmr.msra.gmra.mrb[66].mxu0 %vm97_vm0, %v15335_v27 }
0x12ca   :  { %13084 = vmatmul.mubr.msk.f32.vlgmr.msra.gmra.mrb[66].mxu1 %vm97_vm0, %v15339_v36  ;;  %13088 = vmatprep.mubr.msk.f32.mxu0 %vm879_vm2, %v15346_v26 }
0x12cb   :  { %13093 = vmatprep.mubr.msk.f32.mxu1 %vm879_vm2, %v15353_v28 }
0x1398   :  { %v5949_v25 = vpop.f32.mrb[64].mxu0 }
0x1399   :  { %14004 = vlog2.f32 %v5949_v25  ;;  %v6058_v14 = vpop.f32.mrb[64].mxu1  ;;  %v13064_v4 = vpop.f32.mrb[65].mxu0 }
0x139a   :  { %14006 = vlog2.f32 %v6058_v14  ;;  %v13071_v39 = vpop.f32.mrb[65].mxu1 }
0x139c   :  { %v6167_v63 = vpop.f32.mrb[66].mxu0 }
0x139d   :  { %14008 = vlog2.f32 %v6167_v63  ;;  %v6276_v8 = vpop.f32.mrb[66].mxu1  ;;  %v13078_v18 = vpop.f32.mrb[67].mxu0 }
0x139e   :  { %14010 = vlog2.f32 %v6276_v8  ;;  %v13085_v27 = vpop.f32.mrb[67].mxu1 }
0x13a3   :  { %v14005_v10 = vpop.eup %14004 }
0x13a4   :  { %v14007_v36 = vpop.eup %14006  ;;  %v5954_v61 = vmul.f32 0.6931472, %v14005_v10 }
0x13a5   :  { %v6063_v19 = vmul.f32 0.6931472, %v14007_v36 }
0x13a6   :  { %v15518_v26 = vadd.f32 %v5954_v61, %v15483_v58 }
0x13a7   :  { %v14009_v28 = vpop.eup %14008  ;;  %v15521_v56 = vadd.f32 %v6063_v19, %v15485_v44 }
0x13a8   :  { %v14011_v15 = vpop.eup %14010  ;;  %v5956_v21 = vsel %vm521_vm3, %v15518_v26, -inf  ;;  %v6172_v30 = vmul.f32 0.6931472, %v14009_v28 }
0x13a9   :  { %v5957_v59 = vrot.slane %v5956_v21, 4  ;;  %v6065_v5 = vsel %vm521_vm3, %v15521_v56, -inf  ;;  %v6281_v57 = vmul.f32 0.6931472, %v14011_v15 }
0x13aa   :  { %v6066_v6 = vrot.slane %v6065_v5, 4  ;;  %v15528_v49 = vadd.f32 %v6172_v30, %v15487_v16 }
0x13ab   :  { %v5958_v58 = vmax.f32 %v5956_v21, %v5957_v59  ;;  %v15531_v11 = vadd.f32 %v6281_v57, %v15489_v12 }
0x13ac   :  { %v6067_v44 = vmax.f32 %v6065_v5, %v6066_v6  ;;  %v6174_v22 = vsel %vm521_vm3, %v15528_v49, -inf }
0x13ad   :  { %v5959_v20 = vrot.slane %v5958_v58, 2  ;;  %v6175_v24 = vrot.slane %v6174_v22, 4  ;;  %v6283_v23 = vsel %vm521_vm3, %v15531_v11, -inf }
0x13ae   :  { %v6068_v29 = vrot.slane %v6067_v44, 2  ;;  %v6284_v46 = vrot.slane %v6283_v23, 4 }
0x13af   :  { %v5960_v38 = vmax.f32 %v5958_v58, %v5959_v20  ;;  %v6176_v52 = vmax.f32 %v6174_v22, %v6175_v24 }
0x13b0   :  { %v6069_v31 = vmax.f32 %v6067_v44, %v6068_v29  ;;  %v6285_v16 = vmax.f32 %v6283_v23, %v6284_v46 }
0x13b1   :  { %v5961_v48 = vrot.slane %v5960_v38, 1  ;;  %v6177_v51 = vrot.slane %v6176_v52, 2 }
0x13b2   :  { %v6070_v42 = vrot.slane %v6069_v31, 1  ;;  %v6286_v12 = vrot.slane %v6285_v16, 2 }
0x13b3   :  { %v5962_v45 = vmax.f32 %v5960_v38, %v5961_v48  ;;  %v6178_v53 = vmax.f32 %v6176_v52, %v6177_v51 }
0x13b4   :  { %v6071_v32 = vmax.f32 %v6069_v31, %v6070_v42  ;;  %v6287_v17 = vmax.f32 %v6285_v16, %v6286_v12 }
0x13b5   :  { %v5963_v1 = vsub.f32 %v15518_v26, %v5962_v45  ;;  %v6179_v2 = vrot.slane %v6178_v53, 1 }
0x13b6   :  { %v6072_v43 = vsub.f32 %v15521_v56, %v6071_v32  ;;  %v6288_v40 = vrot.slane %v6287_v17, 1 }
0x13b7   :  { %v5964_v41 = vmul.f32 1.442695, %v5963_v1  ;;  %v6180_v62 = vmax.f32 %v6178_v53, %v6179_v2 }
0x13b8   :  { %v6073_v54 = vmul.f32 1.442695, %v6072_v43  ;;  %v6289_v47 = vmax.f32 %v6287_v17, %v6288_v40 }
0x13b9   :  { %14012 = vpow2.f32 %v5964_v41  ;;  %v6181_v13 = vsub.f32 %v15528_v49, %v6180_v62 }
0x13ba   :  { %14014 = vpow2.f32 %v6073_v54  ;;  %v6290_v33 = vsub.f32 %v15531_v11, %v6289_v47 }
0x13bb   :  { %v6182_v25 = vmul.f32 1.442695, %v6181_v13 }
0x13bc   :  { %v6291_v14 = vmul.f32 1.442695, %v6290_v33 }
0x13bd   :  { %14016 = vpow2.f32 %v6182_v25 }
0x13be   :  { %14018 = vpow2.f32 %v6291_v14 }
0x13c3   :  { %v14013_v4 = vpop.eup %14012 }
0x13c4   :  { %v14015_v39 = vpop.eup %14014  ;;  %v5966_v63 = vsel %vm521_vm3, %v14013_v4, 0.0 }
0x13c5   :  { %v6075_v8 = vsel %vm521_vm3, %v14015_v39, 0.0  ;;  %v5967_v18 = vrot.slane %v5966_v63, 4 }
0x13c6   :  { %v6076_v27 = vrot.slane %v6075_v8, 4 }
0x13c7   :  { %v14017_v10 = vpop.eup %14016  ;;  %v5968_v36 = vadd.f32 %v5967_v18, %v5966_v63 }
0x13c8   :  { %v14019_v61 = vpop.eup %14018  ;;  %v6077_v19 = vadd.f32 %v6076_v27, %v6075_v8  ;;  %v6184_v28 = vsel %vm521_vm3, %v14017_v10, 0.0 }
0x13c9   :  { %v5969_v15 = vrot.slane %v5968_v36, 2  ;;  %v6293_v21 = vsel %vm521_vm3, %v14019_v61, 0.0  ;;  %v6185_v30 = vrot.slane %v6184_v28, 4 }
0x13ca   :  { %v6078_v59 = vrot.slane %v6077_v19, 2  ;;  %v6294_v5 = vrot.slane %v6293_v21, 4 }
0x13cb   :  { %v5970_v57 = vadd.f32 %v5969_v15, %v5968_v36  ;;  %v6186_v6 = vadd.f32 %v6185_v30, %v6184_v28 }
0x13cc   :  { %v6079_v58 = vadd.f32 %v6078_v59, %v6077_v19  ;;  %v6295_v44 = vadd.f32 %v6294_v5, %v6293_v21  ;;  %v15596_v5 = vld [vmem:[%s16415_s1 + $0x8] sm:$0xff] }
0x13cd   :  { %v5971_v22 = vrot.slane %v5970_v57, 1  ;;  %v6187_v20 = vrot.slane %v6186_v6, 2 }
0x13ce   :  { %v6080_v24 = vrot.slane %v6079_v58, 1  ;;  %v6296_v23 = vrot.slane %v6295_v44, 2 }
0x13cf   :  { %v5972_v29 = vadd.f32 %v5971_v22, %v5970_v57  ;;  %v6188_v46 = vadd.f32 %v6187_v20, %v6186_v6  ;;  %v15617_v57 = vld [vmem:[%s16415_s1 + $0x30] sm:$0xff]  ;;  %v15626_v6 = vld [vmem:[%s16415_s1 + $0x28] sm:$0xff] }
0x13d0   :  { %v6081_v38 = vadd.f32 %v6080_v24, %v6079_v58  ;;  %v6297_v52 = vadd.f32 %v6296_v23, %v6295_v44  ;;  %v15633_v58 = vld [vmem:[%s16415_s1 + $0x38] sm:$0xff]  ;;  %v15644_v20 = vld [vmem:[%s16414_s0 + $0x8] sm:$0xff] }
0x13d1   :  { %14020 = vlog2.f32 %v5972_v29  ;;  %v6189_v31 = vrot.slane %v6188_v46, 1 }
0x13d2   :  { %14022 = vlog2.f32 %v6081_v38  ;;  %v6298_v16 = vrot.slane %v6297_v52, 1 }
0x13d3   :  { %v6190_v48 = vadd.f32 %v6189_v31, %v6188_v46  ;;  %v15650_v46 = vld [vmem:[%s16414_s0] sm:$0xff] }
0x13d4   :  { %v6299_v51 = vadd.f32 %v6298_v16, %v6297_v52 }
0x13d5   :  { %14024 = vlog2.f32 %v6190_v48 }
0x13d6   :  { %14026 = vlog2.f32 %v6299_v51 }
0x13db   :  { %v14021_v42 = vpop.eup %14020 }
0x13dc   :  { %v14023_v12 = vpop.eup %14022  ;;  %v5974_v53 = vmul.f32 0.6931472, %v14021_v42 }
0x13dd   :  { %v6083_v17 = vmul.f32 0.6931472, %v14023_v12 }
0x13de   :  { %v5975_v1 = vadd.f32 %v5974_v53, %v5962_v45 }
0x13df   :  { %v14025_v2 = vpop.eup %14024  ;;  %v6084_v43 = vadd.f32 %v6083_v17, %v6071_v32 }
0x13e0   :  { %v14027_v40 = vpop.eup %14026  ;;  %v5976_v41 = vsub.f32 %v15518_v26, %v5975_v1  ;;  %v6192_v54 = vmul.f32 0.6931472, %v14025_v2 }
0x13e1   :  { %v6085_v13 = vsub.f32 %v15521_v56, %v6084_v43  ;;  %v6301_v33 = vmul.f32 0.6931472, %v14027_v40 }
0x13e2   :  { %13091 = vmatprep.subr.msk.mxu1 %vm521_vm3, %v5976_v41  ;;  %v6193_v25 = vadd.f32 %v6192_v54, %v6180_v62 }
0x13e3   :  { %13086 = vmatprep.subr.msk.mxu0 %vm521_vm3, %v6085_v13  ;;  %13092 = vmatpush3.msk.msra.mxu1 %vm521_vm3, %v5976_v41  ;;  %v6302_v14 = vadd.f32 %v6301_v33, %v6289_v47 }
0x13e4   :  { %13087 = vmatpush3.msk.msra.mxu0 %vm521_vm3, %v6085_v13  ;;  %v6194_v45 = vsub.f32 %v15528_v49, %v6193_v25  ;;  %13094 = vmatmul.mubr.msk.f32.vlgmr.msra.gmra.mrb[68].mxu1 %vm879_vm2, %v15395_v3  ;;  %v15572_v3 = vld [vmem:[%s16415_s1 + $0x10] sm:$0xff] }
0x13e5   :  { %13089 = vmatmul.mubr.msk.f32.vlgmr.msra.gmra.mrb[68].mxu0 %vm879_vm2, %v15402_v34  ;;  %v6303_v26 = vsub.f32 %v15531_v11, %v6302_v14  ;;  %13103 = vmatprep.mubr.msk.f32.mxu1 %vm879_vm2, %v15410_v37  ;;  %v15579_v34 = vld [vmem:[%s16415_s1] sm:$0xff] }
0x13e6   :  { %13101 = vmatprep.subr.msk.mxu1 %vm521_vm3, %v6194_v45  ;;  %13098 = vmatprep.mubr.msk.f32.mxu0 %vm879_vm2, %v15418_v35 }
0x13e7   :  { %13096 = vmatprep.subr.msk.mxu0 %vm521_vm3, %v6303_v26  ;;  %13102 = vmatpush3.msk.msra.mxu1 %vm521_vm3, %v6194_v45 }
0x13e8   :  { %13097 = vmatpush3.msk.msra.mxu0 %vm521_vm3, %v6303_v26  ;;  %13104 = vmatmul.mubr.msk.f32.vlgmr.msra.gmra.mrb[70].mxu1 %vm879_vm2, %v15428_v7 }
0x13e9   :  { %13099 = vmatmul.mubr.msk.f32.vlgmr.msra.gmra.mrb[70].mxu0 %vm879_vm2, %v15435_v60  ;;  %13117 = vmatprep.mubr.msk.f32.mxu1 %vm97_vm0, %v15572_v3 }
0x13ea   :  { %13110 = vmatprep.mubr.msk.f32.mxu0 %vm97_vm0, %v15579_v34 }
0x14b7   :  { %v13095_v37 = vpop.f32.mrb[68].mxu1 }
0x14b8   :  { %v13090_v35 = vpop.f32.mrb[68].mxu0  ;;  %v6455_v7 = vpop.f32.mrb[69].mxu1 }
0x14b9   :  { %6384 = vrot.lane.b32.xlu1 %v13090_v35, %s14436_s12  ;;  %v6373_v60 = vpop.f32.mrb[69].mxu0 }
0x14ba   :  { %6382 = vrot.lane.b32.xlu0 %v6373_v60, %s14436_s12 }
0x14bb   :  { %v13105_v56 = vpop.f32.mrb[70].mxu1 }
0x14bc   :  { %v13100_v49 = vpop.f32.mrb[70].mxu0  ;;  %v6623_v11 = vpop.f32.mrb[71].mxu1 }
0x14bd   :  { %6466 = vrot.lane.b32.xlu1 %v13095_v37, %s14435_s11  ;;  %v6539_v32 = vpop.f32.mrb[71].mxu0 }
0x14be   :  { %6464 = vrot.lane.b32.xlu0 %v6455_v7, %s14435_s11 }
0x14c1   :  { %6550 = vrot.lane.b32.xlu1 %v13100_v49, %s14437_s13 }
0x14c2   :  { %6548 = vrot.lane.b32.xlu0 %v6539_v32, %s14437_s13 }
0x14c5   :  { %6634 = vrot.lane.b32.xlu1 %v13105_v56, %s14438_s15 }
0x14c6   :  { %6632 = vrot.lane.b32.xlu0 %v6623_v11, %s14438_s15 }
0x152b   :  { %v6385_v62 = vpop.permute.xlu1 %6384 }
0x152c   :  { %v6383_v47 = vpop.permute.xlu0 %6382 }
0x152f   :  { %v6467_v4 = vpop.permute.xlu1 %6466 }
0x1530   :  { %v6465_v39 = vpop.permute.xlu0 %6464  ;;  %v6469_v8 = vadd.f32 %v6467_v4, %v6385_v62 }
0x1531   :  { %v6468_v27 = vadd.f32 %v6465_v39, %v6383_v47 }
0x1533   :  { %v6551_v63 = vpop.permute.xlu1 %6550 }
0x1534   :  { %v6549_v18 = vpop.permute.xlu0 %6548  ;;  %v6553_v10 = vadd.f32 %v6551_v63, %v6469_v8 }
0x1535   :  { %v6552_v36 = vadd.f32 %v6549_v18, %v6468_v27 }
0x1537   :  { %v6635_v61 = vpop.permute.xlu1 %6634 }
0x1538   :  { %v6637_v19 = vadd.f32 %v6635_v61, %v6553_v10  ;;  %v6633_v28 = vpop.permute.xlu0 %6632 }
0x1539   :  { %v6636_v15 = vadd.f32 %v6633_v28, %v6552_v36 }
0x153a   :  { %v6639_v21 = vmul.f32 %v15454_v50, %v6637_v19  ;;  %v15603_v50 = vld [vmem:[%s16415_s1 + $0x18] sm:$0xff] }
0x153b   :  { %v6638_v30 = vmul.f32 %v15460_v55, %v6636_v15  ;;  %v15610_v55 = vld [vmem:[%s16415_s1 + $0x20] sm:$0xff] }
0x153d   :  { %v13627_v59 = vpack.c.bf16 %v6639_v21, %v6638_v30 }
0x153f   :  { %13628 = vmatprep.subr.bf16.mxu0 %v13627_v59  ;;  %13632 = vmatprep.subr.bf16.mxu1 %v13627_v59 }
0x1540   :  { %13630 = vmatpush3.bf16.msra.mxu0 %v13627_v59  ;;  %13634 = vmatpush3.bf16.msra.mxu1 %v13627_v59 }
0x1541   :  { %13636 = vmatprep.subr.bf16.mxu0 %v13627_v59  ;;  %13640 = vmatprep.subr.bf16.mxu1 %v13627_v59 }
0x1543   :  { %13111 = vmatmul.mubr.msk.f32.vlgmr.msra.gmra.mrb[72].mxu0 %vm97_vm0, %v15596_v5  ;;  %13118 = vmatmul.mubr.msk.f32.vlgmr.msra.gmra.mrb[72].mxu1 %vm97_vm0, %v15603_v50 }
0x1544   :  { %13638 = vmatpush3.bf16.msra.mxu0 %v13627_v59  ;;  %13642 = vmatpush3.bf16.msra.mxu1 %v13627_v59 }
0x1545   :  { %13124 = vmatprep.mubr.msk.f32.mxu0 %vm97_vm0, %v15610_v55  ;;  %13131 = vmatprep.mubr.msk.f32.mxu1 %vm97_vm0, %v15617_v57 }
0x1546   :  { %13643 = vmatprep.subr.bf16.mxu0 %v14433_v9  ;;  %13646 = vmatprep.subr.bf16.mxu1 %v14433_v9 }
0x1547   :  { %13125 = vmatmul.mubr.msk.f32.vlgmr.msra.gmra.mrb[74].mxu0 %vm97_vm0, %v15626_v6  ;;  %13132 = vmatmul.mubr.msk.f32.vlgmr.msra.gmra.mrb[74].mxu1 %vm97_vm0, %v15633_v58 }
0x1548   :  { %13138 = vmatprep.mubr.msk.f32.mxu0 %vm14434_vm1, %v14432_v0  ;;  %13145 = vmatprep.mubr.msk.f32.mxu1 %vm14434_vm1, %v14432_v0 }
0x1616   :  { %v13112_v44 = vpop.f32.mrb[72].mxu0  ;;  %v13119_v22 = vpop.f32.mrb[72].mxu1 }
0x1617   :  { %v6941_v24 = vadd.f32 %v15644_v20, %v13112_v44  ;;  %v6706_v23 = vpop.f32.mrb[73].mxu0  ;;  %v6781_v29 = vpop.f32.mrb[73].mxu1 }
0x1618   :  { %v6940_v38 = vadd.f32 %v15650_v46, %v6706_v23 }
0x1619   :  { %v6943_v52 = vadd.f32 %v13119_v22, %v6941_v24 }
0x161a   :  { %v6942_v31 = vadd.f32 %v6940_v38, %v6781_v29  ;;  %v13126_v16 = vpop.f32.mrb[74].mxu0  ;;  %v13133_v48 = vpop.f32.mrb[74].mxu1 }
0x161b   :  { %v6945_v51 = vadd.f32 %v13126_v16, %v6943_v52  ;;  %v6856_v42 = vpop.f32.mrb[75].mxu0  ;;  %v6931_v12 = vpop.f32.mrb[75].mxu1 }
0x161c   :  { %v6944_v53 = vadd.f32 %v6942_v31, %v6856_v42 }
0x161d   :  { %v6947_v17 = vadd.f32 %v13133_v48, %v6945_v51 }
0x161e   :  { %v6946_v1 = vadd.f32 %v6944_v53, %v6931_v12 }
0x161f   :  { %v6949_v2 = vsub.f32 %v6947_v17, %v13112_v44  ;;  %v7058_v43 = vsub.f32 %v6947_v17, %v13119_v22  ;;  %v7167_v40 = vsub.f32 %v6947_v17, %v13126_v16  ;;  %v7276_v41 = vsub.f32 %v6947_v17, %v13133_v48 }
0x1620   :  { %v6948_v54 = vsub.f32 %v6946_v1, %v6706_v23  ;;  %v7057_v13 = vsub.f32 %v6946_v1, %v6781_v29  ;;  %v7166_v33 = vsub.f32 %v6946_v1, %v6856_v42  ;;  %v7275_v25 = vsub.f32 %v6946_v1, %v6931_v12 }
0x1622   :  { %v6950_v14 = vmax.f32 %v6948_v54, %v6949_v2  ;;  %v7059_v45 = vmax.f32 %v7057_v13, %v7058_v43  ;;  %v7168_v26 = vmax.f32 %v7166_v33, %v7167_v40  ;;  %v7277_v37 = vmax.f32 %v7275_v25, %v7276_v41 }
0x1624   :  { %v6951_v35 = vrot.slane %v6950_v14, 4  ;;  %v7060_v7 = vrot.slane %v7059_v45, 4  ;;  %v7169_v60 = vrot.slane %v7168_v26, 4  ;;  %v7278_v56 = vrot.slane %v7277_v37, 4 }
0x1626   :  { %v6952_v49 = vmax.f32 %v6950_v14, %v6951_v35  ;;  %v7061_v11 = vmax.f32 %v7059_v45, %v7060_v7  ;;  %v7170_v32 = vmax.f32 %v7168_v26, %v7169_v60  ;;  %v7279_v62 = vmax.f32 %v7277_v37, %v7278_v56  ;;  %v15671_v35 = vld [vmem:[#allocation2] sm:$0xf]  ;;  %v15675_v7 = vld [vmem:[#allocation2 + $0x4] sm:$0xf]  ;;  %v15683_v60 = vld [vmem:[#allocation2 + $0x8] sm:$0xf] }
0x1627   :  { %v15687_v56 = vld [vmem:[#allocation2 + $0xc] sm:$0xf] }
0x1628   :  { %v6953_v47 = vrot.slane %v6952_v49, 2  ;;  %v7062_v4 = vrot.slane %v7061_v11, 2  ;;  %v7171_v39 = vrot.slane %v7170_v32, 2  ;;  %v7280_v63 = vrot.slane %v7279_v62, 2 }
0x162a   :  { %v6954_v8 = vmax.f32 %v6952_v49, %v6953_v47  ;;  %v7063_v18 = vmax.f32 %v7061_v11, %v7062_v4  ;;  %v7172_v27 = vmax.f32 %v7170_v32, %v7171_v39  ;;  %v7281_v10 = vmax.f32 %v7279_v62, %v7280_v63  ;;  %v15694_v49 = vld [vmem:[%s16417_s3] sm:$0xff]  ;;  %v15701_v11 = vld [vmem:[%s16417_s3 + $0x10] sm:$0xff] }
0x162c   :  { %v6955_v36 = vrot.slane %v6954_v8, 1  ;;  %v7064_v61 = vrot.slane %v7063_v18, 1  ;;  %v7173_v19 = vrot.slane %v7172_v27, 1  ;;  %v7282_v28 = vrot.slane %v7281_v10, 1 }
0x162e   :  { %v15653_v15 = vmax.f32 %v6954_v8, %v6955_v36  ;;  %v15655_v21 = vmax.f32 %v7063_v18, %v7064_v61  ;;  %v15657_v30 = vmax.f32 %v7172_v27, %v7173_v19  ;;  %v15659_v59 = vmax.f32 %v7281_v10, %v7282_v28 }
0x1630   :  { %v6957_v44 = vsub.f32 %v6948_v54, %v15653_v15  ;;  %v7066_v22 = vsub.f32 %v7057_v13, %v15655_v21  ;;  %v7175_v24 = vsub.f32 %v7166_v33, %v15657_v30  ;;  %v7284_v23 = vsub.f32 %v7275_v25, %v15659_v59 }
0x1631   :  { %v7285_v29 = vsub.f32 %v7276_v41, %v15659_v59  ;;  %v6958_v38 = vsub.f32 %v6949_v2, %v15653_v15  ;;  %v7067_v48 = vsub.f32 %v7058_v43, %v15655_v21  ;;  %v7176_v42 = vsub.f32 %v7167_v40, %v15657_v30 }
0x1632   :  { %v6959_v52 = vmul.f32 1.442695, %v6957_v44  ;;  %v7068_v31 = vmul.f32 1.442695, %v7066_v22  ;;  %v7177_v16 = vmul.f32 1.442695, %v7175_v24 }
0x1633   :  { %v7286_v51 = vmul.f32 1.442695, %v7284_v23  ;;  %v7288_v12 = vmul.f32 1.442695, %v7285_v29  ;;  %v6961_v53 = vmul.f32 1.442695, %v6958_v38 }
0x1634   :  { %14028 = vpow2.f32 %v6959_v52  ;;  %v7070_v17 = vmul.f32 1.442695, %v7067_v48  ;;  %v7179_v1 = vmul.f32 1.442695, %v7176_v42 }
0x1635   :  { %14030 = vpow2.f32 %v7068_v31 }
0x1636   :  { %14032 = vpow2.f32 %v7177_v16 }
0x1637   :  { %14034 = vpow2.f32 %v7286_v51 }
0x1638   :  { %14036 = vpow2.f32 %v7288_v12 }
0x1639   :  { %14038 = vpow2.f32 %v6961_v53 }
0x163a   :  { %14040 = vpow2.f32 %v7070_v17 }
0x163b   :  { %14042 = vpow2.f32 %v7179_v1 }
0x163e   :  { %v14029_v2 = vpop.eup %14028 }
0x163f   :  { %v14031_v41 = vpop.eup %14030 }
0x1640   :  { %v14033_v54 = vpop.eup %14032 }
0x1641   :  { %v14035_v13 = vpop.eup %14034 }
0x1642   :  { %v14037_v43 = vpop.eup %14036 }
0x1643   :  { %v14039_v33 = vpop.eup %14038  ;;  %v13653_v25 = vpack.c.bf16 %v14037_v43, %v14035_v13 }
0x1644   :  { %v14041_v40 = vpop.eup %14040  ;;  %v13644_v14 = vpack.c.bf16 %v14039_v33, %v14029_v2 }
0x1645   :  { %v14043_v45 = vpop.eup %14042  ;;  %v13647_v26 = vpack.c.bf16 %v14041_v40, %v14031_v41 }
0x1646   :  { %13645 = vmatpush3.bf16.msra.mxu0 %v13644_v14  ;;  %v13650_v37 = vpack.c.bf16 %v14043_v45, %v14033_v54 }
0x1647   :  { %13648 = vmatpush3.bf16.msra.mxu1 %v13647_v26  ;;  %13649 = vmatprep.subr.bf16.mxu0 %v14433_v9 }
0x1648   :  { %13652 = vmatprep.subr.bf16.mxu1 %v14433_v9 }
0x1649   :  { %13139 = vmatmul.mubr.msk.f32.vlgmr.msra.gmra.mrb[76].mxu0 %vm97_vm0, %v15671_v35 }
0x164a   :  { %13146 = vmatmul.mubr.msk.f32.vlgmr.msra.gmra.mrb[76].mxu1 %vm97_vm0, %v15675_v7  ;;  %13651 = vmatpush3.bf16.msra.mxu0 %v13650_v37 }
0x164b   :  { %13654 = vmatpush3.bf16.msra.mxu1 %v13653_v25  ;;  %13152 = vmatprep.mubr.msk.f32.mxu0 %vm14434_vm1, %v14432_v0 }
0x164c   :  { %13159 = vmatprep.mubr.msk.f32.mxu1 %vm14434_vm1, %v14432_v0 }
0x164d   :  { %13153 = vmatmul.mubr.msk.f32.vlgmr.msra.gmra.mrb[78].mxu0 %vm97_vm0, %v15683_v60 }
0x164e   :  { %13160 = vmatmul.mubr.msk.f32.vlgmr.msra.gmra.mrb[78].mxu1 %vm97_vm0, %v15687_v56  ;;  %13164 = vmatprep.mubr.msk.f32.mxu0 %vm879_vm2, %v15694_v49 }
0x164f   :  { %13169 = vmatprep.mubr.msk.f32.mxu1 %vm879_vm2, %v15701_v11 }
0x171c   :  { %v7029_v32 = vpop.f32.mrb[76].mxu0 }
0x171d   :  { %14044 = vlog2.f32 %v7029_v32  ;;  %v7138_v62 = vpop.f32.mrb[76].mxu1  ;;  %v13140_v47 = vpop.f32.mrb[77].mxu0 }
0x171e   :  { %14046 = vlog2.f32 %v7138_v62  ;;  %v13147_v4 = vpop.f32.mrb[77].mxu1 }
0x1720   :  { %v7247_v39 = vpop.f32.mrb[78].mxu0 }
0x1721   :  { %14048 = vlog2.f32 %v7247_v39  ;;  %v7356_v63 = vpop.f32.mrb[78].mxu1  ;;  %v13154_v8 = vpop.f32.mrb[79].mxu0 }
0x1722   :  { %14050 = vlog2.f32 %v7356_v63  ;;  %v13161_v18 = vpop.f32.mrb[79].mxu1 }
0x1727   :  { %v14045_v27 = vpop.eup %14044 }
0x1728   :  { %v14047_v10 = vpop.eup %14046  ;;  %v7034_v36 = vmul.f32 0.6931472, %v14045_v27 }
0x1729   :  { %v7143_v61 = vmul.f32 0.6931472, %v14047_v10 }
0x172a   :  { %v15706_v19 = vadd.f32 %v7034_v36, %v15653_v15 }
0x172b   :  { %v14049_v28 = vpop.eup %14048  ;;  %v15709_v44 = vadd.f32 %v7143_v61, %v15655_v21 }
0x172c   :  { %v14051_v22 = vpop.eup %14050  ;;  %v7036_v24 = vsel %vm521_vm3, %v15706_v19, -inf  ;;  %v7252_v23 = vmul.f32 0.6931472, %v14049_v28 }
0x172d   :  { %v7037_v29 = vrot.slane %v7036_v24, 4  ;;  %v7145_v38 = vsel %vm521_vm3, %v15709_v44, -inf  ;;  %v7361_v52 = vmul.f32 0.6931472, %v14051_v22 }
0x172e   :  { %v7146_v31 = vrot.slane %v7145_v38, 4  ;;  %v15716_v16 = vadd.f32 %v7252_v23, %v15657_v30 }
0x172f   :  { %v7038_v15 = vmax.f32 %v7036_v24, %v7037_v29  ;;  %v15719_v48 = vadd.f32 %v7361_v52, %v15659_v59 }
0x1730   :  { %v7147_v21 = vmax.f32 %v7145_v38, %v7146_v31  ;;  %v7254_v51 = vsel %vm521_vm3, %v15716_v16, -inf }
0x1731   :  { %v7039_v42 = vrot.slane %v7038_v15, 2  ;;  %v7255_v12 = vrot.slane %v7254_v51, 4  ;;  %v7363_v53 = vsel %vm521_vm3, %v15719_v48, -inf }
0x1732   :  { %v7148_v17 = vrot.slane %v7147_v21, 2  ;;  %v7364_v1 = vrot.slane %v7363_v53, 4 }
0x1733   :  { %v7040_v2 = vmax.f32 %v7038_v15, %v7039_v42  ;;  %v7256_v41 = vmax.f32 %v7254_v51, %v7255_v12 }
0x1734   :  { %v7149_v54 = vmax.f32 %v7147_v21, %v7148_v17  ;;  %v7365_v30 = vmax.f32 %v7363_v53, %v7364_v1 }
0x1735   :  { %v7041_v13 = vrot.slane %v7040_v2, 1  ;;  %v7257_v43 = vrot.slane %v7256_v41, 2 }
0x1736   :  { %v7150_v33 = vrot.slane %v7149_v54, 1  ;;  %v7366_v59 = vrot.slane %v7365_v30, 2 }
0x1737   :  { %v7042_v25 = vmax.f32 %v7040_v2, %v7041_v13  ;;  %v7258_v40 = vmax.f32 %v7256_v41, %v7257_v43 }
0x1738   :  { %v7151_v14 = vmax.f32 %v7149_v54, %v7150_v33  ;;  %v7367_v45 = vmax.f32 %v7365_v30, %v7366_v59 }
0x1739   :  { %v7043_v26 = vsub.f32 %v15706_v19, %v7042_v25  ;;  %v7259_v37 = vrot.slane %v7258_v40, 1 }
0x173a   :  { %v7152_v32 = vsub.f32 %v15709_v44, %v7151_v14  ;;  %v7368_v62 = vrot.slane %v7367_v45, 1 }
0x173b   :  { %v7044_v47 = vmul.f32 1.442695, %v7043_v26  ;;  %v7260_v4 = vmax.f32 %v7258_v40, %v7259_v37 }
0x173c   :  { %v7153_v39 = vmul.f32 1.442695, %v7152_v32  ;;  %v7369_v63 = vmax.f32 %v7367_v45, %v7368_v62 }
0x173d   :  { %14052 = vpow2.f32 %v7044_v47  ;;  %v7261_v8 = vsub.f32 %v15716_v16, %v7260_v4 }
0x173e   :  { %14054 = vpow2.f32 %v7153_v39  ;;  %v7370_v18 = vsub.f32 %v15719_v48, %v7369_v63 }
0x173f   :  { %v7262_v27 = vmul.f32 1.442695, %v7261_v8 }
0x1740   :  { %v7371_v10 = vmul.f32 1.442695, %v7370_v18 }
0x1741   :  { %14056 = vpow2.f32 %v7262_v27 }
0x1742   :  { %14058 = vpow2.f32 %v7371_v10 }
0x1747   :  { %v14053_v36 = vpop.eup %14052 }
0x1748   :  { %v14055_v61 = vpop.eup %14054  ;;  %v7046_v28 = vsel %vm521_vm3, %v14053_v36, 0.0 }
0x1749   :  { %v7155_v22 = vsel %vm521_vm3, %v14055_v61, 0.0  ;;  %v7047_v24 = vrot.slane %v7046_v28, 4 }
0x174a   :  { %v7156_v23 = vrot.slane %v7155_v22, 4 }
0x174b   :  { %v14057_v29 = vpop.eup %14056  ;;  %v7048_v38 = vadd.f32 %v7047_v24, %v7046_v28 }
0x174c   :  { %v14059_v52 = vpop.eup %14058  ;;  %v7157_v31 = vadd.f32 %v7156_v23, %v7155_v22  ;;  %v7264_v15 = vsel %vm521_vm3, %v14057_v29, 0.0 }
0x174d   :  { %v7049_v21 = vrot.slane %v7048_v38, 2  ;;  %v7373_v51 = vsel %vm521_vm3, %v14059_v52, 0.0  ;;  %v7265_v42 = vrot.slane %v7264_v15, 4 }
0x174e   :  { %v7158_v12 = vrot.slane %v7157_v31, 2  ;;  %v7374_v53 = vrot.slane %v7373_v51, 4 }
0x174f   :  { %v7050_v17 = vadd.f32 %v7049_v21, %v7048_v38  ;;  %v7266_v1 = vadd.f32 %v7265_v42, %v7264_v15 }
0x1750   :  { %v7159_v2 = vadd.f32 %v7158_v12, %v7157_v31  ;;  %v7375_v41 = vadd.f32 %v7374_v53, %v7373_v51 }
0x1751   :  { %v7051_v54 = vrot.slane %v7050_v17, 1  ;;  %v7267_v30 = vrot.slane %v7266_v1, 2 }
0x1752   :  { %v7160_v13 = vrot.slane %v7159_v2, 1  ;;  %v7376_v43 = vrot.slane %v7375_v41, 2 }
0x1753   :  { %v7052_v33 = vadd.f32 %v7051_v54, %v7050_v17  ;;  %v7268_v59 = vadd.f32 %v7267_v30, %v7266_v1 }
0x1754   :  { %v7161_v40 = vadd.f32 %v7160_v13, %v7159_v2  ;;  %v7377_v45 = vadd.f32 %v7376_v43, %v7375_v41 }
0x1755   :  { %14060 = vlog2.f32 %v7052_v33  ;;  %v7269_v26 = vrot.slane %v7268_v59, 1 }
0x1756   :  { %14062 = vlog2.f32 %v7161_v40  ;;  %v7378_v37 = vrot.slane %v7377_v45, 1 }
0x1757   :  { %v7270_v32 = vadd.f32 %v7269_v26, %v7268_v59  ;;  %v15802_v26 = vld [vmem:[%s16420_s6 + $0x8] sm:$0xff] }
0x1758   :  { %v7379_v62 = vadd.f32 %v7378_v37, %v7377_v45 }
0x1759   :  { %14064 = vlog2.f32 %v7270_v32  ;;  %v15808_v32 = vld [vmem:[%s16420_s6] sm:$0xff] }
0x175a   :  { %14066 = vlog2.f32 %v7379_v62 }
0x175f   :  { %v14061_v47 = vpop.eup %14060 }
0x1760   :  { %v14063_v39 = vpop.eup %14062  ;;  %v7054_v8 = vmul.f32 0.6931472, %v14061_v47 }
0x1761   :  { %v7163_v18 = vmul.f32 0.6931472, %v14063_v39 }
0x1762   :  { %v7055_v27 = vadd.f32 %v7054_v8, %v7042_v25 }
0x1763   :  { %v14065_v10 = vpop.eup %14064  ;;  %v7164_v36 = vadd.f32 %v7163_v18, %v7151_v14 }
0x1764   :  { %v14067_v61 = vpop.eup %14066  ;;  %v7056_v28 = vsub.f32 %v15706_v19, %v7055_v27  ;;  %v7272_v22 = vmul.f32 0.6931472, %v14065_v10  ;;  %v15743_v19 = vld [vmem:[%s16417_s3 + $0x18] sm:$0xff] }
0x1765   :  { %v7165_v24 = vsub.f32 %v15709_v44, %v7164_v36  ;;  %v7381_v23 = vmul.f32 0.6931472, %v14067_v61  ;;  %v15750_v44 = vld [vmem:[%s16417_s3 + $0x8] sm:$0xff] }
0x1766   :  { %13167 = vmatprep.subr.msk.mxu1 %vm521_vm3, %v7056_v28  ;;  %v7273_v29 = vadd.f32 %v7272_v22, %v7260_v4  ;;  %v15766_v4 = vld [vmem:[%s16417_s3 + $0x20] sm:$0xff] }
0x1767   :  { %13162 = vmatprep.subr.msk.mxu0 %vm521_vm3, %v7165_v24  ;;  %13168 = vmatpush3.msk.msra.mxu1 %vm521_vm3, %v7056_v28  ;;  %v7382_v38 = vadd.f32 %v7381_v23, %v7369_v63  ;;  %v15783_v63 = vld [vmem:[%s16417_s3 + $0x28] sm:$0xff] }
0x1768   :  { %13163 = vmatpush3.msk.msra.mxu0 %vm521_vm3, %v7165_v24  ;;  %v7274_v25 = vsub.f32 %v15716_v16, %v7273_v29  ;;  %13170 = vmatmul.mubr.msk.f32.vlgmr.msra.gmra.mrb[80].mxu1 %vm879_vm2, %v15743_v19  ;;  %v15758_v16 = vld [vmem:[%s16417_s3 + $0x30] sm:$0xff] }
0x1769   :  { %13165 = vmatmul.mubr.msk.f32.vlgmr.msra.gmra.mrb[80].mxu0 %vm879_vm2, %v15750_v44  ;;  %v7383_v14 = vsub.f32 %v15719_v48, %v7382_v38  ;;  %13179 = vmatprep.mubr.msk.f32.mxu1 %vm879_vm2, %v15758_v16  ;;  %v15776_v48 = vld [vmem:[%s16417_s3 + $0x38] sm:$0xff] }
0x176a   :  { %13177 = vmatprep.subr.msk.mxu1 %vm521_vm3, %v7274_v25  ;;  %13174 = vmatprep.mubr.msk.f32.mxu0 %vm879_vm2, %v15766_v4 }
0x176b   :  { %13172 = vmatprep.subr.msk.mxu0 %vm521_vm3, %v7383_v14  ;;  %13178 = vmatpush3.msk.msra.mxu1 %vm521_vm3, %v7274_v25 }
0x176c   :  { %13173 = vmatpush3.msk.msra.mxu0 %vm521_vm3, %v7383_v14  ;;  %13180 = vmatmul.mubr.msk.f32.vlgmr.msra.gmra.mrb[82].mxu1 %vm879_vm2, %v15776_v48 }
0x176d   :  { %13175 = vmatmul.mubr.msk.f32.vlgmr.msra.gmra.mrb[82].mxu0 %vm879_vm2, %v15783_v63  ;;  %13193 = vmatprep.mubr.msk.f32.mxu1 %vm97_vm0, %v15572_v3 }
0x176e   :  { %13186 = vmatprep.mubr.msk.f32.mxu0 %vm97_vm0, %v15579_v34 }
0x183b   :  { %v13171_v52 = vpop.f32.mrb[80].mxu1 }
0x183c   :  { %v13166_v31 = vpop.f32.mrb[80].mxu0  ;;  %v7535_v15 = vpop.f32.mrb[81].mxu1 }
0x183d   :  { %7464 = vrot.lane.b32.xlu1 %v13166_v31, %s14436_s12  ;;  %v7453_v21 = vpop.f32.mrb[81].mxu0 }
0x183e   :  { %7462 = vrot.lane.b32.xlu0 %v7453_v21, %s14436_s12 }
0x183f   :  { %v13181_v51 = vpop.f32.mrb[82].mxu1 }
0x1840   :  { %v13176_v42 = vpop.f32.mrb[82].mxu0  ;;  %v7703_v12 = vpop.f32.mrb[83].mxu1 }
0x1841   :  { %7546 = vrot.lane.b32.xlu1 %v13171_v52, %s14435_s11  ;;  %v7619_v53 = vpop.f32.mrb[83].mxu0 }
0x1842   :  { %7544 = vrot.lane.b32.xlu0 %v7535_v15, %s14435_s11 }
0x1845   :  { %7630 = vrot.lane.b32.xlu1 %v13176_v42, %s14437_s13 }
0x1846   :  { %7628 = vrot.lane.b32.xlu0 %v7619_v53, %s14437_s13 }
0x1849   :  { %7714 = vrot.lane.b32.xlu1 %v13181_v51, %s14438_s15 }
0x184a   :  { %7712 = vrot.lane.b32.xlu0 %v7703_v12, %s14438_s15 }
0x18af   :  { %v7465_v3 = vpop.permute.xlu1 %7464 }
0x18b0   :  { %v7463_v34 = vpop.permute.xlu0 %7462 }
0x18b3   :  { %v7547_v17 = vpop.permute.xlu1 %7546 }
0x18b4   :  { %v7545_v1 = vpop.permute.xlu0 %7544  ;;  %v7549_v41 = vadd.f32 %v7547_v17, %v7465_v3 }
0x18b5   :  { %v7548_v30 = vadd.f32 %v7545_v1, %v7463_v34 }
0x18b7   :  { %v7631_v2 = vpop.permute.xlu1 %7630 }
0x18b8   :  { %v7629_v54 = vpop.permute.xlu0 %7628  ;;  %v7633_v13 = vadd.f32 %v7631_v2, %v7549_v41 }
0x18b9   :  { %v7632_v43 = vadd.f32 %v7629_v54, %v7548_v30 }
0x18bb   :  { %v7715_v33 = vpop.permute.xlu1 %7714 }
0x18bc   :  { %v7717_v59 = vadd.f32 %v7715_v33, %v7633_v13  ;;  %v7713_v40 = vpop.permute.xlu0 %7712 }
0x18bd   :  { %v7716_v45 = vadd.f32 %v7713_v40, %v7632_v43 }
0x18be   :  { %v7719_v37 = vmul.f32 %v15802_v26, %v7717_v59 }
0x18bf   :  { %v7718_v62 = vmul.f32 %v15808_v32, %v7716_v45 }
0x18c1   :  { %v13655_v47 = vpack.c.bf16 %v7719_v37, %v7718_v62 }
0x18c3   :  { %13656 = vmatprep.subr.bf16.mxu0 %v13655_v47  ;;  %13660 = vmatprep.subr.bf16.mxu1 %v13655_v47 }
0x18c4   :  { %13658 = vmatpush3.bf16.msra.mxu0 %v13655_v47  ;;  %13662 = vmatpush3.bf16.msra.mxu1 %v13655_v47 }
0x18c5   :  { %13664 = vmatprep.subr.bf16.mxu0 %v13655_v47  ;;  %13668 = vmatprep.subr.bf16.mxu1 %v13655_v47 }
0x18c7   :  { %13187 = vmatmul.mubr.msk.f32.vlgmr.msra.gmra.mrb[84].mxu0 %vm97_vm0, %v15596_v5  ;;  %13194 = vmatmul.mubr.msk.f32.vlgmr.msra.gmra.mrb[84].mxu1 %vm97_vm0, %v15603_v50 }
0x18c8   :  { %13666 = vmatpush3.bf16.msra.mxu0 %v13655_v47  ;;  %13670 = vmatpush3.bf16.msra.mxu1 %v13655_v47 }
0x18c9   :  { %13200 = vmatprep.mubr.msk.f32.mxu0 %vm97_vm0, %v15610_v55  ;;  %13207 = vmatprep.mubr.msk.f32.mxu1 %vm97_vm0, %v15617_v57 }
0x18ca   :  { %13671 = vmatprep.subr.bf16.mxu0 %v14433_v9  ;;  %13674 = vmatprep.subr.bf16.mxu1 %v14433_v9 }
0x18cb   :  { %13201 = vmatmul.mubr.msk.f32.vlgmr.msra.gmra.mrb[86].mxu0 %vm97_vm0, %v15626_v6  ;;  %13208 = vmatmul.mubr.msk.f32.vlgmr.msra.gmra.mrb[86].mxu1 %vm97_vm0, %v15633_v58 }
0x18cc   :  { %13214 = vmatprep.mubr.msk.f32.mxu0 %vm14434_vm1, %v14432_v0  ;;  %13221 = vmatprep.mubr.msk.f32.mxu1 %vm14434_vm1, %v14432_v0 }
0x199a   :  { %v13188_v5 = vpop.f32.mrb[84].mxu0  ;;  %v13195_v50 = vpop.f32.mrb[84].mxu1 }
0x199b   :  { %v8021_v55 = vadd.f32 %v15644_v20, %v13188_v5  ;;  %v7786_v57 = vpop.f32.mrb[85].mxu0  ;;  %v7861_v39 = vpop.f32.mrb[85].mxu1 }
0x199c   :  { %v8020_v8 = vadd.f32 %v15650_v46, %v7786_v57 }
0x199d   :  { %v8023_v18 = vadd.f32 %v13195_v50, %v8021_v55 }
0x199e   :  { %v8022_v27 = vadd.f32 %v8020_v8, %v7861_v39  ;;  %v13202_v6 = vpop.f32.mrb[86].mxu0  ;;  %v13209_v10 = vpop.f32.mrb[86].mxu1 }
0x199f   :  { %v8025_v36 = vadd.f32 %v13202_v6, %v8023_v18  ;;  %v7936_v58 = vpop.f32.mrb[87].mxu0  ;;  %v8011_v61 = vpop.f32.mrb[87].mxu1 }
0x19a0   :  { %v8024_v28 = vadd.f32 %v8022_v27, %v7936_v58 }
0x19a1   :  { %v8027_v22 = vadd.f32 %v13209_v10, %v8025_v36 }
0x19a2   :  { %v8026_v24 = vadd.f32 %v8024_v28, %v8011_v61 }
0x19a3   :  { %v8029_v23 = vsub.f32 %v8027_v22, %v13188_v5  ;;  %v8138_v29 = vsub.f32 %v8027_v22, %v13195_v50  ;;  %v8247_v38 = vsub.f32 %v8027_v22, %v13202_v6  ;;  %v8356_v25 = vsub.f32 %v8027_v22, %v13209_v10 }
0x19a4   :  { %v8028_v14 = vsub.f32 %v8026_v24, %v7786_v57  ;;  %v8137_v20 = vsub.f32 %v8026_v24, %v7861_v39  ;;  %v8246_v52 = vsub.f32 %v8026_v24, %v7936_v58  ;;  %v8355_v31 = vsub.f32 %v8026_v24, %v8011_v61 }
0x19a6   :  { %v8030_v15 = vmax.f32 %v8028_v14, %v8029_v23  ;;  %v8139_v46 = vmax.f32 %v8137_v20, %v8138_v29  ;;  %v8248_v21 = vmax.f32 %v8246_v52, %v8247_v38  ;;  %v8357_v51 = vmax.f32 %v8355_v31, %v8356_v25 }
0x19a8   :  { %v8031_v42 = vrot.slane %v8030_v15, 4  ;;  %v8140_v12 = vrot.slane %v8139_v46, 4  ;;  %v8249_v53 = vrot.slane %v8248_v21, 4  ;;  %v8358_v3 = vrot.slane %v8357_v51, 4 }
0x19aa   :  { %v8032_v34 = vmax.f32 %v8030_v15, %v8031_v42  ;;  %v8141_v17 = vmax.f32 %v8139_v46, %v8140_v12  ;;  %v8250_v1 = vmax.f32 %v8248_v21, %v8249_v53  ;;  %v8359_v2 = vmax.f32 %v8357_v51, %v8358_v3 }
0x19ac   :  { %v8033_v41 = vrot.slane %v8032_v34, 2  ;;  %v8142_v54 = vrot.slane %v8141_v17, 2  ;;  %v8251_v30 = vrot.slane %v8250_v1, 2  ;;  %v8360_v13 = vrot.slane %v8359_v2, 2 }
0x19ae   :  { %v8034_v43 = vmax.f32 %v8032_v34, %v8033_v41  ;;  %v8143_v33 = vmax.f32 %v8141_v17, %v8142_v54  ;;  %v8252_v59 = vmax.f32 %v8250_v1, %v8251_v30  ;;  %v8361_v40 = vmax.f32 %v8359_v2, %v8360_v13 }
0x19b0   :  { %v8035_v45 = vrot.slane %v8034_v43, 1  ;;  %v8144_v37 = vrot.slane %v8143_v33, 1  ;;  %v8253_v62 = vrot.slane %v8252_v59, 1  ;;  %v8362_v47 = vrot.slane %v8361_v40, 1 }
0x19b2   :  { %v15831_v5 = vmax.f32 %v8034_v43, %v8035_v45  ;;  %v15833_v50 = vmax.f32 %v8143_v33, %v8144_v37  ;;  %v15835_v55 = vmax.f32 %v8252_v59, %v8253_v62  ;;  %v15837_v57 = vmax.f32 %v8361_v40, %v8362_v47 }
0x19b4   :  { %v8037_v39 = vsub.f32 %v8028_v14, %v15831_v5  ;;  %v8146_v8 = vsub.f32 %v8137_v20, %v15833_v50  ;;  %v8255_v18 = vsub.f32 %v8246_v52, %v15835_v55  ;;  %v8364_v27 = vsub.f32 %v8355_v31, %v15837_v57 }
0x19b5   :  { %v8365_v6 = vsub.f32 %v8356_v25, %v15837_v57  ;;  %v8038_v10 = vsub.f32 %v8029_v23, %v15831_v5  ;;  %v8147_v28 = vsub.f32 %v8138_v29, %v15833_v50  ;;  %v8256_v24 = vsub.f32 %v8247_v38, %v15835_v55 }
0x19b6   :  { %v8039_v36 = vmul.f32 1.442695, %v8037_v39  ;;  %v8148_v58 = vmul.f32 1.442695, %v8146_v8  ;;  %v8257_v61 = vmul.f32 1.442695, %v8255_v18 }
0x19b7   :  { %v8366_v22 = vmul.f32 1.442695, %v8364_v27  ;;  %v8368_v14 = vmul.f32 1.442695, %v8365_v6  ;;  %v8041_v20 = vmul.f32 1.442695, %v8038_v10 }
0x19b8   :  { %14068 = vpow2.f32 %v8039_v36  ;;  %v8150_v52 = vmul.f32 1.442695, %v8147_v28  ;;  %v8259_v31 = vmul.f32 1.442695, %v8256_v24 }
0x19b9   :  { %14070 = vpow2.f32 %v8148_v58 }
0x19ba   :  { %14072 = vpow2.f32 %v8257_v61 }
0x19bb   :  { %14074 = vpow2.f32 %v8366_v22 }
0x19bc   :  { %14076 = vpow2.f32 %v8368_v14 }
0x19bd   :  { %14078 = vpow2.f32 %v8041_v20 }
0x19be   :  { %14080 = vpow2.f32 %v8150_v52 }
0x19bf   :  { %14082 = vpow2.f32 %v8259_v31 }
0x19c2   :  { %v14069_v23 = vpop.eup %14068 }
0x19c3   :  { %v14071_v25 = vpop.eup %14070 }
0x19c4   :  { %v14073_v15 = vpop.eup %14072 }
0x19c5   :  { %v14075_v46 = vpop.eup %14074 }
0x19c6   :  { %v14077_v29 = vpop.eup %14076 }
0x19c7   :  { %v14079_v21 = vpop.eup %14078  ;;  %v13681_v51 = vpack.c.bf16 %v14077_v29, %v14075_v46 }
0x19c8   :  { %v14081_v38 = vpop.eup %14080  ;;  %v13672_v42 = vpack.c.bf16 %v14079_v21, %v14069_v23 }
0x19c9   :  { %v14083_v12 = vpop.eup %14082  ;;  %v13675_v53 = vpack.c.bf16 %v14081_v38, %v14071_v25 }
0x19ca   :  { %13673 = vmatpush3.bf16.msra.mxu0 %v13672_v42  ;;  %v13678_v3 = vpack.c.bf16 %v14083_v12, %v14073_v15 }
0x19cb   :  { %13676 = vmatpush3.bf16.msra.mxu1 %v13675_v53  ;;  %13677 = vmatprep.subr.bf16.mxu0 %v14433_v9 }
0x19cc   :  { %13680 = vmatprep.subr.bf16.mxu1 %v14433_v9 }
0x19cd   :  { %13215 = vmatmul.mubr.msk.f32.vlgmr.msra.gmra.mrb[88].mxu0 %vm97_vm0, %v15671_v35 }
0x19ce   :  { %13222 = vmatmul.mubr.msk.f32.vlgmr.msra.gmra.mrb[88].mxu1 %vm97_vm0, %v15675_v7  ;;  %13679 = vmatpush3.bf16.msra.mxu0 %v13678_v3 }
0x19cf   :  { %13682 = vmatpush3.bf16.msra.mxu1 %v13681_v51  ;;  %13228 = vmatprep.mubr.msk.f32.mxu0 %vm14434_vm1, %v14432_v0 }
0x19d0   :  { %13235 = vmatprep.mubr.msk.f32.mxu1 %vm14434_vm1, %v14432_v0 }
0x19d1   :  { %13229 = vmatmul.mubr.msk.f32.vlgmr.msra.gmra.mrb[90].mxu0 %vm97_vm0, %v15683_v60 }
0x19d2   :  { %13236 = vmatmul.mubr.msk.f32.vlgmr.msra.gmra.mrb[90].mxu1 %vm97_vm0, %v15687_v56  ;;  %13240 = vmatprep.mubr.msk.f32.mxu0 %vm879_vm2, %v15694_v49 }
0x19d3   :  { %13245 = vmatprep.mubr.msk.f32.mxu1 %vm879_vm2, %v15701_v11 }
0x1aa0   :  { %v8109_v35 = vpop.f32.mrb[88].mxu0 }
0x1aa1   :  { %14084 = vlog2.f32 %v8109_v35  ;;  %v8218_v7 = vpop.f32.mrb[88].mxu1  ;;  %v13216_v34 = vpop.f32.mrb[89].mxu0 }
0x1aa2   :  { %14086 = vlog2.f32 %v8218_v7  ;;  %v13223_v17 = vpop.f32.mrb[89].mxu1 }
0x1aa4   :  { %v8327_v1 = vpop.f32.mrb[90].mxu0 }
0x1aa5   :  { %14088 = vlog2.f32 %v8327_v1  ;;  %v8436_v2 = vpop.f32.mrb[90].mxu1  ;;  %v13230_v41 = vpop.f32.mrb[91].mxu0 }
0x1aa6   :  { %14090 = vlog2.f32 %v8436_v2  ;;  %v13237_v60 = vpop.f32.mrb[91].mxu1 }
0x1aab   :  { %v14085_v54 = vpop.eup %14084 }
0x1aac   :  { %v14087_v56 = vpop.eup %14086  ;;  %v8114_v30 = vmul.f32 0.6931472, %v14085_v54 }
0x1aad   :  { %v8223_v13 = vmul.f32 0.6931472, %v14087_v56 }
0x1aae   :  { %v15866_v49 = vadd.f32 %v8114_v30, %v15831_v5 }
0x1aaf   :  { %v14089_v11 = vpop.eup %14088  ;;  %v15869_v43 = vadd.f32 %v8223_v13, %v15833_v50 }
0x1ab0   :  { %v14091_v33 = vpop.eup %14090  ;;  %v8116_v59 = vsel %vm521_vm3, %v15866_v49, -inf  ;;  %v8332_v40 = vmul.f32 0.6931472, %v14089_v11 }
0x1ab1   :  { %v8117_v45 = vrot.slane %v8116_v59, 4  ;;  %v8225_v37 = vsel %vm521_vm3, %v15869_v43, -inf  ;;  %v8441_v62 = vmul.f32 0.6931472, %v14091_v33 }
0x1ab2   :  { %v8226_v47 = vrot.slane %v8225_v37, 4  ;;  %v15876_v39 = vadd.f32 %v8332_v40, %v15835_v55 }
0x1ab3   :  { %v8118_v5 = vmax.f32 %v8116_v59, %v8117_v45  ;;  %v15879_v8 = vadd.f32 %v8441_v62, %v15837_v57 }
0x1ab4   :  { %v8227_v50 = vmax.f32 %v8225_v37, %v8226_v47  ;;  %v8334_v18 = vsel %vm521_vm3, %v15876_v39, -inf }
0x1ab5   :  { %v8119_v27 = vrot.slane %v8118_v5, 2  ;;  %v8335_v6 = vrot.slane %v8334_v18, 4  ;;  %v8443_v10 = vsel %vm521_vm3, %v15879_v8, -inf }
0x1ab6   :  { %v8228_v36 = vrot.slane %v8227_v50, 2  ;;  %v8444_v58 = vrot.slane %v8443_v10, 4 }
0x1ab7   :  { %v8120_v61 = vmax.f32 %v8118_v5, %v8119_v27  ;;  %v8336_v28 = vmax.f32 %v8334_v18, %v8335_v6 }
0x1ab8   :  { %v8229_v22 = vmax.f32 %v8227_v50, %v8228_v36  ;;  %v8445_v55 = vmax.f32 %v8443_v10, %v8444_v58 }
0x1ab9   :  { %v8121_v24 = vrot.slane %v8120_v61, 1  ;;  %v8337_v14 = vrot.slane %v8336_v28, 2 }
0x1aba   :  { %v8230_v20 = vrot.slane %v8229_v22, 1  ;;  %v8446_v57 = vrot.slane %v8445_v55, 2 }
0x1abb   :  { %v8122_v52 = vmax.f32 %v8120_v61, %v8121_v24  ;;  %v8338_v31 = vmax.f32 %v8336_v28, %v8337_v14 }
0x1abc   :  { %v8231_v23 = vmax.f32 %v8229_v22, %v8230_v20  ;;  %v8447_v25 = vmax.f32 %v8445_v55, %v8446_v57 }
0x1abd   :  { %v8123_v15 = vsub.f32 %v15866_v49, %v8122_v52  ;;  %v8339_v46 = vrot.slane %v8338_v31, 1 }
0x1abe   :  { %v8232_v29 = vsub.f32 %v15869_v43, %v8231_v23  ;;  %v8448_v21 = vrot.slane %v8447_v25, 1 }
0x1abf   :  { %v8124_v51 = vmul.f32 1.442695, %v8123_v15  ;;  %v8340_v38 = vmax.f32 %v8338_v31, %v8339_v46 }
0x1ac0   :  { %v8233_v42 = vmul.f32 1.442695, %v8232_v29  ;;  %v8449_v12 = vmax.f32 %v8447_v25, %v8448_v21 }
0x1ac1   :  { %14092 = vpow2.f32 %v8124_v51  ;;  %v8341_v53 = vsub.f32 %v15876_v39, %v8340_v38 }
0x1ac2   :  { %14094 = vpow2.f32 %v8233_v42  ;;  %v8450_v3 = vsub.f32 %v15879_v8, %v8449_v12 }
0x1ac3   :  { %v8342_v35 = vmul.f32 1.442695, %v8341_v53 }
0x1ac4   :  { %v8451_v7 = vmul.f32 1.442695, %v8450_v3 }
0x1ac5   :  { %14096 = vpow2.f32 %v8342_v35 }
0x1ac6   :  { %14098 = vpow2.f32 %v8451_v7 }
0x1acb   :  { %v14093_v34 = vpop.eup %14092 }
0x1acc   :  { %v14095_v17 = vpop.eup %14094  ;;  %v8126_v1 = vsel %vm521_vm3, %v14093_v34, 0.0 }
0x1acd   :  { %v8235_v2 = vsel %vm521_vm3, %v14095_v17, 0.0  ;;  %v8127_v41 = vrot.slane %v8126_v1, 4 }
0x1ace   :  { %v8236_v60 = vrot.slane %v8235_v2, 4 }
0x1acf   :  { %v14097_v54 = vpop.eup %14096  ;;  %v8128_v56 = vadd.f32 %v8127_v41, %v8126_v1 }
0x1ad0   :  { %v14099_v30 = vpop.eup %14098  ;;  %v8237_v13 = vadd.f32 %v8236_v60, %v8235_v2  ;;  %v8344_v11 = vsel %vm521_vm3, %v14097_v54, 0.0 }
0x1ad1   :  { %v8129_v33 = vrot.slane %v8128_v56, 2  ;;  %v8453_v59 = vsel %vm521_vm3, %v14099_v30, 0.0  ;;  %v8345_v40 = vrot.slane %v8344_v11, 4 }
0x1ad2   :  { %v8238_v45 = vrot.slane %v8237_v13, 2  ;;  %v8454_v37 = vrot.slane %v8453_v59, 4 }
0x1ad3   :  { %v8130_v62 = vadd.f32 %v8129_v33, %v8128_v56  ;;  %v8346_v47 = vadd.f32 %v8345_v40, %v8344_v11 }
0x1ad4   :  { %v8239_v5 = vadd.f32 %v8238_v45, %v8237_v13  ;;  %v8455_v50 = vadd.f32 %v8454_v37, %v8453_v59  ;;  %v15944_v37 = vld [vmem:[%s16415_s1 + $0x8] sm:$0xff] }
0x1ad5   :  { %v8131_v18 = vrot.slane %v8130_v62, 1  ;;  %v8347_v27 = vrot.slane %v8346_v47, 2 }
0x1ad6   :  { %v8240_v6 = vrot.slane %v8239_v5, 1  ;;  %v8456_v10 = vrot.slane %v8455_v50, 2 }
0x1ad7   :  { %v8132_v36 = vadd.f32 %v8131_v18, %v8130_v62  ;;  %v8348_v58 = vadd.f32 %v8347_v27, %v8346_v47  ;;  %v15965_v62 = vld [vmem:[%s16415_s1 + $0x30] sm:$0xff]  ;;  %v15974_v47 = vld [vmem:[%s16415_s1 + $0x28] sm:$0xff] }
0x1ad8   :  { %v8241_v61 = vadd.f32 %v8240_v6, %v8239_v5  ;;  %v8457_v28 = vadd.f32 %v8456_v10, %v8455_v50  ;;  %v15981_v5 = vld [vmem:[%s16415_s1 + $0x38] sm:$0xff]  ;;  %v15992_v27 = vld [vmem:[%s16414_s0 + $0x8] sm:$0xff] }
0x1ad9   :  { %14100 = vlog2.f32 %v8132_v36  ;;  %v8349_v22 = vrot.slane %v8348_v58, 1 }
0x1ada   :  { %14102 = vlog2.f32 %v8241_v61  ;;  %v8458_v55 = vrot.slane %v8457_v28, 1 }
0x1adb   :  { %v8350_v24 = vadd.f32 %v8349_v22, %v8348_v58  ;;  %v15998_v58 = vld [vmem:[%s16414_s0] sm:$0xff] }
0x1adc   :  { %v8459_v14 = vadd.f32 %v8458_v55, %v8457_v28 }
0x1add   :  { %14104 = vlog2.f32 %v8350_v24 }
0x1ade   :  { %14106 = vlog2.f32 %v8459_v14 }
0x1ae3   :  { %v14101_v20 = vpop.eup %14100 }
0x1ae4   :  { %v14103_v57 = vpop.eup %14102  ;;  %v8134_v31 = vmul.f32 0.6931472, %v14101_v20 }
0x1ae5   :  { %v8243_v25 = vmul.f32 0.6931472, %v14103_v57 }
0x1ae6   :  { %v8135_v15 = vadd.f32 %v8134_v31, %v8122_v52 }
0x1ae7   :  { %v14105_v46 = vpop.eup %14104  ;;  %v8244_v29 = vadd.f32 %v8243_v25, %v8231_v23 }
0x1ae8   :  { %v14107_v21 = vpop.eup %14106  ;;  %v8136_v51 = vsub.f32 %v15866_v49, %v8135_v15  ;;  %v8352_v42 = vmul.f32 0.6931472, %v14105_v46 }
0x1ae9   :  { %v8245_v53 = vsub.f32 %v15869_v43, %v8244_v29  ;;  %v8461_v3 = vmul.f32 0.6931472, %v14107_v21 }
0x1aea   :  { %13243 = vmatprep.subr.msk.mxu1 %vm521_vm3, %v8136_v51  ;;  %v8353_v35 = vadd.f32 %v8352_v42, %v8340_v38 }
0x1aeb   :  { %13238 = vmatprep.subr.msk.mxu0 %vm521_vm3, %v8245_v53  ;;  %13244 = vmatpush3.msk.msra.mxu1 %vm521_vm3, %v8136_v51  ;;  %v8462_v7 = vadd.f32 %v8461_v3, %v8449_v12 }
0x1aec   :  { %13239 = vmatpush3.msk.msra.mxu0 %vm521_vm3, %v8245_v53  ;;  %v8354_v52 = vsub.f32 %v15876_v39, %v8353_v35  ;;  %13246 = vmatmul.mubr.msk.f32.vlgmr.msra.gmra.mrb[92].mxu1 %vm879_vm2, %v15743_v19  ;;  %v15920_v19 = vld [vmem:[%s16415_s1 + $0x10] sm:$0xff] }
0x1aed   :  { %13241 = vmatmul.mubr.msk.f32.vlgmr.msra.gmra.mrb[92].mxu0 %vm879_vm2, %v15750_v44  ;;  %v8463_v49 = vsub.f32 %v15879_v8, %v8462_v7  ;;  %13255 = vmatprep.mubr.msk.f32.mxu1 %vm879_vm2, %v15758_v16  ;;  %v15927_v44 = vld [vmem:[%s16415_s1] sm:$0xff] }
0x1aee   :  { %13253 = vmatprep.subr.msk.mxu1 %vm521_vm3, %v8354_v52  ;;  %13250 = vmatprep.mubr.msk.f32.mxu0 %vm879_vm2, %v15766_v4 }
0x1aef   :  { %13248 = vmatprep.subr.msk.mxu0 %vm521_vm3, %v8463_v49  ;;  %13254 = vmatpush3.msk.msra.mxu1 %vm521_vm3, %v8354_v52 }
0x1af0   :  { %13249 = vmatpush3.msk.msra.mxu0 %vm521_vm3, %v8463_v49  ;;  %13256 = vmatmul.mubr.msk.f32.vlgmr.msra.gmra.mrb[94].mxu1 %vm879_vm2, %v15776_v48 }
0x1af1   :  { %13251 = vmatmul.mubr.msk.f32.vlgmr.msra.gmra.mrb[94].mxu0 %vm879_vm2, %v15783_v63  ;;  %13269 = vmatprep.mubr.msk.f32.mxu1 %vm97_vm0, %v15920_v19 }
0x1af2   :  { %13262 = vmatprep.mubr.msk.f32.mxu0 %vm97_vm0, %v15927_v44 }
0x1bbf   :  { %v13247_v16 = vpop.f32.mrb[92].mxu1 }
0x1bc0   :  { %v13242_v4 = vpop.f32.mrb[92].mxu0  ;;  %v8615_v48 = vpop.f32.mrb[93].mxu1 }
0x1bc1   :  { %8544 = vrot.lane.b32.xlu1 %v13242_v4, %s14436_s12  ;;  %v8533_v63 = vpop.f32.mrb[93].mxu0 }
0x1bc2   :  { %8542 = vrot.lane.b32.xlu0 %v8533_v63, %s14436_s12 }
0x1bc3   :  { %v13257_v43 = vpop.f32.mrb[94].mxu1 }
0x1bc4   :  { %v13252_v39 = vpop.f32.mrb[94].mxu0  ;;  %v8783_v8 = vpop.f32.mrb[95].mxu1 }
0x1bc5   :  { %8626 = vrot.lane.b32.xlu1 %v13247_v16, %s14435_s11  ;;  %v8699_v23 = vpop.f32.mrb[95].mxu0 }
0x1bc6   :  { %8624 = vrot.lane.b32.xlu0 %v8615_v48, %s14435_s11 }
0x1bc9   :  { %8710 = vrot.lane.b32.xlu1 %v13252_v39, %s14437_s13 }
0x1bca   :  { %8708 = vrot.lane.b32.xlu0 %v8699_v23, %s14437_s13 }
0x1bcd   :  { %8794 = vrot.lane.b32.xlu1 %v13257_v43, %s14438_s15 }
0x1bce   :  { %8792 = vrot.lane.b32.xlu0 %v8783_v8, %s14438_s15 }
0x1c33   :  { %v8545_v38 = vpop.permute.xlu1 %8544 }
0x1c34   :  { %v8543_v12 = vpop.permute.xlu0 %8542 }
0x1c37   :  { %v8627_v34 = vpop.permute.xlu1 %8626 }
0x1c38   :  { %v8625_v17 = vpop.permute.xlu0 %8624  ;;  %v8629_v2 = vadd.f32 %v8627_v34, %v8545_v38 }
0x1c39   :  { %v8628_v60 = vadd.f32 %v8625_v17, %v8543_v12 }
0x1c3b   :  { %v8711_v1 = vpop.permute.xlu1 %8710 }
0x1c3c   :  { %v8709_v41 = vpop.permute.xlu0 %8708  ;;  %v8713_v54 = vadd.f32 %v8711_v1, %v8629_v2 }
0x1c3d   :  { %v8712_v56 = vadd.f32 %v8709_v41, %v8628_v60 }
0x1c3f   :  { %v8795_v30 = vpop.permute.xlu1 %8794 }
0x1c40   :  { %v8797_v13 = vadd.f32 %v8795_v30, %v8713_v54  ;;  %v8793_v11 = vpop.permute.xlu0 %8792 }
0x1c41   :  { %v8796_v33 = vadd.f32 %v8793_v11, %v8712_v56 }
0x1c42   :  { %v8799_v59 = vmul.f32 %v15802_v26, %v8797_v13  ;;  %v15951_v26 = vld [vmem:[%s16415_s1 + $0x18] sm:$0xff] }
0x1c43   :  { %v8798_v40 = vmul.f32 %v15808_v32, %v8796_v33  ;;  %v15958_v32 = vld [vmem:[%s16415_s1 + $0x20] sm:$0xff] }
0x1c45   :  { %v13683_v45 = vpack.c.bf16 %v8799_v59, %v8798_v40 }
0x1c47   :  { %13684 = vmatprep.subr.bf16.mxu0 %v13683_v45  ;;  %13688 = vmatprep.subr.bf16.mxu1 %v13683_v45 }
0x1c48   :  { %13686 = vmatpush3.bf16.msra.mxu0 %v13683_v45  ;;  %13690 = vmatpush3.bf16.msra.mxu1 %v13683_v45 }
0x1c49   :  { %13692 = vmatprep.subr.bf16.mxu0 %v13683_v45  ;;  %13696 = vmatprep.subr.bf16.mxu1 %v13683_v45 }
0x1c4b   :  { %13263 = vmatmul.mubr.msk.f32.vlgmr.msra.gmra.mrb[96].mxu0 %vm97_vm0, %v15944_v37  ;;  %13270 = vmatmul.mubr.msk.f32.vlgmr.msra.gmra.mrb[96].mxu1 %vm97_vm0, %v15951_v26 }
0x1c4c   :  { %13694 = vmatpush3.bf16.msra.mxu0 %v13683_v45  ;;  %13698 = vmatpush3.bf16.msra.mxu1 %v13683_v45 }
0x1c4d   :  { %13276 = vmatprep.mubr.msk.f32.mxu0 %vm97_vm0, %v15958_v32  ;;  %13283 = vmatprep.mubr.msk.f32.mxu1 %vm97_vm0, %v15965_v62 }
0x1c4e   :  { %13699 = vmatprep.subr.bf16.mxu0 %v14433_v9  ;;  %13702 = vmatprep.subr.bf16.mxu1 %v14433_v9 }
0x1c4f   :  { %13277 = vmatmul.mubr.msk.f32.vlgmr.msra.gmra.mrb[98].mxu0 %vm97_vm0, %v15974_v47  ;;  %13284 = vmatmul.mubr.msk.f32.vlgmr.msra.gmra.mrb[98].mxu1 %vm97_vm0, %v15981_v5 }
0x1c50   :  { %13290 = vmatprep.mubr.msk.f32.mxu0 %vm14434_vm1, %v14432_v0  ;;  %13297 = vmatprep.mubr.msk.f32.mxu1 %vm14434_vm1, %v14432_v0 }
0x1d1e   :  { %v13264_v50 = vpop.f32.mrb[96].mxu0  ;;  %v13271_v18 = vpop.f32.mrb[96].mxu1 }
0x1d1f   :  { %v9101_v6 = vadd.f32 %v15992_v27, %v13264_v50  ;;  %v8866_v10 = vpop.f32.mrb[97].mxu0  ;;  %v8941_v36 = vpop.f32.mrb[97].mxu1 }
0x1d20   :  { %v9100_v61 = vadd.f32 %v15998_v58, %v8866_v10 }
0x1d21   :  { %v9103_v28 = vadd.f32 %v13271_v18, %v9101_v6 }
0x1d22   :  { %v9102_v22 = vadd.f32 %v9100_v61, %v8941_v36  ;;  %v13278_v55 = vpop.f32.mrb[98].mxu0  ;;  %v13285_v24 = vpop.f32.mrb[98].mxu1 }
0x1d23   :  { %v9105_v14 = vadd.f32 %v13278_v55, %v9103_v28  ;;  %v9016_v20 = vpop.f32.mrb[99].mxu0  ;;  %v9091_v57 = vpop.f32.mrb[99].mxu1 }
0x1d24   :  { %v9104_v31 = vadd.f32 %v9102_v22, %v9016_v20 }
0x1d25   :  { %v9107_v25 = vadd.f32 %v13285_v24, %v9105_v14 }
0x1d26   :  { %v9106_v15 = vadd.f32 %v9104_v31, %v9091_v57 }
0x1d27   :  { %v9109_v46 = vsub.f32 %v9107_v25, %v13264_v50  ;;  %v9218_v29 = vsub.f32 %v9107_v25, %v13271_v18  ;;  %v9327_v21 = vsub.f32 %v9107_v25, %v13278_v55  ;;  %v9436_v51 = vsub.f32 %v9107_v25, %v13285_v24 }
0x1d28   :  { %v9108_v42 = vsub.f32 %v9106_v15, %v8866_v10  ;;  %v9217_v53 = vsub.f32 %v9106_v15, %v8941_v36  ;;  %v9326_v3 = vsub.f32 %v9106_v15, %v9016_v20  ;;  %v9435_v35 = vsub.f32 %v9106_v15, %v9091_v57 }
0x1d2a   :  { %v9110_v7 = vmax.f32 %v9108_v42, %v9109_v46  ;;  %v9219_v52 = vmax.f32 %v9217_v53, %v9218_v29  ;;  %v9328_v49 = vmax.f32 %v9326_v3, %v9327_v21  ;;  %v9437_v16 = vmax.f32 %v9435_v35, %v9436_v51 }
0x1d2c   :  { %v9111_v4 = vrot.slane %v9110_v7, 4  ;;  %v9220_v48 = vrot.slane %v9219_v52, 4  ;;  %v9329_v63 = vrot.slane %v9328_v49, 4  ;;  %v9438_v43 = vrot.slane %v9437_v16, 4 }
0x1d2e   :  { %v9112_v39 = vmax.f32 %v9110_v7, %v9111_v4  ;;  %v9221_v8 = vmax.f32 %v9219_v52, %v9220_v48  ;;  %v9330_v23 = vmax.f32 %v9328_v49, %v9329_v63  ;;  %v9439_v38 = vmax.f32 %v9437_v16, %v9438_v43  ;;  %v16019_v4 = vld [vmem:[#allocation2] sm:$0xf]  ;;  %v16023_v48 = vld [vmem:[#allocation2 + $0x4] sm:$0xf]  ;;  %v16031_v63 = vld [vmem:[#allocation2 + $0x8] sm:$0xf] }
0x1d2f   :  { %v16035_v43 = vld [vmem:[#allocation2 + $0xc] sm:$0xf] }
0x1d30   :  { %v9113_v12 = vrot.slane %v9112_v39, 2  ;;  %v9222_v34 = vrot.slane %v9221_v8, 2  ;;  %v9331_v17 = vrot.slane %v9330_v23, 2  ;;  %v9440_v1 = vrot.slane %v9439_v38, 2 }
0x1d32   :  { %v9114_v2 = vmax.f32 %v9112_v39, %v9113_v12  ;;  %v9223_v41 = vmax.f32 %v9221_v8, %v9222_v34  ;;  %v9332_v60 = vmax.f32 %v9330_v23, %v9331_v17  ;;  %v9441_v54 = vmax.f32 %v9439_v38, %v9440_v1  ;;  %v16042_v39 = vld [vmem:[%s16417_s3] sm:$0xff]  ;;  %v16049_v8 = vld [vmem:[%s16417_s3 + $0x10] sm:$0xff] }
0x1d34   :  { %v9115_v56 = vrot.slane %v9114_v2, 1  ;;  %v9224_v30 = vrot.slane %v9223_v41, 1  ;;  %v9333_v13 = vrot.slane %v9332_v60, 1  ;;  %v9442_v11 = vrot.slane %v9441_v54, 1 }
0x1d36   :  { %v16001_v33 = vmax.f32 %v9114_v2, %v9115_v56  ;;  %v16003_v59 = vmax.f32 %v9223_v41, %v9224_v30  ;;  %v16005_v40 = vmax.f32 %v9332_v60, %v9333_v13  ;;  %v16007_v45 = vmax.f32 %v9441_v54, %v9442_v11 }
0x1d38   :  { %v9117_v50 = vsub.f32 %v9108_v42, %v16001_v33  ;;  %v9226_v18 = vsub.f32 %v9217_v53, %v16003_v59  ;;  %v9335_v6 = vsub.f32 %v9326_v3, %v16005_v40  ;;  %v9444_v10 = vsub.f32 %v9435_v35, %v16007_v45 }
0x1d39   :  { %v9445_v36 = vsub.f32 %v9436_v51, %v16007_v45  ;;  %v9118_v61 = vsub.f32 %v9109_v46, %v16001_v33  ;;  %v9227_v24 = vsub.f32 %v9218_v29, %v16003_v59  ;;  %v9336_v20 = vsub.f32 %v9327_v21, %v16005_v40 }
0x1d3a   :  { %v9119_v28 = vmul.f32 1.442695, %v9117_v50  ;;  %v9228_v22 = vmul.f32 1.442695, %v9226_v18  ;;  %v9337_v55 = vmul.f32 1.442695, %v9335_v6 }
0x1d3b   :  { %v9446_v14 = vmul.f32 1.442695, %v9444_v10  ;;  %v9448_v57 = vmul.f32 1.442695, %v9445_v36  ;;  %v9121_v31 = vmul.f32 1.442695, %v9118_v61 }
0x1d3c   :  { %14108 = vpow2.f32 %v9119_v28  ;;  %v9230_v25 = vmul.f32 1.442695, %v9227_v24  ;;  %v9339_v15 = vmul.f32 1.442695, %v9336_v20 }
0x1d3d   :  { %14110 = vpow2.f32 %v9228_v22 }
0x1d3e   :  { %14112 = vpow2.f32 %v9337_v55 }
0x1d3f   :  { %14114 = vpow2.f32 %v9446_v14 }
0x1d40   :  { %14116 = vpow2.f32 %v9448_v57 }
0x1d41   :  { %14118 = vpow2.f32 %v9121_v31 }
0x1d42   :  { %14120 = vpow2.f32 %v9230_v25 }
0x1d43   :  { %14122 = vpow2.f32 %v9339_v15 }
0x1d46   :  { %v14109_v46 = vpop.eup %14108 }
0x1d47   :  { %v14111_v51 = vpop.eup %14110 }
0x1d48   :  { %v14113_v42 = vpop.eup %14112 }
0x1d49   :  { %v14115_v53 = vpop.eup %14114 }
0x1d4a   :  { %v14117_v29 = vpop.eup %14116 }
0x1d4b   :  { %v14119_v3 = vpop.eup %14118  ;;  %v13709_v35 = vpack.c.bf16 %v14117_v29, %v14115_v53 }
0x1d4c   :  { %v14121_v21 = vpop.eup %14120  ;;  %v13700_v7 = vpack.c.bf16 %v14119_v3, %v14109_v46 }
0x1d4d   :  { %v14123_v52 = vpop.eup %14122  ;;  %v13703_v49 = vpack.c.bf16 %v14121_v21, %v14111_v51 }
0x1d4e   :  { %13701 = vmatpush3.bf16.msra.mxu0 %v13700_v7  ;;  %v13706_v16 = vpack.c.bf16 %v14123_v52, %v14113_v42 }
0x1d4f   :  { %13704 = vmatpush3.bf16.msra.mxu1 %v13703_v49  ;;  %13705 = vmatprep.subr.bf16.mxu0 %v14433_v9 }
0x1d50   :  { %13708 = vmatprep.subr.bf16.mxu1 %v14433_v9 }
0x1d51   :  { %13291 = vmatmul.mubr.msk.f32.vlgmr.msra.gmra.mrb[100].mxu0 %vm97_vm0, %v16019_v4 }
0x1d52   :  { %13298 = vmatmul.mubr.msk.f32.vlgmr.msra.gmra.mrb[100].mxu1 %vm97_vm0, %v16023_v48  ;;  %13707 = vmatpush3.bf16.msra.mxu0 %v13706_v16 }
0x1d53   :  { %13710 = vmatpush3.bf16.msra.mxu1 %v13709_v35  ;;  %13304 = vmatprep.mubr.msk.f32.mxu0 %vm14434_vm1, %v14432_v0 }
0x1d54   :  { %13311 = vmatprep.mubr.msk.f32.mxu1 %vm14434_vm1, %v14432_v0 }
0x1d55   :  { %13305 = vmatmul.mubr.msk.f32.vlgmr.msra.gmra.mrb[102].mxu0 %vm97_vm0, %v16031_v63 }
0x1d56   :  { %13312 = vmatmul.mubr.msk.f32.vlgmr.msra.gmra.mrb[102].mxu1 %vm97_vm0, %v16035_v43  ;;  %13316 = vmatprep.mubr.msk.f32.mxu0 %vm879_vm2, %v16042_v39 }
0x1d57   :  { %13321 = vmatprep.mubr.msk.f32.mxu1 %vm879_vm2, %v16049_v8 }
0x1e24   :  { %v9189_v23 = vpop.f32.mrb[100].mxu0 }
0x1e25   :  { %14124 = vlog2.f32 %v9189_v23  ;;  %v9298_v38 = vpop.f32.mrb[100].mxu1  ;;  %v13292_v12 = vpop.f32.mrb[101].mxu0 }
0x1e26   :  { %14126 = vlog2.f32 %v9298_v38  ;;  %v13299_v34 = vpop.f32.mrb[101].mxu1 }
0x1e28   :  { %v9407_v17 = vpop.f32.mrb[102].mxu0 }
0x1e29   :  { %14128 = vlog2.f32 %v9407_v17  ;;  %v9516_v1 = vpop.f32.mrb[102].mxu1  ;;  %v13306_v2 = vpop.f32.mrb[103].mxu0 }
0x1e2a   :  { %14130 = vlog2.f32 %v9516_v1  ;;  %v13313_v41 = vpop.f32.mrb[103].mxu1 }
0x1e2f   :  { %v14125_v60 = vpop.eup %14124 }
0x1e30   :  { %v14127_v54 = vpop.eup %14126  ;;  %v9194_v56 = vmul.f32 0.6931472, %v14125_v60 }
0x1e31   :  { %v9303_v30 = vmul.f32 0.6931472, %v14127_v54 }
0x1e32   :  { %v16054_v13 = vadd.f32 %v9194_v56, %v16001_v33 }
0x1e33   :  { %v14129_v11 = vpop.eup %14128  ;;  %v16057_v50 = vadd.f32 %v9303_v30, %v16003_v59 }
0x1e34   :  { %v14131_v18 = vpop.eup %14130  ;;  %v9196_v6 = vsel %vm521_vm3, %v16054_v13, -inf  ;;  %v9412_v10 = vmul.f32 0.6931472, %v14129_v11 }
0x1e35   :  { %v9197_v36 = vrot.slane %v9196_v6, 4  ;;  %v9305_v61 = vsel %vm521_vm3, %v16057_v50, -inf  ;;  %v9521_v28 = vmul.f32 0.6931472, %v14131_v18 }
0x1e36   :  { %v9306_v22 = vrot.slane %v9305_v61, 4  ;;  %v16064_v55 = vadd.f32 %v9412_v10, %v16005_v40 }
0x1e37   :  { %v9198_v33 = vmax.f32 %v9196_v6, %v9197_v36  ;;  %v16067_v24 = vadd.f32 %v9521_v28, %v16007_v45 }
0x1e38   :  { %v9307_v59 = vmax.f32 %v9305_v61, %v9306_v22  ;;  %v9414_v14 = vsel %vm521_vm3, %v16064_v55, -inf }
0x1e39   :  { %v9199_v20 = vrot.slane %v9198_v33, 2  ;;  %v9415_v57 = vrot.slane %v9414_v14, 4  ;;  %v9523_v31 = vsel %vm521_vm3, %v16067_v24, -inf }
0x1e3a   :  { %v9308_v25 = vrot.slane %v9307_v59, 2  ;;  %v9524_v15 = vrot.slane %v9523_v31, 4 }
0x1e3b   :  { %v9200_v46 = vmax.f32 %v9198_v33, %v9199_v20  ;;  %v9416_v51 = vmax.f32 %v9414_v14, %v9415_v57 }
0x1e3c   :  { %v9309_v42 = vmax.f32 %v9307_v59, %v9308_v25  ;;  %v9525_v40 = vmax.f32 %v9523_v31, %v9524_v15 }
0x1e3d   :  { %v9201_v53 = vrot.slane %v9200_v46, 1  ;;  %v9417_v29 = vrot.slane %v9416_v51, 2 }
0x1e3e   :  { %v9310_v3 = vrot.slane %v9309_v42, 1  ;;  %v9526_v45 = vrot.slane %v9525_v40, 2 }
0x1e3f   :  { %v9202_v35 = vmax.f32 %v9200_v46, %v9201_v53  ;;  %v9418_v21 = vmax.f32 %v9416_v51, %v9417_v29 }
0x1e40   :  { %v9311_v7 = vmax.f32 %v9309_v42, %v9310_v3  ;;  %v9527_v52 = vmax.f32 %v9525_v40, %v9526_v45 }
0x1e41   :  { %v9203_v49 = vsub.f32 %v16054_v13, %v9202_v35  ;;  %v9419_v16 = vrot.slane %v9418_v21, 1 }
0x1e42   :  { %v9312_v23 = vsub.f32 %v16057_v50, %v9311_v7  ;;  %v9528_v38 = vrot.slane %v9527_v52, 1 }
0x1e43   :  { %v9204_v12 = vmul.f32 1.442695, %v9203_v49  ;;  %v9420_v34 = vmax.f32 %v9418_v21, %v9419_v16 }
0x1e44   :  { %v9313_v17 = vmul.f32 1.442695, %v9312_v23  ;;  %v9529_v1 = vmax.f32 %v9527_v52, %v9528_v38 }
0x1e45   :  { %14132 = vpow2.f32 %v9204_v12  ;;  %v9421_v2 = vsub.f32 %v16064_v55, %v9420_v34 }
0x1e46   :  { %14134 = vpow2.f32 %v9313_v17  ;;  %v9530_v41 = vsub.f32 %v16067_v24, %v9529_v1 }
0x1e47   :  { %v9422_v60 = vmul.f32 1.442695, %v9421_v2 }
0x1e48   :  { %v9531_v54 = vmul.f32 1.442695, %v9530_v41 }
0x1e49   :  { %14136 = vpow2.f32 %v9422_v60 }
0x1e4a   :  { %14138 = vpow2.f32 %v9531_v54 }
0x1e4f   :  { %v14133_v56 = vpop.eup %14132 }
0x1e50   :  { %v14135_v30 = vpop.eup %14134  ;;  %v9206_v11 = vsel %vm521_vm3, %v14133_v56, 0.0 }
0x1e51   :  { %v9315_v18 = vsel %vm521_vm3, %v14135_v30, 0.0  ;;  %v9207_v6 = vrot.slane %v9206_v11, 4 }
0x1e52   :  { %v9316_v10 = vrot.slane %v9315_v18, 4 }
0x1e53   :  { %v14137_v36 = vpop.eup %14136  ;;  %v9208_v61 = vadd.f32 %v9207_v6, %v9206_v11 }
0x1e54   :  { %v14139_v28 = vpop.eup %14138  ;;  %v9317_v22 = vadd.f32 %v9316_v10, %v9315_v18  ;;  %v9424_v33 = vsel %vm521_vm3, %v14137_v36, 0.0 }
0x1e55   :  { %v9209_v59 = vrot.slane %v9208_v61, 2  ;;  %v9533_v14 = vsel %vm521_vm3, %v14139_v28, 0.0  ;;  %v9425_v20 = vrot.slane %v9424_v33, 4 }
0x1e56   :  { %v9318_v57 = vrot.slane %v9317_v22, 2  ;;  %v9534_v31 = vrot.slane %v9533_v14, 4 }
0x1e57   :  { %v9210_v25 = vadd.f32 %v9209_v59, %v9208_v61  ;;  %v9426_v15 = vadd.f32 %v9425_v20, %v9424_v33 }
0x1e58   :  { %v9319_v46 = vadd.f32 %v9318_v57, %v9317_v22  ;;  %v9535_v51 = vadd.f32 %v9534_v31, %v9533_v14 }
0x1e59   :  { %v9211_v42 = vrot.slane %v9210_v25, 1  ;;  %v9427_v40 = vrot.slane %v9426_v15, 2 }
0x1e5a   :  { %v9320_v53 = vrot.slane %v9319_v46, 1  ;;  %v9536_v29 = vrot.slane %v9535_v51, 2 }
0x1e5b   :  { %v9212_v3 = vadd.f32 %v9211_v42, %v9210_v25  ;;  %v9428_v45 = vadd.f32 %v9427_v40, %v9426_v15 }
0x1e5c   :  { %v9321_v21 = vadd.f32 %v9320_v53, %v9319_v46  ;;  %v9537_v52 = vadd.f32 %v9536_v29, %v9535_v51 }
0x1e5d   :  { %14140 = vlog2.f32 %v9212_v3  ;;  %v9429_v49 = vrot.slane %v9428_v45, 1 }
0x1e5e   :  { %14142 = vlog2.f32 %v9321_v21  ;;  %v9538_v16 = vrot.slane %v9537_v52, 1 }
0x1e5f   :  { %v9430_v23 = vadd.f32 %v9429_v49, %v9428_v45  ;;  %v16150_v49 = vld [vmem:[%s16420_s6 + $0x8] sm:$0xff] }
0x1e60   :  { %v9539_v38 = vadd.f32 %v9538_v16, %v9537_v52 }
0x1e61   :  { %14144 = vlog2.f32 %v9430_v23  ;;  %v16156_v23 = vld [vmem:[%s16420_s6] sm:$0xff]  ;;  %s14440_s6 = smov [#allocation7]  }
0x1e62   :  { %14146 = vlog2.f32 %v9539_v38  ;;  %s11903_s17 = sshll.u32 %s14440_s6, 4  ;;  %s11904_s17 = int_to_ptr.vmem [resolvable:$true] %s11903_s17 }
0x1e67   :  { %v14141_v12 = vpop.eup %14140 }
0x1e68   :  { %v14143_v17 = vpop.eup %14142  ;;  %v9214_v2 = vmul.f32 0.6931472, %v14141_v12 }
0x1e69   :  { %v9323_v41 = vmul.f32 0.6931472, %v14143_v17 }
0x1e6a   :  { %v9215_v60 = vadd.f32 %v9214_v2, %v9202_v35 }
0x1e6b   :  { %v14145_v54 = vpop.eup %14144  ;;  %v9324_v56 = vadd.f32 %v9323_v41, %v9311_v7 }
0x1e6c   :  { %v14147_v30 = vpop.eup %14146  ;;  %v9216_v11 = vsub.f32 %v16054_v13, %v9215_v60  ;;  %v9432_v18 = vmul.f32 0.6931472, %v14145_v54  ;;  %v16091_v13 = vld [vmem:[%s16417_s3 + $0x18] sm:$0xff] }
0x1e6d   :  { %v9325_v6 = vsub.f32 %v16057_v50, %v9324_v56  ;;  %v9541_v10 = vmul.f32 0.6931472, %v14147_v30  ;;  %v16098_v50 = vld [vmem:[%s16417_s3 + $0x8] sm:$0xff] }
0x1e6e   :  { %13319 = vmatprep.subr.msk.mxu1 %vm521_vm3, %v9216_v11  ;;  %v9433_v36 = vadd.f32 %v9432_v18, %v9420_v34  ;;  %v16114_v34 = vld [vmem:[%s16417_s3 + $0x20] sm:$0xff] }
0x1e6f   :  { %13314 = vmatprep.subr.msk.mxu0 %vm521_vm3, %v9325_v6  ;;  %13320 = vmatpush3.msk.msra.mxu1 %vm521_vm3, %v9216_v11  ;;  %v9542_v61 = vadd.f32 %v9541_v10, %v9529_v1  ;;  %v16131_v1 = vld [vmem:[%s16417_s3 + $0x28] sm:$0xff] }
0x1e70   :  { %13315 = vmatpush3.msk.msra.mxu0 %vm521_vm3, %v9325_v6  ;;  %v9434_v35 = vsub.f32 %v16064_v55, %v9433_v36  ;;  %13322 = vmatmul.mubr.msk.f32.vlgmr.msra.gmra.mrb[104].mxu1 %vm879_vm2, %v16091_v13  ;;  %v16106_v55 = vld [vmem:[%s16417_s3 + $0x30] sm:$0xff] }
0x1e71   :  { %13317 = vmatmul.mubr.msk.f32.vlgmr.msra.gmra.mrb[104].mxu0 %vm879_vm2, %v16098_v50  ;;  %v9543_v7 = vsub.f32 %v16067_v24, %v9542_v61  ;;  %13331 = vmatprep.mubr.msk.f32.mxu1 %vm879_vm2, %v16106_v55  ;;  %v16124_v24 = vld [vmem:[%s16417_s3 + $0x38] sm:$0xff] }
0x1e72   :  { %13329 = vmatprep.subr.msk.mxu1 %vm521_vm3, %v9434_v35  ;;  %13326 = vmatprep.mubr.msk.f32.mxu0 %vm879_vm2, %v16114_v34 }
0x1e73   :  { %13324 = vmatprep.subr.msk.mxu0 %vm521_vm3, %v9543_v7  ;;  %13330 = vmatpush3.msk.msra.mxu1 %vm521_vm3, %v9434_v35 }
0x1e74   :  { %13325 = vmatpush3.msk.msra.mxu0 %vm521_vm3, %v9543_v7  ;;  %13332 = vmatmul.mubr.msk.f32.vlgmr.msra.gmra.mrb[106].mxu1 %vm879_vm2, %v16124_v24 }
0x1e75   :  { %13327 = vmatmul.mubr.msk.f32.vlgmr.msra.gmra.mrb[106].mxu0 %vm879_vm2, %v16131_v1  ;;  %13345 = vmatprep.mubr.msk.f32.mxu1 %vm97_vm0, %v15920_v19 }
0x1e76   :  { %13338 = vmatprep.mubr.msk.f32.mxu0 %vm97_vm0, %v15927_v44 }
0x1f43   :  { %v13323_v28 = vpop.f32.mrb[104].mxu1 }
0x1f44   :  { %v13318_v22 = vpop.f32.mrb[104].mxu0  ;;  %v9695_v33 = vpop.f32.mrb[105].mxu1 }
0x1f45   :  { %9624 = vrot.lane.b32.xlu1 %v13318_v22, %s14436_s12  ;;  %v9613_v59 = vpop.f32.mrb[105].mxu0 }
0x1f46   :  { %9622 = vrot.lane.b32.xlu0 %v9613_v59, %s14436_s12 }
0x1f47   :  { %v13333_v14 = vpop.f32.mrb[106].mxu1 }
0x1f48   :  { %v13328_v20 = vpop.f32.mrb[106].mxu0  ;;  %v9863_v57 = vpop.f32.mrb[107].mxu1 }
0x1f49   :  { %9706 = vrot.lane.b32.xlu1 %v13323_v28, %s14435_s11  ;;  %v9779_v31 = vpop.f32.mrb[107].mxu0 }
0x1f4a   :  { %9704 = vrot.lane.b32.xlu0 %v9695_v33, %s14435_s11 }
0x1f4d   :  { %9790 = vrot.lane.b32.xlu1 %v13328_v20, %s14437_s13 }
0x1f4e   :  { %9788 = vrot.lane.b32.xlu0 %v9779_v31, %s14437_s13 }
0x1f51   :  { %9874 = vrot.lane.b32.xlu1 %v13333_v14, %s14438_s15 }
0x1f52   :  { %9872 = vrot.lane.b32.xlu0 %v9863_v57, %s14438_s15 }
0x1fb7   :  { %v9625_v19 = vpop.permute.xlu1 %9624 }
0x1fb8   :  { %v9623_v44 = vpop.permute.xlu0 %9622 }
0x1fbb   :  { %v9707_v25 = vpop.permute.xlu1 %9706 }
0x1fbc   :  { %v9705_v15 = vpop.permute.xlu0 %9704  ;;  %v9709_v51 = vadd.f32 %v9707_v25, %v9625_v19 }
0x1fbd   :  { %v9708_v40 = vadd.f32 %v9705_v15, %v9623_v44 }
0x1fbf   :  { %v9791_v46 = vpop.permute.xlu1 %9790 }
0x1fc0   :  { %v9789_v42 = vpop.permute.xlu0 %9788  ;;  %v9793_v53 = vadd.f32 %v9791_v46, %v9709_v51 }
0x1fc1   :  { %v9792_v29 = vadd.f32 %v9789_v42, %v9708_v40 }
0x1fc3   :  { %v9875_v3 = vpop.permute.xlu1 %9874 }
0x1fc4   :  { %v9877_v45 = vadd.f32 %v9875_v3, %v9793_v53  ;;  %v9873_v21 = vpop.permute.xlu0 %9872 }
0x1fc5   :  { %v9876_v52 = vadd.f32 %v9873_v21, %v9792_v29 }
0x1fc6   :  { %v9879_v16 = vmul.f32 %v16150_v49, %v9877_v45 }
0x1fc7   :  { %v9878_v38 = vmul.f32 %v16156_v23, %v9876_v52 }
0x1fc9   :  { %v13711_v12 = vpack.c.bf16 %v9879_v16, %v9878_v38 }
0x1fcb   :  { %13712 = vmatprep.subr.bf16.mxu0 %v13711_v12  ;;  %13716 = vmatprep.subr.bf16.mxu1 %v13711_v12 }
0x1fcc   :  { %13714 = vmatpush3.bf16.msra.mxu0 %v13711_v12  ;;  %13718 = vmatpush3.bf16.msra.mxu1 %v13711_v12 }
0x1fcd   :  { %13720 = vmatprep.subr.bf16.mxu0 %v13711_v12  ;;  %13724 = vmatprep.subr.bf16.mxu1 %v13711_v12 }
0x1fcf   :  { %13339 = vmatmul.mubr.msk.f32.vlgmr.msra.gmra.mrb[108].mxu0 %vm97_vm0, %v15944_v37  ;;  %13346 = vmatmul.mubr.msk.f32.vlgmr.msra.gmra.mrb[108].mxu1 %vm97_vm0, %v15951_v26 }
0x1fd0   :  { %13722 = vmatpush3.bf16.msra.mxu0 %v13711_v12  ;;  %13726 = vmatpush3.bf16.msra.mxu1 %v13711_v12 }
0x1fd1   :  { %13352 = vmatprep.mubr.msk.f32.mxu0 %vm97_vm0, %v15958_v32  ;;  %13359 = vmatprep.mubr.msk.f32.mxu1 %vm97_vm0, %v15965_v62 }
0x1fd2   :  { %13727 = vmatprep.subr.bf16.mxu0 %v14433_v9  ;;  %13730 = vmatprep.subr.bf16.mxu1 %v14433_v9 }
0x1fd3   :  { %13353 = vmatmul.mubr.msk.f32.vlgmr.msra.gmra.mrb[110].mxu0 %vm97_vm0, %v15974_v47  ;;  %13360 = vmatmul.mubr.msk.f32.vlgmr.msra.gmra.mrb[110].mxu1 %vm97_vm0, %v15981_v5 }
0x1fd4   :  { %13366 = vmatprep.mubr.msk.f32.mxu0 %vm14434_vm1, %v14432_v0  ;;  %13373 = vmatprep.mubr.msk.f32.mxu1 %vm14434_vm1, %v14432_v0 }
0x20a2   :  { %v13340_v37 = vpop.f32.mrb[108].mxu0  ;;  %v13347_v26 = vpop.f32.mrb[108].mxu1 }
0x20a3   :  { %v10181_v32 = vadd.f32 %v15992_v27, %v13340_v37  ;;  %v9946_v62 = vpop.f32.mrb[109].mxu0  ;;  %v10021_v17 = vpop.f32.mrb[109].mxu1 }
0x20a4   :  { %v10180_v2 = vadd.f32 %v15998_v58, %v9946_v62 }
0x20a5   :  { %v10183_v41 = vadd.f32 %v13347_v26, %v10181_v32 }
0x20a6   :  { %v10182_v60 = vadd.f32 %v10180_v2, %v10021_v17  ;;  %v13354_v47 = vpop.f32.mrb[110].mxu0  ;;  %v13361_v54 = vpop.f32.mrb[110].mxu1 }
0x20a7   :  { %v10185_v56 = vadd.f32 %v13354_v47, %v10183_v41  ;;  %v10096_v5 = vpop.f32.mrb[111].mxu0  ;;  %v10171_v30 = vpop.f32.mrb[111].mxu1 }
0x20a8   :  { %v10184_v11 = vadd.f32 %v10182_v60, %v10096_v5 }
0x20a9   :  { %v10187_v18 = vadd.f32 %v13361_v54, %v10185_v56 }
0x20aa   :  { %v10186_v6 = vadd.f32 %v10184_v11, %v10171_v30 }
0x20ab   :  { %v10189_v10 = vsub.f32 %v10187_v18, %v13340_v37  ;;  %v10298_v36 = vsub.f32 %v10187_v18, %v13347_v26  ;;  %v10407_v61 = vsub.f32 %v10187_v18, %v13354_v47  ;;  %v10516_v35 = vsub.f32 %v10187_v18, %v13361_v54 }
0x20ac   :  { %v10188_v7 = vsub.f32 %v10186_v6, %v9946_v62  ;;  %v10297_v27 = vsub.f32 %v10186_v6, %v10021_v17  ;;  %v10406_v28 = vsub.f32 %v10186_v6, %v10096_v5  ;;  %v10515_v22 = vsub.f32 %v10186_v6, %v10171_v30 }
0x20ae   :  { %v10190_v33 = vmax.f32 %v10188_v7, %v10189_v10  ;;  %v10299_v58 = vmax.f32 %v10297_v27, %v10298_v36  ;;  %v10408_v59 = vmax.f32 %v10406_v28, %v10407_v61  ;;  %v10517_v14 = vmax.f32 %v10515_v22, %v10516_v35 }
0x20b0   :  { %v10191_v20 = vrot.slane %v10190_v33, 4  ;;  %v10300_v57 = vrot.slane %v10299_v58, 4  ;;  %v10409_v31 = vrot.slane %v10408_v59, 4  ;;  %v10518_v19 = vrot.slane %v10517_v14, 4 }
0x20b2   :  { %v10192_v44 = vmax.f32 %v10190_v33, %v10191_v20  ;;  %v10301_v25 = vmax.f32 %v10299_v58, %v10300_v57  ;;  %v10410_v15 = vmax.f32 %v10408_v59, %v10409_v31  ;;  %v10519_v46 = vmax.f32 %v10517_v14, %v10518_v19 }
0x20b4   :  { %v10193_v51 = vrot.slane %v10192_v44, 2  ;;  %v10302_v42 = vrot.slane %v10301_v25, 2  ;;  %v10411_v40 = vrot.slane %v10410_v15, 2  ;;  %v10520_v53 = vrot.slane %v10519_v46, 2 }
0x20b6   :  { %v10194_v29 = vmax.f32 %v10192_v44, %v10193_v51  ;;  %v10303_v3 = vmax.f32 %v10301_v25, %v10302_v42  ;;  %v10412_v45 = vmax.f32 %v10410_v15, %v10411_v40  ;;  %v10521_v21 = vmax.f32 %v10519_v46, %v10520_v53 }
0x20b8   :  { %v10195_v52 = vrot.slane %v10194_v29, 1  ;;  %v10304_v16 = vrot.slane %v10303_v3, 1  ;;  %v10413_v38 = vrot.slane %v10412_v45, 1  ;;  %v10522_v12 = vrot.slane %v10521_v21, 1 }
0x20ba   :  { %v16179_v37 = vmax.f32 %v10194_v29, %v10195_v52  ;;  %v16181_v26 = vmax.f32 %v10303_v3, %v10304_v16  ;;  %v16183_v32 = vmax.f32 %v10412_v45, %v10413_v38  ;;  %v16185_v62 = vmax.f32 %v10521_v21, %v10522_v12 }
0x20bc   :  { %v10197_v17 = vsub.f32 %v10188_v7, %v16179_v37  ;;  %v10306_v2 = vsub.f32 %v10297_v27, %v16181_v26  ;;  %v10415_v41 = vsub.f32 %v10406_v28, %v16183_v32  ;;  %v10524_v60 = vsub.f32 %v10515_v22, %v16185_v62 }
0x20bd   :  { %v10525_v47 = vsub.f32 %v10516_v35, %v16185_v62  ;;  %v10198_v54 = vsub.f32 %v10189_v10, %v16179_v37  ;;  %v10307_v11 = vsub.f32 %v10298_v36, %v16181_v26  ;;  %v10416_v6 = vsub.f32 %v10407_v61, %v16183_v32 }
0x20be   :  { %v10199_v56 = vmul.f32 1.442695, %v10197_v17  ;;  %v10308_v5 = vmul.f32 1.442695, %v10306_v2  ;;  %v10417_v30 = vmul.f32 1.442695, %v10415_v41 }
0x20bf   :  { %v10526_v18 = vmul.f32 1.442695, %v10524_v60  ;;  %v10528_v7 = vmul.f32 1.442695, %v10525_v47  ;;  %v10201_v27 = vmul.f32 1.442695, %v10198_v54 }
0x20c0   :  { %14148 = vpow2.f32 %v10199_v56  ;;  %v10310_v28 = vmul.f32 1.442695, %v10307_v11  ;;  %v10419_v22 = vmul.f32 1.442695, %v10416_v6 }
0x20c1   :  { %14150 = vpow2.f32 %v10308_v5 }
0x20c2   :  { %14152 = vpow2.f32 %v10417_v30 }
0x20c3   :  { %14154 = vpow2.f32 %v10526_v18 }
0x20c4   :  { %14156 = vpow2.f32 %v10528_v7 }
0x20c5   :  { %14158 = vpow2.f32 %v10201_v27 }
0x20c6   :  { %14160 = vpow2.f32 %v10310_v28 }
0x20c7   :  { %14162 = vpow2.f32 %v10419_v22 }
0x20ca   :  { %v14149_v10 = vpop.eup %14148 }
0x20cb   :  { %v14151_v35 = vpop.eup %14150 }
0x20cc   :  { %v14153_v33 = vpop.eup %14152 }
0x20cd   :  { %v14155_v58 = vpop.eup %14154 }
0x20ce   :  { %v14157_v36 = vpop.eup %14156 }
0x20cf   :  { %v14159_v59 = vpop.eup %14158  ;;  %v13737_v14 = vpack.c.bf16 %v14157_v36, %v14155_v58 }
0x20d0   :  { %v14161_v61 = vpop.eup %14160  ;;  %v13728_v20 = vpack.c.bf16 %v14159_v59, %v14149_v10 }
0x20d1   :  { %v14163_v57 = vpop.eup %14162  ;;  %v13731_v31 = vpack.c.bf16 %v14161_v61, %v14151_v35 }
0x20d2   :  { %13729 = vmatpush3.bf16.msra.mxu0 %v13728_v20  ;;  %v13734_v19 = vpack.c.bf16 %v14163_v57, %v14153_v33 }
0x20d3   :  { %13732 = vmatpush3.bf16.msra.mxu1 %v13731_v31  ;;  %13733 = vmatprep.subr.bf16.mxu0 %v14433_v9 }
0x20d4   :  { %13736 = vmatprep.subr.bf16.mxu1 %v14433_v9 }
0x20d5   :  { %13367 = vmatmul.mubr.msk.f32.vlgmr.msra.gmra.mrb[112].mxu0 %vm97_vm0, %v16019_v4 }
0x20d6   :  { %13374 = vmatmul.mubr.msk.f32.vlgmr.msra.gmra.mrb[112].mxu1 %vm97_vm0, %v16023_v48  ;;  %13735 = vmatpush3.bf16.msra.mxu0 %v13734_v19 }
0x20d7   :  { %13738 = vmatpush3.bf16.msra.mxu1 %v13737_v14  ;;  %13380 = vmatprep.mubr.msk.f32.mxu0 %vm14434_vm1, %v14432_v0 }
0x20d8   :  { %13387 = vmatprep.mubr.msk.f32.mxu1 %vm14434_vm1, %v14432_v0 }
0x20d9   :  { %13381 = vmatmul.mubr.msk.f32.vlgmr.msra.gmra.mrb[114].mxu0 %vm97_vm0, %v16031_v63 }
0x20da   :  { %13388 = vmatmul.mubr.msk.f32.vlgmr.msra.gmra.mrb[114].mxu1 %vm97_vm0, %v16035_v43  ;;  %13392 = vmatprep.mubr.msk.f32.mxu0 %vm879_vm2, %v16042_v39 }
0x20db   :  { %13397 = vmatprep.mubr.msk.f32.mxu1 %vm879_vm2, %v16049_v8 }
0x21a8   :  { %v10269_v4 = vpop.f32.mrb[112].mxu0 }
0x21a9   :  { %14164 = vlog2.f32 %v10269_v4  ;;  %v10378_v48 = vpop.f32.mrb[112].mxu1  ;;  %v13368_v44 = vpop.f32.mrb[113].mxu0 }
0x21aa   :  { %14166 = vlog2.f32 %v10378_v48  ;;  %v13375_v25 = vpop.f32.mrb[113].mxu1 }
0x21ac   :  { %v10487_v15 = vpop.f32.mrb[114].mxu0 }
0x21ad   :  { %14168 = vlog2.f32 %v10487_v15  ;;  %v10596_v46 = vpop.f32.mrb[114].mxu1  ;;  %v13382_v51 = vpop.f32.mrb[115].mxu0 }
0x21ae   :  { %14170 = vlog2.f32 %v10596_v46  ;;  %v13389_v63 = vpop.f32.mrb[115].mxu1 }
0x21b3   :  { %v14165_v42 = vpop.eup %14164 }
0x21b4   :  { %v14167_v43 = vpop.eup %14166  ;;  %v10274_v40 = vmul.f32 0.6931472, %v14165_v42 }
0x21b5   :  { %v10383_v53 = vmul.f32 0.6931472, %v14167_v43 }
0x21b6   :  { %v16214_v29 = vadd.f32 %v10274_v40, %v16179_v37 }
0x21b7   :  { %v14169_v3 = vpop.eup %14168  ;;  %v16217_v45 = vadd.f32 %v10383_v53, %v16181_v26 }
0x21b8   :  { %v14171_v21 = vpop.eup %14170  ;;  %v10276_v52 = vsel %vm521_vm3, %v16214_v29, -inf  ;;  %v10492_v16 = vmul.f32 0.6931472, %v14169_v3 }
0x21b9   :  { %v10277_v38 = vrot.slane %v10276_v52, 4  ;;  %v10385_v12 = vsel %vm521_vm3, %v16217_v45, -inf  ;;  %v10601_v17 = vmul.f32 0.6931472, %v14171_v21 }
0x21ba   :  { %v10386_v2 = vrot.slane %v10385_v12, 4  ;;  %v16224_v41 = vadd.f32 %v10492_v16, %v16183_v32 }
0x21bb   :  { %v10278_v37 = vmax.f32 %v10276_v52, %v10277_v38  ;;  %v16227_v60 = vadd.f32 %v10601_v17, %v16185_v62 }
0x21bc   :  { %v10387_v26 = vmax.f32 %v10385_v12, %v10386_v2  ;;  %v10494_v47 = vsel %vm521_vm3, %v16224_v41, -inf }
0x21bd   :  { %v10279_v54 = vrot.slane %v10278_v37, 2  ;;  %v10495_v56 = vrot.slane %v10494_v47, 4  ;;  %v10603_v5 = vsel %vm521_vm3, %v16227_v60, -inf }
0x21be   :  { %v10388_v30 = vrot.slane %v10387_v26, 2  ;;  %v10604_v11 = vrot.slane %v10603_v5, 4 }
0x21bf   :  { %v10280_v18 = vmax.f32 %v10278_v37, %v10279_v54  ;;  %v10496_v6 = vmax.f32 %v10494_v47, %v10495_v56 }
0x21c0   :  { %v10389_v7 = vmax.f32 %v10387_v26, %v10388_v30  ;;  %v10605_v32 = vmax.f32 %v10603_v5, %v10604_v11 }
0x21c1   :  { %v10281_v27 = vrot.slane %v10280_v18, 1  ;;  %v10497_v28 = vrot.slane %v10496_v6, 2 }
0x21c2   :  { %v10390_v22 = vrot.slane %v10389_v7, 1  ;;  %v10606_v62 = vrot.slane %v10605_v32, 2 }
0x21c3   :  { %v10282_v10 = vmax.f32 %v10280_v18, %v10281_v27  ;;  %v10498_v35 = vmax.f32 %v10496_v6, %v10497_v28 }
0x21c4   :  { %v10391_v33 = vmax.f32 %v10389_v7, %v10390_v22  ;;  %v10607_v58 = vmax.f32 %v10605_v32, %v10606_v62 }
0x21c5   :  { %v10283_v36 = vsub.f32 %v16214_v29, %v10282_v10  ;;  %v10499_v59 = vrot.slane %v10498_v35, 1 }
0x21c6   :  { %v10392_v14 = vsub.f32 %v16217_v45, %v10391_v33  ;;  %v10608_v61 = vrot.slane %v10607_v58, 1 }
0x21c7   :  { %v10284_v20 = vmul.f32 1.442695, %v10283_v36  ;;  %v10500_v57 = vmax.f32 %v10498_v35, %v10499_v59 }
0x21c8   :  { %v10393_v31 = vmul.f32 1.442695, %v10392_v14  ;;  %v10609_v19 = vmax.f32 %v10607_v58, %v10608_v61 }
0x21c9   :  { %14172 = vpow2.f32 %v10284_v20  ;;  %v10501_v4 = vsub.f32 %v16224_v41, %v10500_v57 }
0x21ca   :  { %14174 = vpow2.f32 %v10393_v31  ;;  %v10610_v48 = vsub.f32 %v16227_v60, %v10609_v19 }
0x21cb   :  { %v10502_v44 = vmul.f32 1.442695, %v10501_v4 }
0x21cc   :  { %v10611_v25 = vmul.f32 1.442695, %v10610_v48 }
0x21cd   :  { %14176 = vpow2.f32 %v10502_v44 }
0x21ce   :  { %14178 = vpow2.f32 %v10611_v25 }
0x21d3   :  { %v14173_v15 = vpop.eup %14172 }
0x21d4   :  { %v14175_v46 = vpop.eup %14174  ;;  %v10286_v51 = vsel %vm521_vm3, %v14173_v15, 0.0 }
0x21d5   :  { %v10395_v63 = vsel %vm521_vm3, %v14175_v46, 0.0  ;;  %v10287_v42 = vrot.slane %v10286_v51, 4 }
0x21d6   :  { %v10396_v43 = vrot.slane %v10395_v63, 4 }
0x21d7   :  { %v14177_v40 = vpop.eup %14176  ;;  %v10288_v53 = vadd.f32 %v10287_v42, %v10286_v51 }
0x21d8   :  { %v14179_v3 = vpop.eup %14178  ;;  %v10397_v21 = vadd.f32 %v10396_v43, %v10395_v63  ;;  %v10504_v52 = vsel %vm521_vm3, %v14177_v40, 0.0 }
0x21d9   :  { %v10289_v16 = vrot.slane %v10288_v53, 2  ;;  %v10613_v38 = vsel %vm521_vm3, %v14179_v3, 0.0  ;;  %v10505_v12 = vrot.slane %v10504_v52, 4 }
0x21da   :  { %v10398_v17 = vrot.slane %v10397_v21, 2  ;;  %v10614_v2 = vrot.slane %v10613_v38, 4 }
0x21db   :  { %v10290_v37 = vadd.f32 %v10289_v16, %v10288_v53  ;;  %v10506_v26 = vadd.f32 %v10505_v12, %v10504_v52 }
0x21dc   :  { %v10399_v47 = vadd.f32 %v10398_v17, %v10397_v21  ;;  %v10615_v54 = vadd.f32 %v10614_v2, %v10613_v38 }
0x21dd   :  { %v10291_v56 = vrot.slane %v10290_v37, 1  ;;  %v10507_v5 = vrot.slane %v10506_v26, 2 }
0x21de   :  { %v10400_v30 = vrot.slane %v10399_v47, 1  ;;  %v10616_v11 = vrot.slane %v10615_v54, 2 }
0x21df   :  { %v10292_v18 = vadd.f32 %v10291_v56, %v10290_v37  ;;  %v10508_v6 = vadd.f32 %v10507_v5, %v10506_v26 }
0x21e0   :  { %v10401_v7 = vadd.f32 %v10400_v30, %v10399_v47  ;;  %v10617_v32 = vadd.f32 %v10616_v11, %v10615_v54  ;;  %v14301_v11 = vld [vmem:[%s16415_s1 + $0x8] sm:$0xff] }
0x21e1   :  { %14180 = vlog2.f32 %v10292_v18  ;;  %v10509_v27 = vrot.slane %v10508_v6, 1  ;;  %v14302_v18 = vld [vmem:[%s16415_s1 + $0x10] sm:$0xff] }
0x21e2   :  { %14182 = vlog2.f32 %v10401_v7  ;;  %v10618_v28 = vrot.slane %v10617_v32, 1 }
0x21e3   :  { %v10510_v22 = vadd.f32 %v10509_v27, %v10508_v6 }
0x21e4   :  { %v10619_v62 = vadd.f32 %v10618_v28, %v10617_v32  ;;  %v14303_v28 = vld [vmem:[%s16415_s1 + $0x18] sm:$0xff] }
0x21e5   :  { %14184 = vlog2.f32 %v10510_v22  ;;  %v14304_v22 = vld [vmem:[%s16415_s1 + $0x20] sm:$0xff] }
0x21e6   :  { %14186 = vlog2.f32 %v10619_v62 }
0x21eb   :  { %v14181_v35 = vpop.eup %14180 }
0x21ec   :  { %v14183_v58 = vpop.eup %14182  ;;  %v10294_v36 = vmul.f32 0.6931472, %v14181_v35 }
0x21ed   :  { %v10403_v59 = vmul.f32 0.6931472, %v14183_v58 }
0x21ee   :  { %v10295_v14 = vadd.f32 %v10294_v36, %v10282_v10 }
0x21ef   :  { %v14185_v61 = vpop.eup %14184  ;;  %v10404_v20 = vadd.f32 %v10403_v59, %v10391_v33  ;;  %v14305_v59 = vld [vmem:[%s16415_s1 + $0x28] sm:$0xff] }
0x21f0   :  { %v14187_v31 = vpop.eup %14186  ;;  %v10296_v4 = vsub.f32 %v16214_v29, %v10295_v14  ;;  %v10512_v48 = vmul.f32 0.6931472, %v14185_v61  ;;  %v14306_v14 = vld [vmem:[%s16415_s1 + $0x30] sm:$0xff] }
0x21f1   :  { %v10405_v44 = vsub.f32 %v16217_v45, %v10404_v20  ;;  %v10621_v25 = vmul.f32 0.6931472, %v14187_v31  ;;  %v14300_v45 = vld [vmem:[%s16415_s1] sm:$0xff]  ;;  %v14307_v20 = vld [vmem:[%s16415_s1 + $0x38] sm:$0xff] }
0x21f2   :  { %13395 = vmatprep.subr.msk.mxu1 %vm521_vm3, %v10296_v4  ;;  %v10513_v15 = vadd.f32 %v10512_v48, %v10500_v57  ;;  %v94_v48 = vld [vmem:[#allocation5] sm:$0xf] }
0x21f3   :  { %13390 = vmatprep.subr.msk.mxu0 %vm521_vm3, %v10405_v44  ;;  %13396 = vmatpush3.msk.msra.mxu1 %vm521_vm3, %v10296_v4  ;;  %v10622_v46 = vadd.f32 %v10621_v25, %v10609_v19 }
0x21f4   :  { %13391 = vmatpush3.msk.msra.mxu0 %vm521_vm3, %v10405_v44  ;;  %13398 = vmatmul.mubr.msk.f32.vlgmr.msra.gmra.mrb[116].mxu1 %vm879_vm2, %v16091_v13  ;;  %v10514_v10 = vsub.f32 %v16224_v41, %v10513_v15 }
0x21f5   :  { %13393 = vmatmul.mubr.msk.f32.vlgmr.msra.gmra.mrb[116].mxu0 %vm879_vm2, %v16098_v50  ;;  %v10623_v29 = vsub.f32 %v16227_v60, %v10622_v46  ;;  %13407 = vmatprep.mubr.msk.f32.mxu1 %vm879_vm2, %v16106_v55  ;;  %v14309_v46 = vld [vmem:[%s16414_s0] sm:$0xff] }
0x21f6   :  { %13405 = vmatprep.subr.msk.mxu1 %vm521_vm3, %v10514_v10  ;;  %13402 = vmatprep.mubr.msk.f32.mxu0 %vm879_vm2, %v16114_v34 }
0x21f7   :  { %13400 = vmatprep.subr.msk.mxu0 %vm521_vm3, %v10623_v29  ;;  %13406 = vmatpush3.msk.msra.mxu1 %vm521_vm3, %v10514_v10 }
0x21f8   :  { %13401 = vmatpush3.msk.msra.mxu0 %vm521_vm3, %v10623_v29  ;;  %13408 = vmatmul.mubr.msk.f32.vlgmr.msra.gmra.mrb[118].mxu1 %vm879_vm2, %v16124_v24 }
0x21f9   :  { %13438 = vmatprep.subr.msk.mxu1 %vm521_vm3, %v10405_v44  ;;  %13403 = vmatmul.mubr.msk.f32.vlgmr.msra.gmra.mrb[118].mxu0 %vm879_vm2, %v16131_v1 }
0x21fa   :  { %13439 = vmatpush3.msk.msra.mxu1 %vm521_vm3, %v10405_v44  ;;  %13440 = vmatprep.mubr.msk.f32.mxu1 %vm879_vm2, %v16049_v8 }
0x21fb   :  { %13443 = vmatprep.subr.msk.mxu1 %vm521_vm3, %v10296_v4  ;;  %13414 = vmatprep.mubr.msk.f32.mxu0 %vm97_vm0, %v14300_v45 }
0x21fc   :  { %13441 = vmatmul.mubr.msk.f32.vlgmr.msra.gmra.mrb[120].mxu1 %vm879_vm2, %v16091_v13 }
0x21fd   :  { %13444 = vmatpush3.msk.msra.mxu1 %vm521_vm3, %v10296_v4  ;;  %13445 = vmatprep.mubr.msk.f32.mxu1 %vm879_vm2, %v16042_v39 }
0x21fe   :  { %13448 = vmatprep.subr.msk.mxu1 %vm521_vm3, %v10514_v10 }
0x2204   :  { %13446 = vmatmul.mubr.msk.f32.vlgmr.msra.gmra.mrb[120].mxu1 %vm879_vm2, %v16098_v50 }
0x2205   :  { %13449 = vmatpush3.msk.msra.mxu1 %vm521_vm3, %v10514_v10  ;;  %13450 = vmatprep.mubr.msk.f32.mxu1 %vm879_vm2, %v16114_v34 }
0x2206   :  { %13453 = vmatprep.subr.msk.mxu1 %vm521_vm3, %v10623_v29 }
0x220c   :  { %13451 = vmatmul.mubr.msk.f32.vlgmr.msra.gmra.mrb[120].mxu1 %vm879_vm2, %v16131_v1 }
0x220d   :  { %13454 = vmatpush3.msk.msra.mxu1 %vm521_vm3, %v10623_v29  ;;  %13455 = vmatprep.mubr.msk.f32.mxu1 %vm879_vm2, %v16106_v55 }
0x2214   :  { %13456 = vmatmul.mubr.msk.f32.vlgmr.msra.gmra.mrb[120].mxu1 %vm879_vm2, %v16124_v24 }
0x22c7   :  { %v13399_v39 = vpop.f32.mrb[116].mxu1 }
0x22c8   :  { %v13394_v8 = vpop.f32.mrb[116].mxu0  ;;  %v10775_v13 = vpop.f32.mrb[117].mxu1 }
0x22c9   :  { %10704 = vrot.lane.b32.xlu1 %v13394_v8, %s14436_s12  ;;  %v10693_v50 = vpop.f32.mrb[117].mxu0 }
0x22ca   :  { %10702 = vrot.lane.b32.xlu0 %v10693_v50, %s14436_s12 }
0x22cb   :  { %v13409_v34 = vpop.f32.mrb[118].mxu1 }
0x22cc   :  { %v13404_v41 = vpop.f32.mrb[118].mxu0  ;;  %v10943_v60 = vpop.f32.mrb[119].mxu1 }
0x22cd   :  { %10786 = vrot.lane.b32.xlu1 %v13399_v39, %s14435_s11  ;;  %v10859_v1 = vpop.f32.mrb[119].mxu0 }
0x22ce   :  { %10784 = vrot.lane.b32.xlu0 %v10775_v13, %s14435_s11 }
0x22d1   :  { %10870 = vrot.lane.b32.xlu1 %v13404_v41, %s14437_s13 }
0x22d2   :  { %10868 = vrot.lane.b32.xlu0 %v10859_v1, %s14437_s13 }
0x22d5   :  { %10954 = vrot.lane.b32.xlu1 %v13409_v34, %s14438_s15 }
0x22d6   :  { %10952 = vrot.lane.b32.xlu0 %v10943_v60, %s14438_s15 }
0x22e7   :  { %v13457_v55 = vpop.f32.mrb[120].mxu1 }
0x22e8   :  { %v11590_v24 = vpop.f32.mrb[121].mxu1  ;;  %v11602_v12 = vmul.f32 %v16150_v49, %v13457_v55 }
0x22e9   :  { %v11601_v2 = vmul.f32 %v16156_v23, %v11590_v24 }
0x233b   :  { %v10705_v33 = vpop.permute.xlu1 %10704 }
0x233c   :  { %v10703_v57 = vpop.permute.xlu0 %10702 }
0x233f   :  { %v10787_v19 = vpop.permute.xlu1 %10786 }
0x2340   :  { %v10785_v51 = vpop.permute.xlu0 %10784  ;;  %v10789_v42 = vadd.f32 %v10787_v19, %v10705_v33  ;;  %v96_v19 = vld [vmem:[%s16419_s5 + $0x8] sm:$0xff] }
0x2341   :  { %v10788_v40 = vadd.f32 %v10785_v51, %v10703_v57 }
0x2343   :  { %v10871_v63 = vpop.permute.xlu1 %10870 }
0x2344   :  { %v10869_v43 = vpop.permute.xlu0 %10868  ;;  %v10873_v53 = vadd.f32 %v10871_v63, %v10789_v42 }
0x2345   :  { %v10872_v3 = vadd.f32 %v10869_v43, %v10788_v40 }
0x2347   :  { %v10955_v21 = vpop.permute.xlu1 %10954 }
0x2348   :  { %v10957_v52 = vadd.f32 %v10955_v21, %v10873_v53  ;;  %v10953_v16 = vpop.permute.xlu0 %10952 }
0x2349   :  { %v10956_v38 = vadd.f32 %v10953_v16, %v10872_v3 }
0x234a   :  { %v10959_v17 = vmul.f32 %v16150_v49, %v10957_v52 }
0x234b   :  { %v10958_v37 = vmul.f32 %v16156_v23, %v10956_v38 }
0x234c   :  { %v11604_v26 = vadd.f32 %v11602_v12, %v10959_v17 }
0x234d   :  { %v13739_v47 = vpack.c.bf16 %v10959_v17, %v10958_v37  ;;  %v11603_v54 = vadd.f32 %v11601_v2, %v10958_v37  ;;  %v12224_v37 = vld [vmem:[%s16421_s7] ss:$0 sm:$0xff]  ;;  %s14439_s7 = smov [#allocation8]  }
0x234e   :  { %s11915_s16 = sshll.u32 %s14439_s7, 4  ;;  %s11916_s16 = int_to_ptr.vmem [resolvable:$true] %s11915_s16 }
0x234f   :  { %v11605_v56 = vmax.f32 %v11603_v54, %v11604_v26  ;;  %13740 = vmatprep.subr.bf16.mxu0 %v13739_v47  ;;  %s14354_s11 = scalar_lea.vmem %s11916_s16, 256  ;;  %p14359_p3 = scmp.lt.s32.totalorder %s11916_s16, %s11916_s16 }
0x2350   :  { %13742 = vmatpush3.bf16.msra.mxu0 %v13739_v47  ;;  %p14355_p2 = scmp.ne.s32.totalorder %s11916_s16, %s14354_s11  ;;  %p14360_p4 = scmp.lt.s32.totalorder %s14354_s11, %s14354_s11 }
0x2351   :  { %v11606_v5 = vrot.slane %v11605_v56, 4  ;;  %13744 = vmatprep.subr.bf16.mxu0 %v13739_v47 }
0x2352   :  { %p14361_p5 = por %p14360_p4, %p14359_p3 }
0x2353   :  { %v11607_v30 = vmax.f32 %v11605_v56, %v11606_v5  ;;  %13415 = vmatmul.mubr.msk.f32.vlgmr.msra.gmra.mrb[120].mxu0 %vm97_vm0, %v14301_v11 }
0x2354   :  { %13746 = vmatpush3.bf16.msra.mxu0 %v13739_v47  ;;  %13421 = vmatprep.mubr.msk.f32.mxu0 %vm97_vm0, %v14302_v18  ;;  %p14362_p6 = pnand %p14361_p5, %p14355_p2 }
0x2355   :  { %v11608_v6 = vrot.slane %v11607_v30, 2  ;;  %13748 = vmatprep.subr.bf16.mxu0 %v13739_v47 }
0x2357   :  { %v11609_v7 = vmax.f32 %v11607_v30, %v11608_v6 }
0x2359   :  { %v11610_v32 = vrot.slane %v11609_v7, 1 }
0x235b   :  { %v11611_v27 = vmax.f32 %v11609_v7, %v11610_v32  ;;  %13422 = vmatmul.mubr.msk.f32.vlgmr.msra.gmra.mrb[120].mxu0 %vm97_vm0, %v14303_v28 }
0x235c   :  { %13750 = vmatpush3.bf16.msra.mxu0 %v13739_v47  ;;  %13428 = vmatprep.mubr.msk.f32.mxu0 %vm97_vm0, %v14304_v22 }
0x235d   :  { %v16321_v62 = vsub.f32 %v11603_v54, %v11611_v27  ;;  %v16323_v35 = vsub.f32 %v11604_v26, %v11611_v27  ;;  %13752 = vmatprep.subr.bf16.mxu0 %v13739_v47 }
0x235f   :  { %v11614_v58 = vmul.f32 1.442695, %v16321_v62  ;;  %v11616_v36 = vmul.f32 1.442695, %v16323_v35 }
0x2361   :  { %14188 = vpow2.f32 %v11614_v58 }
0x2362   :  { %14190 = vpow2.f32 %v11616_v36 }
0x2363   :  { %13429 = vmatmul.mubr.msk.f32.vlgmr.msra.gmra.mrb[120].mxu0 %vm97_vm0, %v14305_v59 }
0x2364   :  { %13754 = vmatpush3.bf16.msra.mxu0 %v13739_v47  ;;  %13435 = vmatprep.mubr.msk.f32.mxu0 %vm97_vm0, %v14306_v14 }
0x2365   :  { %13755 = vmatprep.subr.bf16.mxu0 %v14433_v9  ;;  %v95_v9 = vld [vmem:[%s16419_s5] sm:$0xff] }
0x2366   :  { %13467 = vmatprep.mubr.msk.f32.mxu1 %vm879_vm2, %v95_v9 }
0x236b   :  { %v16336_v61 = vpop.eup %14188  ;;  %13436 = vmatmul.mubr.msk.f32.vlgmr.msra.gmra.mrb[120].mxu0 %vm97_vm0, %v14307_v20 }
0x236c   :  { %v16342_v31 = vpop.eup %14190  ;;  %13462 = vmatprep.mubr.msk.f32.mxu0 %vm14434_vm1, %v14432_v0  ;;  %v14308_v0 = vld [vmem:[%s16414_s0 + $0x8] sm:$0xff] }
0x236d   :  { %v13756_v4 = vpack.c.bf16 %v16342_v31, %v16336_v61 }
0x236f   :  { %13757 = vmatpush3.bf16.msra.mxu0 %v13756_v4 }
0x2372   :  { %13463 = vmatmul.mubr.msk.f32.vlgmr.msra.gmra.mrb[122].mxu0 %vm97_vm0, %v94_v48 }
0x2373   :  { %13472 = vmatprep.mubr.msk.f32.mxu0 %vm879_vm2, %v95_v9 }
0x243e   :  { %v13437_v44 = vpop.f32.mrb[120].mxu0 }
0x243f   :  { %v13758_v25 = vadd.f32 %v14308_v0, %v13437_v44  ;;  %v11251_v15 = vpop.f32.mrb[121].mxu0 }
0x2440   :  { %v13759_v10 = vadd.f32 %v14309_v46, %v11251_v15 }
0x2442   :  { %v11268_v29 = vmax.f32 %v13759_v10, %v13758_v25 }
0x2444   :  { %v11269_v45 = vrot.slane %v11268_v29, 4 }
0x2445   :  { %v11687_v39 = vpop.f32.mrb[122].mxu0 }
0x2446   :  { %v11270_v8 = vmax.f32 %v11268_v29, %v11269_v45  ;;  %14192 = vlog2.f32 %v11687_v39  ;;  %v13464_v13 = vpop.f32.mrb[123].mxu0 }
0x2447   :  { %14194 = vrcp.f32 %v11687_v39 }
0x2448   :  { %v11271_v50 = vrot.slane %v11270_v8, 2 }
0x244a   :  { %v11272_v34 = vmax.f32 %v11270_v8, %v11271_v50 }
0x244c   :  { %v11273_v41 = vrot.slane %v11272_v34, 1 }
0x244e   :  { %v11274_v60 = vmax.f32 %v11272_v34, %v11273_v41 }
0x2450   :  { %v14193_v1 = vpop.eup %14192  ;;  %v11275_v55 = vsub.f32 %v13759_v10, %v11274_v60  ;;  %v11276_v24 = vsub.f32 %v13758_v25, %v11274_v60 }
0x2451   :  { %v14195_v33 = vpop.eup %14194  ;;  %v11692_v57 = vmul.f32 0.6931472, %v14193_v1 }
0x2452   :  { %v11277_v51 = vmul.f32 1.442695, %v11275_v55  ;;  %v11279_v63 = vmul.f32 1.442695, %v11276_v24  ;;  %13470 = vmatprep.subr.msk.mxu0 %vm521_vm3, %v14195_v33 }
0x2453   :  { %13471 = vmatpush3.msk.msra.mxu0 %vm521_vm3, %v14195_v33  ;;  %13465 = vmatprep.subr.msk.mxu1 %vm521_vm3, %v11692_v57 }
0x2454   :  { %14196 = vpow2.f32 %v11277_v51  ;;  %13473 = vmatmul.mubr.msk.f32.vlgmr.msra.gmra.mrb[124].mxu0 %vm879_vm2, %v96_v19  ;;  %13466 = vmatpush3.msk.msra.mxu1 %vm521_vm3, %v11692_v57 }
0x2455   :  { %14198 = vpow2.f32 %v11279_v63  ;;  %13468 = vmatmul.mubr.msk.f32.vlgmr.msra.gmra.mrb[122].mxu1 %vm879_vm2, %v96_v19 }
0x245e   :  { %v14197_v42 = vpop.eup %14196 }
0x245f   :  { %v14199_v43 = vpop.eup %14198 }
0x2460   :  { %v11281_v40 = vadd.f32 %v14199_v43, %v14197_v42 }
0x2462   :  { %v11282_v53 = vrot.slane %v11281_v40, 4 }
0x2464   :  { %v11283_v3 = vadd.f32 %v11282_v53, %v11281_v40 }
0x2466   :  { %v11284_v21 = vrot.slane %v11283_v3, 2 }
0x2468   :  { %v11285_v52 = vadd.f32 %v11284_v21, %v11283_v3 }
0x246a   :  { %v11286_v16 = vrot.slane %v11285_v52, 1 }
0x246c   :  { %v11287_v38 = vadd.f32 %v11286_v16, %v11285_v52 }
0x246e   :  { %14200 = vlog2.f32 %v11287_v38 }
0x246f   :  { %14202 = vrcp.f32 %v11287_v38 }
0x2478   :  { %v14201_v12 = vpop.eup %14200 }
0x2479   :  { %v14203_v17 = vpop.eup %14202  ;;  %v11289_v2 = vmul.f32 0.6931472, %v14201_v12 }
0x247a   :  { %v11293_v26 = vmul.f32 %v14203_v17, %v14197_v42  ;;  %v11294_v47 = vmul.f32 %v14203_v17, %v14199_v43 }
0x247b   :  { %v11290_v54 = vsub.f32 %v11275_v55, %v11289_v2  ;;  %v11291_v56 = vsub.f32 %v11276_v24, %v11289_v2 }
0x247c   :  { %11295 = vst [vmem:[#allocation7] sm:$0xff] %v11293_v26  ;;  %11296 = vst [vmem:[#allocation7 + $0x8] sm:$0xff] %v11294_v47  ;;  %v11868_v5 = vmul.f32 %v12224_v37, %v11293_v26  ;;  %v11869_v30 = vmul.f32 %v12224_v37, %v11294_v47 }
0x247d   :  { %v11870_v11 = vsub.f32 %v11290_v54, %v14309_v46  ;;  %v11871_v18 = vsub.f32 %v11291_v56, %v14308_v0 }
0x247f   :  { %v11872_v6 = vmul.f32 %v11870_v11, %v11868_v5  ;;  %v11873_v7 = vmul.f32 %v11871_v18, %v11869_v30 }
0x2481   :  { %v11874_v32 = vadd.f32 %v11873_v7, %v11872_v6 }
0x2483   :  { %v11875_v20 = vrot.slane %v11874_v32, 4 }
0x2485   :  { %v11876_v25 = vadd.f32 %v11875_v20, %v11874_v32 }
0x2487   :  { %v11877_v46 = vrot.slane %v11876_v25, 2 }
0x2527   :  { %v13474_v27 = vpop.f32.mrb[124].mxu0 }
0x2528   :  { %v11859_v28 = vmul.f32 %v16342_v31, %v13474_v27  ;;  %v11849_v22 = vpop.f32.mrb[125].mxu0  ;;  %v13469_v58 = vpop.f32.mrb[122].mxu1 }
0x2529   :  { %v11858_v36 = vmul.f32 %v16336_v61, %v11849_v22  ;;  %v11778_v59 = vsub.f32 %v16323_v35, %v13469_v58  ;;  %v11768_v14 = vpop.f32.mrb[123].mxu1  ;;  %v11878_v61 = vadd.f32 %v11877_v46, %v11876_v25 }
0x252a   :  { %11861 = vst [vmem:[#allocation8 + $0x8] sm:$0xff] %v11859_v28  ;;  %v11882_v4 = vmul.f32 %v16150_v49, %v11859_v28  ;;  %v11777_v48 = vsub.f32 %v16321_v62, %v11768_v14 }
0x252b   :  { %11860 = vst [vmem:[#allocation8] sm:$0xff] %v11858_v36  ;;  %v11881_v9 = vmul.f32 %v16156_v23, %v11858_v36  ;;  %v11879_v45 = vrot.slane %v11878_v61, 1 }
0x252c   :  { %v11884_v44 = vmul.f32 %v11882_v4, %v11778_v59 }
0x252d   :  { %v11883_v0 = vmul.f32 %v11881_v9, %v11777_v48  ;;  %v11880_v13 = vadd.f32 %v11879_v45, %v11878_v61 }
0x252f   :  { %v11885_v31 = vadd.f32 %v11884_v44, %v11883_v0 }
0x2531   :  { %v11886_v15 = vrot.slane %v11885_v31, 4 }
0x2533   :  { %v11887_v10 = vadd.f32 %v11886_v15, %v11885_v31 }
0x2535   :  { %v11888_v29 = vrot.slane %v11887_v10, 2 }
0x2537   :  { %v11889_v35 = vadd.f32 %v11888_v29, %v11887_v10 }
0x2539   :  { %v11890_v39 = vrot.slane %v11889_v35, 1 }
0x253b   :  { %v11891_v8 = vadd.f32 %v11890_v39, %v11889_v35 }
0x253d   :  { %v11892_v49 = vmul.f32 0.5, %v11891_v8 }
0x253f   :  { %v11893_v50 = vsub.f32 %v11880_v13, %v11892_v49 }
0x2541   :  { %11894 = vadd.xlane.f32.xlu0 %v11893_v50 }
0x2542   :  { %14365 = shalt.err (!%p14362_p6)
}
0x2543   :  { %s14366_s15 = scalar_lea.hbm %s16423_s9, 256 }
0x2544   :  { %p14367_p7 = scmp.ne.s32.totalorder %s16423_s9, %s14366_s15  ;;  %p14370_p8 = scmp.lt.u32.totalorder %s14366_s15, %s16423_s9 }
0x2546   :  { %p14372_p9 = pnand %p14370_p8, %p14367_p7 }
0x2548   :  { %14375 = shalt.err (!%p14372_p9)
}
0x2549   :  { %s14441_s19 = smov 128   ;;  %s14442_s20 = smov 8  }
0x254a   :  { %11921 = dma.vmem_to_hbm [thread:$0]  %s11916_s16, 256, %s16423_s9, [#allocation9], %s14441_s19, %s14441_s19, %s14442_s20  }
0x254b   :  { %s14376_s23 = scalar_lea.vmem %s11904_s17, 256  ;;  %p14381_p11 = scmp.lt.s32.totalorder %s11904_s17, %s11904_s17 }
0x254c   :  { %p14377_p10 = scmp.ne.s32.totalorder %s11904_s17, %s14376_s23  ;;  %p14382_p12 = scmp.lt.s32.totalorder %s14376_s23, %s14376_s23 }
0x254e   :  { %p14383_p13 = por %p14382_p12, %p14381_p11 }
0x2550   :  { %p14384_p0 = pnand %p14383_p13, %p14377_p10 }
0x2552   :  { %14387 = shalt.err (!%p14384_p0)
}
0x2553   :  { %s14388_s26 = scalar_lea.hbm %s16422_s8, 256 }
0x2554   :  { %p14389_p1 = scmp.ne.s32.totalorder %s16422_s8, %s14388_s26  ;;  %p14392_p2 = scmp.lt.u32.totalorder %s14388_s26, %s16422_s8 }
0x2556   :  { %p14394_p3 = pnand %p14392_p2, %p14389_p1 }
0x2558   :  { %14397 = shalt.err (!%p14394_p3)
}
0x2559   :  { %11909 = dma.vmem_to_hbm [thread:$0]  %s11904_s17, 256, %s16422_s8, [#allocation4], %s14441_s19, %s14441_s19, %s14442_s20   ;;  %vm11896_vm4 = vcmask 0  }
0x255a   :  { %s14443_s30 = smov [#allocation10]  }
0x255b   :  { %s11928_s0 = sshll.u32 %s14443_s30, 4  ;;  %s11929_s0 = int_to_ptr.vmem [resolvable:$true] %s11928_s0 }
0x255c   :  { %s14398_s5 = scalar_lea.vmem %s11929_s0, 16  ;;  %s14402_s7 = scalar_lea.vmem %s11929_s0, 32 }
0x255d   :  { %p14399_p4 = scmp.ne.s32.totalorder %s11929_s0, %s14398_s5  ;;  %p14403_p5 = scmp.lt.s32.totalorder %s11929_s0, %s11929_s0 }
0x255e   :  { %p14404_p6 = scmp.lt.s32.totalorder %s14402_s7, %s14398_s5 }
0x2560   :  { %p14405_p7 = por %p14404_p6, %p14403_p5 }
0x2562   :  { %p14406_p8 = pnand %p14405_p7, %p14399_p4 }
0x25ce   :  { %v11895_v23 = vpop.xlane.xlu0 %11894 }
0x25cf   :  { %11897 = vst.msk [vmem:[#allocation10] sm:$0x1] %vm11896_vm4, %v11895_v23 }
0x25d0   :  { %14409 = shalt.err (!%p14406_p8)
}
0x25d1   :  { %s14410_s11 = scalar_lea.hbm %s16424_s10, 16 }
0x25d2   :  { %p14411_p9 = scmp.ne.s32.totalorder %s16424_s10, %s14410_s11  ;;  %p14414_p10 = scmp.lt.u32.totalorder %s14410_s11, %s16424_s10 }
0x25d4   :  { %p14416_p11 = pnand %p14414_p10, %p14411_p9 }
0x25d6   :  { %14419 = shalt.err (!%p14416_p11)
}
0x25d7   :  { %11931 = dma.vmem_to_hbm [thread:$0]  %s11929_s0, 16, %s16424_s10, [#allocation9]  }
0x25d8   :  { %14424 = dma.done.wait [#allocation4], 256  }
0x25d9   :  { %14425 = vsyncadd [#allocation4], 4294967040 }
0x25da   :  { %14426 = dma.done.wait [#allocation9], 272  }
0x25db   :  { %14427 = vsyncadd [#allocation9], 4294967024 }
0x25dc   :  { %11941 = vsyncpa [#allocation3], 1 }
0x25dd   :  { %11942 = vsyncpa [#allocation6], 1 }
0x25de   :  { %11943 = vsyncpa [#allocation4], 1 }
0x25df   :  { %11944 = vsyncpa [#allocation9], 1 }

</bundles_post_ra>
